<compile_context>
chip_gen: v6e
topology: v6e:2x2x1
jax: 0.10.0
libtpu: 0.0.40
codegen_flags: <defaults>
</compile_context>

<pallas_src>
import jax
import jax.numpy as jnp
from jax.experimental import pallas as pl
from jax.experimental.pallas import tpu as pltpu

# --- GBNeck2 / OBC-style constants (nm, kJ/mol, elementary charge) ----------
OFFSET      = 0.0195141        # dielectric offset
CUTOFF      = 0.4              # radius graph cutoff (== module's `radius`)
CUTOFF2     = CUTOFF * CUTOFF
EPS_SOLUTE  = 1.0
EPS_SOLVENT = 78.5
KE          = 138.935485       # Coulomb constant, kJ*nm/(mol*e^2)
PREFACTOR   = -0.5 * KE * (1.0 / EPS_SOLUTE - 1.0 / EPS_SOLVENT)
SA_GAMMA    = 28.3919551       # ACE surface-area coefficient, kJ/(mol*nm^2)
PROBE       = 0.14             # solvent probe radius, nm

TILE_N = 128                   # row-atom tile (sublane axis of the pair block)
TILE_K = 512                   # column (neighbour) DMA tile (lane axis)
CHUNK  = 128                   # in-kernel lane sub-chunk (bounds vreg live ranges)
NPAR   = 8                     # row params padded to 8: [q, rad, scale, a, b, g, 0, 0]
NCOL   = 8                     # fused column rows: [x, y, z, q, rad, scale, batch, born]
CX, CY, CZ, CQ, CRAD, CSCALE, CBATCH, CBORN = range(NCOL)


# ---------------------------------------------------------------------------
# Shared math (used inside the Pallas kernels AND by the plain-JAX mirror that
# supplies the VJP; identical ops -> identical results up to summation order).
# Column atoms arrive as one fused lane-major (NCOL, tk) block.
# ---------------------------------------------------------------------------
def _pair_geometry(pos_r, bat_r, col_a, row_off, col_off):
    """Squared distances + radius-graph mask for a (row-tile x col-chunk) block."""
    tn = pos_r.shape[0]
    tk = col_a.shape[1]
    dx = pos_r[:, 0:1] - col_a[CX:CX + 1, :]
    dy = pos_r[:, 1:2] - col_a[CY:CY + 1, :]
    dz = pos_r[:, 2:3] - col_a[CZ:CZ + 1, :]
    r2 = dx * dx + dy * dy + dz * dz

    # small (tn,1)/(1,tk) iotas + broadcast compare (no full-block iotas).
    row_id = jax.lax.broadcasted_iota(jnp.int32, (tn, 1), 0) + row_off
    col_id = jax.lax.broadcasted_iota(jnp.int32, (1, tk), 1) + col_off
    not_self = row_id != col_id

    bat_c = col_a[CBATCH:CBATCH + 1, :]
    same_graph = bat_r == bat_c                      # batch-aware RadiusGraph
    valid = (bat_r >= 0.0) & (bat_c >= 0.0)          # padded atoms carry batch = -1
    # TODO(synk): RadiusGraph max_num_neighbors=32 truncation is not replicated;
    #             exact only when every atom has <= 32 neighbours within the cutoff.
    mask = not_self & same_graph & valid & (r2 < CUTOFF2)
    return r2, mask


def _descreen_block(pos_r, par_r, bat_r, col_a, row_off, col_off):
    """GBNeck_interaction message: per-pair HCT descreening terms, (tn, tk)."""
    r2, mask = _pair_geometry(pos_r, bat_r, col_a, row_off, col_off)
    r2_s = jnp.where(mask, jnp.maximum(r2, 1e-12), 1.0)
    inv_r = jax.lax.rsqrt(r2_s)                      # single EUP rsqrt
    r_s = r2_s * inv_r                               # == sqrt(r2), no extra EUP op

    rho_i   = par_r[:, 1:2] - OFFSET                 # (tn, 1)
    inv_rho = 1.0 / rho_i
    rho_j   = col_a[CRAD:CRAD + 1, :] - OFFSET       # (1, tk)
    sr_j    = col_a[CSCALE:CSCALE + 1, :] * rho_j    # (1, tk)

    U  = r_s + sr_j
    L  = jnp.maximum(rho_i, jnp.abs(r_s - sr_j))
    li = 1.0 / L
    ui = 1.0 / U
    li2, ui2 = li * li, ui * ui
    term = (li - ui
            + 0.25 * r_s * (ui2 - li2)
            + 0.5 * inv_r * jnp.log(L * ui)                      # == (0.5/r)*log(ui/li)
            + 0.25 * (sr_j * sr_j) * inv_r * (li2 - ui2))
    term = term + jnp.where(rho_i < (sr_j - r_s), 2.0 * (inv_rho - li), 0.0)
    term = jnp.where(rho_i < U, term, 0.0)
    term = jnp.where(mask, term, 0.0)
    return 0.5 * term                                            # (tn, tk)


def _born_finalize(integral, par_r):
    """GBNeck_interaction update: effective Born radii from the accumulated integral."""
    rad_i = par_r[:, 1:2]
    rho_i = rad_i - OFFSET
    psi = integral * rho_i
    alpha, beta, gamma = par_r[:, 3:4], par_r[:, 4:5], par_r[:, 5:6]
    tanh_arg = alpha * psi - beta * psi * psi + gamma * psi * psi * psi
    return 1.0 / (1.0 / rho_i - jnp.tanh(tanh_arg) / rad_i)      # (tn, 1)


def _energy_pair_block(pos_r, par_r, bat_r, born_r, col_a, row_off, col_off):
    """GBNeck_energies message: per-pair GB energies, (tn, tk). Pure r^2 math (no sqrt)."""
    r2, mask = _pair_geometry(pos_r, bat_r, col_a, row_off, col_off)
    r2_s = jnp.where(mask, r2, 1.0)

    q_i, q_j = par_r[:, 0:1], col_a[CQ:CQ + 1, :]
    bb = born_r * col_a[CBORN:CBORN + 1, :]                      # (tn, tk)
    f_gb2 = r2_s + bb * jnp.exp(-0.25 * r2_s / bb)
    inv_f = jax.lax.rsqrt(f_gb2)                                 # EUP rsqrt
    # TODO(synk): like the reference GBNeck graph, the 0.4 nm cutoff is applied to
    #             the GB pair sum as well (the 1/f_GB term is formally long-range).
    return jnp.where(mask, PREFACTOR * q_i * q_j * inv_f, 0.0)   # (tn, tk)


def _energy_finalize(pair_sum, par_r, bat_r, born_r):
    """GBNeck_energies update: self-polarization + ACE surface term; zero padded rows."""
    q_i   = par_r[:, 0:1]
    rad_i = par_r[:, 1:2]
    inv_b = 1.0 / born_r
    self_e = PREFACTOR * q_i * q_i * inv_b
    sa = SA_GAMMA * (rad_i + PROBE) ** 2 * (rad_i * inv_b) ** 6
    valid_i = (bat_r >= 0.0).astype(jnp.float32)
    return (self_e + pair_sum + sa) * valid_i                    # (tn, 1)


# ---------------------------------------------------------------------------
# Pallas kernels (grid = (row tiles, column tiles); column axis accumulates)
# ---------------------------------------------------------------------------
def _interaction_kernel(act_ref, pos_r, par_r, bat_r, colT, born_out, acc):
    i = pl.program_id(0)
    k = pl.program_id(1)
    n_ct = pl.num_programs(1)

    @pl.when(k == 0)
    def _():
        acc[...] = jnp.zeros_like(acc)

    @pl.when(act_ref[i * n_ct + k] > 0)          # tile-level cutoff/batch sparsity
    def _():
        pos_b, par_b, bat_b = pos_r[...], par_r[...], bat_r[...]
        row_off = i * TILE_N
        # Fully-unrolled 128-lane chunk loop with static slices; the acc store after
        # each chunk keeps the working set at (TILE_N, CHUNK) values (16 vregs each).
        for c in range(TILE_K // CHUNK):
            col_b = colT[:, c * CHUNK:(c + 1) * CHUNK]           # (NCOL, CHUNK)
            acc[...] += _descreen_block(pos_b, par_b, bat_b, col_b,
                                        row_off, k * TILE_K + c * CHUNK)

    @pl.when(k == n_ct - 1)
    def _():
        integral = jnp.sum(acc[...], axis=1, keepdims=True)      # one XLU reduce / row tile
        born_out[...] = _born_finalize(integral, par_r[...])     # (TILE_N, 1)


def _energies_kernel(act_ref, pos_r, par_r, bat_r, born_r, colT, e_out, acc):
    i = pl.program_id(0)
    k = pl.program_id(1)
    n_ct = pl.num_programs(1)

    @pl.when(k == 0)
    def _():
        acc[...] = jnp.zeros_like(acc)

    @pl.when(act_ref[i * n_ct + k] > 0)
    def _():
        pos_b, par_b, bat_b, born_b = pos_r[...], par_r[...], bat_r[...], born_r[...]
        row_off = i * TILE_N
        for c in range(TILE_K // CHUNK):
            col_b = colT[:, c * CHUNK:(c + 1) * CHUNK]
            acc[...] += _energy_pair_block(pos_b, par_b, bat_b, born_b, col_b,
                                           row_off, k * TILE_K + c * CHUNK)

    @pl.when(k == n_ct - 1)
    def _():
        pair_sum = jnp.sum(acc[...], axis=1, keepdims=True)
        e_out[...] = _energy_finalize(pair_sum, par_r[...], bat_r[...], born_r[...])


# ---------------------------------------------------------------------------
# pallas_call wrappers (scalar-prefetched active-tile flags)
# ---------------------------------------------------------------------------
def _row_spec(cols):
    return pl.BlockSpec((TILE_N, cols), lambda i, k, act: (i, 0))


def _col_spec():
    return pl.BlockSpec((NCOL, TILE_K), lambda i, k, act: (0, k))


def _out_spec():
    return pl.BlockSpec((TILE_N, 1), lambda i, k, act: (i, 0))


def _compiler_params():
    return pltpu.CompilerParams(
        dimension_semantics=("parallel", "arbitrary"))   # rows across TCs, cols accumulate


def aggregate_information(active, pos, params, batchv, colT):
    n = pos.shape[0]
    assert n % TILE_N == 0 and n % TILE_K == 0
    return pl.pallas_call(
        _interaction_kernel,
        out_shape=jax.ShapeDtypeStruct((n, 1), jnp.float32),
        grid_spec=pltpu.PrefetchScalarGridSpec(
            num_scalar_prefetch=1,
            grid=(n // TILE_N, n // TILE_K),
            in_specs=[_row_spec(3), _row_spec(NPAR), _row_spec(1), _col_spec()],
            out_specs=_out_spec(),
            scratch_shapes=[pltpu.VMEM((TILE_N, CHUNK), jnp.float32)]),
        compiler_params=_compiler_params(),
    )(active, pos, params, batchv, colT)


def calculate_energies(active, pos, params, batchv, born, colT):
    n = pos.shape[0]
    assert n % TILE_N == 0 and n % TILE_K == 0
    return pl.pallas_call(
        _energies_kernel,
        out_shape=jax.ShapeDtypeStruct((n, 1), jnp.float32),
        grid_spec=pltpu.PrefetchScalarGridSpec(
            num_scalar_prefetch=1,
            grid=(n // TILE_N, n // TILE_K),
            in_specs=[_row_spec(3), _row_spec(NPAR), _row_spec(1), _row_spec(1), _col_spec()],
            out_specs=_out_spec(),
            scratch_shapes=[pltpu.VMEM((TILE_N, CHUNK), jnp.float32)]),
        compiler_params=_compiler_params(),
    )(active, pos, params, batchv, born, colT)


# ---------------------------------------------------------------------------
# Padding / fused-operand / tile-sparsity helpers
# ---------------------------------------------------------------------------
_PAD_PARAM_ROW = (0.0, 0.15, 0.8, 1.0, 0.8, 4.85, 0.0, 0.0)


def _pad_system(pos, x, batchv):
    """Pad atoms to a multiple of TILE_K (so tile_k=512 always applies and the
    row-tile count is a multiple of 4 -> even split across v7x's two TCs) and
    params to NPAR columns. Padded atoms carry batch = -1 (masked everywhere)."""
    n, c = x.shape
    if c < NPAR:
        x = jnp.concatenate([x, jnp.zeros((n, NPAR - c), jnp.float32)], axis=1)
    n_pad = max(TILE_K, ((n + TILE_K - 1) // TILE_K) * TILE_K)
    pad = n_pad - n
    if pad > 0:
        pad_par = jnp.tile(jnp.array(_PAD_PARAM_ROW, jnp.float32)[None, :], (pad, 1))
        pos = jnp.concatenate([pos, jnp.zeros((pad, 3), jnp.float32)], axis=0)
        x = jnp.concatenate([x, pad_par], axis=0)
        batchv = jnp.concatenate([batchv, -jnp.ones((pad, 1), jnp.float32)], axis=0)
    return pos, x, batchv


def _fuse_columns(pos, params, batchv, born=None):
    """One lane-major (NCOL, N) column operand: [x, y, z, q, rad, scale, batch, born]."""
    n = pos.shape[0]
    born_row = jnp.zeros((n,), jnp.float32) if born is None else born[:, 0]
    return jnp.stack([pos[:, 0], pos[:, 1], pos[:, 2],
                      params[:, 0], params[:, 1], params[:, 2],
                      batchv[:, 0], born_row], axis=0).astype(jnp.float32)


def _tile_active(pos, batchv):
    """Conservative per-(row-tile, col-tile) interaction flags (int32, flattened).

    A tile pair is marked inactive only if no atom pair can lie inside the cutoff
    (axis-aligned bounding boxes over valid atoms further apart than CUTOFF) or
    their batch-id ranges cannot overlap, so skipping it is exact."""
    BIG = 1.0e6

    def stats(tile):
        nt = pos.shape[0] // tile
        p = pos.reshape(nt, tile, 3)
        b = batchv.reshape(nt, tile, 1)
        v = b >= 0.0
        lo = jnp.min(jnp.where(v, p, BIG), axis=1)               # (nt, 3)
        hi = jnp.max(jnp.where(v, p, -BIG), axis=1)
        bmin = jnp.min(jnp.where(v, b, BIG), axis=1)[:, 0]       # (nt,)
        bmax = jnp.max(jnp.where(v, b, -BIG), axis=1)[:, 0]
        anyv = jnp.any(v[:, :, 0], axis=1)                       # (nt,)
        return lo, hi, bmin, bmax, anyv

    rlo, rhi, rbmin, rbmax, rany = stats(TILE_N)
    clo, chi, cbmin, cbmax, cany = stats(TILE_K)

    gap = jnp.maximum(0.0, jnp.maximum(clo[None, :, :] - rhi[:, None, :],
                                       rlo[:, None, :] - chi[None, :, :]))
    geom = jnp.sum(gap * gap, axis=-1) < CUTOFF2                 # (n_rt, n_ct)
    bover = (rbmin[:, None] <= cbmax[None, :]) & (cbmin[None, :] <= rbmax[:, None])
    act = geom & bover & rany[:, None] & cany[None, :]
    return act.astype(jnp.int32).reshape(-1)


# ---------------------------------------------------------------------------
# Differentiable per-atom energy (torch.autograd.grad equivalent)
# ---------------------------------------------------------------------------
def _per_atom_energy_pallas(pos, params, batchv):
    """Two Pallas kernels: Born radii, then GB energies. Inputs are padded arrays."""
    active = _tile_active(pos, batchv)
    colT = _fuse_columns(pos, params, batchv)
    born = aggregate_information(active, pos, params, batchv, colT)          # (n, 1)
    colT_e = colT.at[CBORN].set(born[:, 0])
    return calculate_energies(active, pos, params, batchv, born, colT_e)     # (n, 1)


def _per_atom_energy_ref(pos, params, batchv):
    """Plain-JAX mirror of the Pallas math, row-block tiled with lax.map + remat.

    Supplies the VJP for force computation; per-block intermediates are only
    (TILE_N, N) and are rematerialized in the backward, so no N x N array is
    ever materialized in HBM."""
    n = pos.shape[0]
    nb = n // TILE_N
    offs = jnp.arange(nb, dtype=jnp.int32) * TILE_N
    pos_b = pos.reshape(nb, TILE_N, 3)
    par_b = params.reshape(nb, TILE_N, NPAR)
    bat_b = batchv.reshape(nb, TILE_N, 1)

    colT = _fuse_columns(pos, params, batchv)

    @jax.checkpoint
    def born_block(args):
        p, pr, bt, off = args
        blk = _descreen_block(p, pr, bt, colT, off, 0)
        return _born_finalize(jnp.sum(blk, axis=1, keepdims=True), pr)

    born = jax.lax.map(born_block, (pos_b, par_b, bat_b, offs)).reshape(n, 1)

    colT_e = colT.at[CBORN].set(born[:, 0])
    born_b = born.reshape(nb, TILE_N, 1)

    @jax.checkpoint
    def energy_block(args):
        p, pr, bt, bn, off = args
        blk = _energy_pair_block(p, pr, bt, bn, colT_e, off, 0)
        return _energy_finalize(jnp.sum(blk, axis=1, keepdims=True), pr, bt, bn)

    e = jax.lax.map(energy_block, (pos_b, par_b, bat_b, born_b, offs)).reshape(n, 1)
    return e


@jax.custom_vjp
def per_atom_energy(pos, params, batchv):
    return _per_atom_energy_pallas(pos, params, batchv)


def _pae_fwd(pos, params, batchv):
    return _per_atom_energy_pallas(pos, params, batchv), (pos, params, batchv)


def _pae_bwd(res, g):
    # TODO(synk): a fully hand-written Pallas backward would avoid even the tiled
    #             XLA replay; the lax.map + remat mirror already bounds HBM use.
    pos, params, batchv = res
    _, vjp = jax.vjp(_per_atom_energy_ref, pos, params, batchv)
    return vjp(g)


per_atom_energy.defvjp(_pae_fwd, _pae_bwd)


# ---------------------------------------------------------------------------
# GNN_GBNeck.forward equivalent
# ---------------------------------------------------------------------------
def gnn_gbneck_forward(pos, batch, gbparameters, num_graphs=None):
    """Returns (energy[num_graphs, 1], forces[N, 3]) like GNN_GBNeck.forward."""
    if num_graphs is None:
        num_graphs = int(jnp.max(batch)) + 1     # host sync; pass explicitly under jit
    x = jnp.tile(gbparameters.astype(jnp.float32), (num_graphs, 1))   # gbparameters.repeat
    batchv = batch.astype(jnp.float32)[:, None]
    n = pos.shape[0]

    pos_p, x_p, b_p = _pad_system(pos.astype(jnp.float32), x, batchv)

    def total_energy(p):
        e = per_atom_energy(p, x_p, b_p)         # (n_pad, 1)
        return jnp.sum(e), e

    # Single pass for both energies and forces (value_and_grad instead of fwd + grad).
    (_, energies_p), grads_p = jax.value_and_grad(total_energy, has_aux=True)(pos_p)
    energies = energies_p[:n]                    # (N, 1)
    forces = -grads_p[:n]                        # (N, 3)

    energy = jax.ops.segment_sum(energies[:, 0], batch, num_segments=num_graphs)[:, None]
    return energy, forces
    # TODO(synk): self.lin (nn.Linear(1,1)) and get_edge_features are unused in the
    #             reference forward and therefore not implemented.


# ---------------------------------------------------------------------------
if __name__ == "__main__":
    key = jax.random.PRNGKey(0)
    k_pos, k_q, k_r = jax.random.split(key, 3)

    n_per_mol, n_mol = 24, 2
    n_atoms = n_per_mol * n_mol

    # Per-atom GBNeck parameters: [charge, radius(nm), scale, alpha, beta, gamma, pad]
    charges = jax.random.uniform(k_q, (n_per_mol, 1), minval=-0.5, maxval=0.5)
    radii   = 0.12 + 0.08 * jax.random.uniform(k_r, (n_per_mol, 1))
    scales  = jnp.full((n_per_mol, 1), 0.80, jnp.float32)
    alphas  = jnp.full((n_per_mol, 1), 1.00, jnp.float32)
    betas   = jnp.full((n_per_mol, 1), 0.80, jnp.float32)
    gammas  = jnp.full((n_per_mol, 1), 4.85, jnp.float32)
    padcol  = jnp.zeros((n_per_mol, 1), jnp.float32)
    gbparameters = jnp.concatenate(
        [charges, radii, scales, alphas, betas, gammas, padcol], axis=1).astype(jnp.float32)

    # Positions: each molecule inside a 0.5 nm box; second molecule shifted far away.
    pos = jax.random.uniform(k_pos, (n_atoms, 3), minval=0.0, maxval=0.5)
    mol_shift = jnp.repeat(jnp.arange(n_mol, dtype=jnp.float32), n_per_mol)[:, None] * 5.0
    pos = (pos + mol_shift).astype(jnp.float32)
    batch = jnp.repeat(jnp.arange(n_mol, dtype=jnp.int32), n_per_mol)

    energy, forces = gnn_gbneck_forward(pos, batch, gbparameters, num_graphs=n_mol)
    jax.block_until_ready((energy, forces))

    # Cross-check the Pallas forward against the plain-JAX mirror used for the VJP.
    x_full = jnp.tile(gbparameters, (n_mol, 1))
    batchv = batch.astype(jnp.float32)[:, None]
    pos_p, x_p, b_p = _pad_system(pos, x_full, batchv)
    got = _per_atom_energy_pallas(pos_p, x_p, b_p)[:n_atoms]
    ref = _per_atom_energy_ref(pos_p, x_p, b_p)[:n_atoms]
    jax.block_until_ready((got, ref))
    assert jnp.allclose(got, ref, rtol=1e-3, atol=1e-4), "Pallas / JAX mismatch"
    assert energy.shape == (n_mol, 1) and forces.shape == (n_atoms, 3)
    assert bool(jnp.all(jnp.isfinite(energy))) and bool(jnp.all(jnp.isfinite(forces)))

    print("KERNEL_OK")
</pallas_src>

<mosaic_0001>
module attributes {stable_mosaic.version = 11 : i64} {
  func.func @_interaction_kernel(%arg0: i32, %arg1: i32, %arg2: memref<4xi32, #tpu.memory_space<smem>>, %arg3: memref<128x3xf32, #tpu.memory_space<vmem>>, %arg4: memref<128x8xf32, #tpu.memory_space<vmem>>, %arg5: memref<128x1xf32, #tpu.memory_space<vmem>>, %arg6: memref<8x512xf32, #tpu.memory_space<vmem>>, %arg7: memref<128x1xf32, #tpu.memory_space<vmem>>, %arg8: memref<128x128xf32, #tpu.memory_space<vmem>>) attributes {dimension_semantics = [#tpu.dimension_semantics<parallel>, #tpu.dimension_semantics<arbitrary>], iteration_bounds = array<i64: 4, 1>, scalar_prefetch = 1 : i64, scratch_operands = 1 : i64, tpu.core_type = #tpu.core_type<tc>, window_params = [{transform_indices = @transform_0, window_bounds = array<i64: 128, 3>}, {transform_indices = @transform_1, window_bounds = array<i64: 128, 8>}, {transform_indices = @transform_2, window_bounds = array<i64: 128, 1>}, {transform_indices = @transform_3, window_bounds = array<i64: 8, 512>}, {transform_indices = @transform_4, window_bounds = array<i64: 128, 1>}]} {
    %c0_i32 = arith.constant 0 : i32
    %0 = arith.cmpi eq, %arg1, %c0_i32 : i32
    %1 = arith.extui %0 : i1 to i32
    %c0_i32_0 = arith.constant 0 : i32
    %2 = arith.cmpi ne, %1, %c0_i32_0 : i32
    scf.if %2 {
      %cst = arith.constant 0.000000e+00 : f32
      %13 = vector.broadcast %cst : f32 to vector<128x128xf32>
      %c0 = arith.constant 0 : index
      %c0_5 = arith.constant 0 : index
      %14 = vector.load %arg8[%c0, %c0_5] : memref<128x128xf32, #tpu.memory_space<vmem>>, vector<128x128xf32>
      tpu.vector_store %arg8[%c0, %c0_5], %13 {strides = array<i32>} : memref<128x128xf32, #tpu.memory_space<vmem>>, vector<128x128xf32>,
    } else {
    }
    %c1_i32 = arith.constant 1 : i32
    %3 = arith.muli %arg0, %c1_i32 : i32
    %4 = arith.addi %3, %arg1 : i32
    %5 = arith.index_cast %4 : i32 to index
    %6 = memref.load %arg2[%5] : memref<4xi32, #tpu.memory_space<smem>>
    %c0_i32_1 = arith.constant 0 : i32
    %7 = arith.cmpi sgt, %6, %c0_i32_1 : i32
    %8 = arith.extui %7 : i1 to i32
    %c0_i32_2 = arith.constant 0 : i32
    %9 = arith.cmpi ne, %8, %c0_i32_2 : i32
    scf.if %9 {
      %c0 = arith.constant 0 : index
      %c0_5 = arith.constant 0 : index
      %13 = vector.load %arg3[%c0, %c0_5] : memref<128x3xf32, #tpu.memory_space<vmem>>, vector<128x3xf32>
      %c0_6 = arith.constant 0 : index
      %c0_7 = arith.constant 0 : index
      %14 = vector.load %arg4[%c0_6, %c0_7] : memref<128x8xf32, #tpu.memory_space<vmem>>, vector<128x8xf32>
      %c0_8 = arith.constant 0 : index
      %c0_9 = arith.constant 0 : index
      %15 = vector.load %arg5[%c0_8, %c0_9] : memref<128x1xf32, #tpu.memory_space<vmem>>, vector<128x1xf32>
      %c128_i32 = arith.constant 128 : i32
      %16 = arith.muli %arg0, %c128_i32 : i32
      %c0_10 = arith.constant 0 : index
      %c0_11 = arith.constant 0 : index
      %17 = vector.load %arg6[%c0_10, %c0_11] : memref<8x512xf32, #tpu.memory_space<vmem>>, vector<8x128xf32>
      %c0_12 = arith.constant 0 : index
      %c0_13 = arith.constant 0 : index
      %18 = vector.load %arg8[%c0_12, %c0_13] : memref<128x128xf32, #tpu.memory_space<vmem>>, vector<128x128xf32>
      %c512_i32 = arith.constant 512 : i32
      %19 = arith.muli %arg1, %c512_i32 : i32
      %c0_i32_14 = arith.constant 0 : i32
      %20 = arith.addi %19, %c0_i32_14 : i32
      %21 = vector.extract_strided_slice %13 {offsets = [0, 0], sizes = [128, 1], strides = [1, 1]} : vector<128x3xf32> to vector<128x1xf32>
      %22 = vector.extract_strided_slice %17 {offsets = [0, 0], sizes = [1, 128], strides = [1, 1]} : vector<8x128xf32> to vector<1x128xf32>
      %23 = vector.broadcast %21 : vector<128x1xf32> to vector<128x128xf32>
      %24 = vector.broadcast %22 : vector<1x128xf32> to vector<128x128xf32>
      %25 = arith.subf %23, %24 : vector<128x128xf32>
      %26 = vector.extract_strided_slice %13 {offsets = [0, 1], sizes = [128, 1], strides = [1, 1]} : vector<128x3xf32> to vector<128x1xf32>
      %27 = vector.extract_strided_slice %17 {offsets = [1, 0], sizes = [1, 128], strides = [1, 1]} : vector<8x128xf32> to vector<1x128xf32>
      %28 = vector.broadcast %26 : vector<128x1xf32> to vector<128x128xf32>
      %29 = vector.broadcast %27 : vector<1x128xf32> to vector<128x128xf32>
      %30 = arith.subf %28, %29 : vector<128x128xf32>
      %31 = vector.extract_strided_slice %13 {offsets = [0, 2], sizes = [128, 1], strides = [1, 1]} : vector<128x3xf32> to vector<128x1xf32>
      %32 = vector.extract_strided_slice %17 {offsets = [2, 0], sizes = [1, 128], strides = [1, 1]} : vector<8x128xf32> to vector<1x128xf32>
      %33 = vector.broadcast %31 : vector<128x1xf32> to vector<128x128xf32>
      %34 = vector.broadcast %32 : vector<1x128xf32> to vector<128x128xf32>
      %35 = arith.subf %33, %34 : vector<128x128xf32>
      %36 = arith.mulf %25, %25 : vector<128x128xf32>
      %37 = arith.mulf %30, %30 : vector<128x128xf32>
      %38 = arith.addf %36, %37 : vector<128x128xf32>
      %39 = arith.mulf %35, %35 : vector<128x128xf32>
      %40 = arith.addf %38, %39 : vector<128x128xf32>
      %41 = tpu.iota {dimensions = array<i32: 0>} : vector<128x1xi32>
      %42 = vector.broadcast %16 : i32 to vector<128x1xi32>
      %43 = arith.addi %41, %42 : vector<128x1xi32>
      %44 = tpu.iota {dimensions = array<i32: 1>} : vector<1x128xi32>
      %45 = vector.broadcast %20 : i32 to vector<1x128xi32>
      %46 = arith.addi %44, %45 : vector<1x128xi32>
      %47 = vector.broadcast %43 : vector<128x1xi32> to vector<128x128xi32>
      %48 = vector.broadcast %46 : vector<1x128xi32> to vector<128x128xi32>
      %49 = arith.cmpi ne, %47, %48 : vector<128x128xi32>
      %50 = vector.extract_strided_slice %17 {offsets = [6, 0], sizes = [1, 128], strides = [1, 1]} : vector<8x128xf32> to vector<1x128xf32>
      %51 = vector.broadcast %15 : vector<128x1xf32> to vector<128x128xf32>
      %52 = vector.broadcast %50 : vector<1x128xf32> to vector<128x128xf32>
      %53 = arith.cmpf oeq, %51, %52 : vector<128x128xf32>
      %cst = arith.constant 0.000000e+00 : f32
      %54 = vector.broadcast %cst : f32 to vector<128x1xf32>
      %55 = arith.cmpf oge, %15, %54 : vector<128x1xf32>
      %cst_15 = arith.constant 0.000000e+00 : f32
      %56 = vector.broadcast %cst_15 : f32 to vector<1x128xf32>
      %57 = arith.cmpf oge, %50, %56 : vector<1x128xf32>
      %58 = vector.broadcast %55 : vector<128x1xi1> to vector<128x128xi1>
      %59 = vector.broadcast %57 : vector<1x128xi1> to vector<128x128xi1>
      %60 = arith.andi %58, %59 : vector<128x128xi1>
      %61 = arith.andi %49, %53 : vector<128x128xi1>
      %62 = arith.andi %61, %60 : vector<128x128xi1>
      %cst_16 = arith.constant 1.600000e-01 : f32
      %63 = vector.broadcast %cst_16 : f32 to vector<128x128xf32>
      %64 = arith.cmpf olt, %40, %63 : vector<128x128xf32>
      %65 = arith.andi %62, %64 : vector<128x128xi1>
      %cst_17 = arith.constant 9.99999996E-13 : f32
      %66 = vector.broadcast %cst_17 : f32 to vector<128x128xf32>
      %67 = arith.maximumf %40, %66 : vector<128x128xf32>
      %cst_18 = arith.constant 1.000000e+00 : f32
      %68 = vector.broadcast %cst_18 : f32 to vector<128x128xf32>
      %69 = arith.select %65, %67, %68 : vector<128x128xi1>, vector<128x128xf32>
      %70 = math.rsqrt %69 : vector<128x128xf32>
      %71 = arith.mulf %69, %70 : vector<128x128xf32>
      %72 = vector.extract_strided_slice %14 {offsets = [0, 1], sizes = [128, 1], strides = [1, 1]} : vector<128x8xf32> to vector<128x1xf32>
      %cst_19 = arith.constant 1.951410e-02 : f32
      %73 = vector.broadcast %cst_19 : f32 to vector<128x1xf32>
      %74 = arith.subf %72, %73 : vector<128x1xf32>
      %cst_20 = arith.constant 1.000000e+00 : f32
      %75 = vector.broadcast %cst_20 : f32 to vector<128x1xf32>
      %76 = arith.divf %75, %74 : vector<128x1xf32>
      %77 = vector.extract_strided_slice %17 {offsets = [4, 0], sizes = [1, 128], strides = [1, 1]} : vector<8x128xf32> to vector<1x128xf32>
      %cst_21 = arith.constant 1.951410e-02 : f32
      %78 = vector.broadcast %cst_21 : f32 to vector<1x128xf32>
      %79 = arith.subf %77, %78 : vector<1x128xf32>
      %80 = vector.extract_strided_slice %17 {offsets = [5, 0], sizes = [1, 128], strides = [1, 1]} : vector<8x128xf32> to vector<1x128xf32>
      %81 = arith.mulf %80, %79 : vector<1x128xf32>
      %82 = vector.broadcast %81 : vector<1x128xf32> to vector<128x128xf32>
      %83 = arith.addf %71, %82 : vector<128x128xf32>
      %84 = vector.broadcast %81 : vector<1x128xf32> to vector<128x128xf32>
      %85 = arith.subf %71, %84 : vector<128x128xf32>
      %86 = math.absf %85 : vector<128x128xf32>
      %87 = vector.broadcast %74 : vector<128x1xf32> to vector<128x128xf32>
      %88 = arith.maximumf %87, %86 : vector<128x128xf32>
      %cst_22 = arith.constant 1.000000e+00 : f32
      %89 = vector.broadcast %cst_22 : f32 to vector<128x128xf32>
      %90 = arith.divf %89, %88 : vector<128x128xf32>
      %cst_23 = arith.constant 1.000000e+00 : f32
      %91 = vector.broadcast %cst_23 : f32 to vector<128x128xf32>
      %92 = arith.divf %91, %83 : vector<128x128xf32>
      %93 = arith.mulf %90, %90 : vector<128x128xf32>
      %94 = arith.mulf %92, %92 : vector<128x128xf32>
      %95 = arith.subf %90, %92 : vector<128x128xf32>
      %cst_24 = arith.constant 2.500000e-01 : f32
      %96 = vector.broadcast %cst_24 : f32 to vector<128x128xf32>
      %97 = arith.mulf %96, %71 : vector<128x128xf32>
      %98 = arith.subf %94, %93 : vector<128x128xf32>
      %99 = arith.mulf %97, %98 : vector<128x128xf32>
      %100 = arith.addf %95, %99 : vector<128x128xf32>
      %cst_25 = arith.constant 5.000000e-01 : f32
      %101 = vector.broadcast %cst_25 : f32 to vector<128x128xf32>
      %102 = arith.mulf %101, %70 : vector<128x128xf32>
      %103 = arith.mulf %88, %92 : vector<128x128xf32>
      %104 = math.log %103 : vector<128x128xf32>
      %105 = arith.mulf %102, %104 : vector<128x128xf32>
      %106 = arith.addf %100, %105 : vector<128x128xf32>
      %107 = arith.mulf %81, %81 : vector<1x128xf32>
      %cst_26 = arith.constant 2.500000e-01 : f32
      %108 = vector.broadcast %cst_26 : f32 to vector<1x128xf32>
      %109 = arith.mulf %108, %107 : vector<1x128xf32>
      %110 = vector.broadcast %109 : vector<1x128xf32> to vector<128x128xf32>
      %111 = arith.mulf %110, %70 : vector<128x128xf32>
      %112 = arith.subf %93, %94 : vector<128x128xf32>
      %113 = arith.mulf %111, %112 : vector<128x128xf32>
      %114 = arith.addf %106, %113 : vector<128x128xf32>
      %115 = vector.broadcast %81 : vector<1x128xf32> to vector<128x128xf32>
      %116 = arith.subf %115, %71 : vector<128x128xf32>
      %117 = vector.broadcast %74 : vector<128x1xf32> to vector<128x128xf32>
      %118 = arith.cmpf olt, %117, %116 : vector<128x128xf32>
      %119 = vector.broadcast %76 : vector<128x1xf32> to vector<128x128xf32>
      %120 = arith.subf %119, %90 : vector<128x128xf32>
      %cst_27 = arith.constant 2.000000e+00 : f32
      %121 = vector.broadcast %cst_27 : f32 to vector<128x128xf32>
      %122 = arith.mulf %121, %120 : vector<128x128xf32>
      %cst_28 = arith.constant 0.000000e+00 : f32
      %123 = vector.broadcast %cst_28 : f32 to vector<128x128xf32>
      %124 = arith.select %118, %122, %123 : vector<128x128xi1>, vector<128x128xf32>
      %125 = arith.addf %114, %124 : vector<128x128xf32>
      %126 = vector.broadcast %74 : vector<128x1xf32> to vector<128x128xf32>
      %127 = arith.cmpf olt, %126, %83 : vector<128x128xf32>
      %cst_29 = arith.constant 0.000000e+00 : f32
      %128 = vector.broadcast %cst_29 : f32 to vector<128x128xf32>
      %129 = arith.select %127, %125, %128 : vector<128x128xi1>, vector<128x128xf32>
      %cst_30 = arith.constant 0.000000e+00 : f32
      %130 = vector.broadcast %cst_30 : f32 to vector<128x128xf32>
      %131 = arith.select %65, %129, %130 : vector<128x128xi1>, vector<128x128xf32>
      %cst_31 = arith.constant 5.000000e-01 : f32
      %132 = vector.broadcast %cst_31 : f32 to vector<128x128xf32>
      %133 = arith.mulf %132, %131 : vector<128x128xf32>
      %134 = arith.addf %18, %133 : vector<128x128xf32>
      %c0_32 = arith.constant 0 : index
      %c0_33 = arith.constant 0 : index
      %135 = vector.load %arg8[%c0_32, %c0_33] : memref<128x128xf32, #tpu.memory_space<vmem>>, vector<128x128xf32>
      tpu.vector_store %arg8[%c0_32, %c0_33], %134 {strides = array<i32>} : memref<128x128xf32, #tpu.memory_space<vmem>>, vector<128x128xf32>,
      %c0_34 = arith.constant 0 : index
      %c128 = arith.constant 128 : index
      %136 = vector.load %arg6[%c0_34, %c128] : memref<8x512xf32, #tpu.memory_space<vmem>>, vector<8x128xf32>
      %c0_35 = arith.constant 0 : index
      %c0_36 = arith.constant 0 : index
      %137 = vector.load %arg8[%c0_35, %c0_36] : memref<128x128xf32, #tpu.memory_space<vmem>>, vector<128x128xf32>
      %c512_i32_37 = arith.constant 512 : i32
      %138 = arith.muli %arg1, %c512_i32_37 : i32
      %c128_i32_38 = arith.constant 128 : i32
      %139 = arith.addi %138, %c128_i32_38 : i32
      %140 = vector.extract_strided_slice %13 {offsets = [0, 0], sizes = [128, 1], strides = [1, 1]} : vector<128x3xf32> to vector<128x1xf32>
      %141 = vector.extract_strided_slice %136 {offsets = [0, 0], sizes = [1, 128], strides = [1, 1]} : vector<8x128xf32> to vector<1x128xf32>
      %142 = vector.broadcast %140 : vector<128x1xf32> to vector<128x128xf32>
      %143 = vector.broadcast %141 : vector<1x128xf32> to vector<128x128xf32>
      %144 = arith.subf %142, %143 : vector<128x128xf32>
      %145 = vector.extract_strided_slice %13 {offsets = [0, 1], sizes = [128, 1], strides = [1, 1]} : vector<128x3xf32> to vector<128x1xf32>
      %146 = vector.extract_strided_slice %136 {offsets = [1, 0], sizes = [1, 128], strides = [1, 1]} : vector<8x128xf32> to vector<1x128xf32>
      %147 = vector.broadcast %145 : vector<128x1xf32> to vector<128x128xf32>
      %148 = vector.broadcast %146 : vector<1x128xf32> to vector<128x128xf32>
      %149 = arith.subf %147, %148 : vector<128x128xf32>
      %150 = vector.extract_strided_slice %13 {offsets = [0, 2], sizes = [128, 1], strides = [1, 1]} : vector<128x3xf32> to vector<128x1xf32>
      %151 = vector.extract_strided_slice %136 {offsets = [2, 0], sizes = [1, 128], strides = [1, 1]} : vector<8x128xf32> to vector<1x128xf32>
      %152 = vector.broadcast %150 : vector<128x1xf32> to vector<128x128xf32>
      %153 = vector.broadcast %151 : vector<1x128xf32> to vector<128x128xf32>
      %154 = arith.subf %152, %153 : vector<128x128xf32>
      %155 = arith.mulf %144, %144 : vector<128x128xf32>
      %156 = arith.mulf %149, %149 : vector<128x128xf32>
      %157 = arith.addf %155, %156 : vector<128x128xf32>
      %158 = arith.mulf %154, %154 : vector<128x128xf32>
      %159 = arith.addf %157, %158 : vector<128x128xf32>
      %160 = tpu.iota {dimensions = array<i32: 0>} : vector<128x1xi32>
      %161 = vector.broadcast %16 : i32 to vector<128x1xi32>
      %162 = arith.addi %160, %161 : vector<128x1xi32>
      %163 = tpu.iota {dimensions = array<i32: 1>} : vector<1x128xi32>
      %164 = vector.broadcast %139 : i32 to vector<1x128xi32>
      %165 = arith.addi %163, %164 : vector<1x128xi32>
      %166 = vector.broadcast %162 : vector<128x1xi32> to vector<128x128xi32>
      %167 = vector.broadcast %165 : vector<1x128xi32> to vector<128x128xi32>
      %168 = arith.cmpi ne, %166, %167 : vector<128x128xi32>
      %169 = vector.extract_strided_slice %136 {offsets = [6, 0], sizes = [1, 128], strides = [1, 1]} : vector<8x128xf32> to vector<1x128xf32>
      %170 = vector.broadcast %15 : vector<128x1xf32> to vector<128x128xf32>
      %171 = vector.broadcast %169 : vector<1x128xf32> to vector<128x128xf32>
      %172 = arith.cmpf oeq, %170, %171 : vector<128x128xf32>
      %cst_39 = arith.constant 0.000000e+00 : f32
      %173 = vector.broadcast %cst_39 : f32 to vector<128x1xf32>
      %174 = arith.cmpf oge, %15, %173 : vector<128x1xf32>
      %cst_40 = arith.constant 0.000000e+00 : f32
      %175 = vector.broadcast %cst_40 : f32 to vector<1x128xf32>
      %176 = arith.cmpf oge, %169, %175 : vector<1x128xf32>
      %177 = vector.broadcast %174 : vector<128x1xi1> to vector<128x128xi1>
      %178 = vector.broadcast %176 : vector<1x128xi1> to vector<128x128xi1>
      %179 = arith.andi %177, %178 : vector<128x128xi1>
      %180 = arith.andi %168, %172 : vector<128x128xi1>
      %181 = arith.andi %180, %179 : vector<128x128xi1>
      %cst_41 = arith.constant 1.600000e-01 : f32
      %182 = vector.broadcast %cst_41 : f32 to vector<128x128xf32>
      %183 = arith.cmpf olt, %159, %182 : vector<128x128xf32>
      %184 = arith.andi %181, %183 : vector<128x128xi1>
      %cst_42 = arith.constant 9.99999996E-13 : f32
      %185 = vector.broadcast %cst_42 : f32 to vector<128x128xf32>
      %186 = arith.maximumf %159, %185 : vector<128x128xf32>
      %cst_43 = arith.constant 1.000000e+00 : f32
      %187 = vector.broadcast %cst_43 : f32 to vector<128x128xf32>
      %188 = arith.select %184, %186, %187 : vector<128x128xi1>, vector<128x128xf32>
      %189 = math.rsqrt %188 : vector<128x128xf32>
      %190 = arith.mulf %188, %189 : vector<128x128xf32>
      %191 = vector.extract_strided_slice %14 {offsets = [0, 1], sizes = [128, 1], strides = [1, 1]} : vector<128x8xf32> to vector<128x1xf32>
      %cst_44 = arith.constant 1.951410e-02 : f32
      %192 = vector.broadcast %cst_44 : f32 to vector<128x1xf32>
      %193 = arith.subf %191, %192 : vector<128x1xf32>
      %cst_45 = arith.constant 1.000000e+00 : f32
      %194 = vector.broadcast %cst_45 : f32 to vector<128x1xf32>
      %195 = arith.divf %194, %193 : vector<128x1xf32>
      %196 = vector.extract_strided_slice %136 {offsets = [4, 0], sizes = [1, 128], strides = [1, 1]} : vector<8x128xf32> to vector<1x128xf32>
      %cst_46 = arith.constant 1.951410e-02 : f32
      %197 = vector.broadcast %cst_46 : f32 to vector<1x128xf32>
      %198 = arith.subf %196, %197 : vector<1x128xf32>
      %199 = vector.extract_strided_slice %136 {offsets = [5, 0], sizes = [1, 128], strides = [1, 1]} : vector<8x128xf32> to vector<1x128xf32>
      %200 = arith.mulf %199, %198 : vector<1x128xf32>
      %201 = vector.broadcast %200 : vector<1x128xf32> to vector<128x128xf32>
      %202 = arith.addf %190, %201 : vector<128x128xf32>
      %203 = vector.broadcast %200 : vector<1x128xf32> to vector<128x128xf32>
      %204 = arith.subf %190, %203 : vector<128x128xf32>
      %205 = math.absf %204 : vector<128x128xf32>
      %206 = vector.broadcast %193 : vector<128x1xf32> to vector<128x128xf32>
      %207 = arith.maximumf %206, %205 : vector<128x128xf32>
      %cst_47 = arith.constant 1.000000e+00 : f32
      %208 = vector.broadcast %cst_47 : f32 to vector<128x128xf32>
      %209 = arith.divf %208, %207 : vector<128x128xf32>
      %cst_48 = arith.constant 1.000000e+00 : f32
      %210 = vector.broadcast %cst_48 : f32 to vector<128x128xf32>
      %211 = arith.divf %210, %202 : vector<128x128xf32>
      %212 = arith.mulf %209, %209 : vector<128x128xf32>
      %213 = arith.mulf %211, %211 : vector<128x128xf32>
      %214 = arith.subf %209, %211 : vector<128x128xf32>
      %cst_49 = arith.constant 2.500000e-01 : f32
      %215 = vector.broadcast %cst_49 : f32 to vector<128x128xf32>
      %216 = arith.mulf %215, %190 : vector<128x128xf32>
      %217 = arith.subf %213, %212 : vector<128x128xf32>
      %218 = arith.mulf %216, %217 : vector<128x128xf32>
      %219 = arith.addf %214, %218 : vector<128x128xf32>
      %cst_50 = arith.constant 5.000000e-01 : f32
      %220 = vector.broadcast %cst_50 : f32 to vector<128x128xf32>
      %221 = arith.mulf %220, %189 : vector<128x128xf32>
      %222 = arith.mulf %207, %211 : vector<128x128xf32>
      %223 = math.log %222 : vector<128x128xf32>
      %224 = arith.mulf %221, %223 : vector<128x128xf32>
      %225 = arith.addf %219, %224 : vector<128x128xf32>
      %226 = arith.mulf %200, %200 : vector<1x128xf32>
      %cst_51 = arith.constant 2.500000e-01 : f32
      %227 = vector.broadcast %cst_51 : f32 to vector<1x128xf32>
      %228 = arith.mulf %227, %226 : vector<1x128xf32>
      %229 = vector.broadcast %228 : vector<1x128xf32> to vector<128x128xf32>
      %230 = arith.mulf %229, %189 : vector<128x128xf32>
      %231 = arith.subf %212, %213 : vector<128x128xf32>
      %232 = arith.mulf %230, %231 : vector<128x128xf32>
      %233 = arith.addf %225, %232 : vector<128x128xf32>
      %234 = vector.broadcast %200 : vector<1x128xf32> to vector<128x128xf32>
      %235 = arith.subf %234, %190 : vector<128x128xf32>
      %236 = vector.broadcast %193 : vector<128x1xf32> to vector<128x128xf32>
      %237 = arith.cmpf olt, %236, %235 : vector<128x128xf32>
      %238 = vector.broadcast %195 : vector<128x1xf32> to vector<128x128xf32>
      %239 = arith.subf %238, %209 : vector<128x128xf32>
      %cst_52 = arith.constant 2.000000e+00 : f32
      %240 = vector.broadcast %cst_52 : f32 to vector<128x128xf32>
      %241 = arith.mulf %240, %239 : vector<128x128xf32>
      %cst_53 = arith.constant 0.000000e+00 : f32
      %242 = vector.broadcast %cst_53 : f32 to vector<128x128xf32>
      %243 = arith.select %237, %241, %242 : vector<128x128xi1>, vector<128x128xf32>
      %244 = arith.addf %233, %243 : vector<128x128xf32>
      %245 = vector.broadcast %193 : vector<128x1xf32> to vector<128x128xf32>
      %246 = arith.cmpf olt, %245, %202 : vector<128x128xf32>
      %cst_54 = arith.constant 0.000000e+00 : f32
      %247 = vector.broadcast %cst_54 : f32 to vector<128x128xf32>
      %248 = arith.select %246, %244, %247 : vector<128x128xi1>, vector<128x128xf32>
      %cst_55 = arith.constant 0.000000e+00 : f32
      %249 = vector.broadcast %cst_55 : f32 to vector<128x128xf32>
      %250 = arith.select %184, %248, %249 : vector<128x128xi1>, vector<128x128xf32>
      %cst_56 = arith.constant 5.000000e-01 : f32
      %251 = vector.broadcast %cst_56 : f32 to vector<128x128xf32>
      %252 = arith.mulf %251, %250 : vector<128x128xf32>
      %253 = arith.addf %137, %252 : vector<128x128xf32>
      %c0_57 = arith.constant 0 : index
      %c0_58 = arith.constant 0 : index
      %254 = vector.load %arg8[%c0_57, %c0_58] : memref<128x128xf32, #tpu.memory_space<vmem>>, vector<128x128xf32>
      tpu.vector_store %arg8[%c0_57, %c0_58], %253 {strides = array<i32>} : memref<128x128xf32, #tpu.memory_space<vmem>>, vector<128x128xf32>,
      %c0_59 = arith.constant 0 : index
      %c256 = arith.constant 256 : index
      %255 = vector.load %arg6[%c0_59, %c256] : memref<8x512xf32, #tpu.memory_space<vmem>>, vector<8x128xf32>
      %c0_60 = arith.constant 0 : index
      %c0_61 = arith.constant 0 : index
      %256 = vector.load %arg8[%c0_60, %c0_61] : memref<128x128xf32, #tpu.memory_space<vmem>>, vector<128x128xf32>
      %c512_i32_62 = arith.constant 512 : i32
      %257 = arith.muli %arg1, %c512_i32_62 : i32
      %c256_i32 = arith.constant 256 : i32
      %258 = arith.addi %257, %c256_i32 : i32
      %259 = vector.extract_strided_slice %13 {offsets = [0, 0], sizes = [128, 1], strides = [1, 1]} : vector<128x3xf32> to vector<128x1xf32>
      %260 = vector.extract_strided_slice %255 {offsets = [0, 0], sizes = [1, 128], strides = [1, 1]} : vector<8x128xf32> to vector<1x128xf32>
      %261 = vector.broadcast %259 : vector<128x1xf32> to vector<128x128xf32>
      %262 = vector.broadcast %260 : vector<1x128xf32> to vector<128x128xf32>
      %263 = arith.subf %261, %262 : vector<128x128xf32>
      %264 = vector.extract_strided_slice %13 {offsets = [0, 1], sizes = [128, 1], strides = [1, 1]} : vector<128x3xf32> to vector<128x1xf32>
      %265 = vector.extract_strided_slice %255 {offsets = [1, 0], sizes = [1, 128], strides = [1, 1]} : vector<8x128xf32> to vector<1x128xf32>
      %266 = vector.broadcast %264 : vector<128x1xf32> to vector<128x128xf32>
      %267 = vector.broadcast %265 : vector<1x128xf32> to vector<128x128xf32>
      %268 = arith.subf %266, %267 : vector<128x128xf32>
      %269 = vector.extract_strided_slice %13 {offsets = [0, 2], sizes = [128, 1], strides = [1, 1]} : vector<128x3xf32> to vector<128x1xf32>
      %270 = vector.extract_strided_slice %255 {offsets = [2, 0], sizes = [1, 128], strides = [1, 1]} : vector<8x128xf32> to vector<1x128xf32>
      %271 = vector.broadcast %269 : vector<128x1xf32> to vector<128x128xf32>
      %272 = vector.broadcast %270 : vector<1x128xf32> to vector<128x128xf32>
      %273 = arith.subf %271, %272 : vector<128x128xf32>
      %274 = arith.mulf %263, %263 : vector<128x128xf32>
      %275 = arith.mulf %268, %268 : vector<128x128xf32>
      %276 = arith.addf %274, %275 : vector<128x128xf32>
      %277 = arith.mulf %273, %273 : vector<128x128xf32>
      %278 = arith.addf %276, %277 : vector<128x128xf32>
      %279 = tpu.iota {dimensions = array<i32: 0>} : vector<128x1xi32>
      %280 = vector.broadcast %16 : i32 to vector<128x1xi32>
      %281 = arith.addi %279, %280 : vector<128x1xi32>
      %282 = tpu.iota {dimensions = array<i32: 1>} : vector<1x128xi32>
      %283 = vector.broadcast %258 : i32 to vector<1x128xi32>
      %284 = arith.addi %282, %283 : vector<1x128xi32>
      %285 = vector.broadcast %281 : vector<128x1xi32> to vector<128x128xi32>
      %286 = vector.broadcast %284 : vector<1x128xi32> to vector<128x128xi32>
      %287 = arith.cmpi ne, %285, %286 : vector<128x128xi32>
      %288 = vector.extract_strided_slice %255 {offsets = [6, 0], sizes = [1, 128], strides = [1, 1]} : vector<8x128xf32> to vector<1x128xf32>
      %289 = vector.broadcast %15 : vector<128x1xf32> to vector<128x128xf32>
      %290 = vector.broadcast %288 : vector<1x128xf32> to vector<128x128xf32>
      %291 = arith.cmpf oeq, %289, %290 : vector<128x128xf32>
      %cst_63 = arith.constant 0.000000e+00 : f32
      %292 = vector.broadcast %cst_63 : f32 to vector<128x1xf32>
      %293 = arith.cmpf oge, %15, %292 : vector<128x1xf32>
      %cst_64 = arith.constant 0.000000e+00 : f32
      %294 = vector.broadcast %cst_64 : f32 to vector<1x128xf32>
      %295 = arith.cmpf oge, %288, %294 : vector<1x128xf32>
      %296 = vector.broadcast %293 : vector<128x1xi1> to vector<128x128xi1>
      %297 = vector.broadcast %295 : vector<1x128xi1> to vector<128x128xi1>
      %298 = arith.andi %296, %297 : vector<128x128xi1>
      %299 = arith.andi %287, %291 : vector<128x128xi1>
      %300 = arith.andi %299, %298 : vector<128x128xi1>
      %cst_65 = arith.constant 1.600000e-01 : f32
      %301 = vector.broadcast %cst_65 : f32 to vector<128x128xf32>
      %302 = arith.cmpf olt, %278, %301 : vector<128x128xf32>
      %303 = arith.andi %300, %302 : vector<128x128xi1>
      %cst_66 = arith.constant 9.99999996E-13 : f32
      %304 = vector.broadcast %cst_66 : f32 to vector<128x128xf32>
      %305 = arith.maximumf %278, %304 : vector<128x128xf32>
      %cst_67 = arith.constant 1.000000e+00 : f32
      %306 = vector.broadcast %cst_67 : f32 to vector<128x128xf32>
      %307 = arith.select %303, %305, %306 : vector<128x128xi1>, vector<128x128xf32>
      %308 = math.rsqrt %307 : vector<128x128xf32>
      %309 = arith.mulf %307, %308 : vector<128x128xf32>
      %310 = vector.extract_strided_slice %14 {offsets = [0, 1], sizes = [128, 1], strides = [1, 1]} : vector<128x8xf32> to vector<128x1xf32>
      %cst_68 = arith.constant 1.951410e-02 : f32
      %311 = vector.broadcast %cst_68 : f32 to vector<128x1xf32>
      %312 = arith.subf %310, %311 : vector<128x1xf32>
      %cst_69 = arith.constant 1.000000e+00 : f32
      %313 = vector.broadcast %cst_69 : f32 to vector<128x1xf32>
      %314 = arith.divf %313, %312 : vector<128x1xf32>
      %315 = vector.extract_strided_slice %255 {offsets = [4, 0], sizes = [1, 128], strides = [1, 1]} : vector<8x128xf32> to vector<1x128xf32>
      %cst_70 = arith.constant 1.951410e-02 : f32
      %316 = vector.broadcast %cst_70 : f32 to vector<1x128xf32>
      %317 = arith.subf %315, %316 : vector<1x128xf32>
      %318 = vector.extract_strided_slice %255 {offsets = [5, 0], sizes = [1, 128], strides = [1, 1]} : vector<8x128xf32> to vector<1x128xf32>
      %319 = arith.mulf %318, %317 : vector<1x128xf32>
      %320 = vector.broadcast %319 : vector<1x128xf32> to vector<128x128xf32>
      %321 = arith.addf %309, %320 : vector<128x128xf32>
      %322 = vector.broadcast %319 : vector<1x128xf32> to vector<128x128xf32>
      %323 = arith.subf %309, %322 : vector<128x128xf32>
      %324 = math.absf %323 : vector<128x128xf32>
      %325 = vector.broadcast %312 : vector<128x1xf32> to vector<128x128xf32>
      %326 = arith.maximumf %325, %324 : vector<128x128xf32>
      %cst_71 = arith.constant 1.000000e+00 : f32
      %327 = vector.broadcast %cst_71 : f32 to vector<128x128xf32>
      %328 = arith.divf %327, %326 : vector<128x128xf32>
      %cst_72 = arith.constant 1.000000e+00 : f32
      %329 = vector.broadcast %cst_72 : f32 to vector<128x128xf32>
      %330 = arith.divf %329, %321 : vector<128x128xf32>
      %331 = arith.mulf %328, %328 : vector<128x128xf32>
      %332 = arith.mulf %330, %330 : vector<128x128xf32>
      %333 = arith.subf %328, %330 : vector<128x128xf32>
      %cst_73 = arith.constant 2.500000e-01 : f32
      %334 = vector.broadcast %cst_73 : f32 to vector<128x128xf32>
      %335 = arith.mulf %334, %309 : vector<128x128xf32>
      %336 = arith.subf %332, %331 : vector<128x128xf32>
      %337 = arith.mulf %335, %336 : vector<128x128xf32>
      %338 = arith.addf %333, %337 : vector<128x128xf32>
      %cst_74 = arith.constant 5.000000e-01 : f32
      %339 = vector.broadcast %cst_74 : f32 to vector<128x128xf32>
      %340 = arith.mulf %339, %308 : vector<128x128xf32>
      %341 = arith.mulf %326, %330 : vector<128x128xf32>
      %342 = math.log %341 : vector<128x128xf32>
      %343 = arith.mulf %340, %342 : vector<128x128xf32>
      %344 = arith.addf %338, %343 : vector<128x128xf32>
      %345 = arith.mulf %319, %319 : vector<1x128xf32>
      %cst_75 = arith.constant 2.500000e-01 : f32
      %346 = vector.broadcast %cst_75 : f32 to vector<1x128xf32>
      %347 = arith.mulf %346, %345 : vector<1x128xf32>
      %348 = vector.broadcast %347 : vector<1x128xf32> to vector<128x128xf32>
      %349 = arith.mulf %348, %308 : vector<128x128xf32>
      %350 = arith.subf %331, %332 : vector<128x128xf32>
      %351 = arith.mulf %349, %350 : vector<128x128xf32>
      %352 = arith.addf %344, %351 : vector<128x128xf32>
      %353 = vector.broadcast %319 : vector<1x128xf32> to vector<128x128xf32>
      %354 = arith.subf %353, %309 : vector<128x128xf32>
      %355 = vector.broadcast %312 : vector<128x1xf32> to vector<128x128xf32>
      %356 = arith.cmpf olt, %355, %354 : vector<128x128xf32>
      %357 = vector.broadcast %314 : vector<128x1xf32> to vector<128x128xf32>
      %358 = arith.subf %357, %328 : vector<128x128xf32>
      %cst_76 = arith.constant 2.000000e+00 : f32
      %359 = vector.broadcast %cst_76 : f32 to vector<128x128xf32>
      %360 = arith.mulf %359, %358 : vector<128x128xf32>
      %cst_77 = arith.constant 0.000000e+00 : f32
      %361 = vector.broadcast %cst_77 : f32 to vector<128x128xf32>
      %362 = arith.select %356, %360, %361 : vector<128x128xi1>, vector<128x128xf32>
      %363 = arith.addf %352, %362 : vector<128x128xf32>
      %364 = vector.broadcast %312 : vector<128x1xf32> to vector<128x128xf32>
      %365 = arith.cmpf olt, %364, %321 : vector<128x128xf32>
      %cst_78 = arith.constant 0.000000e+00 : f32
      %366 = vector.broadcast %cst_78 : f32 to vector<128x128xf32>
      %367 = arith.select %365, %363, %366 : vector<128x128xi1>, vector<128x128xf32>
      %cst_79 = arith.constant 0.000000e+00 : f32
      %368 = vector.broadcast %cst_79 : f32 to vector<128x128xf32>
      %369 = arith.select %303, %367, %368 : vector<128x128xi1>, vector<128x128xf32>
      %cst_80 = arith.constant 5.000000e-01 : f32
      %370 = vector.broadcast %cst_80 : f32 to vector<128x128xf32>
      %371 = arith.mulf %370, %369 : vector<128x128xf32>
      %372 = arith.addf %256, %371 : vector<128x128xf32>
      %c0_81 = arith.constant 0 : index
      %c0_82 = arith.constant 0 : index
      %373 = vector.load %arg8[%c0_81, %c0_82] : memref<128x128xf32, #tpu.memory_space<vmem>>, vector<128x128xf32>
      tpu.vector_store %arg8[%c0_81, %c0_82], %372 {strides = array<i32>} : memref<128x128xf32, #tpu.memory_space<vmem>>, vector<128x128xf32>,
      %c0_83 = arith.constant 0 : index
      %c384 = arith.constant 384 : index
      %374 = vector.load %arg6[%c0_83, %c384] : memref<8x512xf32, #tpu.memory_space<vmem>>, vector<8x128xf32>
      %c0_84 = arith.constant 0 : index
      %c0_85 = arith.constant 0 : index
      %375 = vector.load %arg8[%c0_84, %c0_85] : memref<128x128xf32, #tpu.memory_space<vmem>>, vector<128x128xf32>
      %c512_i32_86 = arith.constant 512 : i32
      %376 = arith.muli %arg1, %c512_i32_86 : i32
      %c384_i32 = arith.constant 384 : i32
      %377 = arith.addi %376, %c384_i32 : i32
      %378 = vector.extract_strided_slice %13 {offsets = [0, 0], sizes = [128, 1], strides = [1, 1]} : vector<128x3xf32> to vector<128x1xf32>
      %379 = vector.extract_strided_slice %374 {offsets = [0, 0], sizes = [1, 128], strides = [1, 1]} : vector<8x128xf32> to vector<1x128xf32>
      %380 = vector.broadcast %378 : vector<128x1xf32> to vector<128x128xf32>
      %381 = vector.broadcast %379 : vector<1x128xf32> to vector<128x128xf32>
      %382 = arith.subf %380, %381 : vector<128x128xf32>
      %383 = vector.extract_strided_slice %13 {offsets = [0, 1], sizes = [128, 1], strides = [1, 1]} : vector<128x3xf32> to vector<128x1xf32>
      %384 = vector.extract_strided_slice %374 {offsets = [1, 0], sizes = [1, 128], strides = [1, 1]} : vector<8x128xf32> to vector<1x128xf32>
      %385 = vector.broadcast %383 : vector<128x1xf32> to vector<128x128xf32>
      %386 = vector.broadcast %384 : vector<1x128xf32> to vector<128x128xf32>
      %387 = arith.subf %385, %386 : vector<128x128xf32>
      %388 = vector.extract_strided_slice %13 {offsets = [0, 2], sizes = [128, 1], strides = [1, 1]} : vector<128x3xf32> to vector<128x1xf32>
      %389 = vector.extract_strided_slice %374 {offsets = [2, 0], sizes = [1, 128], strides = [1, 1]} : vector<8x128xf32> to vector<1x128xf32>
      %390 = vector.broadcast %388 : vector<128x1xf32> to vector<128x128xf32>
      %391 = vector.broadcast %389 : vector<1x128xf32> to vector<128x128xf32>
      %392 = arith.subf %390, %391 : vector<128x128xf32>
      %393 = arith.mulf %382, %382 : vector<128x128xf32>
      %394 = arith.mulf %387, %387 : vector<128x128xf32>
      %395 = arith.addf %393, %394 : vector<128x128xf32>
      %396 = arith.mulf %392, %392 : vector<128x128xf32>
      %397 = arith.addf %395, %396 : vector<128x128xf32>
      %398 = tpu.iota {dimensions = array<i32: 0>} : vector<128x1xi32>
      %399 = vector.broadcast %16 : i32 to vector<128x1xi32>
      %400 = arith.addi %398, %399 : vector<128x1xi32>
      %401 = tpu.iota {dimensions = array<i32: 1>} : vector<1x128xi32>
      %402 = vector.broadcast %377 : i32 to vector<1x128xi32>
      %403 = arith.addi %401, %402 : vector<1x128xi32>
      %404 = vector.broadcast %400 : vector<128x1xi32> to vector<128x128xi32>
      %405 = vector.broadcast %403 : vector<1x128xi32> to vector<128x128xi32>
      %406 = arith.cmpi ne, %404, %405 : vector<128x128xi32>
      %407 = vector.extract_strided_slice %374 {offsets = [6, 0], sizes = [1, 128], strides = [1, 1]} : vector<8x128xf32> to vector<1x128xf32>
      %408 = vector.broadcast %15 : vector<128x1xf32> to vector<128x128xf32>
      %409 = vector.broadcast %407 : vector<1x128xf32> to vector<128x128xf32>
      %410 = arith.cmpf oeq, %408, %409 : vector<128x128xf32>
      %cst_87 = arith.constant 0.000000e+00 : f32
      %411 = vector.broadcast %cst_87 : f32 to vector<128x1xf32>
      %412 = arith.cmpf oge, %15, %411 : vector<128x1xf32>
      %cst_88 = arith.constant 0.000000e+00 : f32
      %413 = vector.broadcast %cst_88 : f32 to vector<1x128xf32>
      %414 = arith.cmpf oge, %407, %413 : vector<1x128xf32>
      %415 = vector.broadcast %412 : vector<128x1xi1> to vector<128x128xi1>
      %416 = vector.broadcast %414 : vector<1x128xi1> to vector<128x128xi1>
      %417 = arith.andi %415, %416 : vector<128x128xi1>
      %418 = arith.andi %406, %410 : vector<128x128xi1>
      %419 = arith.andi %418, %417 : vector<128x128xi1>
      %cst_89 = arith.constant 1.600000e-01 : f32
      %420 = vector.broadcast %cst_89 : f32 to vector<128x128xf32>
      %421 = arith.cmpf olt, %397, %420 : vector<128x128xf32>
      %422 = arith.andi %419, %421 : vector<128x128xi1>
      %cst_90 = arith.constant 9.99999996E-13 : f32
      %423 = vector.broadcast %cst_90 : f32 to vector<128x128xf32>
      %424 = arith.maximumf %397, %423 : vector<128x128xf32>
      %cst_91 = arith.constant 1.000000e+00 : f32
      %425 = vector.broadcast %cst_91 : f32 to vector<128x128xf32>
      %426 = arith.select %422, %424, %425 : vector<128x128xi1>, vector<128x128xf32>
      %427 = math.rsqrt %426 : vector<128x128xf32>
      %428 = arith.mulf %426, %427 : vector<128x128xf32>
      %429 = vector.extract_strided_slice %14 {offsets = [0, 1], sizes = [128, 1], strides = [1, 1]} : vector<128x8xf32> to vector<128x1xf32>
      %cst_92 = arith.constant 1.951410e-02 : f32
      %430 = vector.broadcast %cst_92 : f32 to vector<128x1xf32>
      %431 = arith.subf %429, %430 : vector<128x1xf32>
      %cst_93 = arith.constant 1.000000e+00 : f32
      %432 = vector.broadcast %cst_93 : f32 to vector<128x1xf32>
      %433 = arith.divf %432, %431 : vector<128x1xf32>
      %434 = vector.extract_strided_slice %374 {offsets = [4, 0], sizes = [1, 128], strides = [1, 1]} : vector<8x128xf32> to vector<1x128xf32>
      %cst_94 = arith.constant 1.951410e-02 : f32
      %435 = vector.broadcast %cst_94 : f32 to vector<1x128xf32>
      %436 = arith.subf %434, %435 : vector<1x128xf32>
      %437 = vector.extract_strided_slice %374 {offsets = [5, 0], sizes = [1, 128], strides = [1, 1]} : vector<8x128xf32> to vector<1x128xf32>
      %438 = arith.mulf %437, %436 : vector<1x128xf32>
      %439 = vector.broadcast %438 : vector<1x128xf32> to vector<128x128xf32>
      %440 = arith.addf %428, %439 : vector<128x128xf32>
      %441 = vector.broadcast %438 : vector<1x128xf32> to vector<128x128xf32>
      %442 = arith.subf %428, %441 : vector<128x128xf32>
      %443 = math.absf %442 : vector<128x128xf32>
      %444 = vector.broadcast %431 : vector<128x1xf32> to vector<128x128xf32>
      %445 = arith.maximumf %444, %443 : vector<128x128xf32>
      %cst_95 = arith.constant 1.000000e+00 : f32
      %446 = vector.broadcast %cst_95 : f32 to vector<128x128xf32>
      %447 = arith.divf %446, %445 : vector<128x128xf32>
      %cst_96 = arith.constant 1.000000e+00 : f32
      %448 = vector.broadcast %cst_96 : f32 to vector<128x128xf32>
      %449 = arith.divf %448, %440 : vector<128x128xf32>
      %450 = arith.mulf %447, %447 : vector<128x128xf32>
      %451 = arith.mulf %449, %449 : vector<128x128xf32>
      %452 = arith.subf %447, %449 : vector<128x128xf32>
      %cst_97 = arith.constant 2.500000e-01 : f32
      %453 = vector.broadcast %cst_97 : f32 to vector<128x128xf32>
      %454 = arith.mulf %453, %428 : vector<128x128xf32>
      %455 = arith.subf %451, %450 : vector<128x128xf32>
      %456 = arith.mulf %454, %455 : vector<128x128xf32>
      %457 = arith.addf %452, %456 : vector<128x128xf32>
      %cst_98 = arith.constant 5.000000e-01 : f32
      %458 = vector.broadcast %cst_98 : f32 to vector<128x128xf32>
      %459 = arith.mulf %458, %427 : vector<128x128xf32>
      %460 = arith.mulf %445, %449 : vector<128x128xf32>
      %461 = math.log %460 : vector<128x128xf32>
      %462 = arith.mulf %459, %461 : vector<128x128xf32>
      %463 = arith.addf %457, %462 : vector<128x128xf32>
      %464 = arith.mulf %438, %438 : vector<1x128xf32>
      %cst_99 = arith.constant 2.500000e-01 : f32
      %465 = vector.broadcast %cst_99 : f32 to vector<1x128xf32>
      %466 = arith.mulf %465, %464 : vector<1x128xf32>
      %467 = vector.broadcast %466 : vector<1x128xf32> to vector<128x128xf32>
      %468 = arith.mulf %467, %427 : vector<128x128xf32>
      %469 = arith.subf %450, %451 : vector<128x128xf32>
      %470 = arith.mulf %468, %469 : vector<128x128xf32>
      %471 = arith.addf %463, %470 : vector<128x128xf32>
      %472 = vector.broadcast %438 : vector<1x128xf32> to vector<128x128xf32>
      %473 = arith.subf %472, %428 : vector<128x128xf32>
      %474 = vector.broadcast %431 : vector<128x1xf32> to vector<128x128xf32>
      %475 = arith.cmpf olt, %474, %473 : vector<128x128xf32>
      %476 = vector.broadcast %433 : vector<128x1xf32> to vector<128x128xf32>
      %477 = arith.subf %476, %447 : vector<128x128xf32>
      %cst_100 = arith.constant 2.000000e+00 : f32
      %478 = vector.broadcast %cst_100 : f32 to vector<128x128xf32>
      %479 = arith.mulf %478, %477 : vector<128x128xf32>
      %cst_101 = arith.constant 0.000000e+00 : f32
      %480 = vector.broadcast %cst_101 : f32 to vector<128x128xf32>
      %481 = arith.select %475, %479, %480 : vector<128x128xi1>, vector<128x128xf32>
      %482 = arith.addf %471, %481 : vector<128x128xf32>
      %483 = vector.broadcast %431 : vector<128x1xf32> to vector<128x128xf32>
      %484 = arith.cmpf olt, %483, %440 : vector<128x128xf32>
      %cst_102 = arith.constant 0.000000e+00 : f32
      %485 = vector.broadcast %cst_102 : f32 to vector<128x128xf32>
      %486 = arith.select %484, %482, %485 : vector<128x128xi1>, vector<128x128xf32>
      %cst_103 = arith.constant 0.000000e+00 : f32
      %487 = vector.broadcast %cst_103 : f32 to vector<128x128xf32>
      %488 = arith.select %422, %486, %487 : vector<128x128xi1>, vector<128x128xf32>
      %cst_104 = arith.constant 5.000000e-01 : f32
      %489 = vector.broadcast %cst_104 : f32 to vector<128x128xf32>
      %490 = arith.mulf %489, %488 : vector<128x128xf32>
      %491 = arith.addf %375, %490 : vector<128x128xf32>
      %c0_105 = arith.constant 0 : index
      %c0_106 = arith.constant 0 : index
      %492 = vector.load %arg8[%c0_105, %c0_106] : memref<128x128xf32, #tpu.memory_space<vmem>>, vector<128x128xf32>
      tpu.vector_store %arg8[%c0_105, %c0_106], %491 {strides = array<i32>} : memref<128x128xf32, #tpu.memory_space<vmem>>, vector<128x128xf32>,
    } else {
    }
    %c0_i32_3 = arith.constant 0 : i32
    %10 = arith.cmpi eq, %arg1, %c0_i32_3 : i32
    %11 = arith.extui %10 : i1 to i32
    %c0_i32_4 = arith.constant 0 : i32
    %12 = arith.cmpi ne, %11, %c0_i32_4 : i32
    scf.if %12 {
      %c0 = arith.constant 0 : index
      %c0_5 = arith.constant 0 : index
      %13 = vector.load %arg8[%c0, %c0_5] : memref<128x128xf32, #tpu.memory_space<vmem>>, vector<128x128xf32>
      %cst = arith.constant dense<0.000000e+00> : vector<128xf32>
      %14 = vector.multi_reduction <add>, %13, %cst [1] : vector<128x128xf32> to vector<128xf32>
      %15 = vector.shape_cast %14 : vector<128xf32> to vector<128x1xf32>
      %c0_6 = arith.constant 0 : index
      %c0_7 = arith.constant 0 : index
      %16 = vector.load %arg4[%c0_6, %c0_7] : memref<128x8xf32, #tpu.memory_space<vmem>>, vector<128x8xf32>
      %17 = vector.extract_strided_slice %16 {offsets = [0, 1], sizes = [128, 1], strides = [1, 1]} : vector<128x8xf32> to vector<128x1xf32>
      %cst_8 = arith.constant 1.951410e-02 : f32
      %18 = vector.broadcast %cst_8 : f32 to vector<128x1xf32>
      %19 = arith.subf %17, %18 : vector<128x1xf32>
      %20 = arith.mulf %15, %19 : vector<128x1xf32>
      %21 = vector.extract_strided_slice %16 {offsets = [0, 3], sizes = [128, 1], strides = [1, 1]} : vector<128x8xf32> to vector<128x1xf32>
      %22 = vector.extract_strided_slice %16 {offsets = [0, 4], sizes = [128, 1], strides = [1, 1]} : vector<128x8xf32> to vector<128x1xf32>
      %23 = vector.extract_strided_slice %16 {offsets = [0, 5], sizes = [128, 1], strides = [1, 1]} : vector<128x8xf32> to vector<128x1xf32>
      %24 = arith.mulf %21, %20 : vector<128x1xf32>
      %25 = arith.mulf %22, %20 : vector<128x1xf32>
      %26 = arith.mulf %25, %20 : vector<128x1xf32>
      %27 = arith.subf %24, %26 : vector<128x1xf32>
      %28 = arith.mulf %23, %20 : vector<128x1xf32>
      %29 = arith.mulf %28, %20 : vector<128x1xf32>
      %30 = arith.mulf %29, %20 : vector<128x1xf32>
      %31 = arith.addf %27, %30 : vector<128x1xf32>
      %cst_9 = arith.constant 1.000000e+00 : f32
      %32 = vector.broadcast %cst_9 : f32 to vector<128x1xf32>
      %33 = arith.divf %32, %19 : vector<128x1xf32>
      %34 = math.tanh %31 : vector<128x1xf32>
      %35 = arith.divf %34, %17 : vector<128x1xf32>
      %36 = arith.subf %33, %35 : vector<128x1xf32>
      %cst_10 = arith.constant 1.000000e+00 : f32
      %37 = vector.broadcast %cst_10 : f32 to vector<128x1xf32>
      %38 = arith.divf %37, %36 : vector<128x1xf32>
      %c0_11 = arith.constant 0 : index
      %c0_12 = arith.constant 0 : index
      %39 = vector.load %arg7[%c0_11, %c0_12] : memref<128x1xf32, #tpu.memory_space<vmem>>, vector<128x1xf32>
      tpu.vector_store %arg7[%c0_11, %c0_12], %38 {strides = array<i32>} : memref<128x1xf32, #tpu.memory_space<vmem>>, vector<128x1xf32>,
    } else {
    }
    return
  }
  func.func @transform_0(%arg0: i32, %arg1: i32, %arg2: memref<4xi32, #tpu.memory_space<smem>>) -> (i32, i32) {
    %c0_i32 = arith.constant 0 : i32
    %c0_i32_0 = arith.constant 0 : i32
    return %arg0, %c0_i32 : i32, i32
  }
  func.func @transform_1(%arg0: i32, %arg1: i32, %arg2: memref<4xi32, #tpu.memory_space<smem>>) -> (i32, i32) {
    %c0_i32 = arith.constant 0 : i32
    %c0_i32_0 = arith.constant 0 : i32
    return %arg0, %c0_i32 : i32, i32
  }
  func.func @transform_2(%arg0: i32, %arg1: i32, %arg2: memref<4xi32, #tpu.memory_space<smem>>) -> (i32, i32) {
    %c0_i32 = arith.constant 0 : i32
    %c0_i32_0 = arith.constant 0 : i32
    return %arg0, %c0_i32 : i32, i32
  }
  func.func @transform_3(%arg0: i32, %arg1: i32, %arg2: memref<4xi32, #tpu.memory_space<smem>>) -> (i32, i32) {
    %c0_i32 = arith.constant 0 : i32
    %c0_i32_0 = arith.constant 0 : i32
    return %c0_i32, %arg1 : i32, i32
  }
  func.func @transform_4(%arg0: i32, %arg1: i32, %arg2: memref<4xi32, #tpu.memory_space<smem>>) -> (i32, i32) {
    %c0_i32 = arith.constant 0 : i32
    %c0_i32_0 = arith.constant 0 : i32
    return %arg0, %c0_i32 : i32, i32
  }
}

</mosaic_0001>

<bundles_post_ra>
// kernel: tpu_custom_call.1
= control target key start
LH: loop header
LB: loop body
LE: loop exit
PB: predicated region body
PF: predicated region fallthrough
CT: control target
= control target key end

     0   :  { %s14663_s0 = inlined_call_operand.vmem [shape: s32[4], index: 0, kind: input, shape index: {}]   ;;  %s14664_s1 = inlined_call_operand.vmem [shape: f32[512,3], index: 1, kind: input, shape index: {}]   ;;  %s14665_s2 = inlined_call_operand.vmem [shape: f32[512,8], index: 2, kind: input, shape index: {}]   ;;  %s14666_s3 = inlined_call_operand.vmem [shape: f32[512,1], index: 3, kind: input, shape index: {}]   ;;  %s14667_s4 = inlined_call_operand.vmem [shape: f32[8,512], index: 4, kind: input, shape index: {}]   ;;  %s14668_s5 = inlined_call_operand.vmem [shape: f32[512,1], index: 5, kind: output, shape index: {}]  }
   0x1   :  { %s10_s20 = sshll.u32 %s14663_s0, 4  ;;  %s11_s20 = int_to_ptr.vmem [resolvable:$true] %s10_s20 }
   0x2   :  { %s6534_s21 = scalar_lea.vmem %s11_s20, 16  ;;  %p6539_p1 = scmp.lt.s32.totalorder %s11_s20, %s11_s20 }
   0x3   :  { %p6535_p0 = scmp.ne.s32.totalorder %s11_s20, %s6534_s21  ;;  %p6540_p2 = scmp.lt.s32.totalorder %s6534_s21, %s6534_s21 }
   0x5   :  { %p6541_p3 = por %p6540_p2, %p6539_p1 }
   0x7   :  { %p6542_p4 = pnand %p6541_p3, %p6535_p0 }
   0x9   :  { %6545 = shalt.err (!%p6542_p4)  }
   0xa   :  { %s6572_s22 = smov [#allocation4]  }
   0xb   :  { %13 = dma.vmem_to_smem %s11_s20, 16, %s6572_s22, [#allocation3] }
   0xc   :  { %6558 = dma.done.wait [#allocation3], 16 }
   0xd   :  { %6559 = vsyncadd [#allocation3], 4294967280 }
   0xe   :  { %15 = sfence }
   0xf   :  { %s6615_s23 = smov 0   ;;  %s6617_s24 = smov 0  }
  0x10   :  { %s6619_s25 = smov 0  }
  0x11 LB: > { %s33_s0 = sadd.s32 1, %s6566_s24  ;;  %p5766_p5 = scmp.ge.s32.totalorder %s6570_s25, 1  ;;  %s6570_s25 = sphi %s6619_s25, %s21_s25   ;;  %s6566_s24 = sphi %s6617_s24, %s17133_s24   ;;  %s6562_s23 = sphi %s6615_s23, %s17132_s23  }
  0x12   : > { %p35_p6 = scmp.ge.s32.totalorder %s33_s0, 4  ;;  %p215_p7 = scmp.lt.s32.totalorder %s6570_s25, 5 }
  0x14   : > { %s17135_s0 = smov (%p35_p6, %s33_s0), 0  ;;  %p216_p8 = pnand %p5766_p5, %p215_p7 }
  0x16   : > { %219 = sbr.rel (%p216_p8) target bundleno = 1847 (0x737), region = 36 }
  0x1b   : > { %s5767_s26 = sshll.u32 %s6562_s23, 4  ;;  %s307_s27 = sld [smem:[#allocation4 + %s6562_s23]]  ;;  %v6573_v0 = vmov 0.0  }
  0x1c   : > { %p6637_p9 = scmp.lt.s32.totalorder %s5767_s26, 63  ;;  %290 = vst [vmem:[#allocation2 + $0x30] sm:$0xff] %v6573_v0  ;;  %291 = vst [vmem:[#allocation2] sm:$0xff] %v6573_v0 }
  0x1d   : > { %292 = vst [vmem:[#allocation2 + $0x58] sm:$0xff] %v6573_v0  ;;  %293 = vst [vmem:[#allocation2 + $0x18] sm:$0xff] %v6573_v0 }
  0x1e   : > { %294 = vst [vmem:[#allocation2 + $0x50] sm:$0xff] %v6573_v0  ;;  %295 = vst [vmem:[#allocation2 + $0x68] sm:$0xff] %v6573_v0  ;;  %s17137_s26 = smov (!%p6637_p9, %s5767_s26), 63 }
  0x1f   : > { %296 = vst [vmem:[#allocation2 + $0x8] sm:$0xff] %v6573_v0  ;;  %297 = vst [vmem:[#allocation2 + $0x48] sm:$0xff] %v6573_v0  ;;  %s5768_s29 = sshll.u32 %s17137_s26, 3 }
  0x20   : > { %298 = vst [vmem:[#allocation2 + $0x40] sm:$0xff] %v6573_v0  ;;  %299 = vst [vmem:[#allocation2 + $0x20] sm:$0xff] %v6573_v0  ;;  %s6646_s7 = scalar_lea.vmem %s14664_s1, %s5768_s29  ;;  %s6651_s10 = scalar_lea.vmem %s14665_s2, %s5768_s29 }
  0x21   : > { %300 = vst [vmem:[#allocation2 + $0x10] sm:$0xff] %v6573_v0  ;;  %301 = vst [vmem:[#allocation2 + $0x38] sm:$0xff] %v6573_v0  ;;  %s6656_s13 = scalar_lea.vmem %s14666_s3, %s5768_s29  ;;  %s6661_s16 = scalar_lea.vmem %s14668_s5, %s5768_s29 }
  0x22   : > { %302 = vst [vmem:[#allocation2 + $0x60] sm:$0xff] %v6573_v0  ;;  %303 = vst [vmem:[#allocation2 + $0x70] sm:$0xff] %v6573_v0  ;;  %p5775_p10 = scmp.le.s32.totalorder %s307_s27, 0 }
  0x23   : > { %304 = vst [vmem:[#allocation2 + $0x78] sm:$0xff] %v6573_v0  ;;  %305 = vst [vmem:[#allocation2 + $0x28] sm:$0xff] %v6573_v0 }
  0x24   : > { %311 = sbr.rel (%p5775_p10) target bundleno = 1132 (0x46c), region = 44 }
  0x29   : > { %v314_v1 = vld [vmem:[%s6646_s7 + $0x10] sm:$0xff]  ;;  %v312_v2 = vld [vmem:[%s6646_s7] sm:$0xff]  ;;  %v14670_v3 = vmov 1   ;;  %v14672_v4 = vmov 0   ;;  %v315_v5 = vld [vmem:[%s6646_s7 + $0x18] sm:$0xff]  ;;  %v6576_v13 = vmov 2   ;;  %v14669_v28 = vlaneseq }
  0x2a   : > { %5850 = vset.pattern.permute.xlu0 %v14670_v3  ;;  %5849 = vset.pattern.permute.xlu1 %v14672_v4  ;;  %v317_v6 = vld [vmem:[%s6646_s7 + $0x28] sm:$0xff]  ;;  %v319_v7 = vld [vmem:[%s6646_s7 + $0x38] sm:$0xff]  ;;  %v316_v14 = vld [vmem:[%s6646_s7 + $0x20] sm:$0xff]  ;;  %s5776_s28 = sshll.u32 %s6562_s23, 7 }
  0x2b   : > { %391 = vperm.xlu1 %5849, %v314_v1   ;;  %480 = vperm.xlu0 %5850, %v312_v2   ;;  %v321_v8 = vld [vmem:[%s6646_s7 + $0x48] sm:$0xff]  ;;  %v323_v9 = vld [vmem:[%s6646_s7 + $0x58] sm:$0xff]  ;;  %v318_v15 = vld [vmem:[%s6646_s7 + $0x30] sm:$0xff]  ;;  %v6711_v31 = vshrl.u32 %v14669_v28, 7 }
  0x2c   : > { %v325_v10 = vld [vmem:[%s6646_s7 + $0x68] sm:$0xff]  ;;  %v327_v11 = vld [vmem:[%s6646_s7 + $0x78] sm:$0xff]  ;;  %v320_v16 = vld [vmem:[%s6646_s7 + $0x40] sm:$0xff] }
  0x2d   : > { %v313_v12 = vld [vmem:[%s6646_s7 + $0x8] sm:$0xff]  ;;  %v322_v17 = vld [vmem:[%s6646_s7 + $0x50] sm:$0xff]  ;;  %v324_v18 = vld [vmem:[%s6646_s7 + $0x60] sm:$0xff]  ;;  %15256 = vst [vmem:[#allocation6_spill] sm:$0xff] %v6711_v31  ;;  %v461_v34 = vsub.s32 0, %v6711_v31  ;;  %v545_v35 = vsub.s32 1, %v6711_v31 }
  0x2e   : > { %v326_v19 = vld [vmem:[%s6646_s7 + $0x70] sm:$0xff]  ;;  %v344_v20 = vld [vmem:[%s6656_s13] sm:$0xff]  ;;  %v347_v21 = vld [vmem:[%s6656_s13 + $0x18] sm:$0xff] }
  0x2f   : > { %396 = vperm.xlu1 %5849, %v315_v5   ;;  %492 = vperm.xlu0 %5850, %v315_v5   ;;  %v349_v22 = vld [vmem:[%s6656_s13 + $0x28] sm:$0xff]  ;;  %v6689_v24 = vld [vmem:[%s6656_s13 + $0x38] sm:$0xff]  ;;  %v6692_v25 = vld [vmem:[%s6656_s13 + $0x10] sm:$0xff]  ;;  %vm884_vm1 = vcmp.ge.f32.partialorder %v347_v21, 0.0  ;;  %vm881_vm3 = vcmp.ge.f32.partialorder %v344_v20, 0.0 }
  0x30   : > { %v345_v23 = vld [vmem:[%s6656_s13 + $0x8] sm:$0xff]  ;;  %v6700_v27 = vld [vmem:[%s6656_s13 + $0x20] sm:$0xff]  ;;  %v6705_v29 = vld [vmem:[%s6656_s13 + $0x58] sm:$0xff]  ;;  %vm886_vm2 = vcmp.ge.f32.partialorder %v349_v22, 0.0  ;;  %v901_v45 = vsel %vm884_vm1, 1, %v14672_v4  ;;  %v6759_v47 = vsel %vm881_vm3, 1, %v14672_v4 }
  0x31   : > { %v6697_v26 = vld [vmem:[%s6656_s13 + $0x48] sm:$0xff]  ;;  %v6708_v30 = vld [vmem:[%s6656_s13 + $0x30] sm:$0xff]  ;;  %v6719_v33 = vld [vmem:[%s6656_s13 + $0x40] sm:$0xff]  ;;  %vm882_vm0 = vcmp.ge.f32.partialorder %v345_v23, 0.0  ;;  %v6756_v46 = vsel %vm886_vm2, 1, %v14672_v4  ;;  %vm888_vm4 = vcmp.ge.f32.partialorder %v6689_v24, 0.0 }
  0x32   : > { %v6716_v32 = vld [vmem:[%s6656_s13 + $0x68] sm:$0xff]  ;;  %v6725_v36 = vld [vmem:[%s6656_s13 + $0x78] sm:$0xff]  ;;  %v6730_v37 = vld [vmem:[%s14667_s4] sm:$0xff]  ;;  %v899_v44 = vsel %vm882_vm0, 1, %v14672_v4  ;;  %vm883_vm5 = vcmp.ge.f32.partialorder %v6692_v25, 0.0  ;;  %vm890_vm6 = vcmp.ge.f32.partialorder %v6697_v26, 0.0 }
  0x33   : > { %406 = vperm.xlu1 %5849, %v317_v6   ;;  %500 = vperm.xlu0 %5850, %v317_v6   ;;  %v6736_v38 = vld [vmem:[%s14667_s4 + $0x8] sm:$0xff]  ;;  %v6741_v39 = vld [vmem:[%s14667_s4 + $0x10] sm:$0xff]  ;;  %v6747_v41 = vld [vmem:[%s14667_s4 + $0x18] sm:$0xff]  ;;  %v6764_v49 = vrot.slane %v6730_v37, %v461_v34  ;;  %v6770_v51 = vrot.slane %v6730_v37, %v545_v35  ;;  %vm885_vm7 = vcmp.ge.f32.partialorder %v6700_v27, 0.0  ;;  %vm892_vm8 = vcmp.ge.f32.partialorder %v6705_v29, 0.0 }
  0x34   : > { %v329_v40 = vld [vmem:[%s6651_s10 + $0x8] sm:$0xff]  ;;  %v6750_v42 = vld [vmem:[%s6656_s13 + $0x50] sm:$0xff]  ;;  %v332_v43 = vld [vmem:[%s6651_s10 + $0x20] sm:$0xff]  ;;  %v6767_v50 = vrot.slane %v6736_v38, %v461_v34  ;;  %v6776_v54 = vrot.slane %v6741_v39, %v461_v34  ;;  %v6779_v55 = vrot.slane %v6747_v41, %v461_v34  ;;  %v6785_v57 = vrot.slane %v6736_v38, %v545_v35 }
  0x35   : > { %v334_v48 = vld [vmem:[%s6651_s10 + $0x30] sm:$0xff]  ;;  %15257 = vst [vmem:[#allocation7_spill] sm:$0xff] %v6770_v51  ;;  %v6772_v52 = vadd.f32 -0.0195141, %v329_v40  ;;  %v328_v53 = vld [vmem:[%s6651_s10] sm:$0xff]  ;;  %v6793_v61 = vrot.slane %v6741_v39, %v545_v35  ;;  %vm887_vm9 = vcmp.ge.f32.partialorder %v6708_v30, 0.0 }
  0x36   : > { %v6789_v59 = vadd.f32 -0.0195141, %v332_v43  ;;  %v336_v60 = vld [vmem:[%s6651_s10 + $0x40] sm:$0xff]  ;;  %v6800_v63 = vadd.f32 -0.0195141, %v334_v48  ;;  %v330_v0 = vld [vmem:[%s6651_s10 + $0x10] sm:$0xff] }
  0x37   : > { %416 = vperm.xlu1 %5849, %v319_v7   ;;  %508 = vperm.xlu0 %5850, %v319_v7   ;;  %v6796_v62 = vld [vmem:[%s6656_s13 + $0x60] sm:$0xff]  ;;  %5858 = vrcp.f32 %v6772_v52  ;;  %vm894_vm10 = vcmp.ge.f32.partialorder %v6716_v32, 0.0  ;;  %vm889_vm11 = vcmp.ge.f32.partialorder %v6719_v33, 0.0  ;;  %vm896_vm12 = vcmp.ge.f32.partialorder %v6725_v36, 0.0 }
  0x38   : > { %5860 = vrcp.f32 %v6789_v59  ;;  %vm891_vm13 = vcmp.ge.f32.partialorder %v6750_v42, 0.0  ;;  %v6901_v43 = vsel %vm889_vm11, 1, %v14672_v4  ;;  %vm893_vm14 = vcmp.ge.f32.partialorder %v6796_v62, 0.0 }
  0x39   : > { %5862 = vrcp.f32 %v6800_v63 }
  0x3b   : > { %426 = vperm.xlu1 %5849, %v321_v8   ;;  %516 = vperm.xlu0 %5850, %v321_v8  }
  0x3f   : > { %436 = vperm.xlu1 %5849, %v323_v9   ;;  %524 = vperm.xlu0 %5850, %v323_v9  }
  0x43   : > { %446 = vperm.xlu1 %5849, %v325_v10   ;;  %532 = vperm.xlu0 %5850, %v325_v10  }
  0x47   : > { %456 = vperm.xlu1 %5849, %v327_v11   ;;  %540 = vperm.xlu0 %5850, %v327_v11  }
  0x4b   : > { %5851 = vset.pattern.permute.xlu1 %v14670_v3  ;;  %5853 = vset.pattern.permute.xlu0 %v6576_v13 }
  0x4c   : > { %484 = vperm.xlu1 %5851, %v313_v12   ;;  %568 = vperm.xlu0 %5853, %v313_v12  }
  0x50   : > { %488 = vperm.xlu1 %5851, %v314_v1   ;;  %580 = vperm.xlu0 %5853, %v316_v14  }
  0x54   : > { %496 = vperm.xlu1 %5851, %v316_v14   ;;  %588 = vperm.xlu0 %5853, %v318_v15  }
  0x58   : > { %504 = vperm.xlu1 %5851, %v318_v15   ;;  %596 = vperm.xlu0 %5853, %v320_v16  }
  0x5c   : > { %512 = vperm.xlu1 %5851, %v320_v16   ;;  %604 = vperm.xlu0 %5853, %v322_v17  }
  0x60   : > { %520 = vperm.xlu1 %5851, %v322_v17   ;;  %612 = vperm.xlu0 %5853, %v324_v18  }
  0x64   : > { %528 = vperm.xlu1 %5851, %v324_v18   ;;  %620 = vperm.xlu0 %5853, %v326_v19  }
  0x68   : > { %536 = vperm.xlu1 %5851, %v326_v19   ;;  %5854 = vset.pattern.permute.xlu0 %v14672_v4 }
  0x69   : > { %381 = vperm.xlu0 %5854, %v312_v2  }
  0x6c   : > { %5852 = vset.pattern.permute.xlu1 %v6576_v13  ;;  %v6833_v13 = vld [vmem:[%s6656_s13 + $0x70] sm:$0xff] }
  0x6d   : > { %564 = vperm.xlu1 %5852, %v312_v2   ;;  %386 = vperm.xlu0 %5854, %v313_v12   ;;  %v338_v2 = vld [vmem:[%s6651_s10 + $0x50] sm:$0xff]  ;;  %v340_v12 = vld [vmem:[%s6651_s10 + $0x60] sm:$0xff]  ;;  %vm895_vm15 = vcmp.ge.f32.partialorder %v6833_v13, 0.0 }
  0x71   : > { %572 = vperm.xlu1 %5852, %v314_v1   ;;  %401 = vperm.xlu0 %5854, %v316_v14   ;;  %v6806_v1 = vadd.f32 -0.0195141, %v328_v53  ;;  %v6838_v14 = vsel %vm883_vm5, 1, %v14672_v4 }
  0x73   : > { %5864 = vrcp.f32 %v6806_v1 }
  0x75   : > { %576 = vperm.xlu1 %5852, %v315_v5   ;;  %411 = vperm.xlu0 %5854, %v318_v15   ;;  %v6812_v5 = vadd.f32 -0.0195141, %v336_v60  ;;  %v6843_v15 = vsel %vm890_vm6, 1, %v14672_v4  ;;  %v343_v60 = vld [vmem:[%s6651_s10 + $0x78] sm:$0xff] }
  0x77   : > { %5866 = vrcp.f32 %v6812_v5 }
  0x79   : > { %584 = vperm.xlu1 %5852, %v317_v6   ;;  %421 = vperm.xlu0 %5854, %v320_v16   ;;  %v331_v6 = vld [vmem:[%s6651_s10 + $0x18] sm:$0xff]  ;;  %v6846_v16 = vadd.f32 -0.0195141, %v338_v2 }
  0x7d   : > { %592 = vperm.xlu1 %5852, %v319_v7   ;;  %431 = vperm.xlu0 %5854, %v322_v17   ;;  %v6816_v7 = vrot.slane %v6747_v41, %v545_v35  ;;  %v333_v17 = vld [vmem:[%s6651_s10 + $0x28] sm:$0xff]  ;;  %v339_v35 = vld [vmem:[%s6651_s10 + $0x58] sm:$0xff] }
  0x7e   : > { %v6922_v53 = vadd.f32 -0.0195141, %v339_v35  ;;  %v6953_v35 = vadd.f32 -0.0195141, %v343_v60 }
  0x80   : > { %15260 = vst [vmem:[#allocation10_spill] sm:$0xff] %v6922_v53  ;;  %15268 = vst [vmem:[#allocation18_spill] sm:$0xff] %v6953_v35 }
  0x81   : > { %600 = vperm.xlu1 %5852, %v321_v8   ;;  %441 = vperm.xlu0 %5854, %v324_v18   ;;  %v6852_v18 = vsel %vm885_vm7, 1, %v14672_v4 }
  0x85   : > { %608 = vperm.xlu1 %5852, %v323_v9   ;;  %451 = vperm.xlu0 %5854, %v326_v19   ;;  %v6857_v19 = vsel %vm892_vm8, 1, %v14672_v4 }
  0x89   : > { %616 = vperm.xlu1 %5852, %v325_v10   ;;  %783 = vperm.xlu0 %5854, %v344_v20   ;;  %v6826_v10 = vsel %vm888_vm4, 1, %v14672_v4  ;;  %v6860_v20 = vadd.f32 -0.0195141, %v331_v6 }
  0x8d   : > { %624 = vperm.xlu1 %5852, %v327_v11   ;;  %798 = vperm.xlu0 %5854, %v347_v21   ;;  %v6829_v11 = vadd.f32 -0.0195141, %v330_v0  ;;  %v342_v21 = vld [vmem:[%s6651_s10 + $0x70] sm:$0xff] }
  0x8e   : > { %v6883_v34 = vadd.f32 -0.0195141, %v342_v21 }
  0x8f   : > { %5868 = vrcp.f32 %v6829_v11 }
  0x90   : > { %5870 = vrcp.f32 %v6846_v16 }
  0x91   : > { %5855 = vset.pattern.permute.xlu1 %v14672_v4  ;;  %808 = vperm.xlu0 %5854, %v349_v22   ;;  %v6866_v22 = vadd.f32 -0.0195141, %v340_v12  ;;  %5872 = vrcp.f32 %v6860_v20 }
  0x92   : > { %788 = vperm.xlu1 %5855, %v345_v23   ;;  %v335_v23 = vld [vmem:[%s6651_s10 + $0x38] sm:$0xff] }
  0x93   : > { %5874 = vrcp.f32 %v6866_v22  ;;  %v6897_v40 = vadd.f32 -0.0195141, %v335_v23 }
  0x95   : > { %818 = vperm.xlu0 %5854, %v6689_v24  }
  0x96   : > { %793 = vperm.xlu1 %5855, %v6692_v25  }
  0x99   : > { %828 = vperm.xlu0 %5854, %v6697_v26   ;;  %v6877_v26 = vadd.f32 -0.0195141, %v333_v17 }
  0x9a   : > { %803 = vperm.xlu1 %5855, %v6700_v27   ;;  %v337_v27 = vld [vmem:[%s6651_s10 + $0x48] sm:$0xff] }
  0x9b   : > { %5876 = vrcp.f32 %v6877_v26 }
  0x9c   : > { %5878 = vrcp.f32 %v6883_v34 }
  0x9d   : > { %838 = vperm.xlu0 %5854, %v6705_v29   ;;  %v629_v29 = vsub.s32 2, %v6711_v31  ;;  %5880 = vrcp.f32 %v6897_v40 }
  0x9e   : > { %813 = vperm.xlu1 %5855, %v6708_v30   ;;  %v6907_v30 = vadd.f32 -0.0195141, %v337_v27 }
  0x9f   : > { %v6926_v0 = vrot.slane %v6730_v37, %v629_v29  ;;  %v6936_v2 = vrot.slane %v6736_v38, %v629_v29  ;;  %v6939_v6 = vrot.slane %v6741_v39, %v629_v29 }
  0xa0   : > { %15259 = vst [vmem:[#allocation9_spill] sm:$0xff] %v6907_v30  ;;  %5882 = vrcp.f32 %v6907_v30 }
  0xa1   : > { %848 = vperm.xlu0 %5854, %v6716_v32   ;;  %v341_v32 = vld [vmem:[%s6651_s10 + $0x68] sm:$0xff]  ;;  %15261 = vst [vmem:[#allocation11_spill] sm:$0xff] %v6926_v0  ;;  %15264 = vst [vmem:[#allocation14_spill] sm:$0xff] %v6936_v2  ;;  %5884 = vrcp.f32 %v6922_v53 }
  0xa2   : > { %823 = vperm.xlu1 %5855, %v6719_v33   ;;  %v6889_v33 = vsel %vm887_vm9, 1, %v14672_v4  ;;  %15265 = vst [vmem:[#allocation15_spill] sm:$0xff] %v6939_v6  ;;  %v6942_v12 = vadd.f32 -0.0195141, %v341_v32 }
  0xa4   : > { %15266 = vst [vmem:[#allocation16_spill] sm:$0xff] %v6942_v12  ;;  %5886 = vrcp.f32 %v6942_v12 }
  0xa5   : > { %858 = vperm.xlu0 %5854, %v6725_v36   ;;  %v6894_v36 = vsel %vm894_vm10, 1, %v14672_v4  ;;  %5888 = vrcp.f32 %v6953_v35 }
  0xa6   : > { %v6781_v56 = vpop.permute.xlu1 %391  ;;  %833 = vperm.xlu1 %5855, %v6750_v42   ;;  %v6787_v58 = vpop.permute.xlu0 %480 }
  0xa7   : > { %15258 = vst [vmem:[#allocation8_spill] sm:$0xff] %v6787_v58  ;;  %v6933_v42 = vpop.eup %5858  ;;  %v465_v21 = vsub.f32 %v6781_v56, %v6764_v49  ;;  %v1967_v23 = vsub.f32 %v6781_v56, %v6767_v50  ;;  %v2921_v27 = vsub.f32 %v6781_v56, %v6776_v54  ;;  %v1985_v35 = vsub.f32 %v6787_v58, %v6785_v57 }
  0xa8   : > { %15263 = vst [vmem:[#allocation13_spill] sm:$0xff] %v6933_v42  ;;  %v6944_v17 = vpop.eup %5860 }
  0xa9   : > { %918 = vperm.xlu0 %5854, %v899_v44   ;;  %v6904_v44 = vsel %vm896_vm12, 1, %v14672_v4  ;;  %15267 = vst [vmem:[#allocation17_spill] sm:$0xff] %v6944_v17  ;;  %v6955_v28 = vpop.eup %5862 }
  0xaa   : > { %v6818_v8 = vpop.permute.xlu1 %396  ;;  %843 = vperm.xlu1 %5855, %v6796_v62   ;;  %v6821_v9 = vpop.permute.xlu0 %492  ;;  %15269 = vst [vmem:[#allocation19_spill] sm:$0xff] %v6955_v28 }
  0xab   : > { %v6976_v60 = vpop.eup %5864  ;;  %v466_v28 = vsub.f32 %v6818_v8, %v6764_v49  ;;  %v3896_v0 = vsub.f32 %v6821_v9, %v6816_v7 }
  0xac   : > { %15272 = vst [vmem:[#allocation21_spill] sm:$0xff] %v6976_v60 }
  0xad   : > { %924 = vperm.xlu0 %5854, %v901_v45   ;;  %v7064_v2 = vmul.f32 %v466_v28, %v466_v28 }
  0xae   : > { %v6869_v24 = vpop.permute.xlu1 %406  ;;  %853 = vperm.xlu1 %5855, %v6833_v13   ;;  %v6872_v25 = vpop.permute.xlu0 %500 }
  0xaf   : > { %v6991_v13 = vpop.eup %5866  ;;  %15286 = vst [vmem:[#allocation35_spill] sm:$0xff] %v7064_v2  ;;  %v1970_v28 = vsub.f32 %v6869_v24, %v6767_v50 }
  0xb0   : > { %15276 = vst [vmem:[#allocation25_spill] sm:$0xff] %v6991_v13 }
  0xb1   : > { %930 = vperm.xlu0 %5854, %v6756_v46   ;;  %v6918_v46 = vsel %vm891_vm13, 1, %v14672_v4  ;;  %v6963_v4 = vrot.slane %v6747_v41, %v629_v29 }
  0xb2   : > { %v6910_v45 = vpop.permute.xlu1 %416  ;;  %915 = vperm.xlu1 %5855, %v6759_v47   ;;  %v6913_v48 = vpop.permute.xlu0 %508  ;;  %v6931_v47 = vsub.s32 6, %v6711_v31  ;;  %v15271_v31 = vmov 0  }
  0xb3   : > { %15270 = vst [vmem:[#allocation20_spill] sm:$0xff] %v6963_v4  ;;  %v6968_v42 = vsel %vm893_vm14, 1, %v15271_v31  ;;  %v7055_v4 = vmul.f32 %v1985_v35, %v1985_v35  ;;  %v1972_v2 = vsub.f32 %v6910_v45, %v6767_v50 }
  0xb4   : > { %15262 = vst [vmem:[#allocation12_spill] sm:$0xff] %v6931_v47  ;;  %v6985_v62 = vrot.slane %v6736_v38, %v6931_v47  ;;  %v6989_v29 = vrot.slane %v6741_v39, %v6931_v47  ;;  %v7003_v38 = vpop.eup %5868  ;;  %v7007_v39 = vmul.f32 %v1967_v23, %v1967_v23  ;;  %v3876_v23 = vsub.f32 %v6818_v8, %v6779_v55 }
  0xb5   : > { %936 = vperm.xlu0 %5854, %v6826_v10   ;;  %v6973_v10 = vsel %vm895_vm15, 1, %v15271_v31  ;;  %v3875_v31 = vsub.f32 %v6781_v56, %v6779_v55  ;;  %15278 = vst [vmem:[#allocation27_spill] sm:$0xff] %v7003_v38  ;;  %v3893_v56 = vsub.f32 %v6787_v58, %v6816_v7  ;;  %v7014_v13 = vpop.eup %5870 }
  0xb6   : > { %v6957_v3 = vpop.permute.xlu1 %426  ;;  %921 = vperm.xlu1 %5855, %v6838_v14   ;;  %v6960_v32 = vpop.permute.xlu0 %516  ;;  %v6981_v14 = vrot.slane %v6730_v37, %v6931_v47  ;;  %15274 = vst [vmem:[#allocation23_spill] sm:$0xff] %v6985_v62  ;;  %15275 = vst [vmem:[#allocation24_spill] sm:$0xff] %v6989_v29  ;;  %v2939_v37 = vsub.f32 %v6787_v58, %v6793_v61  ;;  %v7005_v62 = vmul.f32 %v465_v21, %v465_v21 }
  0xb7   : > { %v7009_v29 = vmul.f32 %v2921_v27, %v2921_v27  ;;  %15279 = vst [vmem:[#allocation28_spill] sm:$0xff] %v7014_v13  ;;  %v2922_v21 = vsub.f32 %v6818_v8, %v6776_v54  ;;  %v2942_v13 = vsub.f32 %v6821_v9, %v6793_v61  ;;  %v7053_v38 = vmul.f32 %v3875_v31, %v3875_v31 }
  0xb8   : > { %15273 = vst [vmem:[#allocation22_spill] sm:$0xff] %v6981_v14  ;;  %v7001_v14 = vrot.slane %v6747_v41, %v6931_v47  ;;  %v1968_v41 = vsub.f32 %v6818_v8, %v6767_v50  ;;  %v550_v47 = vsub.f32 %v6821_v9, %v6770_v51  ;;  %v7070_v60 = vmul.f32 %v3876_v23, %v3876_v23 }
  0xb9   : > { %942 = vperm.xlu0 %5854, %v6843_v15   ;;  %v7027_v15 = vpop.eup %5872 }
  0xba   : > { %15277 = vst [vmem:[#allocation26_spill] sm:$0xff] %v7001_v14  ;;  %v7024_v27 = vpop.permute.xlu1 %436  ;;  %927 = vperm.xlu1 %5855, %v6852_v18   ;;  %v525_v58 = vpop.permute.xlu0 %524  ;;  %15280 = vst [vmem:[#allocation29_spill] sm:$0xff] %v7027_v15  ;;  %v1988_v14 = vsub.f32 %v6821_v9, %v6785_v57  ;;  %v7057_v9 = vmul.f32 %v2939_v37, %v2939_v37  ;;  %v7066_v30 = vmul.f32 %v1968_v41, %v1968_v41 }
  0xbb   : > { %v7037_v8 = vpop.eup %5874  ;;  %v7040_v12 = vsub.f32 %v525_v58, %v6770_v51  ;;  %v7043_v18 = vsub.f32 %v525_v58, %v6785_v57  ;;  %v7046_v15 = vsub.f32 %v525_v58, %v6793_v61  ;;  %v7049_v17 = vsub.f32 %v525_v58, %v6816_v7  ;;  %15289 = vst [vmem:[#allocation38_spill] sm:$0xff] %v7070_v60 }
  0xbc   : > { %15281 = vst [vmem:[#allocation30_spill] sm:$0xff] %v7037_v8  ;;  %v7051_v53 = vpop.eup %5876  ;;  %15283 = vst [vmem:[#allocation32_spill] sm:$0xff] %v7057_v9  ;;  %v7059_v8 = vmul.f32 %v3893_v56, %v3893_v56  ;;  %v7068_v58 = vmul.f32 %v2922_v21, %v2922_v21  ;;  %v2924_v56 = vsub.f32 %v6869_v24, %v6776_v54 }
  0xbd   : > { %15282 = vst [vmem:[#allocation31_spill] sm:$0xff] %v7051_v53  ;;  %948 = vperm.xlu0 %5854, %v6857_v19   ;;  %v7062_v6 = vpop.eup %5878  ;;  %15287 = vst [vmem:[#allocation36_spill] sm:$0xff] %v7066_v30  ;;  %v468_v19 = vsub.f32 %v6869_v24, %v6764_v49  ;;  %v3878_v41 = vsub.f32 %v6869_v24, %v6779_v55  ;;  %v7087_v23 = vmul.f32 %v550_v47, %v550_v47 }
  0xbe   : > { %15284 = vst [vmem:[#allocation33_spill] sm:$0xff] %v7059_v8  ;;  %15285 = vst [vmem:[#allocation34_spill] sm:$0xff] %v7062_v6  ;;  %v7072_v31 = vpop.permute.xlu1 %446  ;;  %933 = vperm.xlu1 %5855, %v6889_v33   ;;  %v533_v35 = vpop.permute.xlu0 %532  ;;  %v7089_v33 = vmul.f32 %v1988_v14, %v1988_v14  ;;  %v7091_v6 = vmul.f32 %v2942_v13, %v2942_v13  ;;  %v552_v60 = vsub.f32 %v6872_v25, %v6770_v51 }
  0xbf   : > { %15288 = vst [vmem:[#allocation37_spill] sm:$0xff] %v7068_v58  ;;  %v7075_v37 = vpop.eup %5880  ;;  %15292 = vst [vmem:[#allocation41_spill] sm:$0xff] %v7087_v23  ;;  %v1990_v58 = vsub.f32 %v6872_v25, %v6785_v57  ;;  %v2944_v24 = vsub.f32 %v6872_v25, %v6793_v61  ;;  %v3898_v47 = vsub.f32 %v6872_v25, %v6816_v7 }
  0xc0   : > { %15290 = vst [vmem:[#allocation39_spill] sm:$0xff] %v7075_v37  ;;  %v7085_v21 = vpop.eup %5882  ;;  %15293 = vst [vmem:[#allocation42_spill] sm:$0xff] %v7089_v33  ;;  %v7093_v37 = vmul.f32 %v3896_v0, %v3896_v0  ;;  %v7107_v14 = vsub.f32 %v533_v35, %v6770_v51  ;;  %v7110_v0 = vsub.f32 %v533_v35, %v6785_v57 }
  0xc1   : > { %15291 = vst [vmem:[#allocation40_spill] sm:$0xff] %v7085_v21  ;;  %15294 = vst [vmem:[#allocation43_spill] sm:$0xff] %v7091_v6  ;;  %v7095_v53 = vpop.eup %5884  ;;  %954 = vperm.xlu0 %5854, %v6894_v36   ;;  %v7113_v13 = vsub.f32 %v533_v35, %v6793_v61  ;;  %v7123_v36 = vmul.f32 %v468_v19, %v468_v19  ;;  %v7125_v6 = vmul.f32 %v1970_v28, %v1970_v28 }
  0xc2   : > { %15295 = vst [vmem:[#allocation44_spill] sm:$0xff] %v7093_v37  ;;  %15296 = vst [vmem:[#allocation45_spill] sm:$0xff] %v7095_v53  ;;  %v7116_v53 = vsub.f32 %v533_v35, %v6816_v7  ;;  %v7118_v21 = vpop.permute.xlu1 %456  ;;  %939 = vperm.xlu1 %5855, %v6901_v43   ;;  %v541_v37 = vpop.permute.xlu0 %540  ;;  %v7127_v33 = vmul.f32 %v2924_v56, %v2924_v56  ;;  %v7129_v30 = vmul.f32 %v3878_v41, %v3878_v41 }
  0xc3   : > { %v7121_v25 = vpop.eup %5886  ;;  %15298 = vst [vmem:[#allocation47_spill] sm:$0xff] %v7123_v36  ;;  %15299 = vst [vmem:[#allocation48_spill] sm:$0xff] %v7125_v6  ;;  %v470_v35 = vsub.f32 %v6910_v45, %v6764_v49  ;;  %v2926_v43 = vsub.f32 %v6910_v45, %v6776_v54  ;;  %v3880_v19 = vsub.f32 %v6910_v45, %v6779_v55 }
  0xc4   : > { %15297 = vst [vmem:[#allocation46_spill] sm:$0xff] %v7121_v25  ;;  %15300 = vst [vmem:[#allocation49_spill] sm:$0xff] %v7127_v33  ;;  %v7131_v23 = vpop.eup %5888  ;;  %v7141_v28 = vmul.f32 %v552_v60, %v552_v60  ;;  %v7143_v56 = vmul.f32 %v1990_v58, %v1990_v58  ;;  %v7145_v41 = vmul.f32 %v2944_v24, %v2944_v24 }
  0xc5   : > { %15301 = vst [vmem:[#allocation50_spill] sm:$0xff] %v7129_v30  ;;  %15302 = vst [vmem:[#allocation51_spill] sm:$0xff] %v7131_v23  ;;  %v7147_v25 = vmul.f32 %v3898_v47, %v3898_v47  ;;  %960 = vperm.xlu0 %5854, %v6904_v44   ;;  %v554_v23 = vsub.f32 %v6913_v48, %v6770_v51  ;;  %v1992_v30 = vsub.f32 %v6913_v48, %v6785_v57 }
  0xc6   : > { %15303 = vst [vmem:[#allocation52_spill] sm:$0xff] %v7141_v28  ;;  %15304 = vst [vmem:[#allocation53_spill] sm:$0xff] %v7143_v56  ;;  %v2946_v33 = vsub.f32 %v6913_v48, %v6793_v61  ;;  %v3900_v45 = vsub.f32 %v6913_v48, %v6816_v7  ;;  %945 = vperm.xlu1 %5855, %v6918_v46   ;;  %v7160_v60 = vsub.f32 %v541_v37, %v6770_v51 }
  0xc7   : > { %15305 = vst [vmem:[#allocation54_spill] sm:$0xff] %v7145_v41  ;;  %15306 = vst [vmem:[#allocation55_spill] sm:$0xff] %v7147_v25  ;;  %v7163_v58 = vsub.f32 %v541_v37, %v6785_v57  ;;  %v7166_v44 = vsub.f32 %v541_v37, %v6793_v61  ;;  %v7169_v24 = vsub.f32 %v541_v37, %v6816_v7  ;;  %v7171_v47 = vpop.permute.xlu1 %484  ;;  %v7173_v25 = vpop.permute.xlu0 %568 }
  0xc8   : > { %15307 = vst [vmem:[#allocation56_spill] sm:$0xff] %v7173_v25  ;;  %v7175_v41 = vmul.f32 %v470_v35, %v470_v35  ;;  %v7177_v48 = vmul.f32 %v1972_v2, %v1972_v2  ;;  %v7179_v46 = vmul.f32 %v2926_v43, %v2926_v43  ;;  %v7181_v56 = vmul.f32 %v3880_v19, %v3880_v19 }
  0xc9   : > { %v474_v6 = vsub.f32 %v7024_v27, %v6764_v49  ;;  %v1976_v28 = vsub.f32 %v7024_v27, %v6767_v50  ;;  %v2930_v37 = vsub.f32 %v7024_v27, %v6776_v54  ;;  %v3884_v25 = vsub.f32 %v7024_v27, %v6779_v55 }
  0xca   : > { %15308 = vst [vmem:[#allocation57_spill] sm:$0xff] %v7175_v41  ;;  %15309 = vst [vmem:[#allocation58_spill] sm:$0xff] %v7177_v48  ;;  %v15312_v35 = vmov 1   ;;  %v7192_v2 = vmul.f32 %v554_v23, %v554_v23  ;;  %v7194_v43 = vmul.f32 %v1992_v30, %v1992_v30  ;;  %v7196_v19 = vmul.f32 %v2946_v33, %v2946_v33  ;;  %951 = vperm.xlu1 %5855, %v6968_v42  }
  0xcb   : > { %15310 = vst [vmem:[#allocation59_spill] sm:$0xff] %v7179_v46  ;;  %15311 = vst [vmem:[#allocation60_spill] sm:$0xff] %v7181_v56  ;;  %5857 = vset.pattern.permute.xlu0 %v15312_v35  ;;  %v7198_v56 = vmul.f32 %v3900_v45, %v3900_v45  ;;  %v472_v46 = vsub.f32 %v6957_v3, %v6764_v49  ;;  %v1974_v48 = vsub.f32 %v6957_v3, %v6767_v50  ;;  %v7210_v30 = vpop.permute.xlu1 %488  ;;  %v7212_v33 = vpop.permute.xlu0 %580 }
  0xcc   : > { %15313 = vst [vmem:[#allocation61_spill] sm:$0xff] %v7192_v2  ;;  %15314 = vst [vmem:[#allocation62_spill] sm:$0xff] %v7194_v43  ;;  %v2928_v27 = vsub.f32 %v6957_v3, %v6776_v54  ;;  %v3882_v23 = vsub.f32 %v6957_v3, %v6779_v55  ;;  %1240 = vperm.xlu0 %5857, %v6772_v52   ;;  %v556_v42 = vsub.f32 %v6960_v32, %v6770_v51 }
  0xcd   : > { %15315 = vst [vmem:[#allocation63_spill] sm:$0xff] %v7196_v19  ;;  %15316 = vst [vmem:[#allocation64_spill] sm:$0xff] %v7198_v56  ;;  %v1994_v45 = vsub.f32 %v6960_v32, %v6785_v57  ;;  %v2948_v56 = vsub.f32 %v6960_v32, %v6793_v61  ;;  %v3902_v19 = vsub.f32 %v6960_v32, %v6816_v7 }
  0xce   : > { %15317 = vst [vmem:[#allocation65_spill] sm:$0xff] %v7212_v33  ;;  %v658_v43 = vmul.f32 %v474_v6, %v474_v6  ;;  %v2032_v3 = vmul.f32 %v1976_v28, %v1976_v28  ;;  %v2986_v2 = vmul.f32 %v2930_v37, %v2930_v37  ;;  %v3940_v52 = vmul.f32 %v3884_v25, %v3884_v25 }
  0xcf   : > { %v674_v41 = vmul.f32 %v7040_v12, %v7040_v12  ;;  %v2048_v33 = vmul.f32 %v7043_v18, %v7043_v18  ;;  %v3002_v36 = vmul.f32 %v7046_v15, %v7046_v15  ;;  %v3956_v8 = vmul.f32 %v7049_v17, %v7049_v17  ;;  %957 = vperm.xlu1 %5855, %v6973_v10   ;;  %v497_v12 = vpop.permute.xlu1 %496  ;;  %v7240_v18 = vpop.permute.xlu0 %588 }
  0xd0   : > { %v7231_v9 = vmul.f32 %v472_v46, %v472_v46  ;;  %v7233_v6 = vmul.f32 %v1974_v48, %v1974_v48  ;;  %v7235_v32 = vmul.f32 %v2928_v27, %v2928_v27  ;;  %v7237_v25 = vmul.f32 %v3882_v23, %v3882_v23  ;;  %1255 = vperm.xlu0 %5857, %v6789_v59  }
  0xd1   : > { %15319 = vst [vmem:[#allocation67_spill] sm:$0xff] %v7240_v18  ;;  %v7242_v28 = vmul.f32 %v556_v42, %v556_v42  ;;  %v7244_v15 = vmul.f32 %v1994_v45, %v1994_v45  ;;  %v7246_v17 = vmul.f32 %v2948_v56, %v2948_v56  ;;  %v7248_v10 = vmul.f32 %v3902_v19, %v3902_v19 }
  0xd2   : > { %15318 = vst [vmem:[#allocation66_spill] sm:$0xff] %v7237_v25  ;;  %v476_v48 = vsub.f32 %v7072_v31, %v6764_v49  ;;  %v1978_v46 = vsub.f32 %v7072_v31, %v6767_v50  ;;  %v2932_v59 = vsub.f32 %v7072_v31, %v6776_v54  ;;  %v3886_v37 = vsub.f32 %v7072_v31, %v6779_v55  ;;  %v15362_v25 = vld [vmem:[#allocation11_spill] sm:$0xff] }
  0xd3   : > { %15320 = vst [vmem:[#allocation68_spill] sm:$0xff] %v7248_v10  ;;  %v7258_v27 = vadd.f32 %v674_v41, %v658_v43  ;;  %v7260_v23 = vadd.f32 %v2048_v33, %v2032_v3  ;;  %v7262_v56 = vadd.f32 %v3002_v36, %v2986_v2  ;;  %v7264_v19 = vadd.f32 %v3956_v8, %v3940_v52  ;;  %v505_v36 = vpop.permute.xlu1 %504  ;;  %v7280_v41 = vpop.permute.xlu0 %596 }
  0xd4   : > { %5856 = vset.pattern.permute.xlu1 %v15312_v35  ;;  %v7268_v42 = vsub.f32 %v497_v12, %v6770_v51  ;;  %v7271_v45 = vsub.f32 %v497_v12, %v6785_v57  ;;  %v7274_v18 = vsub.f32 %v497_v12, %v6793_v61  ;;  %v7277_v31 = vsub.f32 %v497_v12, %v6816_v7 }
  0xd5   : > { %15321 = vst [vmem:[#allocation69_spill] sm:$0xff] %v7258_v27  ;;  %15322 = vst [vmem:[#allocation70_spill] sm:$0xff] %v7260_v23  ;;  %1265 = vperm.xlu0 %5857, %v6800_v63   ;;  %v478_v8 = vsub.f32 %v7118_v21, %v6764_v49  ;;  %v1980_v35 = vsub.f32 %v7118_v21, %v6767_v50  ;;  %v2934_v2 = vsub.f32 %v7118_v21, %v6776_v54 }
  0xd6   : > { %15323 = vst [vmem:[#allocation71_spill] sm:$0xff] %v7262_v56  ;;  %15324 = vst [vmem:[#allocation72_spill] sm:$0xff] %v7264_v19  ;;  %v3888_v43 = vsub.f32 %v7118_v21, %v6779_v55  ;;  %1235 = vperm.xlu1 %5856, %v6806_v1   ;;  %v660_v33 = vmul.f32 %v476_v48, %v476_v48  ;;  %v2034_v3 = vmul.f32 %v1978_v46, %v1978_v46 }
  0xd7   : > { %15325 = vst [vmem:[#allocation73_spill] sm:$0xff] %v7280_v41  ;;  %v676_v63 = vmul.f32 %v7107_v14, %v7107_v14  ;;  %v2050_v52 = vmul.f32 %v7110_v0, %v7110_v0  ;;  %v2988_v12 = vmul.f32 %v2932_v59, %v2932_v59  ;;  %v3942_v41 = vmul.f32 %v3886_v37, %v3886_v37  ;;  %v513_v0 = vpop.permute.xlu1 %512  ;;  %v7312_v46 = vpop.permute.xlu0 %604 }
  0xd8   : > { %v3004_v19 = vmul.f32 %v7113_v13, %v7113_v13  ;;  %v3958_v56 = vmul.f32 %v7116_v53, %v7116_v53  ;;  %v7300_v21 = vsub.f32 %v505_v36, %v6770_v51  ;;  %v7303_v1 = vsub.f32 %v505_v36, %v6785_v57  ;;  %15326 = vst [vmem:[#allocation74_spill] sm:$0xff] %v7312_v46 }
  0xd9   : > { %v7306_v48 = vsub.f32 %v505_v36, %v6793_v61  ;;  %v7309_v14 = vsub.f32 %v505_v36, %v6816_v7  ;;  %1275 = vperm.xlu0 %5857, %v6812_v5   ;;  %v662_v13 = vmul.f32 %v478_v8, %v478_v8  ;;  %v2036_v59 = vmul.f32 %v1980_v35, %v1980_v35 }
  0xda   : > { %v7314_v53 = vmul.f32 %v2934_v2, %v2934_v2  ;;  %v7316_v37 = vmul.f32 %v3888_v43, %v3888_v43  ;;  %1245 = vperm.xlu1 %5856, %v6829_v11   ;;  %v7319_v23 = vadd.f32 %v676_v63, %v660_v33  ;;  %v7321_v27 = vadd.f32 %v2050_v52, %v2034_v3 }
  0xdb   : > { %v549_v36 = vsub.f32 %v7210_v30, %v6770_v51  ;;  %v1987_v5 = vsub.f32 %v7210_v30, %v6785_v57  ;;  %v7327_v10 = vadd.f32 %v3004_v19, %v2988_v12  ;;  %v7329_v8 = vadd.f32 %v3958_v56, %v3942_v41  ;;  %v521_v19 = vpop.permute.xlu1 %520  ;;  %v7340_v63 = vpop.permute.xlu0 %612 }
  0xdc   : > { %15327 = vst [vmem:[#allocation75_spill] sm:$0xff] %v7314_v53  ;;  %15328 = vst [vmem:[#allocation76_spill] sm:$0xff] %v7316_v37  ;;  %v2941_v35 = vsub.f32 %v7210_v30, %v6793_v61  ;;  %v3895_v11 = vsub.f32 %v7210_v30, %v6816_v7  ;;  %v555_v2 = vsub.f32 %v513_v0, %v6770_v51 }
  0xdd   : > { %15329 = vst [vmem:[#allocation77_spill] sm:$0xff] %v7319_v23  ;;  %15330 = vst [vmem:[#allocation78_spill] sm:$0xff] %v7321_v27  ;;  %v1993_v43 = vsub.f32 %v513_v0, %v6785_v57  ;;  %v2947_v33 = vsub.f32 %v513_v0, %v6793_v61  ;;  %v3901_v3 = vsub.f32 %v513_v0, %v6816_v7  ;;  %1285 = vperm.xlu0 %5857, %v6846_v16   ;;  %v15350_v23 = vld [vmem:[#allocation20_spill] sm:$0xff] }
  0xde   : > { %15331 = vst [vmem:[#allocation79_spill] sm:$0xff] %v7327_v10  ;;  %15332 = vst [vmem:[#allocation80_spill] sm:$0xff] %v7329_v8  ;;  %v548_v56 = vsub.f32 %v7171_v47, %v6770_v51  ;;  %v1986_v41 = vsub.f32 %v7171_v47, %v6785_v57  ;;  %v2940_v30 = vsub.f32 %v7171_v47, %v6793_v61  ;;  %1250 = vperm.xlu1 %5856, %v6860_v20  }
  0xdf   : > { %15333 = vst [vmem:[#allocation81_spill] sm:$0xff] %v7340_v63  ;;  %v3894_v52 = vsub.f32 %v7171_v47, %v6816_v7  ;;  %v678_v16 = vmul.f32 %v7160_v60, %v7160_v60  ;;  %v2052_v12 = vmul.f32 %v7163_v58, %v7163_v58  ;;  %v665_v0 = vmul.f32 %v549_v36, %v549_v36  ;;  %v529_v36 = vpop.permute.xlu1 %528 }
  0xe0   : > { %v2039_v63 = vmul.f32 %v1987_v5, %v1987_v5  ;;  %v7357_v46 = vmul.f32 %v7166_v44, %v7166_v44  ;;  %v7361_v8 = vmul.f32 %v7169_v24, %v7169_v24  ;;  %v2993_v10 = vmul.f32 %v2941_v35, %v2941_v35  ;;  %v7368_v5 = vpop.permute.xlu0 %620 }
  0xe1   : > { %v3947_v47 = vmul.f32 %v3895_v11, %v3895_v11  ;;  %v557_v20 = vsub.f32 %v521_v19, %v6770_v51  ;;  %v1995_v27 = vsub.f32 %v521_v19, %v6785_v57  ;;  %v2949_v60 = vsub.f32 %v521_v19, %v6793_v61  ;;  %1295 = vperm.xlu0 %5857, %v6866_v22  }
  0xe2   : > { %15334 = vst [vmem:[#allocation82_spill] sm:$0xff] %v7357_v46  ;;  %15335 = vst [vmem:[#allocation83_spill] sm:$0xff] %v7361_v8  ;;  %v3903_v58 = vsub.f32 %v521_v19, %v6816_v7  ;;  %v7370_v44 = vmul.f32 %v548_v56, %v548_v56  ;;  %v7372_v37 = vmul.f32 %v1986_v41, %v1986_v41  ;;  %1260 = vperm.xlu1 %5856, %v6877_v26  }
  0xe3   : > { %15336 = vst [vmem:[#allocation84_spill] sm:$0xff] %v7368_v5  ;;  %v7374_v24 = vmul.f32 %v2940_v30, %v2940_v30  ;;  %v7376_v35 = vmul.f32 %v3894_v52, %v3894_v52  ;;  %v7379_v11 = vadd.f32 %v678_v16, %v662_v13  ;;  %v7381_v8 = vadd.f32 %v2052_v12, %v2036_v59 }
  0xe4   : > { %v7384_v19 = vadd.f32 %v665_v0, %v7005_v62  ;;  %v7387_v22 = vadd.f32 %v2039_v63, %v7007_v39  ;;  %v7390_v56 = vadd.f32 %v2993_v10, %v7009_v29  ;;  %v7393_v41 = vadd.f32 %v3947_v47, %v7053_v38  ;;  %v537_v38 = vpop.permute.xlu1 %536  ;;  %v15341_v47 = vld [vmem:[#allocation9_spill] sm:$0xff] }
  0xe5   : > { %15337 = vst [vmem:[#allocation85_spill] sm:$0xff] %v7379_v11  ;;  %15338 = vst [vmem:[#allocation86_spill] sm:$0xff] %v7381_v8  ;;  %v7397_v30 = vmul.f32 %v7268_v42, %v7268_v42  ;;  %v7401_v26 = vmul.f32 %v7271_v45, %v7271_v45  ;;  %v559_v62 = vsub.f32 %v529_v36, %v6770_v51  ;;  %1305 = vperm.xlu0 %5857, %v6883_v34   ;;  %v7425_v34 = vpop.permute.xlu0 %381  ;;  %v15349_v11 = vld [vmem:[#allocation15_spill] sm:$0xff] }
  0xe6   : > { %v1997_v13 = vsub.f32 %v529_v36, %v6785_v57  ;;  %v2951_v39 = vsub.f32 %v529_v36, %v6793_v61  ;;  %v3905_v29 = vsub.f32 %v529_v36, %v6816_v7  ;;  %v7410_v10 = vmul.f32 %v7274_v18, %v7274_v18  ;;  %1270 = vperm.xlu1 %5856, %v6897_v40  }
  0xe7   : > { %v7414_v42 = vmul.f32 %v7277_v31, %v7277_v31  ;;  %v7418_v45 = vmul.f32 %v7300_v21, %v7300_v21  ;;  %v7422_v59 = vmul.f32 %v7303_v1, %v7303_v1  ;;  %15339 = vst [vmem:[#allocation87_spill] sm:$0xff] %v7425_v34  ;;  %v7429_v18 = vmul.f32 %v7306_v48, %v7306_v48 }
  0xe8   : > { %v7433_v31 = vmul.f32 %v7309_v14, %v7309_v14  ;;  %v7435_v63 = vmul.f32 %v555_v2, %v555_v2  ;;  %v7437_v21 = vmul.f32 %v1993_v43, %v1993_v43  ;;  %v7439_v52 = vmul.f32 %v2947_v33, %v2947_v33  ;;  %v15340_v2 = vld [vmem:[#allocation21_spill] sm:$0xff] }
  0xe9   : > { %v7441_v1 = vmul.f32 %v3901_v3, %v3901_v3  ;;  %v7443_v16 = vmul.f32 %v557_v20, %v557_v20  ;;  %v7445_v40 = vmul.f32 %v1995_v27, %v1995_v27  ;;  %v561_v12 = vsub.f32 %v537_v38, %v6770_v51  ;;  %1705 = vperm.xlu0 %5857, %v15340_v2  }
  0xea   : > { %v1999_v48 = vsub.f32 %v537_v38, %v6785_v57  ;;  %v2953_v0 = vsub.f32 %v537_v38, %v6793_v61  ;;  %v3907_v14 = vsub.f32 %v537_v38, %v6816_v7  ;;  %v7452_v43 = vmul.f32 %v2949_v60, %v2949_v60  ;;  %1280 = vperm.xlu1 %5856, %v15341_v47   ;;  %v7461_v57 = vpop.permute.xlu1 %564  ;;  %v387_v61 = vpop.permute.xlu0 %386 }
  0xeb   : > { %v1965_v33 = vsub.f32 %v7425_v34, %v6767_v50  ;;  %v2919_v3 = vsub.f32 %v7425_v34, %v6776_v54  ;;  %v3873_v27 = vsub.f32 %v7425_v34, %v6779_v55  ;;  %15342 = vst [vmem:[#allocation21_spill] sm:$0xff] %v7461_v57  ;;  %v7463_v20 = vmul.f32 %v3903_v58, %v3903_v58  ;;  %v15348_v34 = vld [vmem:[#allocation14_spill] sm:$0xff] }
  0xec   : > { %v7465_v7 = vmul.f32 %v559_v62, %v559_v62  ;;  %v7467_v60 = vmul.f32 %v1997_v13, %v1997_v13  ;;  %v7469_v36 = vmul.f32 %v2951_v39, %v2951_v39  ;;  %v7471_v38 = vmul.f32 %v3905_v29, %v3905_v29  ;;  %v15351_v13 = vld [vmem:[#allocation27_spill] sm:$0xff] }
  0xed   : > { %v2021_v2 = vmul.f32 %v1965_v33, %v1965_v33  ;;  %v2975_v5 = vmul.f32 %v2919_v3, %v2919_v3  ;;  %v3929_v51 = vmul.f32 %v3873_v27, %v3873_v27  ;;  %v7473_v8 = vmul.f32 %v561_v12, %v561_v12  ;;  %1715 = vperm.xlu0 %5857, %v15351_v13   ;;  %v15354_v3 = vld [vmem:[#allocation32_spill] sm:$0xff]  ;;  %v15355_v27 = vld [vmem:[#allocation10_spill] sm:$0xff] }
  0xee   : > { %15343 = vst [vmem:[#allocation9_spill] sm:$0xff] %v7465_v7  ;;  %15344 = vst [vmem:[#allocation88_spill] sm:$0xff] %v7467_v60  ;;  %v2005_v47 = vsub.f32 %v7461_v57, %v15348_v34  ;;  %v2959_v58 = vsub.f32 %v7461_v57, %v15349_v11  ;;  %v3913_v62 = vsub.f32 %v7461_v57, %v15350_v23  ;;  %1290 = vperm.xlu1 %5856, %v15355_v27   ;;  %v573_v46 = vpop.permute.xlu1 %572  ;;  %v402_v53 = vpop.permute.xlu0 %401  ;;  %v15361_v27 = vld [vmem:[#allocation16_spill] sm:$0xff] }
  0xef   : > { %15345 = vst [vmem:[#allocation89_spill] sm:$0xff] %v7469_v36  ;;  %15346 = vst [vmem:[#allocation90_spill] sm:$0xff] %v7471_v38  ;;  %v7482_v39 = vmul.f32 %v1999_v48, %v1999_v48  ;;  %v7484_v29 = vmul.f32 %v2953_v0, %v2953_v0  ;;  %v2053_v33 = vadd.f32 %v7055_v4, %v2021_v2 }
  0xf0   : > { %15347 = vst [vmem:[#allocation91_spill] sm:$0xff] %v7473_v8  ;;  %v3007_v12 = vadd.f32 %v15354_v3, %v2975_v5  ;;  %v15356_v8 = vld [vmem:[#allocation33_spill] sm:$0xff]  ;;  %v2069_v36 = vmul.f32 %v2005_v47, %v2005_v47  ;;  %v3023_v60 = vmul.f32 %v2959_v58, %v2959_v58  ;;  %v3977_v7 = vmul.f32 %v3913_v62, %v3913_v62 }
  0xf1   : > { %15352 = vst [vmem:[#allocation14_spill] sm:$0xff] %v7482_v39  ;;  %15353 = vst [vmem:[#allocation15_spill] sm:$0xff] %v7484_v29  ;;  %v3961_v38 = vadd.f32 %v15356_v8, %v3929_v51  ;;  %v464_v57 = vsub.f32 %v387_v61, %v6764_v49  ;;  %v1966_v48 = vsub.f32 %v387_v61, %v6767_v50  ;;  %v15360_v51 = vld [vmem:[#allocation17_spill] sm:$0xff] }
  0xf2   : > { %v2920_v0 = vsub.f32 %v387_v61, %v6776_v54  ;;  %v3874_v13 = vsub.f32 %v387_v61, %v6779_v55  ;;  %v7494_v4 = vmul.f32 %v3907_v14, %v3907_v14  ;;  %v7496_v5 = vadd.f32 %v2069_v36, %v2053_v33  ;;  %1725 = vperm.xlu0 %5857, %v15360_v51   ;;  %v577_v29 = vpop.permute.xlu1 %576  ;;  %v412_v39 = vpop.permute.xlu0 %411  ;;  %v15363_v51 = vld [vmem:[#allocation19_spill] sm:$0xff] }
  0xf3   : > { %v7498_v2 = vadd.f32 %v3023_v60, %v3007_v12  ;;  %v7500_v3 = vadd.f32 %v3977_v7, %v3961_v38  ;;  %v648_v8 = vmul.f32 %v464_v57, %v464_v57  ;;  %v2022_v47 = vmul.f32 %v1966_v48, %v1966_v48  ;;  %1300 = vperm.xlu1 %5856, %v15361_v27  }
  0xf4   : > { %15357 = vst [vmem:[#allocation20_spill] sm:$0xff] %v7496_v5  ;;  %v2976_v58 = vmul.f32 %v2920_v0, %v2920_v0  ;;  %v3930_v62 = vmul.f32 %v3874_v13, %v3874_v13  ;;  %v633_v61 = vsub.f32 %v573_v46, %v15362_v25  ;;  %v2007_v14 = vsub.f32 %v573_v46, %v15348_v34  ;;  %v15373_v5 = vld [vmem:[#allocation25_spill] sm:$0xff] }
  0xf5   : > { %15358 = vst [vmem:[#allocation27_spill] sm:$0xff] %v7498_v2  ;;  %15359 = vst [vmem:[#allocation32_spill] sm:$0xff] %v7500_v3  ;;  %v2961_v36 = vsub.f32 %v573_v46, %v15349_v11  ;;  %v3915_v60 = vsub.f32 %v573_v46, %v15350_v23  ;;  %v7509_v7 = vadd.f32 %v7370_v44, %v648_v8  ;;  %v15370_v3 = vld [vmem:[#allocation41_spill] sm:$0xff] }
  0xf6   : > { %v7512_v57 = vadd.f32 %v7372_v37, %v2022_v47  ;;  %v7515_v38 = vadd.f32 %v7374_v24, %v2976_v58  ;;  %v7518_v33 = vadd.f32 %v7376_v35, %v3930_v62  ;;  %v697_v12 = vmul.f32 %v633_v61, %v633_v61  ;;  %1735 = vperm.xlu0 %5857, %v15363_v51   ;;  %v15364_v47 = vld [vmem:[#allocation18_spill] sm:$0xff]  ;;  %v585_v24 = vpop.permute.xlu1 %584  ;;  %v7526_v58 = vpop.permute.xlu0 %421 }
  0xf7   : > { %v2071_v48 = vmul.f32 %v2007_v14, %v2007_v14  ;;  %v3025_v0 = vmul.f32 %v2961_v36, %v2961_v36  ;;  %v3979_v13 = vmul.f32 %v3915_v60, %v3915_v60  ;;  %v467_v46 = vsub.f32 %v402_v53, %v6764_v49  ;;  %1310 = vperm.xlu1 %5856, %v15364_v47   ;;  %v15369_v47 = vld [vmem:[#allocation35_spill] sm:$0xff] }
  0xf8   : > { %v1969_v44 = vsub.f32 %v402_v53, %v6767_v50  ;;  %v2923_v8 = vsub.f32 %v402_v53, %v6776_v54  ;;  %v3877_v37 = vsub.f32 %v402_v53, %v6779_v55  ;;  %v7529_v35 = vadd.f32 %v697_v12, %v7384_v19  ;;  %v15371_v12 = vld [vmem:[#allocation36_spill] sm:$0xff] }
  0xf9   : > { %v7532_v62 = vadd.f32 %v2071_v48, %v7387_v22  ;;  %v7535_v27 = vadd.f32 %v3025_v0, %v7390_v56  ;;  %v7538_v61 = vadd.f32 %v3979_v13, %v7393_v41  ;;  %v651_v14 = vmul.f32 %v467_v46, %v467_v46  ;;  %v15372_v22 = vld [vmem:[#allocation42_spill] sm:$0xff] }
  0xfa   : > { %15365 = vst [vmem:[#allocation10_spill] sm:$0xff] %v7529_v35  ;;  %v2025_v36 = vmul.f32 %v1969_v44, %v1969_v44  ;;  %v2979_v53 = vmul.f32 %v2923_v8, %v2923_v8  ;;  %v3933_v60 = vmul.f32 %v3877_v37, %v3877_v37  ;;  %v634_v51 = vsub.f32 %v577_v29, %v15362_v25  ;;  %v7560_v46 = vpop.permute.xlu1 %592  ;;  %v7562_v44 = vpop.permute.xlu0 %431  ;;  %v15376_v37 = vld [vmem:[#allocation37_spill] sm:$0xff] }
  0xfb   : > { %15366 = vst [vmem:[#allocation33_spill] sm:$0xff] %v7532_v62  ;;  %15367 = vst [vmem:[#allocation17_spill] sm:$0xff] %v7535_v27  ;;  %v682_v2 = vadd.f32 %v15370_v3, %v15369_v47  ;;  %v2008_v19 = vsub.f32 %v577_v29, %v15348_v34  ;;  %v2056_v48 = vadd.f32 %v15372_v22, %v15371_v12  ;;  %1745 = vperm.xlu0 %5857, %v15373_v5   ;;  %v15375_v3 = vld [vmem:[#allocation13_spill] sm:$0xff] }
  0xfc   : > { %15368 = vst [vmem:[#allocation16_spill] sm:$0xff] %v7538_v61  ;;  %v7548_v56 = vadd.f32 %v7397_v30, %v651_v14  ;;  %v7551_v41 = vadd.f32 %v7401_v26, %v2025_v36  ;;  %v7554_v0 = vadd.f32 %v7410_v10, %v2979_v53  ;;  %v7557_v13 = vadd.f32 %v7414_v42, %v3933_v60  ;;  %v15377_v14 = vld [vmem:[#allocation43_spill] sm:$0xff]  ;;  %v15378_v10 = vld [vmem:[#allocation38_spill] sm:$0xff]  ;;  %v15379_v53 = vld [vmem:[#allocation44_spill] sm:$0xff] }
  0xfd   : > { %1710 = vperm.xlu1 %5856, %v15375_v3   ;;  %v698_v8 = vmul.f32 %v634_v51, %v634_v51  ;;  %v2072_v5 = vmul.f32 %v2008_v19, %v2008_v19  ;;  %v2962_v30 = vsub.f32 %v577_v29, %v15349_v11  ;;  %v3010_v26 = vadd.f32 %v15377_v14, %v15376_v37  ;;  %v15380_v3 = vld [vmem:[#allocation28_spill] sm:$0xff]  ;;  %v15381_v27 = vld [vmem:[#allocation29_spill] sm:$0xff] }
  0xfe   : > { %15374 = vst [vmem:[#allocation11_spill] sm:$0xff] %v7557_v13  ;;  %v3916_v36 = vsub.f32 %v577_v29, %v15350_v23  ;;  %v3964_v47 = vadd.f32 %v15379_v53, %v15378_v10  ;;  %v469_v42 = vsub.f32 %v412_v39, %v6764_v49  ;;  %v1971_v60 = vsub.f32 %v412_v39, %v6767_v50  ;;  %v7580_v10 = vpop.permute.xlu1 %600  ;;  %v7582_v53 = vpop.permute.xlu0 %441  ;;  %v15389_v13 = vld [vmem:[#allocation30_spill] sm:$0xff] }
  0xff   : > { %v7572_v12 = vadd.f32 %v698_v8, %v682_v2  ;;  %v7574_v22 = vadd.f32 %v2072_v5, %v2056_v48  ;;  %v3026_v51 = vmul.f32 %v2962_v30, %v2962_v30  ;;  %v2925_v19 = vsub.f32 %v412_v39, %v6776_v54  ;;  %1755 = vperm.xlu0 %5857, %v15380_v3   ;;  %v15382_v5 = vld [vmem:[#allocation47_spill] sm:$0xff]  ;;  %v15383_v30 = vld [vmem:[#allocation52_spill] sm:$0xff] }
 0x100   : > { %v3980_v61 = vmul.f32 %v3916_v36, %v3916_v36  ;;  %v653_v37 = vmul.f32 %v469_v42, %v469_v42  ;;  %v2027_v14 = vmul.f32 %v1971_v60, %v1971_v60  ;;  %v3879_v29 = vsub.f32 %v412_v39, %v6779_v55 }
 0x101   : > { %1720 = vperm.xlu1 %5856, %v15381_v27   ;;  %v7584_v2 = vadd.f32 %v3026_v51, %v3010_v26  ;;  %v2981_v48 = vmul.f32 %v2925_v19, %v2925_v19  ;;  %v636_v8 = vsub.f32 %v585_v24, %v15362_v25  ;;  %v684_v62 = vadd.f32 %v15383_v30, %v15382_v5  ;;  %v15387_v51 = vld [vmem:[#allocation48_spill] sm:$0xff]  ;;  %v15388_v19 = vld [vmem:[#allocation53_spill] sm:$0xff]  ;;  %v15395_v30 = vld [vmem:[#allocation55_spill] sm:$0xff] }
 0x102   : > { %v7589_v3 = vadd.f32 %v3980_v61, %v3964_v47  ;;  %v7592_v36 = vadd.f32 %v7418_v45, %v653_v37  ;;  %v7595_v39 = vadd.f32 %v7422_v59, %v2027_v14  ;;  %v3935_v27 = vmul.f32 %v3879_v29, %v3879_v29  ;;  %v15391_v47 = vld [vmem:[#allocation49_spill] sm:$0xff]  ;;  %v15392_v59 = vld [vmem:[#allocation54_spill] sm:$0xff]  ;;  %v7612_v29 = vpop.permute.xlu1 %608 }
 0x103   : > { %v7598_v42 = vadd.f32 %v7429_v18, %v2981_v48  ;;  %v700_v26 = vmul.f32 %v636_v8, %v636_v8  ;;  %v2010_v60 = vsub.f32 %v585_v24, %v15348_v34  ;;  %v2058_v35 = vadd.f32 %v15388_v19, %v15387_v51  ;;  %1765 = vperm.xlu0 %5857, %v15389_v13   ;;  %v15393_v18 = vld [vmem:[#allocation31_spill] sm:$0xff]  ;;  %v7614_v48 = vpop.permute.xlu0 %451  ;;  %v15394_v13 = vld [vmem:[#allocation50_spill] sm:$0xff] }
 0x104   : > { %15384 = vst [vmem:[#allocation19_spill] sm:$0xff] %v7592_v36  ;;  %15385 = vst [vmem:[#allocation18_spill] sm:$0xff] %v7595_v39  ;;  %v7605_v61 = vadd.f32 %v7433_v31, %v3935_v27  ;;  %v2964_v45 = vsub.f32 %v585_v24, %v15349_v11  ;;  %v3012_v37 = vadd.f32 %v15392_v59, %v15391_v47  ;;  %v15400_v39 = vld [vmem:[#allocation61_spill] sm:$0xff] }
 0x105   : > { %15386 = vst [vmem:[#allocation35_spill] sm:$0xff] %v7598_v42  ;;  %v3918_v14 = vsub.f32 %v585_v24, %v15350_v23  ;;  %1730 = vperm.xlu1 %5856, %v15393_v18   ;;  %v7616_v8 = vadd.f32 %v700_v26, %v684_v62  ;;  %v2074_v5 = vmul.f32 %v2010_v60, %v2010_v60  ;;  %v15396_v60 = vld [vmem:[#allocation34_spill] sm:$0xff] }
 0x106   : > { %15390 = vst [vmem:[#allocation41_spill] sm:$0xff] %v7605_v61  ;;  %v3966_v31 = vadd.f32 %v15395_v30, %v15394_v13  ;;  %v471_v27 = vsub.f32 %v7526_v58, %v6764_v49  ;;  %v3028_v51 = vmul.f32 %v2964_v45, %v2964_v45  ;;  %v1973_v24 = vsub.f32 %v7526_v58, %v6767_v50  ;;  %v15397_v61 = vld [vmem:[#allocation39_spill] sm:$0xff]  ;;  %v7638_v42 = vpop.permute.xlu1 %616 }
 0x107   : > { %v3982_v19 = vmul.f32 %v3918_v14, %v3918_v14  ;;  %v2927_v47 = vsub.f32 %v7526_v58, %v6776_v54  ;;  %v7626_v59 = vadd.f32 %v2074_v5, %v2058_v35  ;;  %v3881_v62 = vsub.f32 %v7526_v58, %v6779_v55  ;;  %1775 = vperm.xlu0 %5857, %v15396_v60   ;;  %v7640_v35 = vpop.permute.xlu0 %783 }
 0x108   : > { %v655_v18 = vmul.f32 %v471_v27, %v471_v27  ;;  %v638_v26 = vsub.f32 %v7560_v46, %v15362_v25  ;;  %v7633_v13 = vadd.f32 %v3028_v51, %v3012_v37  ;;  %v2029_v14 = vmul.f32 %v1973_v24, %v1973_v24  ;;  %15398 = vst [vmem:[#allocation36_spill] sm:$0xff] %v7640_v35  ;;  %v15399_v27 = vld [vmem:[#allocation57_spill] sm:$0xff]  ;;  %v15402_v51 = vld [vmem:[#allocation58_spill] sm:$0xff] }
 0x109   : > { %v7635_v45 = vadd.f32 %v3982_v19, %v3966_v31  ;;  %v2983_v30 = vmul.f32 %v2927_v47, %v2927_v47  ;;  %1740 = vperm.xlu1 %5856, %v15397_v61   ;;  %v3937_v58 = vmul.f32 %v3881_v62, %v3881_v62  ;;  %v686_v36 = vadd.f32 %v15400_v39, %v15399_v27  ;;  %v15403_v19 = vld [vmem:[#allocation62_spill] sm:$0xff] }
 0x10a   : > { %v7643_v5 = vadd.f32 %v7435_v63, %v655_v18  ;;  %v702_v60 = vmul.f32 %v638_v26, %v638_v26  ;;  %v7648_v37 = vadd.f32 %v7437_v21, %v2029_v14  ;;  %v2012_v61 = vsub.f32 %v7560_v46, %v15348_v34  ;;  %v15406_v18 = vld [vmem:[#allocation59_spill] sm:$0xff]  ;;  %v15408_v14 = vld [vmem:[#allocation60_spill] sm:$0xff] }
 0x10b   : > { %v7651_v31 = vadd.f32 %v7439_v52, %v2983_v30  ;;  %v2060_v24 = vadd.f32 %v15403_v19, %v15402_v51  ;;  %v7658_v63 = vadd.f32 %v7441_v1, %v3937_v58  ;;  %v2966_v39 = vsub.f32 %v7560_v46, %v15349_v11  ;;  %v15407_v21 = vld [vmem:[#allocation63_spill] sm:$0xff]  ;;  %v15409_v30 = vld [vmem:[#allocation64_spill] sm:$0xff]  ;;  %v7675_v58 = vpop.permute.xlu0 %798 }
 0x10c   : > { %v7660_v47 = vadd.f32 %v702_v60, %v686_v36  ;;  %v3014_v62 = vadd.f32 %v15407_v21, %v15406_v18  ;;  %v2076_v26 = vmul.f32 %v2012_v61, %v2012_v61  ;;  %v3920_v52 = vsub.f32 %v7560_v46, %v15350_v23  ;;  %v15410_v1 = vld [vmem:[#allocation40_spill] sm:$0xff]  ;;  %v7673_v36 = vpop.permute.xlu1 %624 }
 0x10d   : > { %15401 = vst [vmem:[#allocation42_spill] sm:$0xff] %v7651_v31  ;;  %15404 = vst [vmem:[#allocation25_spill] sm:$0xff] %v7658_v63  ;;  %v3968_v27 = vadd.f32 %v15409_v30, %v15408_v14  ;;  %v473_v51 = vsub.f32 %v7562_v44, %v6764_v49  ;;  %1750 = vperm.xlu1 %5856, %v15410_v1   ;;  %v3030_v60 = vmul.f32 %v2966_v39, %v2966_v39 }
 0x10e   : > { %15405 = vst [vmem:[#allocation13_spill] sm:$0xff] %v7660_v47  ;;  %v1975_v19 = vsub.f32 %v7562_v44, %v6767_v50  ;;  %v2929_v61 = vsub.f32 %v7562_v44, %v6776_v54  ;;  %v3883_v46 = vsub.f32 %v7562_v44, %v6779_v55  ;;  %v7683_v18 = vadd.f32 %v2076_v26, %v2060_v24  ;;  %v15411_v26 = vld [vmem:[#allocation45_spill] sm:$0xff] }
 0x10f   : > { %v3984_v21 = vmul.f32 %v3920_v52, %v3920_v52  ;;  %v657_v14 = vmul.f32 %v473_v51, %v473_v51  ;;  %v640_v30 = vsub.f32 %v7580_v10, %v15362_v25  ;;  %v7687_v1 = vadd.f32 %v3030_v60, %v3014_v62  ;;  %v7697_v52 = vpop.permute.xlu0 %808 }
 0x110   : > { %v2031_v35 = vmul.f32 %v1975_v19, %v1975_v19  ;;  %v2985_v39 = vmul.f32 %v2929_v61, %v2929_v61  ;;  %v3939_v47 = vmul.f32 %v3883_v46, %v3883_v46  ;;  %v688_v44 = vadd.f32 %v7242_v28, %v7231_v9  ;;  %v7710_v60 = vpop.permute.xlu1 %788  ;;  %v15414_v19 = vld [vmem:[#allocation68_spill] sm:$0xff] }
 0x111   : > { %v7689_v63 = vadd.f32 %v3984_v21, %v3968_v27  ;;  %v7692_v31 = vadd.f32 %v7443_v16, %v657_v14  ;;  %v704_v24 = vmul.f32 %v640_v30, %v640_v30  ;;  %1760 = vperm.xlu1 %5856, %v15411_v26   ;;  %v2014_v16 = vsub.f32 %v7580_v10, %v15348_v34 }
 0x112   : > { %v7700_v51 = vadd.f32 %v7445_v40, %v2031_v35  ;;  %v7703_v62 = vadd.f32 %v7452_v43, %v2985_v39  ;;  %v7706_v27 = vadd.f32 %v7463_v20, %v3939_v47  ;;  %v2062_v28 = vadd.f32 %v7244_v15, %v7233_v6  ;;  %v15413_v47 = vld [vmem:[#allocation66_spill] sm:$0xff] }
 0x113   : > { %v7712_v9 = vadd.f32 %v704_v24, %v688_v44  ;;  %v2968_v40 = vsub.f32 %v7580_v10, %v15349_v11  ;;  %v3016_v43 = vadd.f32 %v7246_v17, %v7235_v32  ;;  %v2078_v35 = vmul.f32 %v2014_v16, %v2014_v16  ;;  %v15415_v17 = vld [vmem:[#allocation46_spill] sm:$0xff]  ;;  %v7737_v44 = vpop.permute.xlu0 %818 }
 0x114   : > { %v3922_v20 = vsub.f32 %v7580_v10, %v15350_v23  ;;  %v3970_v61 = vadd.f32 %v15414_v19, %v15413_v47  ;;  %v475_v46 = vsub.f32 %v7582_v53, %v6764_v49  ;;  %v1977_v6 = vsub.f32 %v7582_v53, %v6767_v50  ;;  %v7741_v47 = vpop.permute.xlu1 %793 }
 0x115   : > { %15412 = vst [vmem:[#allocation37_spill] sm:$0xff] %v7712_v9  ;;  %v3032_v21 = vmul.f32 %v2968_v40, %v2968_v40  ;;  %v2931_v15 = vsub.f32 %v7582_v53, %v6776_v54  ;;  %v3885_v32 = vsub.f32 %v7582_v53, %v6779_v55  ;;  %1770 = vperm.xlu1 %5856, %v15415_v17   ;;  %v15419_v53 = vld [vmem:[#allocation9_spill] sm:$0xff]  ;;  %v15450_v9 = vld [vmem:[#allocation78_spill] sm:$0xff] }
 0x116   : > { %v7733_v14 = vadd.f32 %v2078_v35, %v2062_v28  ;;  %v3986_v10 = vmul.f32 %v3922_v20, %v3922_v20  ;;  %v659_v30 = vmul.f32 %v475_v46, %v475_v46  ;;  %v642_v39 = vsub.f32 %v7612_v29, %v15362_v25  ;;  %v15420_v20 = vld [vmem:[#allocation88_spill] sm:$0xff] }
 0x117   : > { %v7739_v24 = vadd.f32 %v3032_v21, %v3016_v43  ;;  %v2033_v26 = vmul.f32 %v1977_v6, %v1977_v6  ;;  %v2987_v16 = vmul.f32 %v2931_v15, %v2931_v15  ;;  %v3941_v40 = vmul.f32 %v3885_v32, %v3885_v32  ;;  %v15423_v21 = vld [vmem:[#allocation90_spill] sm:$0xff]  ;;  %v15425_v15 = vld [vmem:[#allocation51_spill] sm:$0xff]  ;;  %v15426_v32 = vld [vmem:[#allocation69_spill] sm:$0xff] }
 0x118   : > { %15416 = vst [vmem:[#allocation43_spill] sm:$0xff] %v7733_v14  ;;  %v7743_v19 = vadd.f32 %v3986_v10, %v3970_v61  ;;  %v7746_v17 = vadd.f32 %v15419_v53, %v659_v30  ;;  %v706_v28 = vmul.f32 %v642_v39, %v642_v39  ;;  %v2016_v35 = vsub.f32 %v7612_v29, %v15348_v34  ;;  %v15421_v14 = vld [vmem:[#allocation89_spill] sm:$0xff] }
 0x119   : > { %15417 = vst [vmem:[#allocation38_spill] sm:$0xff] %v7739_v24  ;;  %v7751_v46 = vadd.f32 %v15420_v20, %v2033_v26  ;;  %v7754_v43 = vadd.f32 %v15421_v14, %v2987_v16  ;;  %v7757_v6 = vadd.f32 %v15423_v21, %v3941_v40  ;;  %v2970_v61 = vsub.f32 %v7612_v29, %v15349_v11  ;;  %v15428_v20 = vld [vmem:[#allocation70_spill] sm:$0xff]  ;;  %v15434_v24 = vld [vmem:[#allocation72_spill] sm:$0xff] }
 0x11a   : > { %15418 = vst [vmem:[#allocation44_spill] sm:$0xff] %v7743_v19  ;;  %1780 = vperm.xlu1 %5856, %v15425_v15   ;;  %v7763_v10 = vadd.f32 %v706_v28, %v15426_v32  ;;  %v2080_v30 = vmul.f32 %v2016_v35, %v2016_v35  ;;  %v3924_v39 = vsub.f32 %v7612_v29, %v15350_v23  ;;  %v7780_v15 = vpop.permute.xlu0 %828 }
 0x11b   : > { %15422 = vst [vmem:[#allocation28_spill] sm:$0xff] %v7754_v43  ;;  %15424 = vst [vmem:[#allocation29_spill] sm:$0xff] %v7757_v6  ;;  %v477_v26 = vsub.f32 %v7614_v48, %v6764_v49  ;;  %v3034_v14 = vmul.f32 %v2970_v61, %v2970_v61  ;;  %v1979_v16 = vsub.f32 %v7614_v48, %v6767_v50  ;;  %v15431_v61 = vld [vmem:[#allocation71_spill] sm:$0xff]  ;;  %v15464_v6 = vld [vmem:[#allocation86_spill] sm:$0xff] }
 0x11c   : > { %15427 = vst [vmem:[#allocation47_spill] sm:$0xff] %v7763_v10  ;;  %v2933_v40 = vsub.f32 %v7614_v48, %v6776_v54  ;;  %v3887_v53 = vsub.f32 %v7614_v48, %v6779_v55  ;;  %v7776_v28 = vadd.f32 %v2080_v30, %v15428_v20  ;;  %v3988_v35 = vmul.f32 %v3924_v39, %v3924_v39  ;;  %v7785_v54 = vpop.permute.xlu1 %803  ;;  %v15436_v48 = vld [vmem:[#allocation91_spill] sm:$0xff]  ;;  %v15438_v20 = vld [vmem:[#allocation14_spill] sm:$0xff] }
 0x11d   : > { %v661_v21 = vmul.f32 %v477_v26, %v477_v26  ;;  %v644_v29 = vsub.f32 %v7638_v42, %v15362_v25  ;;  %15430 = vst [vmem:[#allocation48_spill] sm:$0xff] %v7780_v15  ;;  %v7783_v32 = vadd.f32 %v3034_v14, %v15431_v61  ;;  %v2035_v50 = vmul.f32 %v1979_v16, %v1979_v16  ;;  %v15440_v14 = vld [vmem:[#allocation15_spill] sm:$0xff] }
 0x11e   : > { %15429 = vst [vmem:[#allocation52_spill] sm:$0xff] %v7776_v28  ;;  %v2989_v10 = vmul.f32 %v2933_v40, %v2933_v40  ;;  %v3943_v19 = vmul.f32 %v3887_v53, %v3887_v53  ;;  %15433 = vst [vmem:[#allocation30_spill] sm:$0xff] %v7785_v54  ;;  %v7788_v55 = vadd.f32 %v3988_v35, %v15434_v24  ;;  %v15443_v40 = vld [vmem:[#allocation75_spill] sm:$0xff]  ;;  %v15444_v53 = vld [vmem:[#allocation82_spill] sm:$0xff] }
 0x11f   : > { %15432 = vst [vmem:[#allocation53_spill] sm:$0xff] %v7783_v32  ;;  %v7791_v30 = vadd.f32 %v15436_v48, %v661_v21  ;;  %v708_v39 = vmul.f32 %v644_v29, %v644_v29  ;;  %v2018_v26 = vsub.f32 %v7638_v42, %v15348_v34  ;;  %v7796_v28 = vadd.f32 %v15438_v20, %v2035_v50  ;;  %v15445_v21 = vld [vmem:[#allocation77_spill] sm:$0xff]  ;;  %v15447_v20 = vld [vmem:[#allocation76_spill] sm:$0xff] }
 0x120   : > { %15435 = vst [vmem:[#allocation49_spill] sm:$0xff] %v7788_v55  ;;  %v7799_v61 = vadd.f32 %v15440_v14, %v2989_v10  ;;  %v7802_v16 = vadd.f32 %v7494_v4, %v3943_v19  ;;  %v2972_v24 = vsub.f32 %v7638_v42, %v15349_v11  ;;  %v3022_v35 = vadd.f32 %v15444_v53, %v15443_v40  ;;  %v15448_v55 = vld [vmem:[#allocation83_spill] sm:$0xff]  ;;  %v15449_v14 = vld [vmem:[#allocation56_spill] sm:$0xff] }
 0x121   : > { %15437 = vst [vmem:[#allocation54_spill] sm:$0xff] %v7791_v30  ;;  %15439 = vst [vmem:[#allocation31_spill] sm:$0xff] %v7796_v28  ;;  %v7809_v29 = vadd.f32 %v708_v39, %v15445_v21  ;;  %v2082_v48 = vmul.f32 %v2018_v26, %v2018_v26  ;;  %v3926_v50 = vsub.f32 %v7638_v42, %v15350_v23  ;;  %v7826_v26 = vpop.permute.xlu0 %838  ;;  %v15461_v28 = vld [vmem:[#allocation26_spill] sm:$0xff] }
 0x122   : > { %15441 = vst [vmem:[#allocation50_spill] sm:$0xff] %v7799_v61  ;;  %15442 = vst [vmem:[#allocation55_spill] sm:$0xff] %v7802_v16  ;;  %v3976_v10 = vadd.f32 %v15448_v55, %v15447_v20  ;;  %v632_v4 = vsub.f32 %v15449_v14, %v15362_v25  ;;  %v2006_v19 = vsub.f32 %v15449_v14, %v15348_v34  ;;  %v15453_v55 = vld [vmem:[#allocation79_spill] sm:$0xff] }
 0x123   : > { %15446 = vst [vmem:[#allocation34_spill] sm:$0xff] %v7809_v29  ;;  %v3036_v32 = vmul.f32 %v2972_v24, %v2972_v24  ;;  %v7820_v16 = vadd.f32 %v2082_v48, %v15450_v9  ;;  %v3990_v40 = vmul.f32 %v3926_v50, %v3926_v50  ;;  %v646_v39 = vsub.f32 %v7673_v36, %v15362_v25  ;;  %v15455_v9 = vld [vmem:[#allocation22_spill] sm:$0xff]  ;;  %v7837_v48 = vpop.permute.xlu1 %813  ;;  %v15457_v50 = vld [vmem:[#allocation80_spill] sm:$0xff]  ;;  %v15459_v61 = vld [vmem:[#allocation23_spill] sm:$0xff] }
 0x124   : > { %v2020_v42 = vsub.f32 %v7673_v36, %v15348_v34  ;;  %15452 = vst [vmem:[#allocation57_spill] sm:$0xff] %v7826_v26  ;;  %v2974_v21 = vsub.f32 %v7673_v36, %v15349_v11  ;;  %v3928_v24 = vsub.f32 %v7673_v36, %v15350_v23  ;;  %vm868_vm0 = vcmp.eq.f32.partialorder %v7675_v58, %v15455_v9  ;;  %v15462_v36 = vld [vmem:[#allocation85_spill] sm:$0xff] }
 0x125   : > { %15451 = vst [vmem:[#allocation39_spill] sm:$0xff] %v7820_v16  ;;  %v7829_v53 = vadd.f32 %v3036_v32, %v15453_v55  ;;  %15456 = vst [vmem:[#allocation58_spill] sm:$0xff] %v7837_v48  ;;  %v7840_v20 = vadd.f32 %v3990_v40, %v15457_v50  ;;  %v710_v16 = vmul.f32 %v646_v39, %v646_v39  ;;  %v7962_v50 = vld [vmem:[%s14667_s4] sm:$0xff] }
 0x126   : > { %v2084_v29 = vmul.f32 %v2020_v42, %v2020_v42  ;;  %v3038_v32 = vmul.f32 %v2974_v21, %v2974_v21  ;;  %v3992_v55 = vmul.f32 %v3928_v24, %v3928_v24  ;;  %vm866_vm8 = vcmp.eq.f32.partialorder %v7710_v60, %v15455_v9  ;;  %v15472_v21 = vld [vmem:[#allocation6_spill] sm:$0xff] }
 0x127   : > { %15454 = vst [vmem:[#allocation61_spill] sm:$0xff] %v7829_v53  ;;  %15458 = vst [vmem:[#allocation62_spill] sm:$0xff] %v7840_v20  ;;  %v15460_v53 = vld [vmem:[#allocation24_spill] sm:$0xff]  ;;  %v7849_v30 = vadd.f32 %v710_v16, %v15462_v36  ;;  %vm2124_vm9 = vcmp.eq.f32.partialorder %v7710_v60, %v15459_v61  ;;  %vm4032_vm11 = vcmp.eq.f32.partialorder %v7710_v60, %v15461_v28  ;;  %v7884_v16 = vpop.permute.xlu1 %823  ;;  %v729_v24 = vadd.s32 8, %v15472_v21 }
 0x128   : > { %v7852_v43 = vadd.f32 %v2084_v29, %v15464_v6  ;;  %v7858_v40 = vadd.f32 %v3038_v32, %v3022_v35  ;;  %v7860_v39 = vadd.f32 %v3992_v55, %v3976_v10  ;;  %vm3078_vm10 = vcmp.eq.f32.partialorder %v7710_v60, %v15460_v53  ;;  %v7874_v6 = vpop.permute.xlu0 %848  ;;  %15469 = vst [vmem:[#allocation45_spill] sm:$0xff] %v7884_v16 }
 0x129   : > { %15463 = vst [vmem:[#allocation59_spill] sm:$0xff] %v7849_v30  ;;  %15468 = vst [vmem:[#allocation40_spill] sm:$0xff] %v7874_v6  ;;  %v696_v35 = vmul.f32 %v632_v4, %v632_v4  ;;  %v2070_v29 = vmul.f32 %v2006_v19, %v2006_v19  ;;  %v2960_v19 = vsub.f32 %v15449_v14, %v15349_v11  ;;  %vm897_vm13 = vcmp.ge.f32.partialorder %v7962_v50, 0.0  ;;  %v8010_v30 = vld [vmem:[%s14667_s4 + $0x18] sm:$0xff] }
 0x12a   : > { %15465 = vst [vmem:[#allocation63_spill] sm:$0xff] %v7852_v43  ;;  %15466 = vst [vmem:[#allocation60_spill] sm:$0xff] %v7858_v40  ;;  %v3914_v55 = vsub.f32 %v15449_v14, %v15350_v23  ;;  %v7968_v36 = vstv %s5776_s28  ;;  %v15474_v6 = vmov 0   ;;  %v7990_v43 = vld [vmem:[%s14667_s4 + $0x10] sm:$0xff]  ;;  %vm4047_vm6 = vcmp.ge.f32.partialorder %v8010_v30, 0.0 }
 0x12b   : > { %15467 = vst [vmem:[#allocation64_spill] sm:$0xff] %v7860_v39  ;;  %v7928_v4 = vpop.permute.xlu1 %833  ;;  %v712_v42 = vadd.f32 %v696_v35, %v7509_v7  ;;  %v2086_v32 = vadd.f32 %v2070_v29, %v7512_v57  ;;  %v7976_v7 = vld [vmem:[%s14667_s4 + $0x8] sm:$0xff]  ;;  %v3024_v35 = vmul.f32 %v2960_v19, %v2960_v19  ;;  %v746_v16 = vadd.s32 %v7968_v36, %v729_v24  ;;  %v15475_v39 = vld [vmem:[#allocation12_spill] sm:$0xff] }
 0x12c   : > { %v7918_v10 = vpop.permute.xlu0 %858  ;;  %15471 = vst [vmem:[#allocation68_spill] sm:$0xff] %v7928_v4  ;;  %v15473_v4 = vlaneseq  ;;  %vm2139_vm15 = vcmp.ge.f32.partialorder %v7976_v7, 0.0  ;;  %v978_v57 = vsel %vm897_vm13, 1, %v15474_v6  ;;  %v3978_v48 = vmul.f32 %v3914_v55, %v3914_v55  ;;  %15477 = vst [vmem:[#allocation9_spill] sm:$0xff] %v8010_v30 }
 0x12d   : > { %15470 = vst [vmem:[#allocation66_spill] sm:$0xff] %v7918_v10  ;;  %v2140_v29 = vsel %vm2139_vm15, 1, %v15474_v6  ;;  %v3040_v14 = vadd.f32 %v3024_v35, %v7515_v38  ;;  %vm3093_vm14 = vcmp.ge.f32.partialorder %v7990_v43, 0.0  ;;  %vm1033_vm2 = vcmp.lt.f32.partialorder %v712_v42, 0.16 }
 0x12e   : > { %v7971_v10 = vand.u32 127, %v15473_v4  ;;  %v982_v4 = vrot.slane %v978_v57, %v15475_v39  ;;  %v2144_v38 = vrot.slane %v2140_v29, %v15475_v39  ;;  %v3994_v24 = vadd.f32 %v3978_v48, %v7518_v33 }
 0x12f   : > { %v8000_v55 = vpop.permute.xlu1 %843  ;;  %v3094_v35 = vsel %vm3093_vm14, 1, %v15474_v6  ;;  %v15478_v29 = vmov 0  ;;  %v15491_v30 = vmov 0  ;;  %v2227_v33 = vmax.f32 %v2086_v32, 1e-12 }
 0x130   : > { %v7985_v40 = vadd.s32 128, %v7971_v10  ;;  %vm766_vm7 = vcmp.ne.s32.totalorder %v746_v16, %v7971_v10  ;;  %v7995_v19 = vadd.s32 256, %v7971_v10  ;;  %15476 = vst [vmem:[#allocation46_spill] sm:$0xff] %v8000_v55  ;;  %v8005_v57 = vadd.s32 384, %v7971_v10  ;;  %v919_v20 = vpop.permute.xlu0 %918 }
 0x131   : > { %vm8013_vm12 = vcmp.eq.s32.totalorder %v982_v4, 1  ;;  %vm8020_vm5 = vmand %vm766_vm7, %vm866_vm8  ;;  %v4048_v4 = vsel %vm4047_vm6, 1, %v15474_v6  ;;  %v3098_v26 = vrot.slane %v3094_v35, %v15475_v39  ;;  %vm963_vm8 = vcmp.eq.s32.totalorder %v919_v20, 1 }
 0x132   : > { %vm2104_vm13 = vcmp.ne.s32.totalorder %v746_v16, %v7985_v40  ;;  %vm3058_vm15 = vcmp.ne.s32.totalorder %v746_v16, %v7995_v19  ;;  %v15479_v29 = vsel %vm8013_vm12, 4294967295, %v15478_v29  ;;  %vm4012_vm4 = vcmp.ne.s32.totalorder %v746_v16, %v8005_v57  ;;  %vm985_vm6 = vmand %vm963_vm8, %vm8013_vm12 }
 0x133   : > { %vm8027_vm14 = vmand %vm2104_vm13, %vm2124_vm9  ;;  %vm8045_vm3 = vcmp.eq.s32.totalorder %v2144_v38, 1  ;;  %v15486_v16 = vmov 0  ;;  %v1065_v6 = vmax.f32 %v712_v42, 1e-12  ;;  %v4052_v35 = vrot.slane %v4048_v4, %v15475_v39  ;;  %v8066_v15 = vpop.permute.xlu1 %853 }
 0x134   : > { %vm8037_vm7 = vmand %vm3058_vm15, %vm3078_vm10  ;;  %v15487_v16 = vsel %vm8045_vm3, 4294967295, %v15486_v16  ;;  %15490 = vst [vmem:[#allocation88_spill] sm:$0xff] %v8066_v15  ;;  %v731_v42 = vadd.s32 24, %v15472_v21  ;;  %vm8073_vm15 = vcmp.eq.s32.totalorder %v3098_v26, 1  ;;  %v15494_v39 = vmov 0  ;;  %v925_v54 = vpop.permute.xlu0 %924 }
 0x135   : > { %vm8060_vm13 = vmand %vm4012_vm4, %vm4032_vm11  ;;  %v15495_v39 = vsel %vm8073_vm15, 4294967295, %v15494_v39  ;;  %v15497_v26 = vmov 0  ;;  %v15500_v4 = vmov 0 }
 0x136   : > { %vm1017_vm9 = vmand %vm8020_vm5, %vm985_vm6  ;;  %15496 = vst [vmem:[#allocation90_spill] sm:$0xff] %v15495_v39  ;;  %vm2195_vm5 = vcmp.lt.f32.partialorder %v2086_v32, 0.16  ;;  %vm8090_vm6 = vcmp.eq.s32.totalorder %v4052_v35, 1  ;;  %v748_v48 = vadd.s32 %v7968_v36, %v731_v42  ;;  %v15503_v35 = vmov 0  ;;  %v15506_v42 = vld [vmem:[#allocation65_spill] sm:$0xff] }
 0x137   : > { %vm8068_vm10 = vmand %vm1017_vm9, %vm1033_vm2  ;;  %v15498_v26 = vsel %vm8090_vm6, 4294967295, %v15497_v26  ;;  %vm4103_vm9 = vcmp.lt.f32.partialorder %v3994_v24, 0.16  ;;  %v2009_v38 = vsub.f32 %v15506_v42, %v15348_v34 }
 0x138   : > { %v15492_v30 = vsel %vm8068_vm10, 4294967295, %v15491_v30  ;;  %v8079_v60 = vsel %vm8068_vm10, %v1065_v6, 1.0  ;;  %vm2147_vm4 = vmand %vm963_vm8, %vm8045_vm3  ;;  %15499 = vst [vmem:[#allocation51_spill] sm:$0xff] %v15498_v26  ;;  %v3181_v6 = vmax.f32 %v3040_v14, 1e-12 }
 0x139   : > { %15493 = vst [vmem:[#allocation89_spill] sm:$0xff] %v15492_v30  ;;  %vm2179_vm2 = vmand %vm8027_vm14, %vm2147_vm4  ;;  %v15507_v30 = vmov 0  ;;  %5890 = vrsqrt.f32 %v8079_v60 }
 0x13a   : > { %vm8094_vm1 = vmand %vm2179_vm2, %vm2195_vm5  ;;  %vm3149_vm5 = vcmp.lt.f32.partialorder %v3040_v14, 0.16  ;;  %v4135_v14 = vmax.f32 %v3994_v24, 1e-12 }
 0x13b   : > { %v15501_v4 = vsel %vm8094_vm1, 4294967295, %v15500_v4  ;;  %v8100_v32 = vsel %vm8094_vm1, %v2227_v33, 1.0  ;;  %vm3101_vm14 = vmand %vm963_vm8, %vm8073_vm15 }
 0x13c   : > { %15502 = vst [vmem:[#allocation69_spill] sm:$0xff] %v15501_v4  ;;  %vm3133_vm2 = vmand %vm8037_vm7, %vm3101_vm14  ;;  %v635_v4 = vsub.f32 %v15506_v42, %v15362_v25  ;;  %vm768_vm14 = vcmp.ne.s32.totalorder %v748_v48, %v7971_v10  ;;  %5892 = vrsqrt.f32 %v8100_v32 }
 0x13d   : > { %vm8112_vm11 = vmand %vm3133_vm2, %vm3149_vm5  ;;  %vm2106_vm2 = vcmp.ne.s32.totalorder %v748_v48, %v7985_v40 }
 0x13e   : > { %v15504_v35 = vsel %vm8112_vm11, 4294967295, %v15503_v35  ;;  %v8118_v33 = vsel %vm8112_vm11, %v3181_v6, 1.0  ;;  %vm4055_vm4 = vmand %vm963_vm8, %vm8090_vm6  ;;  %vm3060_vm8 = vcmp.ne.s32.totalorder %v748_v48, %v7995_v19  ;;  %v699_v24 = vmul.f32 %v635_v4, %v635_v4 }
 0x13f   : > { %15505 = vst [vmem:[#allocation70_spill] sm:$0xff] %v15504_v35  ;;  %vm4087_vm7 = vmand %vm8060_vm13, %vm4055_vm4  ;;  %vm965_vm13 = vcmp.eq.s32.totalorder %v925_v54, 1  ;;  %v733_v35 = vadd.s32 40, %v15472_v21  ;;  %v15529_v6 = vmov 0  ;;  %v2963_v54 = vsub.f32 %v15506_v42, %v15349_v11 }
 0x140   : > { %vm8128_vm5 = vmand %vm4087_vm7, %vm4103_vm9  ;;  %vm15510_vm9 = vcmp.eq.f32.partialorder %v7675_v58, %v15459_v61  ;;  %vm4014_vm7 = vcmp.ne.s32.totalorder %v748_v48, %v8005_v57  ;;  %v8160_v4 = vadd.f32 %v699_v24, %v7548_v56  ;;  %v15556_v48 = vld [vmem:[#allocation67_spill] sm:$0xff]  ;;  %5894 = vrsqrt.f32 %v8118_v33 }
 0x141   : > { %v15508_v30 = vsel %vm8128_vm5, 4294967295, %v15507_v30  ;;  %v8135_v20 = vsel %vm8128_vm5, %v4135_v14, 1.0  ;;  %vm1003_vm11 = vmand %vm768_vm14, %vm868_vm0  ;;  %vm15513_vm5 = vcmp.eq.f32.partialorder %v7675_v58, %v15460_v53  ;;  %vm1035_vm14 = vcmp.lt.f32.partialorder %v7572_v12, 0.16 }
 0x142   : > { %15509 = vst [vmem:[#allocation71_spill] sm:$0xff] %v15508_v30  ;;  %vm8144_vm4 = vmand %vm2106_vm2, %vm15510_vm9  ;;  %v1067_v14 = vmax.f32 %v7572_v12, 1e-12  ;;  %vm15517_vm2 = vcmp.eq.f32.partialorder %v7675_v58, %v15461_v28  ;;  %v15520_v30 = vmov 0  ;;  %v2229_v12 = vmax.f32 %v7574_v22, 1e-12 }
 0x143   : > { %vm8152_vm1 = vmand %vm3060_vm8, %vm15513_vm5  ;;  %15516 = vst [vmem:[#allocation72_spill] sm:$0xff] %v8160_v4  ;;  %v15523_v58 = vmov 0  ;;  %v15567_v4 = vld [vmem:[#allocation35_spill] sm:$0xff]  ;;  %5896 = vrsqrt.f32 %v8135_v20 }
 0x144   : > { %vm987_vm0 = vmand %vm965_vm13, %vm8013_vm12 }
 0x145   : > { %vm8167_vm9 = vmand %vm4014_vm7, %vm15517_vm2  ;;  %vm2197_vm7 = vcmp.lt.f32.partialorder %v7574_v22, 0.16  ;;  %vm3151_vm2 = vcmp.lt.f32.partialorder %v7584_v2, 0.16  ;;  %v3183_v22 = vmax.f32 %v7584_v2, 1e-12 }
 0x146   : > { %vm1019_vm5 = vmand %vm1003_vm11, %vm987_vm0  ;;  %v4137_v2 = vmax.f32 %v7589_v3, 1e-12 }
 0x147   : > { %vm8171_vm8 = vmand %vm1019_vm5, %vm1035_vm14 }
 0x148   : > { %v15521_v30 = vsel %vm8171_vm8, 4294967295, %v15520_v30  ;;  %v8178_v56 = vsel %vm8171_vm8, %v1067_v14, 1.0  ;;  %vm2149_vm10 = vmand %vm965_vm13, %vm8045_vm3  ;;  %v750_v14 = vadd.s32 %v7968_v36, %v733_v35  ;;  %v931_v35 = vpop.permute.xlu0 %930 }
 0x149   : > { %15522 = vst [vmem:[#allocation91_spill] sm:$0xff] %v15521_v30  ;;  %vm2181_vm11 = vmand %vm8144_vm4, %vm2149_vm10  ;;  %v2231_v30 = vmax.f32 %v7626_v59, 1e-12  ;;  %5898 = vrsqrt.f32 %v8178_v56 }
 0x14a   : > { %vm8187_vm0 = vmand %vm2181_vm11, %vm2197_vm7  ;;  %vm4105_vm7 = vcmp.lt.f32.partialorder %v7589_v3, 0.16  ;;  %vm770_vm11 = vcmp.ne.s32.totalorder %v750_v14, %v7971_v10  ;;  %v3917_v3 = vsub.f32 %v15506_v42, %v15350_v23  ;;  %v3919_v42 = vsub.f32 %v15556_v48, %v15350_v23 }
 0x14b   : > { %v15524_v58 = vsel %vm8187_vm0, 4294967295, %v15523_v58  ;;  %v8193_v24 = vsel %vm8187_vm0, %v2229_v12, 1.0  ;;  %vm3103_vm14 = vmand %vm965_vm13, %vm8073_vm15 }
 0x14c   : > { %15525 = vst [vmem:[#allocation14_spill] sm:$0xff] %v15524_v58  ;;  %vm3135_vm10 = vmand %vm8152_vm1, %vm3103_vm14  ;;  %v15526_v58 = vmov 0  ;;  %v3983_v55 = vmul.f32 %v3919_v42, %v3919_v42  ;;  %5900 = vrsqrt.f32 %v8193_v24 }
 0x14d   : > { %vm8205_vm4 = vmand %vm3135_vm10, %vm3151_vm2  ;;  %vm2108_vm2 = vcmp.ne.s32.totalorder %v750_v14, %v7985_v40 }
 0x14e   : > { %v15527_v58 = vsel %vm8205_vm4, 4294967295, %v15526_v58  ;;  %v8211_v12 = vsel %vm8205_vm4, %v3183_v22, 1.0  ;;  %vm4057_vm5 = vmand %vm965_vm13, %vm8090_vm6  ;;  %v2073_v22 = vmul.f32 %v2009_v38, %v2009_v38  ;;  %vm3062_vm13 = vcmp.ne.s32.totalorder %v750_v14, %v7995_v19 }
 0x14f   : > { %15528 = vst [vmem:[#allocation15_spill] sm:$0xff] %v15527_v58  ;;  %vm4089_vm1 = vmand %vm8167_vm9, %vm4057_vm5  ;;  %vm15532_vm9 = vcmp.eq.f32.partialorder %v7697_v52, %v15455_v9  ;;  %vm967_vm5 = vcmp.eq.s32.totalorder %v931_v35, 1  ;;  %vm15537_vm4 = vcmp.eq.f32.partialorder %v7697_v52, %v15460_v53  ;;  %5902 = vrsqrt.f32 %v8211_v12 }
 0x150   : > { %vm8221_vm14 = vmand %vm4089_vm1, %vm4105_vm7  ;;  %vm15533_vm7 = vcmp.eq.f32.partialorder %v7697_v52, %v15459_v61  ;;  %v8247_v38 = vadd.f32 %v2073_v22, %v7551_v41  ;;  %v15543_v22 = vmov 0  ;;  %v15566_v41 = vld [vmem:[#allocation73_spill] sm:$0xff] }
 0x151   : > { %v15530_v6 = vsel %vm8221_vm14, 4294967295, %v15529_v6  ;;  %v8230_v58 = vsel %vm8221_vm14, %v4137_v2, 1.0  ;;  %vm1005_vm10 = vmand %vm770_vm11, %vm15532_vm9  ;;  %vm4016_vm14 = vcmp.ne.s32.totalorder %v750_v14, %v8005_v57  ;;  %v3027_v2 = vmul.f32 %v2963_v54, %v2963_v54 }
 0x152   : > { %15531 = vst [vmem:[#allocation75_spill] sm:$0xff] %v15530_v6  ;;  %vm8241_vm1 = vmand %vm2108_vm2, %vm15533_vm7  ;;  %v3981_v6 = vmul.f32 %v3917_v3, %v3917_v3  ;;  %vm1037_vm2 = vcmp.lt.f32.partialorder %v7616_v8, 0.16  ;;  %v1069_v14 = vmax.f32 %v7616_v8, 1e-12  ;;  %vm15540_vm9 = vcmp.eq.f32.partialorder %v7697_v52, %v15461_v28  ;;  %v15547_v8 = vld [vmem:[#allocation11_spill] sm:$0xff] }
 0x153   : > { %15536 = vst [vmem:[#allocation82_spill] sm:$0xff] %v8247_v38  ;;  %vm8252_vm0 = vmand %vm3062_vm13, %vm15537_vm4  ;;  %v8273_v54 = vadd.f32 %v3027_v2, %v7554_v0  ;;  %v15549_v0 = vmov 0  ;;  %v639_v38 = vsub.f32 %v15566_v41, %v15362_v25  ;;  %5904 = vrsqrt.f32 %v8230_v58 }
 0x154   : > { %vm989_vm11 = vmand %vm967_vm5, %vm8013_vm12  ;;  %v8283_v52 = vadd.f32 %v3981_v6, %v15547_v8  ;;  %v3185_v6 = vmax.f32 %v7633_v13, 1e-12 }
 0x155   : > { %vm8264_vm7 = vmand %vm4016_vm14, %vm15540_vm9  ;;  %15546 = vst [vmem:[#allocation76_spill] sm:$0xff] %v8273_v54  ;;  %vm2199_vm14 = vcmp.lt.f32.partialorder %v7626_v59, 0.16  ;;  %vm3153_vm9 = vcmp.lt.f32.partialorder %v7633_v13, 0.16  ;;  %v15553_v59 = vmov 0  ;;  %v2965_v13 = vsub.f32 %v15556_v48, %v15349_v11 }
 0x156   : > { %vm1021_vm4 = vmand %vm1005_vm10, %vm989_vm11  ;;  %15548 = vst [vmem:[#allocation83_spill] sm:$0xff] %v8283_v52  ;;  %v15564_v54 = vld [vmem:[#allocation18_spill] sm:$0xff] }
 0x157   : > { %vm8268_vm13 = vmand %vm1021_vm4, %vm1037_vm2  ;;  %v3029_v15 = vmul.f32 %v2965_v13, %v2965_v13 }
 0x158   : > { %v15544_v22 = vsel %vm8268_vm13, 4294967295, %v15543_v22  ;;  %v8277_v3 = vsel %vm8268_vm13, %v1069_v14, 1.0  ;;  %vm2151_vm8 = vmand %vm967_vm5, %vm8045_vm3  ;;  %v637_v14 = vsub.f32 %v15556_v48, %v15362_v25 }
 0x159   : > { %15545 = vst [vmem:[#allocation77_spill] sm:$0xff] %v15544_v22  ;;  %vm2183_vm10 = vmand %vm8241_vm1, %vm2151_vm8  ;;  %5906 = vrsqrt.f32 %v8277_v3 }
 0x15a   : > { %vm8289_vm11 = vmand %vm2183_vm10, %vm2199_vm14 }
 0x15b   : > { %v15550_v0 = vsel %vm8289_vm11, 4294967295, %v15549_v0  ;;  %v8295_v2 = vsel %vm8289_vm11, %v2231_v30, 1.0  ;;  %vm3105_vm2 = vmand %vm967_vm5, %vm8073_vm15  ;;  %v2011_v30 = vsub.f32 %v15556_v48, %v15348_v34  ;;  %v15562_v48 = vld [vmem:[#allocation19_spill] sm:$0xff] }
 0x15c   : > { %15551 = vst [vmem:[#allocation56_spill] sm:$0xff] %v15550_v0  ;;  %15552 = vst [vmem:[#allocation78_spill] sm:$0xff] %v8295_v2  ;;  %v4139_v0 = vmax.f32 %v7635_v45, 1e-12  ;;  %v15569_v2 = vld [vmem:[#allocation41_spill] sm:$0xff] }
 0x15d   : > { %vm3137_vm4 = vmand %vm8252_vm0, %vm3105_vm2  ;;  %vm4107_vm0 = vcmp.lt.f32.partialorder %v7635_v45, 0.16  ;;  %v2075_v22 = vmul.f32 %v2011_v30, %v2011_v30 }
 0x15e   : > { %vm8304_vm8 = vmand %vm3137_vm4, %vm3153_vm9  ;;  %vm15572_vm9 = vcmp.eq.f32.partialorder %v7737_v44, %v15455_v9 }
 0x15f   : > { %v15554_v59 = vsel %vm8304_vm8, 4294967295, %v15553_v59  ;;  %v8314_v8 = vsel %vm8304_vm8, %v3185_v6, 1.0  ;;  %vm4059_vm1 = vmand %vm967_vm5, %vm8090_vm6  ;;  %v15558_v6 = vmov 0  ;;  %v8339_v45 = vadd.f32 %v2075_v22, %v15564_v54 }
 0x160   : > { %15555 = vst [vmem:[#allocation79_spill] sm:$0xff] %v15554_v59  ;;  %15557 = vst [vmem:[#allocation22_spill] sm:$0xff] %v8314_v8  ;;  %v701_v59 = vmul.f32 %v637_v14, %v637_v14  ;;  %v8344_v8 = vadd.f32 %v3029_v15, %v15567_v4  ;;  %v703_v14 = vmul.f32 %v639_v38, %v639_v38 }
 0x161   : > { %vm4091_vm14 = vmand %vm8264_vm7, %vm4059_vm1  ;;  %15565 = vst [vmem:[#allocation26_spill] sm:$0xff] %v8339_v45  ;;  %v2013_v22 = vsub.f32 %v15566_v41, %v15348_v34  ;;  %v2967_v54 = vsub.f32 %v15566_v41, %v15349_v11  ;;  %v3921_v15 = vsub.f32 %v15566_v41, %v15350_v23 }
 0x162   : > { %vm8327_vm10 = vmand %vm4091_vm14, %vm4107_vm0  ;;  %v8336_v52 = vadd.f32 %v701_v59, %v15562_v48  ;;  %15568 = vst [vmem:[#allocation85_spill] sm:$0xff] %v8344_v8  ;;  %v8352_v59 = vadd.f32 %v703_v14, %v7643_v5  ;;  %vm15575_vm0 = vcmp.eq.f32.partialorder %v7737_v44, %v15459_v61  ;;  %v15579_v48 = vld [vmem:[#allocation42_spill] sm:$0xff]  ;;  %v8437_v8 = vadd.s32 %v7968_v36, %v15472_v21 }
 0x163   : > { %v15559_v6 = vsel %vm8327_vm10, 4294967295, %v15558_v6  ;;  %v8333_v35 = vsel %vm8327_vm10, %v4139_v0, 1.0  ;;  %v735_v0 = vadd.s32 56, %v15472_v21  ;;  %v2077_v4 = vmul.f32 %v2013_v22, %v2013_v22 }
 0x164   : > { %15560 = vst [vmem:[#allocation80_spill] sm:$0xff] %v15559_v6  ;;  %15561 = vst [vmem:[#allocation23_spill] sm:$0xff] %v8333_v35  ;;  %v8347_v6 = vadd.f32 %v3983_v55, %v15569_v2  ;;  %v8361_v55 = vpop.permute.xlu0 %936  ;;  %v3031_v38 = vmul.f32 %v2967_v54, %v2967_v54  ;;  %v3985_v5 = vmul.f32 %v3921_v15, %v3921_v15  ;;  %v15585_v54 = vld [vmem:[#allocation25_spill] sm:$0xff]  ;;  %v15607_v22 = vmov 0 }
 0x165   : > { %15563 = vst [vmem:[#allocation24_spill] sm:$0xff] %v8336_v52  ;;  %v752_v30 = vadd.s32 %v7968_v36, %v735_v0  ;;  %15571 = vst [vmem:[#allocation6_spill] sm:$0xff] %v8352_v59  ;;  %vm14779_vm1 = vcmp.eq.s32.totalorder %v8361_v55, 1  ;;  %v8382_v42 = vadd.f32 %v2077_v4, %v7648_v37  ;;  %v15581_v0 = vld [vmem:[#allocation74_spill] sm:$0xff]  ;;  %v15596_v59 = vld [vmem:[#allocation8_spill] sm:$0xff] }
 0x166   : > { %15570 = vst [vmem:[#allocation86_spill] sm:$0xff] %v8347_v6  ;;  %v8385_v41 = vadd.f32 %v3031_v38, %v15579_v48  ;;  %v641_v14 = vsub.f32 %v15581_v0, %v15362_v25  ;;  %v8397_v15 = vadd.f32 %v3985_v5, %v15585_v54  ;;  %v2015_v37 = vsub.f32 %v15581_v0, %v15348_v34  ;;  %v15587_v38 = vld [vmem:[#allocation13_spill] sm:$0xff] }
 0x167   : > { %vm772_vm5 = vcmp.ne.s32.totalorder %v752_v30, %v7971_v10  ;;  %vm2110_vm7 = vcmp.ne.s32.totalorder %v752_v30, %v7985_v40  ;;  %vm3064_vm2 = vcmp.ne.s32.totalorder %v752_v30, %v7995_v19  ;;  %vm4018_vm10 = vcmp.ne.s32.totalorder %v752_v30, %v8005_v57  ;;  %15578 = vst [vmem:[#allocation12_spill] sm:$0xff] %v8382_v42  ;;  %v15591_v54 = vld [vmem:[#allocation81_spill] sm:$0xff]  ;;  %v15595_v42 = vld [vmem:[#allocation7_spill] sm:$0xff] }
 0x168   : > { %vm8368_vm4 = vmand %vm772_vm5, %vm15572_vm9  ;;  %15580 = vst [vmem:[#allocation65_spill] sm:$0xff] %v8385_v41  ;;  %vm15582_vm5 = vcmp.eq.f32.partialorder %v7737_v44, %v15460_v53  ;;  %v2969_v30 = vsub.f32 %v15581_v0, %v15349_v11  ;;  %v3923_v4 = vsub.f32 %v15581_v0, %v15350_v23  ;;  %v1071_v48 = vmax.f32 %v15587_v38, 1e-12  ;;  %v8424_v41 = vpop.permute.xlu1 %915 }
 0x169   : > { %vm8376_vm14 = vmand %vm2110_vm7, %vm15575_vm0  ;;  %15586 = vst [vmem:[#allocation11_spill] sm:$0xff] %v8397_v15  ;;  %vm15588_vm0 = vcmp.eq.f32.partialorder %v7737_v44, %v15461_v28  ;;  %v643_v15 = vsub.f32 %v15591_v54, %v15362_v25  ;;  %v2017_v0 = vsub.f32 %v15591_v54, %v15348_v34  ;;  %v730_v44 = vadd.s32 16, %v15472_v21 }
 0x16a   : > { %vm8392_vm9 = vmand %vm3064_vm2, %vm15582_vm5  ;;  %vm1039_vm2 = vcmp.lt.f32.partialorder %v15587_v38, 0.16  ;;  %v15592_v38 = vmov 0  ;;  %v8433_v6 = vsub.f32 %v15596_v59, %v15595_v42  ;;  %v705_v2 = vmul.f32 %v641_v14, %v641_v14 }
 0x16b   : > { %vm991_vm7 = vmand %vm14779_vm1, %vm8013_vm12  ;;  %v2079_v52 = vmul.f32 %v2015_v37, %v2015_v37  ;;  %v3033_v35 = vmul.f32 %v2969_v30, %v2969_v30  ;;  %v2233_v59 = vmax.f32 %v7683_v18, 1e-12  ;;  %v3987_v42 = vmul.f32 %v3923_v4, %v3923_v4  ;;  %v15602_v4 = vld [vmem:[#allocation36_spill] sm:$0xff] }
 0x16c   : > { %vm8414_vm5 = vmand %vm4018_vm10, %vm15588_vm0  ;;  %v2971_v14 = vsub.f32 %v15591_v54, %v15349_v11  ;;  %v707_v37 = vmul.f32 %v643_v15, %v643_v15  ;;  %v2081_v30 = vmul.f32 %v2017_v0, %v2017_v0  ;;  %v747_v13 = vadd.s32 %v7968_v36, %v730_v44 }
 0x16d   : > { %vm1023_vm8 = vmand %vm8368_vm4, %vm991_vm7  ;;  %vm2201_vm4 = vcmp.lt.f32.partialorder %v7683_v18, 0.16  ;;  %v3187_v15 = vmax.f32 %v7687_v1, 1e-12  ;;  %v4141_v44 = vmax.f32 %v7689_v63, 1e-12  ;;  %vm15626_vm11 = vcmp.eq.f32.partialorder %v15602_v4, %v15459_v61 }
 0x16e   : > { %vm8426_vm1 = vmand %vm1023_vm8, %vm1039_vm2  ;;  %vm15597_vm8 = vcmp.eq.s32.totalorder %v8361_v55, 1  ;;  %v8530_v55 = vpop.permute.xlu1 %921  ;;  %v15622_v5 = vmov 0 }
 0x16f   : > { %v15593_v38 = vsel %vm8426_vm1, 4294967295, %v15592_v38  ;;  %v8441_v45 = vsel %vm8426_vm1, %v1071_v48, 1.0  ;;  %vm2153_vm10 = vmand %vm15597_vm8, %vm8045_vm3  ;;  %v3925_v48 = vsub.f32 %v15591_v54, %v15350_v23  ;;  %v15603_v54 = vld [vmem:[#allocation84_spill] sm:$0xff] }
 0x170   : > { %15594 = vst [vmem:[#allocation67_spill] sm:$0xff] %v15593_v38  ;;  %vm2185_vm7 = vmand %vm8376_vm14, %vm2153_vm10  ;;  %v15598_v38 = vmov 0  ;;  %v645_v0 = vsub.f32 %v15603_v54, %v15362_v25 }
 0x171   : > { %vm8456_vm0 = vmand %vm2185_vm7, %vm2201_vm4  ;;  %vm3155_vm7 = vcmp.lt.f32.partialorder %v7687_v1, 0.16  ;;  %vm15604_vm4 = vcmp.eq.s32.totalorder %v8424_v41, 1 }
 0x172   : > { %v15599_v38 = vsel %vm8456_vm0, 4294967295, %v15598_v38  ;;  %v8462_v18 = vsel %vm8456_vm0, %v2233_v59, 1.0  ;;  %vm15601_vm14 = vmmov %vm15597_vm8  ;;  %vm4109_vm0 = vcmp.lt.f32.partialorder %v7689_v63, 0.16  ;;  %v15739_v63 = vld [vmem:[#allocation37_spill] sm:$0xff] }
 0x173   : > { %15600 = vst [vmem:[#allocation19_spill] sm:$0xff] %v15599_v38  ;;  %vm3107_vm8 = vmand %vm15601_vm14, %vm8073_vm15 }
 0x174   : > { %vm3139_vm2 = vmand %vm8392_vm9, %vm3107_vm8 }
 0x175   : > { %vm8489_vm1 = vmand %vm15604_vm4, %vm8013_vm12 }
 0x176   : > { %vm8493_vm9 = vmand %vm3139_vm2, %vm3155_vm7  ;;  %vm15612_vm2 = vcmp.eq.f32.partialorder %v15602_v4, %v15455_v9  ;;  %vm15613_vm7 = vcmp.ne.s32.totalorder %v8437_v8, %v7971_v10 }
 0x177   : > { %v15608_v22 = vsel %vm8493_vm9, 4294967295, %v15607_v22  ;;  %v8503_v59 = vsel %vm8493_vm9, %v3187_v15, 1.0  ;;  %vm15611_vm4 = vmmov %vm15601_vm14  ;;  %vm15616_vm14 = vcmp.eq.s32.totalorder %v8424_v41, 1  ;;  %v8533_v15 = vadd.f32 %v705_v2, %v7692_v31 }
 0x178   : > { %15609 = vst [vmem:[#allocation18_spill] sm:$0xff] %v15608_v22  ;;  %15610 = vst [vmem:[#allocation73_spill] sm:$0xff] %v8503_v59  ;;  %v8536_v22 = vadd.f32 %v2079_v52, %v7700_v51  ;;  %v8539_v59 = vadd.f32 %v3033_v35, %v7703_v62  ;;  %v8551_v31 = vadd.f32 %v3987_v42, %v7706_v27  ;;  %v15631_v62 = vmov 0  ;;  %v15634_v42 = vld [vmem:[#allocation87_spill] sm:$0xff] }
 0x179   : > { %vm4061_vm10 = vmand %vm15611_vm4, %vm8090_vm6  ;;  %15619 = vst [vmem:[#allocation35_spill] sm:$0xff] %v8533_v15  ;;  %v8579_v52 = vadd.f32 %v707_v37, %v7746_v17  ;;  %v2019_v35 = vsub.f32 %v15603_v54, %v15348_v34  ;;  %v2973_v2 = vsub.f32 %v15603_v54, %v15349_v11  ;;  %v15639_v17 = vld [vmem:[#allocation21_spill] sm:$0xff]  ;;  %v3035_v11 = vmul.f32 %v2971_v14, %v2971_v14 }
 0x17a   : > { %vm8515_vm8 = vmand %vm15613_vm7, %vm15612_vm2  ;;  %15620 = vst [vmem:[#allocation41_spill] sm:$0xff] %v8536_v22  ;;  %v631_v34 = vsub.f32 %v15639_v17, %v15362_v25  ;;  %vm15640_vm2 = vcmp.eq.f32.partialorder %v15602_v4, %v15460_v53  ;;  %vm15645_vm7 = vcmp.ne.s32.totalorder %v747_v13, %v7985_v40  ;;  %v15650_v37 = vmov 0 }
 0x17b   : > { %vm8523_vm9 = vmand %vm15616_vm14, %vm8045_vm3  ;;  %15621 = vst [vmem:[#allocation42_spill] sm:$0xff] %v8539_v59  ;;  %vm15627_vm14 = vcmp.ne.s32.totalorder %v8437_v8, %v7985_v40  ;;  %v663_v17 = vmul.f32 %v8433_v6, %v8433_v6  ;;  %v3927_v14 = vsub.f32 %v15603_v54, %v15350_v23  ;;  %v15654_v59 = vld [vmem:[#allocation10_spill] sm:$0xff]  ;;  %v15658_v23 = vld [vmem:[#allocation28_spill] sm:$0xff]  ;;  %v15673_v25 = vmov 0 }
 0x17c   : > { %vm4093_vm4 = vmand %vm8414_vm5, %vm4061_vm10  ;;  %15625 = vst [vmem:[#allocation25_spill] sm:$0xff] %v8551_v31  ;;  %v463_v31 = vsub.f32 %v15634_v42, %v6764_v49  ;;  %v15642_v49 = vmov 0  ;;  %vm4013_vm10 = vcmp.ne.s32.totalorder %v747_v13, %v8005_v57  ;;  %v8633_v42 = vadd.f32 %v2081_v30, %v7751_v46 }
 0x17d   : > { %vm8545_vm5 = vmand %vm4093_vm4, %vm4109_vm0  ;;  %vm15630_vm0 = vcmp.eq.s32.totalorder %v8424_v41, 1  ;;  %15633 = vst [vmem:[#allocation13_spill] sm:$0xff] %v8579_v52  ;;  %v709_v52 = vmul.f32 %v645_v0, %v645_v0  ;;  %v1066_v22 = vmax.f32 %v15654_v59, 1e-12  ;;  %v8655_v6 = vadd.f32 %v3035_v11, %v15658_v23 }
 0x17e   : > { %v15623_v5 = vsel %vm8545_vm5, 4294967295, %v15622_v5  ;;  %vm8561_vm13 = vmand %vm15627_vm14, %vm15626_vm11  ;;  %v8575_v27 = vsel %vm8545_vm5, %v4141_v44, 1.0  ;;  %vm15635_vm11 = vcmp.eq.f32.partialorder %v7741_v47, %v15455_v9  ;;  %vm15636_vm14 = vcmp.ne.s32.totalorder %v747_v13, %v7971_v10  ;;  %15652 = vst [vmem:[#allocation81_spill] sm:$0xff] %v8633_v42 }
 0x17f   : > { %15624 = vst [vmem:[#allocation74_spill] sm:$0xff] %v15623_v5  ;;  %vm8569_vm4 = vmand %vm15630_vm0, %vm8073_vm15  ;;  %vm15641_vm5 = vcmp.ne.s32.totalorder %v8437_v8, %v7995_v19  ;;  %v3989_v5 = vmul.f32 %v3925_v48, %v3925_v48  ;;  %v2083_v48 = vmul.f32 %v2019_v35, %v2019_v35  ;;  %v3037_v30 = vmul.f32 %v2973_v2, %v2973_v2  ;;  %v15664_v35 = vld [vmem:[#allocation29_spill] sm:$0xff] }
 0x180   : > { %v15632_v62 = vsel %vm8569_vm4, 4294967295, %v15631_v62  ;;  %vm8592_vm0 = vmand %vm15636_vm14, %vm15635_vm11  ;;  %vm15644_vm14 = vcmp.eq.f32.partialorder %v7741_v47, %v15459_v61  ;;  %15659 = vst [vmem:[#allocation7_spill] sm:$0xff] %v8655_v6  ;;  %v695_v54 = vmul.f32 %v631_v34, %v631_v34  ;;  %v15660_v0 = vmov 0  ;;  %v15666_v34 = vld [vmem:[#allocation33_spill] sm:$0xff] }
 0x181   : > { %vm8608_vm11 = vmand %vm15641_vm5, %vm15640_vm2  ;;  %vm15648_vm2 = vcmp.eq.f32.partialorder %v7741_v47, %v15460_v53  ;;  %vm15649_vm5 = vcmp.ne.s32.totalorder %v747_v13, %v7995_v19  ;;  %v647_v13 = vmul.f32 %v463_v31, %v463_v31  ;;  %v8677_v2 = vadd.f32 %v3989_v5, %v15664_v35  ;;  %v15670_v35 = vld [vmem:[#allocation54_spill] sm:$0xff] }
 0x182   : > { %v15643_v49 = vsel %vm8608_vm11, 4294967295, %v15642_v49  ;;  %vm8617_vm4 = vmand %vm15645_vm7, %vm15644_vm14  ;;  %vm15653_vm7 = vcmp.eq.s32.totalorder %v8530_v55, 1  ;;  %v5794_v44 = vadd.f32 -0.0195141, %v7976_v7  ;;  %v2228_v11 = vmax.f32 %v15666_v34, 1e-12 }
 0x183   : > { %vm8628_vm11 = vmand %vm15649_vm5, %vm15648_vm2  ;;  %vm1034_vm2 = vcmp.lt.f32.partialorder %v15654_v59, 0.16  ;;  %vm15655_vm5 = vcmp.eq.f32.partialorder %v7741_v47, %v15461_v28  ;;  %v737_v59 = vadd.s32 72, %v15472_v21  ;;  %v5793_v47 = vadd.f32 -0.0195141, %v7962_v50  ;;  %15665 = vst [vmem:[#allocation36_spill] sm:$0xff] %v8677_v2 }
 0x184   : > { %v15651_v37 = vsel %vm8628_vm11, 4294967295, %v15650_v37  ;;  %vm986_vm14 = vmand %vm15653_vm7, %vm8013_vm12  ;;  %v679_v23 = vadd.f32 %v663_v17, %v647_v13  ;;  %v15667_v5 = vmov 0  ;;  %v15679_v13 = vld [vmem:[#allocation31_spill] sm:$0xff]  ;;  %v1073_v51 = vmax.f32 %v15739_v63, 1e-12 }
 0x185   : > { %vm8648_vm11 = vmand %vm4013_vm10, %vm15655_vm5  ;;  %vm15672_vm10 = vcmp.eq.s32.totalorder %v8424_v41, 1  ;;  %v8718_v41 = vadd.f32 %v2083_v48, %v15679_v13  ;;  %v1178_v48 = vrot.slane %v5793_v47, 7  ;;  %v15692_v47 = vld [vmem:[#allocation55_spill] sm:$0xff]  ;;  %v8762_v13 = vpop.permute.xlu0 %942 }
 0x186   : > { %vm1018_vm15 = vmand %vm8592_vm0, %vm986_vm14  ;;  %vm2196_vm14 = vcmp.lt.f32.partialorder %v15666_v34, 0.16  ;;  %v15681_v34 = vld [vmem:[#allocation50_spill] sm:$0xff] }
 0x187   : > { %vm8657_vm7 = vmand %vm1018_vm15, %vm1034_vm2  ;;  %vm15663_vm15 = vcmp.eq.s32.totalorder %v8530_v55, 1  ;;  %15680 = vst [vmem:[#allocation21_spill] sm:$0xff] %v8718_v41 }
 0x188   : > { %v15661_v0 = vsel %vm8657_vm7, 4294967295, %v15660_v0  ;;  %v8670_v31 = vsel %vm8657_vm7, %v1066_v22, 1.0  ;;  %vm2148_vm0 = vmand %vm15663_vm15, %vm8045_vm3  ;;  %v3991_v22 = vmul.f32 %v3927_v14, %v3927_v14 }
 0x189   : > { %15662 = vst [vmem:[#allocation8_spill] sm:$0xff] %v15661_v0  ;;  %vm2180_vm2 = vmand %vm8617_vm4, %vm2148_vm0  ;;  %v8694_v0 = vadd.f32 %v709_v52, %v15670_v35  ;;  %vm15675_vm4 = vnez %v15495_v39  ;;  %vm15676_vm0 = vcmp.eq.s32.totalorder %v8530_v55, 1  ;;  %v754_v52 = vadd.s32 %v7968_v36, %v737_v59 }
 0x18a   : > { %vm8689_vm15 = vmand %vm2180_vm2, %vm2196_vm14  ;;  %v8721_v35 = vadd.f32 %v3037_v30, %v15681_v34  ;;  %vm15684_vm2 = vnez %v15643_v49  ;;  %v2292_v30 = vrot.slane %v5794_v44, 7  ;;  %v8755_v44 = vadd.f32 %v3991_v22, %v15692_v47 }
 0x18b   : > { %v15668_v5 = vsel %vm8689_vm15, 4294967295, %v15667_v5  ;;  %15671 = vst [vmem:[#allocation87_spill] sm:$0xff] %v8694_v0  ;;  %vm8700_vm7 = vmand %vm15672_vm10, %vm8090_vm6  ;;  %v8706_v17 = vsel %vm8689_vm15, %v2228_v11, 1.0  ;;  %v8723_v0 = vadd.f32 %v695_v54, %v679_v23  ;;  %v5795_v11 = vadd.f32 -0.0195141, %v7990_v43  ;;  %v15687_v54 = vld [vmem:[#allocation9_spill] sm:$0xff] }
 0x18c   : > { %15669 = vst [vmem:[#allocation84_spill] sm:$0xff] %v15668_v5  ;;  %v15674_v25 = vsel %vm8700_vm7, 4294967295, %v15673_v25  ;;  %vm8712_vm14 = vmand %vm15676_vm0, %vm15675_vm4  ;;  %vm15683_vm10 = vnez %v15632_v62  ;;  %v15685_v5 = vld [vmem:[#allocation17_spill] sm:$0xff]  ;;  %vm15686_vm15 = vnez %v15651_v37  ;;  %v5796_v59 = vadd.f32 -0.0195141, %v15687_v54 }
 0x18d   : > { %15682 = vst [vmem:[#allocation10_spill] sm:$0xff] %v8721_v35  ;;  %vm3150_vm5 = vcmp.lt.f32.partialorder %v15685_v5, 0.16  ;;  %v3182_v2 = vmax.f32 %v15685_v5, 1e-12  ;;  %vm3134_vm4 = vmand %vm15686_vm15, %vm8712_vm14  ;;  %v15688_v23 = vmov 0  ;;  %v8778_v47 = vmul.f32 %v7962_v50, %v1178_v48 }
 0x18e   : > { %vm8739_vm7 = vmand %vm3134_vm4, %vm3150_vm5  ;;  %15693 = vst [vmem:[#allocation29_spill] sm:$0xff] %v8755_v44  ;;  %v15694_v5 = vld [vmem:[#allocation16_spill] sm:$0xff]  ;;  %v8767_v34 = vsub.s32 5, %v15472_v21  ;;  %v3246_v55 = vrot.slane %v5795_v11, 7  ;;  %v15697_v22 = vmov 0  ;;  %v8796_v50 = vmul.f32 %v7976_v7, %v2292_v30  ;;  %v15767_v35 = vld [vmem:[#allocation78_spill] sm:$0xff] }
 0x18f   : > { %v15689_v23 = vsel %vm8739_vm7, 4294967295, %v15688_v23  ;;  %v8748_v37 = vsel %vm8739_vm7, %v3182_v2, 1.0  ;;  %vm15691_vm15 = vmmov %vm15676_vm0  ;;  %vm4104_vm5 = vcmp.lt.f32.partialorder %v15694_v5, 0.16  ;;  %v4136_v14 = vmax.f32 %v15694_v5, 1e-12  ;;  %v8764_v2 = vpop.eup %5890 }
 0x190   : > { %15690 = vst [vmem:[#allocation28_spill] sm:$0xff] %v15689_v23  ;;  %vm4056_vm14 = vmand %vm15691_vm15, %vm8090_vm6  ;;  %v8775_v46 = vpop.eup %5892  ;;  %v4200_v5 = vrot.slane %v5796_v59, 7  ;;  %v15707_v48 = vld [vmem:[#allocation48_spill] sm:$0xff]  ;;  %vm15709_vm7 = vcmp.ne.s32.totalorder %v754_v52, %v7971_v10  ;;  %v8815_v7 = vmul.f32 %v8764_v2, %v8079_v60  ;;  %v15714_v30 = vmov 0 }
 0x191   : > { %vm4088_vm4 = vmand %vm8648_vm11, %vm4056_vm14  ;;  %15695 = vst [vmem:[#allocation33_spill] sm:$0xff] %v8764_v2  ;;  %vm15702_vm11 = vcmp.eq.f32.partialorder %v15602_v4, %v15461_v28  ;;  %vm15703_vm14 = vcmp.ne.s32.totalorder %v8437_v8, %v8005_v57  ;;  %vm15708_vm3 = vcmp.eq.f32.partialorder %v15707_v48, %v15455_v9  ;;  %v8811_v4 = vrot.slane %v8778_v47, %v8767_v34 }
 0x192   : > { %15696 = vst [vmem:[#allocation54_spill] sm:$0xff] %v8767_v34  ;;  %vm8770_vm15 = vmand %vm4088_vm4, %vm4104_vm5  ;;  %vm1032_vm4 = vcmp.lt.f32.partialorder %v8723_v0, 0.16  ;;  %vm15718_vm5 = vcmp.ne.s32.totalorder %v754_v52, %v7985_v40  ;;  %v8839_v60 = vrot.slane %v8796_v50, %v8767_v34  ;;  %v8842_v38 = vmul.f32 %v7990_v43, %v3246_v55 }
 0x193   : > { %v15698_v22 = vsel %vm8770_vm15, 4294967295, %v15697_v22  ;;  %15700 = vst [vmem:[#allocation50_spill] sm:$0xff] %v8775_v46  ;;  %15701 = vst [vmem:[#allocation17_spill] sm:$0xff] %v8778_v47  ;;  %v8792_v23 = vsel %vm8770_vm15, %v4136_v14, 1.0  ;;  %v8846_v1 = vmul.f32 %v8775_v46, %v8100_v32  ;;  %v15723_v14 = vld [vmem:[#allocation20_spill] sm:$0xff]  ;;  %v8861_v43 = vmul.f32 %v15687_v54, %v4200_v5  ;;  %v15737_v5 = vld [vmem:[#allocation27_spill] sm:$0xff] }
 0x194   : > { %15699 = vst [vmem:[#allocation31_spill] sm:$0xff] %v15698_v22  ;;  %vm8786_vm0 = vmand %vm15703_vm14, %vm15702_vm11  ;;  %vm15717_vm14 = vcmp.eq.f32.partialorder %v15707_v48, %v15459_v61  ;;  %v8858_v22 = vpop.eup %5894  ;;  %v15731_v32 = vmov 0  ;;  %v8881_v54 = vrot.slane %v8842_v38, %v8767_v34  ;;  %vm3148_vm6 = vcmp.lt.f32.partialorder %v15737_v5, 0.16  ;;  %v15756_v47 = vld [vmem:[#allocation43_spill] sm:$0xff] }
 0x195   : > { %15706 = vst [vmem:[#allocation9_spill] sm:$0xff] %v8796_v50  ;;  %vm8804_vm11 = vmand %vm15709_vm7, %vm15708_vm3  ;;  %v8877_v55 = vpop.eup %5896  ;;  %v1202_v50 = vsub.f32 %v8815_v7, %v8811_v4  ;;  %v732_v8 = vadd.s32 32, %v15472_v21  ;;  %v2226_v62 = vmax.f32 %v15723_v14, 1e-12  ;;  %v8958_v44 = vmul.f32 0.25, %v8815_v7 }
 0x196   : > { %15712 = vst [vmem:[#allocation55_spill] sm:$0xff] %v8815_v7  ;;  %vm15713_vm3 = vmand %vm8515_vm8, %vm8489_vm1  ;;  %vm2194_vm1 = vcmp.lt.f32.partialorder %v15723_v14, 0.16  ;;  %vm15724_vm8 = vcmp.eq.f32.partialorder %v15707_v48, %v15460_v53  ;;  %v3180_v14 = vmax.f32 %v15737_v5, 1e-12  ;;  %5908 = vrsqrt.f32 %v15767_v35 }
 0x197   : > { %vm8823_vm7 = vmand %vm15713_vm3, %vm1032_vm4  ;;  %15721 = vst [vmem:[#allocation48_spill] sm:$0xff] %v8842_v38  ;;  %v8903_v38 = vrot.slane %v8861_v43, %v8767_v34  ;;  %v2316_v34 = vsub.f32 %v8846_v1, %v8839_v60  ;;  %v749_v59 = vadd.s32 %v7968_v36, %v732_v8 }
 0x198   : > { %v15715_v30 = vsel %vm8823_vm7, 4294967295, %v15714_v30  ;;  %vm8832_vm15 = vmand %vm15718_vm5, %vm15717_vm14  ;;  %15722 = vst [vmem:[#allocation92_spill] sm:$0xff] %v8846_v1  ;;  %vm15725_vm5 = vcmp.ne.s32.totalorder %v754_v52, %v7995_v19  ;;  %vm15738_vm7 = vnez %v15674_v25  ;;  %v15798_v25 = vld [vmem:[#allocation30_spill] sm:$0xff] }
 0x199   : > { %15716 = vst [vmem:[#allocation16_spill] sm:$0xff] %v15715_v30  ;;  %vm8854_vm4 = vmand %vm15725_vm5, %vm15724_vm8  ;;  %vm15734_vm8 = vcmp.eq.s32.totalorder %v8762_v13, 1 }
 0x19a   : > { %15728 = vst [vmem:[#allocation20_spill] sm:$0xff] %v8858_v22  ;;  %15729 = vst [vmem:[#allocation93_spill] sm:$0xff] %v8861_v43  ;;  %v8939_v43 = vmul.f32 %v8877_v55, %v8135_v20  ;;  %v8953_v20 = vpop.eup %5898 }
 0x19b   : > { %vm15730_vm14 = vmand %vm8561_vm13, %vm8523_vm9  ;;  %15735 = vst [vmem:[#allocation95_spill] sm:$0xff] %v8877_v55  ;;  %vm1041_vm9 = vcmp.lt.f32.partialorder %v15739_v63, 0.16  ;;  %v1064_v63 = vmax.f32 %v8723_v0, 1e-12  ;;  %v8926_v0 = vmul.f32 %v8858_v22, %v8118_v33  ;;  %v15758_v22 = vmov 0 }
 0x19c   : > { %vm8869_vm3 = vmand %vm15730_vm14, %vm2194_vm1  ;;  %15736 = vst [vmem:[#allocation96_spill] sm:$0xff] %v8881_v54  ;;  %vm15740_vm1 = vcmp.eq.f32.partialorder %v15707_v48, %v15461_v28  ;;  %vm15741_vm14 = vcmp.ne.s32.totalorder %v754_v52, %v8005_v57  ;;  %v15746_v52 = vmov 0  ;;  %v15749_v48 = vmov 0 }
 0x19d   : > { %v15732_v32 = vsel %vm8869_vm3, 4294967295, %v15731_v32  ;;  %vm993_vm5 = vmand %vm15734_vm8, %vm8013_vm12  ;;  %15744 = vst [vmem:[#allocation27_spill] sm:$0xff] %v8903_v38  ;;  %v2235_v33 = vmax.f32 %v15756_v47, 1e-12  ;;  %v8955_v55 = vand.u32 2147483647, %v1202_v50  ;;  %v3270_v5 = vsub.f32 %v8926_v0, %v8881_v54 }
 0x19e   : > { %15733 = vst [vmem:[#allocation94_spill] sm:$0xff] %v15732_v32  ;;  %vm8895_vm8 = vmand %vm15741_vm14, %vm15740_vm1  ;;  %v15768_v50 = vld [vmem:[#allocation38_spill] sm:$0xff]  ;;  %v8984_v8 = vmul.f32 0.25, %v8926_v0  ;;  %v4224_v7 = vsub.f32 %v8939_v43, %v8903_v38  ;;  %v8994_v2 = vmul.f32 %v8953_v20, %v8178_v56  ;;  %v9035_v46 = vmul.f32 0.25, %v8939_v43 }
 0x19f   : > { %vm1025_vm12 = vmand %vm8804_vm11, %vm993_vm5  ;;  %15752 = vst [vmem:[#allocation98_spill] sm:$0xff] %v8926_v0  ;;  %v15783_v0 = vld [vmem:[#allocation44_spill] sm:$0xff] }
 0x1a0   : > { %vm15745_vm1 = vmand %vm15684_vm2, %vm15683_vm10  ;;  %15755 = vst [vmem:[#allocation99_spill] sm:$0xff] %v8939_v43  ;;  %vm2203_vm2 = vcmp.lt.f32.partialorder %v15756_v47, 0.16  ;;  %v4143_v56 = vmax.f32 %v15783_v0, 1e-12  ;;  %v15812_v43 = vld [vmem:[#allocation82_spill] sm:$0xff] }
 0x1a1   : > { %vm8913_vm14 = vmand %vm15745_vm1, %vm3148_vm6  ;;  %vm15754_vm6 = vcmp.eq.s32.totalorder %v8762_v13, 1  ;;  %15762 = vst [vmem:[#allocation100_spill] sm:$0xff] %v8955_v55  ;;  %v8981_v55 = vmul.f32 0.25, %v8846_v1 }
 0x1a2   : > { %v15747_v52 = vsel %vm8913_vm14, 4294967295, %v15746_v52  ;;  %vm8917_vm13 = vmand %vm1025_vm12, %vm1041_vm9  ;;  %vm15753_vm12 = vnez %v15487_v16  ;;  %15763 = vst [vmem:[#allocation101_spill] sm:$0xff] %v8958_v44  ;;  %v3189_v44 = vmax.f32 %v15768_v50, 1e-12  ;;  %v9060_v11 = vsel %vm8913_vm14, %v3180_v14, 1.0 }
 0x1a3   : > { %15748 = vst [vmem:[#allocation37_spill] sm:$0xff] %v15747_v52  ;;  %v15750_v48 = vsel %vm8917_vm13, 4294967295, %v15749_v48  ;;  %v8931_v49 = vsel %vm8917_vm13, %v1073_v51, 1.0  ;;  %vm2155_vm10 = vmand %vm15754_vm6, %vm15753_vm12  ;;  %v15757_v51 = vld [vmem:[#allocation32_spill] sm:$0xff] }
 0x1a4   : > { %15751 = vst [vmem:[#allocation97_spill] sm:$0xff] %v15750_v48  ;;  %vm2187_vm11 = vmand %vm8832_vm15, %vm2155_vm10  ;;  %v4134_v48 = vmax.f32 %v15757_v51, 1e-12  ;;  %vm15765_vm15 = vnez %v15495_v39  ;;  %vm3157_vm10 = vcmp.lt.f32.partialorder %v15768_v50, 0.16  ;;  %v15777_v50 = vld [vmem:[#allocation22_spill] sm:$0xff] }
 0x1a5   : > { %vm8949_vm9 = vmand %vm2187_vm11, %vm2203_vm2  ;;  %15761 = vst [vmem:[#allocation32_spill] sm:$0xff] %v8953_v20  ;;  %5910 = vrsqrt.f32 %v15777_v50  ;;  %v9027_v20 = vsel %vm8869_vm3, %v2226_v62, 1.0 }
 0x1a6   : > { %v15759_v22 = vsel %vm8949_vm9, 4294967295, %v15758_v22  ;;  %v8962_v47 = vsel %vm8949_vm9, %v2235_v33, 1.0  ;;  %vm15766_vm1 = vmmov %vm15754_vm6  ;;  %v8976_v33 = vpop.eup %5900  ;;  %15771 = vst [vmem:[#allocation103_spill] sm:$0xff] %v8981_v55  ;;  %v15782_v55 = vld [vmem:[#allocation23_spill] sm:$0xff] }
 0x1a7   : > { %15760 = vst [vmem:[#allocation43_spill] sm:$0xff] %v15759_v22  ;;  %15764 = vst [vmem:[#allocation102_spill] sm:$0xff] %v8962_v47  ;;  %v8978_v22 = vand.u32 2147483647, %v2316_v34  ;;  %v15773_v47 = vmov 0  ;;  %5912 = vrsqrt.f32 %v15782_v55 }
 0x1a8   : > { %vm3109_vm6 = vmand %vm15766_vm1, %vm15765_vm15  ;;  %15769 = vst [vmem:[#allocation78_spill] sm:$0xff] %v8976_v33  ;;  %vm15780_vm1 = vnez %v15498_v26 }
 0x1a9   : > { %vm3141_vm2 = vmand %vm8854_vm4, %vm3109_vm6  ;;  %15770 = vst [vmem:[#allocation38_spill] sm:$0xff] %v8978_v22  ;;  %vm15778_vm4 = vnez %v15715_v30  ;;  %vm15781_vm6 = vcmp.eq.s32.totalorder %v8762_v13, 1  ;;  %v9023_v13 = vmul.f32 %v8976_v33, %v8193_v24  ;;  %v15793_v24 = vmov 0 }
 0x1aa   : > { %15772 = vst [vmem:[#allocation104_spill] sm:$0xff] %v8984_v8  ;;  %vm8988_vm11 = vmand %vm3141_vm2, %vm3157_vm10  ;;  %v8999_v34 = vsel %vm15778_vm4, %v1064_v63, 1.0  ;;  %vm4111_vm2 = vcmp.lt.f32.partialorder %v15783_v0, 0.16  ;;  %v9015_v63 = vpop.permute.xlu1 %927  ;;  %v15787_v0 = vmov 0 }
 0x1ab   : > { %v15774_v47 = vsel %vm8988_vm11, 4294967295, %v15773_v47  ;;  %15776 = vst [vmem:[#allocation106_spill] sm:$0xff] %v8994_v2  ;;  %v9003_v8 = vsel %vm8988_vm11, %v3189_v44, 1.0  ;;  %vm4063_vm10 = vmand %vm15781_vm6, %vm15780_vm1  ;;  %v9017_v44 = vpop.eup %5902  ;;  %5914 = vrsqrt.f32 %v8999_v34  ;;  %v9073_v33 = vand.u32 2147483647, %v4224_v7 }
 0x1ac   : > { %15775 = vst [vmem:[#allocation105_spill] sm:$0xff] %v15774_v47  ;;  %15779 = vst [vmem:[#allocation22_spill] sm:$0xff] %v9003_v8  ;;  %v9019_v47 = vand.u32 2147483647, %v3270_v5  ;;  %v9054_v5 = vpop.eup %5904  ;;  %5916 = vrsqrt.f32 %v9027_v20  ;;  %v2318_v7 = vsub.f32 %v9023_v13, %v8839_v60  ;;  %v2230_v22 = vmax.f32 %v15812_v43, 1e-12 }
 0x1ad   : > { %vm4095_vm5 = vmand %vm8895_vm8, %vm4063_vm10  ;;  %15784 = vst [vmem:[#allocation23_spill] sm:$0xff] %v9017_v44  ;;  %vm2107_vm8 = vcmp.ne.s32.totalorder %v749_v59, %v7985_v40  ;;  %vm15791_vm10 = vcmp.lt.f32.partialorder %v15757_v51, 0.16  ;;  %v1204_v51 = vsub.f32 %v8994_v2, %v8811_v4  ;;  %5918 = vrsqrt.f32 %v9060_v11  ;;  %v9116_v1 = vpop.eup %5906 }
 0x1ae   : > { %15785 = vst [vmem:[#allocation44_spill] sm:$0xff] %v9019_v47  ;;  %15786 = vst [vmem:[#allocation107_spill] sm:$0xff] %v9023_v13  ;;  %v9104_v47 = vmul.f32 %v9054_v5, %v8230_v58  ;;  %v9121_v58 = vmul.f32 0.25, %v8994_v2  ;;  %v9139_v2 = vmul.f32 0.25, %v9023_v13  ;;  %v9153_v32 = vand.u32 2147483647, %v2318_v7  ;;  %v9165_v13 = vpop.eup %5908 }
 0x1af   : > { %vm9029_vm6 = vmand %vm4095_vm5, %vm4111_vm2  ;;  %15790 = vst [vmem:[#allocation109_spill] sm:$0xff] %v9035_v46  ;;  %vm3061_vm5 = vcmp.ne.s32.totalorder %v749_v59, %v7995_v19  ;;  %v9077_v46 = vmul.f32 %v9017_v44, %v8211_v12  ;;  %vm15808_vm2 = vcmp.eq.f32.partialorder %v15798_v25, %v15460_v53  ;;  %v15811_v44 = vld [vmem:[#allocation72_spill] sm:$0xff]  ;;  %v9118_v52 = vand.u32 2147483647, %v1204_v51  ;;  %v9136_v51 = vpop.permute.xlu1 %933  ;;  %v15855_v12 = vld [vmem:[#allocation49_spill] sm:$0xff] }
 0x1b0   : > { %v15788_v0 = vsel %vm9029_vm6, 4294967295, %v15787_v0  ;;  %vm15792_vm9 = vmand %vm8786_vm0, %vm15738_vm7  ;;  %v9051_v62 = vsel %vm9029_vm6, %v4143_v56, 1.0  ;;  %15797 = vst [vmem:[#allocation112_spill] sm:$0xff] %v9054_v5  ;;  %vm15799_vm0 = vcmp.eq.f32.partialorder %v15798_v25, %v15455_v9  ;;  %vm15800_vm7 = vcmp.ne.s32.totalorder %v749_v59, %v7971_v10  ;;  %v15822_v5 = vld [vmem:[#allocation76_spill] sm:$0xff] }
 0x1b1   : > { %15789 = vst [vmem:[#allocation108_spill] sm:$0xff] %v15788_v0  ;;  %vm9045_vm11 = vmand %vm15792_vm9, %vm15791_vm10  ;;  %v739_v56 = vadd.s32 88, %v15472_v21  ;;  %vm15805_vm10 = vcmp.eq.f32.partialorder %v15798_v25, %v15459_v61  ;;  %v3184_v0 = vmax.f32 %v15822_v5, 1e-12  ;;  %v4226_v30 = vsub.f32 %v9104_v47, %v8903_v38 }
 0x1b2   : > { %v15794_v24 = vsel %vm9045_vm11, 4294967295, %v15793_v24  ;;  %15796 = vst [vmem:[#allocation111_spill] sm:$0xff] %v9051_v62  ;;  %vm9067_vm9 = vmand %vm15800_vm7, %vm15799_vm0  ;;  %vm4015_vm7 = vcmp.ne.s32.totalorder %v749_v59, %v8005_v57  ;;  %v9109_v59 = vsel %vm9045_vm11, %v4134_v48, 1.0  ;;  %v9171_v7 = vmul.f32 %v9116_v1, %v8277_v3  ;;  %v9191_v3 = vpop.eup %5910 }
 0x1b3   : > { %15795 = vst [vmem:[#allocation110_spill] sm:$0xff] %v15794_v24  ;;  %15803 = vst [vmem:[#allocation30_spill] sm:$0xff] %v9073_v33  ;;  %v1068_v33 = vmax.f32 %v15811_v44, 1e-12  ;;  %v9134_v24 = vadd.s32 %v7968_v36, %v739_v56  ;;  %v9151_v56 = vpop.permute.xlu0 %948  ;;  %5920 = vrsqrt.f32 %v9109_v59  ;;  %v15837_v62 = vmov 0 }
 0x1b4   : > { %15804 = vst [vmem:[#allocation113_spill] sm:$0xff] %v9077_v46  ;;  %vm9085_vm0 = vmand %vm2107_vm8, %vm15805_vm10  ;;  %vm15819_vm8 = vcmp.eq.f32.partialorder %v15798_v25, %v15461_v28  ;;  %v3272_v25 = vsub.f32 %v9077_v46, %v8881_v54  ;;  %5922 = vrsqrt.f32 %v8441_v45 }
 0x1b5   : > { %vm9095_vm6 = vmand %vm3061_vm5, %vm15808_vm2  ;;  %15813 = vst [vmem:[#allocation72_spill] sm:$0xff] %v9104_v47  ;;  %vm15814_vm5 = vnez %v15479_v29  ;;  %vm15815_vm2 = vcmp.eq.s32.totalorder %v9015_v63, 1  ;;  %5924 = vrsqrt.f32 %v8462_v18 }
 0x1b6   : > { %vm988_vm10 = vmand %vm15815_vm2, %vm15814_vm5  ;;  %15816 = vst [vmem:[#allocation82_spill] sm:$0xff] %v9116_v1  ;;  %v9193_v14 = vand.u32 2147483647, %v3272_v25  ;;  %v9213_v25 = vmul.f32 %v9165_v13, %v15767_v35  ;;  %v9220_v1 = vpop.permute.xlu1 %939  ;;  %v15852_v35 = vmov 0 }
 0x1b7   : > { %15817 = vst [vmem:[#allocation114_spill] sm:$0xff] %v9118_v52  ;;  %15818 = vst [vmem:[#allocation115_spill] sm:$0xff] %v9121_v58  ;;  %v15825_v58 = vmov 0  ;;  %v15828_v52 = vld [vmem:[#allocation83_spill] sm:$0xff] }
 0x1b8   : > { %vm9126_vm13 = vmand %vm4015_vm7, %vm15819_vm8  ;;  %15823 = vst [vmem:[#allocation76_spill] sm:$0xff] %v9139_v2  ;;  %vm15824_vm7 = vcmp.lt.f32.partialorder %v15811_v44, 0.16  ;;  %v4138_v44 = vmax.f32 %v15828_v52, 1e-12  ;;  %v9294_v48 = vmul.f32 0.25, %v9213_v25 }
 0x1b9   : > { %vm1020_vm11 = vmand %vm9067_vm9, %vm988_vm10  ;;  %15829 = vst [vmem:[#allocation83_spill] sm:$0xff] %v9153_v32 }
 0x1ba   : > { %vm9145_vm8 = vmand %vm1020_vm11, %vm15824_vm7  ;;  %15832 = vst [vmem:[#allocation118_spill] sm:$0xff] %v9165_v13  ;;  %v15867_v13 = vmov 0 }
 0x1bb   : > { %v15826_v58 = vsel %vm9145_vm8, 4294967295, %v15825_v58  ;;  %v9158_v2 = vsel %vm9145_vm8, %v1068_v33, 1.0  ;;  %vm15831_vm11 = vmmov %vm15815_vm2  ;;  %15833 = vst [vmem:[#allocation119_spill] sm:$0xff] %v9171_v7  ;;  %v15834_v33 = vld [vmem:[#allocation47_spill] sm:$0xff]  ;;  %vm776_vm2 = vcmp.ne.s32.totalorder %v9134_v24, %v7971_v10 }
 0x1bc   : > { %15827 = vst [vmem:[#allocation116_spill] sm:$0xff] %v15826_v58  ;;  %15830 = vst [vmem:[#allocation117_spill] sm:$0xff] %v9158_v2  ;;  %v734_v58 = vadd.s32 48, %v15472_v21  ;;  %v9178_v2 = vmul.f32 0.25, %v9077_v46  ;;  %v9209_v46 = vmul.f32 0.25, %v9104_v47  ;;  %v1206_v47 = vsub.f32 %v9171_v7, %v8811_v4 }
 0x1bd   : > { %vm2150_vm10 = vmand %vm15831_vm11, %vm15753_vm12  ;;  %vm15836_vm11 = vcmp.lt.f32.partialorder %v15812_v43, 0.16  ;;  %15840 = vst [vmem:[#allocation121_spill] sm:$0xff] %v9191_v3  ;;  %v15844_v43 = vld [vmem:[#allocation52_spill] sm:$0xff] }
 0x1be   : > { %vm2182_vm7 = vmand %vm9085_vm0, %vm2150_vm10  ;;  %15835 = vst [vmem:[#allocation47_spill] sm:$0xff] %v9178_v2  ;;  %vm15843_vm10 = vcmp.eq.s32.totalorder %v9015_v63, 1  ;;  %v9206_v2 = vpop.eup %5912 }
 0x1bf   : > { %vm9182_vm9 = vmand %vm2182_vm7, %vm15836_vm11  ;;  %15841 = vst [vmem:[#allocation122_spill] sm:$0xff] %v9193_v14  ;;  %vm15851_vm11 = vcmp.lt.f32.partialorder %v15822_v5, 0.16  ;;  %v9234_v14 = vadd.s32 %v7968_v36, %v734_v58  ;;  %v15860_v58 = vld [vmem:[#allocation24_spill] sm:$0xff] }
 0x1c0   : > { %v15838_v62 = vsel %vm9182_vm9, 4294967295, %v15837_v62  ;;  %v9197_v32 = vsel %vm9182_vm9, %v2230_v22, 1.0  ;;  %vm3104_vm7 = vmand %vm15843_vm10, %vm15765_vm15  ;;  %15845 = vst [vmem:[#allocation52_spill] sm:$0xff] %v9206_v2  ;;  %v15848_v22 = vld [vmem:[#allocation53_spill] sm:$0xff] }
 0x1c1   : > { %15839 = vst [vmem:[#allocation120_spill] sm:$0xff] %v15838_v62  ;;  %15842 = vst [vmem:[#allocation123_spill] sm:$0xff] %v9197_v32  ;;  %v9222_v62 = vand.u32 2147483647, %v4226_v30  ;;  %v9240_v30 = vmul.f32 %v9191_v3, %v15777_v50  ;;  %v9258_v50 = vmul.f32 %v9206_v2, %v15782_v55  ;;  %v15870_v55 = vld [vmem:[#allocation86_spill] sm:$0xff]  ;;  %v741_v2 = vadd.s32 104, %v15472_v21  ;;  %v9277_v3 = vpop.permute.xlu0 %954 }
 0x1c2   : > { %15846 = vst [vmem:[#allocation124_spill] sm:$0xff] %v9209_v46  ;;  %15847 = vst [vmem:[#allocation125_spill] sm:$0xff] %v9213_v25  ;;  %v9236_v46 = vpop.eup %5914  ;;  %v736_v32 = vadd.s32 64, %v15472_v21  ;;  %vm15976_vm9 = vcmp.ne.s32.totalorder %v9234_v14, %v7985_v40 }
 0x1c3   : > { %vm3136_vm0 = vmand %vm9095_vm6, %vm3104_vm7  ;;  %15849 = vst [vmem:[#allocation53_spill] sm:$0xff] %v9220_v1  ;;  %v9264_v63 = vpop.eup %5916  ;;  %v9279_v1 = vand.u32 2147483647, %v1206_v47  ;;  %v3274_v47 = vsub.f32 %v9240_v30, %v8881_v54 }
 0x1c4   : > { %15850 = vst [vmem:[#allocation126_spill] sm:$0xff] %v9222_v62  ;;  %vm9228_vm8 = vmand %vm3136_vm0, %vm15851_vm11  ;;  %v9254_v62 = vmul.f32 0.25, %v9171_v7  ;;  %v9291_v8 = vpop.eup %5918 }
 0x1c5   : > { %v15853_v35 = vsel %vm9228_vm8, 4294967295, %v15852_v35  ;;  %15856 = vst [vmem:[#allocation49_spill] sm:$0xff] %v9236_v46  ;;  %15857 = vst [vmem:[#allocation128_spill] sm:$0xff] %v9240_v30  ;;  %v9245_v5 = vsel %vm9228_vm8, %v3184_v0, 1.0  ;;  %v15863_v0 = vld [vmem:[#allocation26_spill] sm:$0xff] }
 0x1c6   : > { %15854 = vst [vmem:[#allocation127_spill] sm:$0xff] %v15853_v35  ;;  %15858 = vst [vmem:[#allocation129_spill] sm:$0xff] %v9245_v5  ;;  %v15864_v35 = vld [vmem:[#allocation85_spill] sm:$0xff]  ;;  %v2320_v5 = vsub.f32 %v9213_v25, %v8839_v60  ;;  %v9316_v25 = vmul.f32 %v9264_v63, %v9027_v20  ;;  %v9364_v41 = vand.u32 2147483647, %v3274_v47  ;;  %v743_v47 = vadd.s32 120, %v15472_v21 }
 0x1c7   : > { %vm15859_vm6 = vmmov %vm15843_vm10  ;;  %15861 = vst [vmem:[#allocation24_spill] sm:$0xff] %v9254_v62  ;;  %v9283_v62 = vmul.f32 %v9236_v46, %v8999_v34  ;;  %v15878_v34 = vld [vmem:[#allocation57_spill] sm:$0xff]  ;;  %vm15891_vm10 = vcmp.ne.s32.totalorder %v9134_v24, %v7995_v19  ;;  %v15938_v46 = vmov 0 }
 0x1c8   : > { %vm4058_vm0 = vmand %vm15859_vm6, %vm15780_vm1  ;;  %15862 = vst [vmem:[#allocation130_spill] sm:$0xff] %v9258_v50  ;;  %vm15866_vm6 = vcmp.lt.f32.partialorder %v15828_v52, 0.16  ;;  %v9330_v52 = vand.u32 2147483647, %v2320_v5  ;;  %v15894_v5 = vld [vmem:[#allocation61_spill] sm:$0xff] }
 0x1c9   : > { %vm4090_vm11 = vmand %vm9126_vm13, %vm4058_vm0  ;;  %15865 = vst [vmem:[#allocation26_spill] sm:$0xff] %v9264_v63  ;;  %vm15879_vm0 = vcmp.eq.f32.partialorder %v15878_v34, %v15455_v9  ;;  %vm15890_vm13 = vcmp.eq.f32.partialorder %v15878_v34, %v15460_v53  ;;  %v9347_v63 = vadd.s32 %v7968_v36, %v741_v2  ;;  %v15898_v2 = vld [vmem:[#allocation62_spill] sm:$0xff] }
 0x1ca   : > { %vm9271_vm7 = vmand %vm4090_vm11, %vm15866_vm6  ;;  %15871 = vst [vmem:[#allocation86_spill] sm:$0xff] %v9277_v3  ;;  %vm15883_vm6 = vcmp.eq.f32.partialorder %v15878_v34, %v15459_v61  ;;  %v9333_v3 = vmul.f32 0.25, %v9240_v30  ;;  %v9356_v30 = vmul.f32 %v9291_v8, %v9060_v11  ;;  %v15956_v11 = vmov 0 }
 0x1cb   : > { %v15868_v13 = vsel %vm9271_vm7, 4294967295, %v15867_v13  ;;  %15872 = vst [vmem:[#allocation131_spill] sm:$0xff] %v9279_v1  ;;  %v9287_v7 = vsel %vm9271_vm7, %v4138_v44, 1.0  ;;  %15875 = vst [vmem:[#allocation133_spill] sm:$0xff] %v9291_v8  ;;  %v15877_v1 = vld [vmem:[#allocation73_spill] sm:$0xff]  ;;  %v15909_v44 = vmov 0  ;;  %v9445_v8 = vadd.s32 %v7968_v36, %v743_v47 }
 0x1cc   : > { %15869 = vst [vmem:[#allocation85_spill] sm:$0xff] %v15868_v13  ;;  %15873 = vst [vmem:[#allocation132_spill] sm:$0xff] %v9287_v7  ;;  %5926 = vrsqrt.f32 %v15877_v1  ;;  %v9310_v13 = vpop.permute.xlu1 %945  ;;  %v9367_v7 = vmul.f32 0.25, %v9258_v50  ;;  %v738_v47 = vadd.s32 80, %v15472_v21 }
 0x1cd   : > { %15876 = vst [vmem:[#allocation134_spill] sm:$0xff] %v9294_v48  ;;  %vm9305_vm11 = vmand %vm776_vm2, %vm15879_vm0  ;;  %v4228_v48 = vsub.f32 %v9258_v50, %v8903_v38  ;;  %5928 = vrsqrt.f32 %v8575_v27  ;;  %vm15884_vm2 = vcmp.ne.s32.totalorder %v9134_v24, %v7985_v40  ;;  %v9385_v50 = vpop.permute.xlu0 %960 }
 0x1ce   : > { %15882 = vst [vmem:[#allocation73_spill] sm:$0xff] %v9310_v13  ;;  %vm9325_vm0 = vmand %vm15884_vm2, %vm15883_vm6  ;;  %5930 = vrsqrt.f32 %v8670_v31  ;;  %vm15901_vm2 = vcmp.eq.f32.partialorder %v15878_v34, %v15461_v28  ;;  %vm15902_vm6 = vcmp.ne.s32.totalorder %v9134_v24, %v8005_v57  ;;  %v9382_v13 = vadd.s32 %v7968_v36, %v736_v32 }
 0x1cf   : > { %15888 = vst [vmem:[#allocation57_spill] sm:$0xff] %v9330_v52  ;;  %15889 = vst [vmem:[#allocation135_spill] sm:$0xff] %v9333_v3  ;;  %v9350_v52 = vpop.eup %5920  ;;  %v1201_v3 = vsub.f32 %v9283_v62, %v8811_v4  ;;  %v9390_v34 = vmul.f32 0.25, %v9283_v62  ;;  %v2315_v24 = vsub.f32 %v9316_v25, %v8839_v60  ;;  %5932 = vrsqrt.f32 %v8706_v17 }
 0x1d0   : > { %vm9341_vm7 = vmand %vm15891_vm10, %vm15890_vm13  ;;  %15895 = vst [vmem:[#allocation61_spill] sm:$0xff] %v9350_v52  ;;  %vm15897_vm10 = vcmp.eq.s32.totalorder %v9151_v56, 1  ;;  %5934 = vrsqrt.f32 %v8748_v37 }
 0x1d1   : > { %15896 = vst [vmem:[#allocation136_spill] sm:$0xff] %v9356_v30  ;;  %vm995_vm13 = vmand %vm15897_vm10, %vm15814_vm5  ;;  %5936 = vrsqrt.f32 %v8792_v23 }
 0x1d2   : > { %15899 = vst [vmem:[#allocation62_spill] sm:$0xff] %v9364_v41  ;;  %15900 = vst [vmem:[#allocation137_spill] sm:$0xff] %v9367_v7  ;;  %v9387_v7 = vand.u32 2147483647, %v4228_v48  ;;  %v15914_v41 = vmax.f32 %v15834_v33, 1e-12 }
 0x1d3   : > { %vm9375_vm8 = vmand %vm15902_vm6, %vm15901_vm2  ;;  %15905 = vst [vmem:[#allocation138_spill] sm:$0xff] %v9385_v50  ;;  %vm15908_vm2 = vcmp.lt.f32.partialorder %v15834_v33, 0.16  ;;  %v9435_v48 = vmul.f32 0.25, %v9316_v25  ;;  %v15930_v33 = vmax.f32 %v15844_v43, 1e-12 }
 0x1d4   : > { %vm1027_vm10 = vmand %vm9305_vm11, %vm995_vm13  ;;  %15906 = vst [vmem:[#allocation139_spill] sm:$0xff] %v9387_v7  ;;  %v9406_v7 = vmul.f32 %v9350_v52, %v9109_v59  ;;  %v9422_v59 = vpop.permute.xlu1 %951  ;;  %v9424_v52 = vand.u32 2147483647, %v1201_v3  ;;  %vm15922_vm13 = vcmp.lt.f32.partialorder %v15844_v43, 0.16  ;;  %v15923_v3 = vmov 0 }
 0x1d5   : > { %15907 = vst [vmem:[#allocation140_spill] sm:$0xff] %v9390_v34  ;;  %vm9397_vm11 = vmand %vm1027_vm10, %vm15908_vm2  ;;  %vm15916_vm10 = vcmp.eq.s32.totalorder %v9151_v56, 1  ;;  %v9473_v34 = vpop.permute.xlu0 %1240 }
 0x1d6   : > { %v15910_v44 = vsel %vm9397_vm11, 4294967295, %v15909_v44  ;;  %15913 = vst [vmem:[#allocation142_spill] sm:$0xff] %v9406_v7  ;;  %v9412_v50 = vsel %vm9397_vm11, %v15914_v41, 1.0  ;;  %vm2157_vm2 = vmand %vm15916_vm10, %vm15753_vm12  ;;  %v3269_v41 = vsub.f32 %v9356_v30, %v8881_v54  ;;  %vm3063_vm10 = vcmp.ne.s32.totalorder %v9234_v14, %v7995_v19 }
 0x1d7   : > { %15911 = vst [vmem:[#allocation141_spill] sm:$0xff] %v15910_v44  ;;  %15915 = vst [vmem:[#allocation143_spill] sm:$0xff] %v9412_v50  ;;  %v9449_v50 = vpop.eup %5922  ;;  %v9451_v44 = vand.u32 2147483647, %v2315_v24  ;;  %v4223_v24 = vsub.f32 %v9406_v7, %v8903_v38 }
 0x1d8   : > { %15919 = vst [vmem:[#allocation144_spill] sm:$0xff] %v9422_v59  ;;  %vm2189_vm6 = vmand %vm9325_vm0, %vm2157_vm2  ;;  %vm15932_vm0 = vcmp.eq.s32.totalorder %v9151_v56, 1  ;;  %v9477_v59 = vadd.f32 %v8811_v4, %v9283_v62  ;;  %v3285_v32 = vand.u32 2147483647, %v3269_v41  ;;  %v9497_v43 = vmul.f32 %v9449_v50, %v8441_v45  ;;  %v9514_v20 = vpop.permute.xlu1 %957 }
 0x1d9   : > { %15921 = vst [vmem:[#allocation145_spill] sm:$0xff] %v9435_v48  ;;  %vm9439_vm11 = vmand %vm2189_vm6, %vm15922_vm13  ;;  %v15944_v41 = vmax.f32 %v15848_v22, 1e-12  ;;  %v9519_v45 = vadd.f32 %v8881_v54, %v9356_v30 }
 0x1da   : > { %v15924_v3 = vsel %vm9439_vm11, 4294967295, %v15923_v3  ;;  %15926 = vst [vmem:[#allocation147_spill] sm:$0xff] %v9445_v8  ;;  %15929 = vst [vmem:[#allocation148_spill] sm:$0xff] %v9449_v50  ;;  %v9458_v48 = vsel %vm9439_vm11, %v15930_v33, 1.0  ;;  %5938 = vrcp.f32 %v9477_v59  ;;  %v740_v50 = vadd.s32 96, %v15472_v21 }
 0x1db   : > { %15925 = vst [vmem:[#allocation146_spill] sm:$0xff] %v15924_v3  ;;  %15931 = vst [vmem:[#allocation149_spill] sm:$0xff] %v9458_v48  ;;  %v9479_v3 = vpop.eup %5924  ;;  %v9482_v48 = vmul.f32 0.25, %v9356_v30  ;;  %v15960_v33 = vmax.f32 %v15855_v12, 1e-12 }
 0x1dc   : > { %vm3111_vm6 = vmand %vm15932_vm0, %vm15765_vm15  ;;  %15934 = vst [vmem:[#allocation150_spill] sm:$0xff] %v9473_v34  ;;  %vm15937_vm0 = vcmp.lt.f32.partialorder %v15848_v22, 0.16  ;;  %v9493_v34 = vadd.f32 %v8839_v60, %v9316_v25  ;;  %v9521_v22 = vpop.eup %5926  ;;  %vm15995_vm11 = vcmp.lt.f32.partialorder %v15860_v58, 0.16 }
 0x1dd   : > { %vm3143_vm2 = vmand %vm9341_vm7, %vm3111_vm6  ;;  %15935 = vst [vmem:[#allocation151_spill] sm:$0xff] %v9477_v59  ;;  %vm15946_vm7 = vcmp.eq.s32.totalorder %v9151_v56, 1  ;;  %v9531_v56 = vadd.s32 %v7968_v36, %v738_v47  ;;  %v9541_v59 = vmul.f32 %v9479_v3, %v8462_v18  ;;  %v9552_v47 = vadd.f32 %v8903_v38, %v9406_v7 }
 0x1de   : > { %15936 = vst [vmem:[#allocation152_spill] sm:$0xff] %v9479_v3  ;;  %vm9486_vm13 = vmand %vm3143_vm2, %vm15937_vm0  ;;  %5940 = vrcp.f32 %v9493_v34 }
 0x1df   : > { %v15939_v46 = vsel %vm9486_vm13, 4294967295, %v15938_v46  ;;  %15942 = vst [vmem:[#allocation154_spill] sm:$0xff] %v9493_v34  ;;  %15943 = vst [vmem:[#allocation155_spill] sm:$0xff] %v9497_v43  ;;  %v9503_v8 = vsel %vm9486_vm13, %v15944_v41, 1.0  ;;  %v9524_v41 = vmul.f32 0.25, %v9406_v7  ;;  %5942 = vrcp.f32 %v9519_v45 }
 0x1e0   : > { %15940 = vst [vmem:[#allocation153_spill] sm:$0xff] %v15939_v46  ;;  %15945 = vst [vmem:[#allocation156_spill] sm:$0xff] %v9503_v8  ;;  %v9537_v8 = vand.u32 2147483647, %v4223_v24  ;;  %v1208_v7 = vsub.f32 %v9497_v43, %v8811_v4  ;;  %v9601_v46 = vadd.s32 %v7968_v36, %v740_v50  ;;  %5944 = vrcp.f32 %v9552_v47 }
 0x1e1   : > { %vm9509_vm6 = vmand %vm15946_vm7, %vm15780_vm1  ;;  %15949 = vst [vmem:[#allocation157_spill] sm:$0xff] %v9514_v20  ;;  %v9535_v20 = vpop.eup %5928  ;;  %vm15955_vm7 = vcmp.lt.f32.partialorder %v15855_v12, 0.16  ;;  %v9570_v12 = vmul.f32 %v9521_v22, %v15877_v1  ;;  %5946 = vrsqrt.f32 %v8931_v49 }
 0x1e2   : > { %15950 = vst [vmem:[#allocation158_spill] sm:$0xff] %v9519_v45  ;;  %15951 = vst [vmem:[#allocation159_spill] sm:$0xff] %v9521_v22  ;;  %v9588_v1 = vmul.f32 %v9535_v20, %v8575_v27  ;;  %v9606_v27 = vmul.f32 0.25, %v9497_v43  ;;  %v9640_v18 = vand.u32 2147483647, %v1208_v7 }
 0x1e3   : > { %vm4097_vm0 = vmand %vm9375_vm8, %vm9509_vm6  ;;  %15952 = vst [vmem:[#allocation160_spill] sm:$0xff] %v9531_v56  ;;  %v9564_v56 = vpop.eup %5930  ;;  %v3276_v6 = vsub.f32 %v9570_v12, %v8881_v54 }
 0x1e4   : > { %15953 = vst [vmem:[#allocation161_spill] sm:$0xff] %v9535_v20  ;;  %15954 = vst [vmem:[#allocation162_spill] sm:$0xff] %v9541_v59  ;;  %v2322_v20 = vsub.f32 %v9541_v59, %v8839_v60  ;;  %v9627_v42 = vmul.f32 %v9564_v56, %v8670_v31  ;;  %v9638_v43 = vpop.eup %5932  ;;  %v9643_v31 = vmul.f32 0.25, %v9541_v59 }
 0x1e5   : > { %vm9545_vm2 = vmand %vm4097_vm0, %vm15955_vm7  ;;  %15959 = vst [vmem:[#allocation164_spill] sm:$0xff] %v9552_v47  ;;  %vm15968_vm0 = vcmp.ne.s32.totalorder %v9234_v14, %v7971_v10  ;;  %v16050_v47 = vld [vmem:[#allocation39_spill] sm:$0xff] }
 0x1e6   : > { %v15957_v11 = vsel %vm9545_vm2, 4294967295, %v15956_v11  ;;  %v9558_v24 = vsel %vm9545_vm2, %v15960_v33, 1.0  ;;  %15964 = vst [vmem:[#allocation166_spill] sm:$0xff] %v9564_v56  ;;  %15965 = vst [vmem:[#allocation167_spill] sm:$0xff] %v9570_v12 }
 0x1e7   : > { %15958 = vst [vmem:[#allocation163_spill] sm:$0xff] %v15957_v11  ;;  %15961 = vst [vmem:[#allocation165_spill] sm:$0xff] %v9558_v24  ;;  %v15966_v11 = vld [vmem:[#allocation58_spill] sm:$0xff]  ;;  %v9584_v24 = vpop.permute.xlu0 %1255 }
 0x1e8   : > { %vm15967_vm6 = vcmp.eq.f32.partialorder %v15966_v11, %v15455_v9  ;;  %15973 = vst [vmem:[#allocation58_spill] sm:$0xff] %v9584_v24  ;;  %15974 = vst [vmem:[#allocation168_spill] sm:$0xff] %v9588_v1  ;;  %vm15975_vm8 = vcmp.eq.f32.partialorder %v15966_v11, %v15459_v61 }
 0x1e9   : > { %vm9578_vm7 = vmand %vm15968_vm0, %vm15967_vm6  ;;  %15979 = vst [vmem:[#allocation169_spill] sm:$0xff] %v9601_v46  ;;  %vm15981_vm0 = vcmp.eq.f32.partialorder %v15966_v11, %v15460_v53  ;;  %v16003_v46 = vmax.f32 %v15860_v58, 1e-12  ;;  %v1203_v58 = vsub.f32 %v9627_v42, %v8811_v4 }
 0x1ea   : > { %vm9596_vm6 = vmand %vm15976_vm9, %vm15975_vm8  ;;  %15980 = vst [vmem:[#allocation170_spill] sm:$0xff] %v9606_v27  ;;  %v9623_v27 = vpop.permute.xlu1 %1235  ;;  %vm15990_vm8 = vcmp.eq.f32.partialorder %v15966_v11, %v15461_v28  ;;  %v15996_v11 = vmov 0 }
 0x1eb   : > { %vm9616_vm9 = vmand %vm3063_vm10, %vm15981_vm0  ;;  %15985 = vst [vmem:[#allocation171_spill] sm:$0xff] %v9627_v42  ;;  %vm15986_vm10 = vcmp.eq.s32.totalorder %v9136_v51, 1  ;;  %v1313_v3 = vmax.f32 %v9623_v27, %v9424_v52  ;;  %v2347_v50 = vmax.f32 %v9623_v27, %v9451_v44  ;;  %v9659_v7 = vpop.permute.xlu0 %1265  ;;  %v9662_v44 = vmax.f32 %v9623_v27, %v3285_v32  ;;  %v9677_v32 = vpop.eup %5934 }
 0x1ec   : > { %vm990_vm0 = vmand %vm15986_vm10, %vm15814_vm5  ;;  %15987 = vst [vmem:[#allocation172_spill] sm:$0xff] %v9638_v43  ;;  %vm15991_vm10 = vcmp.ne.s32.totalorder %v9234_v14, %v8005_v57  ;;  %v9694_v33 = vpop.eup %5936 }
 0x1ed   : > { %15988 = vst [vmem:[#allocation173_spill] sm:$0xff] %v9640_v18  ;;  %15989 = vst [vmem:[#allocation174_spill] sm:$0xff] %v9643_v31  ;;  %v4230_v31 = vsub.f32 %v9588_v1, %v8903_v38  ;;  %5948 = vrcp.f32 %v1313_v3  ;;  %v742_v18 = vadd.s32 112, %v15472_v21  ;;  %v16037_v21 = vld [vmem:[#allocation34_spill] sm:$0xff] }
 0x1ee   : > { %vm9653_vm2 = vmand %vm15991_vm10, %vm15990_vm8  ;;  %15994 = vst [vmem:[#allocation175_spill] sm:$0xff] %v9659_v7  ;;  %v9679_v7 = vand.u32 2147483647, %v2322_v20  ;;  %5950 = vrcp.f32 %v2347_v50  ;;  %v9697_v20 = vmul.f32 0.25, %v9570_v12  ;;  %v9713_v12 = vmul.f32 0.25, %v9588_v1 }
 0x1ef   : > { %vm1022_vm13 = vmand %vm9578_vm7, %vm990_vm0  ;;  %16001 = vst [vmem:[#allocation177_spill] sm:$0xff] %v9677_v32  ;;  %vm16012_vm7 = vcmp.lt.f32.partialorder %v15863_v0, 0.16  ;;  %v9723_v14 = vpop.permute.xlu0 %1275  ;;  %5952 = vrcp.f32 %v9662_v44  ;;  %v16021_v1 = vmax.f32 %v15863_v0, 1e-12  ;;  %v9753_v0 = vmul.f32 %v9694_v33, %v8792_v23 }
 0x1f0   : > { %vm9668_vm14 = vmand %vm1022_vm13, %vm15995_vm11  ;;  %16002 = vst [vmem:[#allocation178_spill] sm:$0xff] %v9679_v7  ;;  %vm16005_vm11 = vcmp.eq.s32.totalorder %v9136_v51, 1  ;;  %v9726_v7 = vpop.eup %5938  ;;  %v9759_v59 = vadd.s32 %v7968_v36, %v742_v18  ;;  %v16030_v23 = vmov 0  ;;  %v16033_v36 = vld [vmem:[#allocation111_spill] sm:$0xff]  ;;  %v16034_v18 = vmax.f32 %v15864_v35, 1e-12 }
 0x1f1   : > { %v15997_v11 = vsel %vm9668_vm14, 4294967295, %v15996_v11  ;;  %v9685_v15 = vsel %vm9668_vm14, %v16003_v46, 1.0  ;;  %vm2152_vm13 = vmand %vm16005_vm11, %vm15753_vm12  ;;  %16006 = vst [vmem:[#allocation180_spill] sm:$0xff] %v9694_v33  ;;  %v9703_v46 = vmul.f32 %v9638_v43, %v8706_v17  ;;  %v16016_v17 = vld [vmem:[#allocation86_spill] sm:$0xff]  ;;  %v1521_v24 = vmul.f32 %v9726_v7, %v1313_v3  ;;  %v16038_v33 = vld [vmem:[#allocation17_spill] sm:$0xff] }
 0x1f2   : > { %15998 = vst [vmem:[#allocation176_spill] sm:$0xff] %v15997_v11  ;;  %16004 = vst [vmem:[#allocation179_spill] sm:$0xff] %v9685_v15  ;;  %v9710_v11 = vand.u32 2147483647, %v3276_v6  ;;  %v9728_v6 = vand.u32 2147483647, %v4230_v31  ;;  %v4255_v31 = vmax.f32 %v9623_v27, %v9537_v8  ;;  %v1601_v3 = vmul.f32 %v16038_v33, %v16038_v33 }
 0x1f3   : > { %16007 = vst [vmem:[#allocation181_spill] sm:$0xff] %v9697_v20  ;;  %16008 = vst [vmem:[#allocation182_spill] sm:$0xff] %v9703_v46  ;;  %v16013_v20 = vmov 0  ;;  %v2317_v8 = vsub.f32 %v9703_v46, %v8839_v60  ;;  %v4225_v33 = vsub.f32 %v9753_v0, %v8903_v38  ;;  %v9810_v52 = vpop.permute.xlu0 %1285  ;;  %v9819_v56 = vmul.f32 0.25, %v9703_v46 }
 0x1f4   : > { %vm2184_vm0 = vmand %vm9596_vm6, %vm2152_vm13  ;;  %16010 = vst [vmem:[#allocation183_spill] sm:$0xff] %v9710_v11  ;;  %vm16061_vm8 = vcmp.ne.s32.totalorder %v9347_v63, %v7985_v40  ;;  %v16104_v38 = vmax.f32 %v16050_v47, 1e-12 }
 0x1f5   : > { %16011 = vst [vmem:[#allocation184_spill] sm:$0xff] %v9713_v12  ;;  %vm9717_vm10 = vmand %vm2184_vm0, %vm16012_vm7  ;;  %v9732_v12 = vmul.f32 %v9677_v32, %v8748_v37  ;;  %v9749_v37 = vmul.f32 0.25, %v9627_v42 }
 0x1f6   : > { %v16014_v20 = vsel %vm9717_vm10, 4294967295, %v16013_v20  ;;  %16018 = vst [vmem:[#allocation86_spill] sm:$0xff] %v9723_v14  ;;  %16019 = vst [vmem:[#allocation186_spill] sm:$0xff] %v9728_v6  ;;  %v9738_v11 = vsel %vm9717_vm10, %v16021_v1, 1.0  ;;  %v16026_v1 = vld [vmem:[#allocation102_spill] sm:$0xff]  ;;  %v9761_v6 = vpop.eup %5940 }
 0x1f7   : > { %16015 = vst [vmem:[#allocation185_spill] sm:$0xff] %v16014_v20  ;;  %16020 = vst [vmem:[#allocation187_spill] sm:$0xff] %v9732_v12  ;;  %5954 = vrsqrt.f32 %v16026_v1  ;;  %v9763_v20 = vand.u32 2147483647, %v1203_v58  ;;  %v16028_v14 = vld [vmem:[#allocation22_spill] sm:$0xff]  ;;  %v9775_v22 = vpop.eup %5942  ;;  %v3271_v32 = vsub.f32 %v9732_v12, %v8881_v54 }
 0x1f8   : > { %16022 = vst [vmem:[#allocation188_spill] sm:$0xff] %v9738_v11  ;;  %vm16023_vm6 = vmmov %vm16005_vm11  ;;  %5956 = vrsqrt.f32 %v16028_v14  ;;  %v9800_v43 = vpop.eup %5944  ;;  %v16048_v11 = vmax.f32 %v15870_v55, 1e-12  ;;  %v16101_v14 = vld [vmem:[#allocation53_spill] sm:$0xff] }
 0x1f9   : > { %vm3106_vm13 = vmand %vm16023_vm6, %vm15765_vm15  ;;  %16024 = vst [vmem:[#allocation189_spill] sm:$0xff] %v9749_v37  ;;  %vm16029_vm6 = vcmp.lt.f32.partialorder %v15864_v35, 0.16  ;;  %5958 = vrsqrt.f32 %v16033_v36  ;;  %v16039_v35 = vld [vmem:[#allocation9_spill] sm:$0xff]  ;;  %v9816_v37 = vand.u32 2147483647, %v2317_v8 }
 0x1fa   : > { %16025 = vst [vmem:[#allocation190_spill] sm:$0xff] %v9753_v0  ;;  %vm3138_vm0 = vmand %vm9616_vm9, %vm3106_vm13  ;;  %5960 = vrcp.f32 %v4255_v31  ;;  %v16054_v8 = vld [vmem:[#allocation40_spill] sm:$0xff] }
 0x1fb   : > { %16027 = vst [vmem:[#allocation191_spill] sm:$0xff] %v9759_v59  ;;  %vm9770_vm7 = vmand %vm3138_vm0, %vm16029_vm6  ;;  %v2555_v59 = vmul.f32 %v9761_v6, %v2347_v50  ;;  %v16042_v50 = vmov 0  ;;  %5962 = vlog2.f32 %v1521_v24  ;;  %v9828_v24 = vpop.eup %5946 }
 0x1fc   : > { %v16031_v23 = vsel %vm9770_vm7, 4294967295, %v16030_v23  ;;  %v9782_v58 = vsel %vm9770_vm7, %v16034_v18, 1.0  ;;  %vm16036_vm9 = vmmov %vm16005_vm11  ;;  %v2635_v18 = vmul.f32 %v16039_v35, %v16039_v35  ;;  %16045 = vst [vmem:[#allocation17_spill] sm:$0xff] %v9810_v52  ;;  %v3509_v35 = vmul.f32 %v9775_v22, %v9662_v44 }
 0x1fd   : > { %16032 = vst [vmem:[#allocation192_spill] sm:$0xff] %v16031_v23  ;;  %16035 = vst [vmem:[#allocation193_spill] sm:$0xff] %v9782_v58  ;;  %v16040_v23 = vld [vmem:[#allocation48_spill] sm:$0xff]  ;;  %v16046_v58 = vld [vmem:[#allocation93_spill] sm:$0xff]  ;;  %5964 = vlog2.f32 %v2555_v59  ;;  %v9831_v44 = vmul.f32 0.25, %v9732_v12  ;;  %v4463_v59 = vmul.f32 %v9800_v43, %v4255_v31  ;;  %v16115_v31 = vmov 0 }
 0x1fe   : > { %vm4060_vm13 = vmand %vm16036_vm9, %vm15780_vm1  ;;  %v3589_v51 = vmul.f32 %v16040_v23, %v16040_v23  ;;  %vm16041_vm9 = vcmp.lt.f32.partialorder %v15870_v55, 0.16  ;;  %v4543_v23 = vmul.f32 %v16046_v58, %v16046_v58  ;;  %16047 = vst [vmem:[#allocation9_spill] sm:$0xff] %v9819_v56  ;;  %v16053_v58 = vld [vmem:[#allocation117_spill] sm:$0xff]  ;;  %v9845_v52 = vand.u32 2147483647, %v3271_v32  ;;  %v9857_v56 = vpop.eup %5948 }
 0x1ff   : > { %vm4092_vm6 = vmand %vm9653_vm2, %vm4060_vm13  ;;  %16051 = vst [vmem:[#allocation93_spill] sm:$0xff] %v9828_v24  ;;  %5966 = vrsqrt.f32 %v16053_v58  ;;  %vm16055_vm13 = vcmp.eq.f32.partialorder %v16054_v8, %v15455_v9  ;;  %vm16060_vm2 = vcmp.eq.f32.partialorder %v16054_v8, %v15459_v61  ;;  %v9862_v32 = vmul.f32 0.25, %v9753_v0  ;;  %v16081_v12 = vld [vmem:[#allocation132_spill] sm:$0xff] }
 0x200   : > { %vm9806_vm0 = vmand %vm4092_vm6, %vm16041_vm9  ;;  %16052 = vst [vmem:[#allocation39_spill] sm:$0xff] %v9831_v44  ;;  %vm16056_vm6 = vcmp.ne.s32.totalorder %v9347_v63, %v7971_v10  ;;  %v2636_v44 = vmul.f32 0.25, %v2635_v18  ;;  %5968 = vlog2.f32 %v3509_v35  ;;  %v4544_v18 = vmul.f32 0.25, %v4543_v23  ;;  %v16071_v35 = vld [vmem:[#allocation123_spill] sm:$0xff] }
 0x201   : > { %v16043_v50 = vsel %vm9806_vm0, 4294967295, %v16042_v50  ;;  %v9825_v15 = vsel %vm9806_vm0, %v16048_v11, 1.0  ;;  %vm9840_vm9 = vmand %vm16056_vm6, %vm16055_vm13  ;;  %v1602_v11 = vmul.f32 0.25, %v1601_v3  ;;  %16059 = vst [vmem:[#allocation40_spill] sm:$0xff] %v9845_v52  ;;  %v9859_v3 = vand.u32 2147483647, %v4225_v33 }
 0x202   : > { %16044 = vst [vmem:[#allocation34_spill] sm:$0xff] %v16043_v50  ;;  %16049 = vst [vmem:[#allocation48_spill] sm:$0xff] %v9825_v15  ;;  %v3590_v15 = vmul.f32 0.25, %v3589_v51  ;;  %vm16066_vm13 = vcmp.eq.f32.partialorder %v16054_v8, %v15460_v53  ;;  %vm16067_vm6 = vcmp.ne.s32.totalorder %v9347_v63, %v7995_v19  ;;  %5970 = vlog2.f32 %v4463_v59  ;;  %v9875_v51 = vpop.eup %5950  ;;  %v16073_v59 = vld [vmem:[#allocation129_spill] sm:$0xff]  ;;  %v16496_v29 = vld [vmem:[#allocation190_spill] sm:$0xff] }
 0x203   : > { %vm9853_vm11 = vmand %vm16061_vm8, %vm16060_vm2  ;;  %16064 = vst [vmem:[#allocation194_spill] sm:$0xff] %v9859_v3  ;;  %v9879_v33 = vmul.f32 %v9828_v24, %v8931_v49  ;;  %5972 = vrsqrt.f32 %v16071_v35  ;;  %vm16072_vm0 = vcmp.eq.s32.totalorder %v16016_v17, 1  ;;  %v9892_v23 = vmul.f32 %v9726_v7, %v9726_v7  ;;  %v9907_v24 = vpop.permute.xlu0 %1295  ;;  %v16079_v3 = vld [vmem:[#allocation54_spill] sm:$0xff] }
 0x204   : > { %16065 = vst [vmem:[#allocation195_spill] sm:$0xff] %v9862_v32  ;;  %vm9870_vm8 = vmand %vm16067_vm6, %vm16066_vm13  ;;  %v9888_v32 = vmul.f32 %v9857_v56, %v9857_v56  ;;  %5974 = vrsqrt.f32 %v16073_v59  ;;  %vm16074_vm6 = vcmp.eq.f32.partialorder %v16054_v8, %v15461_v28  ;;  %vm16075_vm2 = vcmp.ne.s32.totalorder %v9347_v63, %v8005_v57  ;;  %v9920_v63 = vpop.eup %5952 }
 0x205   : > { %16070 = vst [vmem:[#allocation196_spill] sm:$0xff] %v9879_v33  ;;  %vm997_vm13 = vmand %vm16072_vm0, %vm15814_vm5  ;;  %v9910_v0 = vrot.slane %v1602_v11, %v16079_v3  ;;  %v9914_v52 = vmul.f32 %v9875_v51, %v9875_v51  ;;  %v9918_v8 = vmul.f32 %v9761_v6, %v9761_v6  ;;  %5976 = vrsqrt.f32 %v16081_v12  ;;  %v16088_v12 = vld [vmem:[#allocation143_spill] sm:$0xff]  ;;  %v10010_v33 = vpop.permute.xlu1 %1245 }
 0x206   : > { %vm9901_vm7 = vmand %vm16075_vm2, %vm16074_vm6  ;;  %16078 = vst [vmem:[#allocation197_spill] sm:$0xff] %v9907_v24  ;;  %v16083_v55 = vmov 0  ;;  %v1457_v11 = vsub.f32 %v9892_v23, %v9888_v32  ;;  %v9935_v24 = vrot.slane %v2636_v44, %v16079_v3  ;;  %v9938_v59 = vrot.slane %v3590_v15, %v16079_v3 }
 0x207   : > { %vm1029_vm0 = vmand %vm9840_vm9, %vm997_vm13  ;;  %16080 = vst [vmem:[#allocation54_spill] sm:$0xff] %v9910_v0  ;;  %vm16082_vm9 = vcmp.lt.f32.partialorder %v16037_v21, 0.16  ;;  %5978 = vrsqrt.f32 %v16088_v12  ;;  %v16089_v35 = vmax.f32 %v16037_v21, 1e-12  ;;  %vm2111_vm6 = vcmp.ne.s32.totalorder %v9382_v13, %v7985_v40  ;;  %v9958_v12 = vpop.eup %5954  ;;  %v16094_v21 = vld [vmem:[#allocation49_spill] sm:$0xff] }
 0x208   : > { %vm9926_vm13 = vmand %vm1029_vm0, %vm16082_vm9  ;;  %16086 = vst [vmem:[#allocation199_spill] sm:$0xff] %v9935_v24  ;;  %vm16091_vm0 = vcmp.eq.s32.totalorder %v16016_v17, 1  ;;  %v2491_v15 = vsub.f32 %v9918_v8, %v9914_v52  ;;  %v9956_v44 = vrot.slane %v4544_v18, %v16079_v3  ;;  %v9972_v3 = vmul.f32 %v9920_v63, %v9920_v63  ;;  %v9974_v18 = vpop.eup %5956 }
 0x209   : > { %v16084_v55 = vsel %vm9926_vm13, 4294967295, %v16083_v55  ;;  %16087 = vst [vmem:[#allocation200_spill] sm:$0xff] %v9938_v59  ;;  %v9945_v58 = vsel %vm9926_vm13, %v16089_v35, 1.0  ;;  %vm2159_vm9 = vmand %vm16091_vm0, %vm15753_vm12  ;;  %v1505_v35 = vmul.f32 0.5, %v16094_v21  ;;  %vm16097_vm0 = vcmp.lt.f32.partialorder %v16050_v47, 0.16  ;;  %v9992_v1 = vpop.eup %5958 }
 0x20a   : > { %16085 = vst [vmem:[#allocation198_spill] sm:$0xff] %v16084_v55  ;;  %16090 = vst [vmem:[#allocation201_spill] sm:$0xff] %v9945_v58  ;;  %v9967_v55 = vmul.f32 %v16094_v21, %v9910_v0  ;;  %v16095_v58 = vld [vmem:[#allocation26_spill] sm:$0xff]  ;;  %v16098_v50 = vmov 0  ;;  %v16109_v21 = vld [vmem:[#allocation140_spill] sm:$0xff]  ;;  %v10015_v47 = vmul.f32 %v9775_v22, %v9775_v22  ;;  %v3413_v54 = vsub.f32 %v9920_v63, %v9775_v22 }
 0x20b   : > { %16092 = vst [vmem:[#allocation202_spill] sm:$0xff] %v9956_v44  ;;  %16093 = vst [vmem:[#allocation203_spill] sm:$0xff] %v9958_v12  ;;  %v2539_v36 = vmul.f32 0.5, %v16095_v58  ;;  %v9987_v0 = vmul.f32 %v16095_v58, %v9935_v24  ;;  %v16102_v12 = vld [vmem:[#allocation133_spill] sm:$0xff]  ;;  %v1473_v24 = vmul.f32 %v1457_v11, %v16109_v21  ;;  %v10051_v58 = vadd.f32 %v8811_v4, %v9627_v42 }
 0x20c   : > { %vm2191_vm2 = vmand %vm9853_vm11, %vm2159_vm9  ;;  %16096 = vst [vmem:[#allocation49_spill] sm:$0xff] %v9974_v18  ;;  %v3493_v18 = vmul.f32 0.5, %v16102_v12  ;;  %v16112_v21 = vld [vmem:[#allocation61_spill] sm:$0xff]  ;;  %vm16114_vm9 = vcmp.lt.f32.partialorder %v15894_v5, 0.16 }
 0x20d   : > { %vm9978_vm11 = vmand %vm2191_vm2, %vm16097_vm0  ;;  %16103 = vst [vmem:[#allocation53_spill] sm:$0xff] %v9992_v1  ;;  %vm16106_vm2 = vcmp.eq.s32.totalorder %v16016_v17, 1  ;;  %v16111_v1 = vld [vmem:[#allocation145_spill] sm:$0xff]  ;;  %v10033_v39 = vmul.f32 0.5, %v16112_v21  ;;  %5980 = vrcp.f32 %v10051_v58 }
 0x20e   : > { %v16099_v50 = vsel %vm9978_vm11, 4294967295, %v16098_v50  ;;  %v9998_v45 = vsel %vm9978_vm11, %v16104_v38, 1.0  ;;  %vm10004_vm0 = vmand %vm16106_vm2, %vm15765_vm15  ;;  %v10019_v38 = vmul.f32 %v16102_v12, %v9938_v59  ;;  %v2507_v34 = vmul.f32 %v2491_v15, %v16111_v1 }
 0x20f   : > { %16100 = vst [vmem:[#allocation26_spill] sm:$0xff] %v16099_v50  ;;  %16105 = vst [vmem:[#allocation133_spill] sm:$0xff] %v9998_v45  ;;  %v10021_v50 = vpop.eup %5960  ;;  %v10027_v45 = vpop.permute.xlu0 %1305  ;;  %v10037_v12 = vmul.f32 %v16112_v21, %v9956_v44  ;;  %v1425_v1 = vsub.f32 %v9857_v56, %v9726_v7  ;;  %v3445_v15 = vsub.f32 %v10015_v47, %v9972_v3  ;;  %v16121_v7 = vld [vmem:[#allocation6_spill] sm:$0xff] }
 0x210   : > { %vm3145_vm2 = vmand %vm9870_vm8, %vm10004_vm0  ;;  %16110 = vst [vmem:[#allocation140_spill] sm:$0xff] %v10027_v45  ;;  %v5963_v59 = vpop.eup %5962  ;;  %v10055_v21 = vadd.f32 %v8839_v60, %v9703_v46  ;;  %v16118_v45 = vmax.f32 %v15894_v5, 1e-12  ;;  %vm16120_vm8 = vcmp.eq.s32.totalorder %v16016_v17, 1  ;;  %v10072_v46 = vmax.f32 %v10010_v33, %v9763_v20 }
 0x211   : > { %16113 = vst [vmem:[#allocation145_spill] sm:$0xff] %v10037_v12  ;;  %vm10041_vm13 = vmand %vm3145_vm2, %vm16114_vm9  ;;  %v5965_v11 = vpop.eup %5964  ;;  %v1538_v42 = vmul.f32 0.6931472, %v5963_v59  ;;  %v2459_v12 = vsub.f32 %v9875_v51, %v9761_v6  ;;  %v10080_v17 = vmul.f32 %v10021_v50, %v10021_v50  ;;  %v10084_v59 = vmul.f32 %v9800_v43, %v9800_v43 }
 0x212   : > { %v16116_v31 = vsel %vm10041_vm13, 4294967295, %v16115_v31  ;;  %v10061_v44 = vsel %vm10041_vm13, %v16118_v45, 1.0  ;;  %vm4067_vm9 = vmand %vm16120_vm8, %vm15780_vm1  ;;  %16122 = vst [vmem:[#allocation6_spill] sm:$0xff] %v10072_v46  ;;  %v10074_v5 = vpop.eup %5966  ;;  %v1489_v45 = vadd.f32 %v1473_v24, %v1425_v1  ;;  %vm16124_vm8 = vcmp.lt.f32.partialorder %v15898_v2, 0.16  ;;  %v16130_v46 = vld [vmem:[#allocation12_spill] sm:$0xff] }
 0x213   : > { %16117 = vst [vmem:[#allocation61_spill] sm:$0xff] %v16116_v31  ;;  %16119 = vst [vmem:[#allocation204_spill] sm:$0xff] %v10061_v44  ;;  %v2572_v31 = vmul.f32 0.6931472, %v5965_v11  ;;  %v5969_v6 = vpop.eup %5968  ;;  %v16125_v20 = vmov 0  ;;  %v1569_v44 = vmul.f32 %v1538_v42, %v1505_v35  ;;  %v1623_v24 = vsub.f32 %v9888_v32, %v9892_v23  ;;  %v16132_v32 = vld [vmem:[#allocation45_spill] sm:$0xff]  ;;  %v10120_v22 = vpop.permute.xlu0 %1705 }
 0x214   : > { %16123 = vst [vmem:[#allocation205_spill] sm:$0xff] %v10074_v5  ;;  %vm4099_vm2 = vmand %vm9901_vm7, %vm4067_vm9  ;;  %v2523_v49 = vadd.f32 %v2507_v34, %v2459_v12  ;;  %v3461_v11 = vmul.f32 %v3445_v15, %v9482_v48  ;;  %v5971_v1 = vpop.eup %5970  ;;  %v16128_v5 = vmax.f32 %v15898_v2, 1e-12  ;;  %v3526_v42 = vmul.f32 0.6931472, %v5969_v6  ;;  %v16146_v15 = vld [vmem:[#allocation65_spill] sm:$0xff] }
 0x215   : > { %vm10088_vm0 = vmand %vm4099_vm2, %vm16124_vm8  ;;  %v2603_v30 = vmul.f32 %v2572_v31, %v2539_v36  ;;  %v10104_v35 = vpop.eup %5972  ;;  %vm16133_vm9 = vcmp.eq.f32.partialorder %v16132_v32, %v15455_v9  ;;  %vm16134_vm2 = vcmp.ne.s32.totalorder %v9382_v13, %v7971_v10  ;;  %v2657_v34 = vsub.f32 %v9914_v52, %v9918_v8 }
 0x216   : > { %v16126_v20 = vsel %vm10088_vm0, 4294967295, %v16125_v20  ;;  %v10099_v26 = vsel %vm10088_vm0, %v16128_v5, 1.0  ;;  %16131 = vst [vmem:[#allocation12_spill] sm:$0xff] %v10104_v35  ;;  %vm10112_vm8 = vmand %vm16134_vm2, %vm16133_vm9  ;;  %v3611_v48 = vsub.f32 %v9972_v3, %v10015_v47  ;;  %v10125_v36 = vmax.f32 %v10010_v33, %v9816_v37  ;;  %v10127_v23 = vpop.eup %5974 }
 0x217   : > { %16127 = vst [vmem:[#allocation206_spill] sm:$0xff] %v16126_v20  ;;  %16129 = vst [vmem:[#allocation207_spill] sm:$0xff] %v10099_v26  ;;  %vm16138_vm9 = vcmp.eq.f32.partialorder %v16132_v32, %v15459_v61  ;;  %v1585_v8 = vadd.f32 %v1569_v44, %v1489_v45  ;;  %v3477_v3 = vadd.f32 %v3461_v11, %v3413_v54  ;;  %v10141_v37 = vpop.eup %5976  ;;  %5982 = vrcp.f32 %v10055_v21  ;;  %v16309_v26 = vld [vmem:[#allocation194_spill] sm:$0xff] }
 0x218   : > { %16137 = vst [vmem:[#allocation45_spill] sm:$0xff] %v10127_v23  ;;  %vm10135_vm2 = vmand %vm2111_vm6, %vm16138_vm9  ;;  %v3557_v47 = vmul.f32 %v3526_v42, %v3493_v18  ;;  %v4399_v12 = vsub.f32 %v10084_v59, %v10080_v17  ;;  %vm16142_vm7 = vcmp.eq.f32.partialorder %v16132_v32, %v15460_v53  ;;  %vm16143_vm0 = vcmp.ne.s32.totalorder %v9382_v13, %v7995_v19  ;;  %v10156_v5 = vpop.eup %5978  ;;  %v16186_v31 = vld [vmem:[#allocation145_spill] sm:$0xff] }
 0x219   : > { %16141 = vst [vmem:[#allocation208_spill] sm:$0xff] %v10141_v37  ;;  %vm10149_vm13 = vmand %vm16143_vm0, %vm16142_vm7  ;;  %v1639_v54 = vmul.f32 %v1623_v24, %v9967_v55  ;;  %v2619_v44 = vadd.f32 %v2603_v30, %v2523_v49  ;;  %v4480_v18 = vmul.f32 0.6931472, %v5971_v1  ;;  %vm16148_vm9 = vcmp.eq.s32.totalorder %v16101_v14, 1  ;;  %v16157_v49 = vld [vmem:[#allocation11_spill] sm:$0xff]  ;;  %v16222_v30 = vld [vmem:[#allocation53_spill] sm:$0xff] }
 0x21a   : > { %16147 = vst [vmem:[#allocation65_spill] sm:$0xff] %v10156_v5  ;;  %vm992_vm11 = vmand %vm16148_vm9, %vm15814_vm5  ;;  %v3573_v45 = vadd.f32 %v3557_v47, %v3477_v3  ;;  %v4367_v6 = vsub.f32 %v10021_v50, %v9800_v43  ;;  %v4415_v11 = vmul.f32 %v4399_v12, %v9524_v41  ;;  %v1783_v55 = vsub.f32 %v10120_v22, %v9857_v56  ;;  %v16158_v1 = vld [vmem:[#allocation147_spill] sm:$0xff]  ;;  %v16170_v12 = vld [vmem:[#allocation96_spill] sm:$0xff] }
 0x21b   : > { %vm16149_vm0 = vcmp.eq.f32.partialorder %v16132_v32, %v15461_v28  ;;  %vm16150_vm7 = vcmp.ne.s32.totalorder %v9382_v13, %v8005_v57  ;;  %vm1024_vm9 = vmand %vm10112_vm8, %vm992_vm11  ;;  %v2673_v43 = vmul.f32 %v2657_v34, %v9987_v0  ;;  %v3627_v41 = vmul.f32 %v3611_v48, %v10019_v38 }
 0x21c   : > { %vm10173_vm6 = vmand %vm16150_vm7, %vm16149_vm0  ;;  %v2737_v56 = vsub.f32 %v10120_v22, %v9875_v51  ;;  %v3691_v24 = vsub.f32 %v10120_v22, %v9920_v63  ;;  %vm16153_vm10 = vcmp.lt.f32.partialorder %v16121_v7, 0.16  ;;  %v16154_v13 = vmov 0 }
 0x21d   : > { %vm10187_vm14 = vmand %vm1024_vm9, %vm16153_vm10  ;;  %v1655_v0 = vadd.f32 %v1639_v54, %v1585_v8  ;;  %v4431_v42 = vadd.f32 %v4415_v11, %v4367_v6  ;;  %v4511_v38 = vmul.f32 %v4480_v18, %v10033_v39  ;;  %v1799_v32 = vmul.f32 2.0, %v1783_v55  ;;  %v16171_v54 = vld [vmem:[#allocation136_spill] sm:$0xff] }
 0x21e   : > { %v16155_v13 = vsel %vm10187_vm14, 4294967295, %v16154_v13  ;;  %v16159_v51 = vmax.f32 %v16121_v7, 1e-12  ;;  %vm16160_vm10 = vcmp.eq.s32.totalorder %v16101_v14, 1  ;;  %v2689_v2 = vadd.f32 %v2673_v43, %v2619_v44  ;;  %v16197_v44 = vld [vmem:[#allocation27_spill] sm:$0xff] }
 0x21f   : > { %16156 = vst [vmem:[#allocation209_spill] sm:$0xff] %v16155_v13  ;;  %vm2154_vm8 = vmand %vm16160_vm10, %vm15753_vm12  ;;  %v2753_v34 = vmul.f32 2.0, %v2737_v56  ;;  %v3707_v48 = vmul.f32 2.0, %v3691_v24  ;;  %v16161_v39 = vsub.f32 %v8811_v4, %v9283_v62  ;;  %v16162_v7 = vsub.f32 %v8839_v60, %v9316_v25  ;;  %v16169_v62 = vld [vmem:[#allocation138_spill] sm:$0xff] }
 0x220   : > { %v10199_v63 = vsel %vm10187_vm14, %v16159_v51, 1.0  ;;  %vm2186_vm9 = vmand %vm10135_vm2, %vm2154_vm8  ;;  %v3643_v3 = vadd.f32 %v3627_v41, %v3573_v45  ;;  %v4565_v52 = vsub.f32 %v10080_v17, %v10084_v59  ;;  %vm16165_vm2 = vcmp.lt.f32.partialorder %v16130_v46, 0.16  ;;  %v16175_v59 = vld [vmem:[#allocation6_spill] sm:$0xff] }
 0x221   : > { %vm1687_vm0 = vcmp.lt.f32.partialorder %v9623_v27, %v16161_v39  ;;  %vm10219_vm10 = vcmp.lt.f32.partialorder %v9623_v27, %v16162_v7  ;;  %vm10227_vm8 = vmand %vm2186_vm9, %vm16165_vm2  ;;  %v16166_v47 = vmov 0  ;;  %v16172_v25 = vsub.f32 %v16170_v12, %v16171_v54  ;;  %v16185_v24 = vld [vmem:[#allocation154_spill] sm:$0xff]  ;;  %v362_v39 = vld [vmem:[#allocation2 + $0x30] sm:$0xff] }
 0x222   : > { %v16167_v47 = vsel %vm10227_vm8, 4294967295, %v16166_v47  ;;  %v1815_v18 = vsel %vm1687_vm0, %v1799_v32, 0.0  ;;  %v4645_v17 = vsub.f32 %v10120_v22, %v10021_v50  ;;  %5984 = vrcp.f32 %v16175_v59  ;;  %v16210_v7 = vld [vmem:[#allocation196_spill] sm:$0xff] }
 0x223   : > { %16168 = vst [vmem:[#allocation11_spill] sm:$0xff] %v16167_v47  ;;  %vm10236_vm7 = vcmp.lt.f32.partialorder %v9623_v27, %v16172_v25  ;;  %v16176_v45 = vmax.f32 %v16130_v46, 1e-12  ;;  %vm16179_vm9 = vcmp.eq.s32.totalorder %v16101_v14, 1  ;;  %v4527_v55 = vadd.f32 %v4511_v38, %v4431_v42  ;;  %v16180_v46 = vld [vmem:[#allocation151_spill] sm:$0xff]  ;;  %v16196_v25 = vld [vmem:[#allocation142_spill] sm:$0xff] }
 0x224   : > { %vm3108_vm2 = vmand %vm16179_vm9, %vm15765_vm15  ;;  %v1831_v43 = vadd.f32 %v1815_v18, %v1655_v0  ;;  %v2769_v50 = vsel %vm10219_vm10, %v2753_v34, 0.0  ;;  %v3723_v41 = vsel %vm10236_vm7, %v3707_v48, 0.0  ;;  %5986 = vrcp.f32 %v10125_v36  ;;  %v16193_v48 = vld [vmem:[#allocation59_spill] sm:$0xff] }
 0x225   : > { %v10247_v6 = vsel %vm10227_vm8, %v16176_v45, 1.0  ;;  %vm3140_vm0 = vmand %vm10149_vm13, %vm3108_vm2  ;;  %vm1847_vm8 = vcmp.lt.f32.partialorder %v9623_v27, %v16180_v46  ;;  %v2785_v22 = vadd.f32 %v2769_v50, %v2689_v2  ;;  %vm16181_vm9 = vcmp.lt.f32.partialorder %v16146_v15, 0.16  ;;  %v16199_v50 = vld [vmem:[#allocation203_spill] sm:$0xff] }
 0x226   : > { %16177 = vst [vmem:[#allocation147_spill] sm:$0xff] %v10247_v6  ;;  %vm10266_vm11 = vmand %vm3140_vm0, %vm16181_vm9  ;;  %v16182_v56 = vmov 0  ;;  %vm2801_vm10 = vcmp.lt.f32.partialorder %v9623_v27, %v16185_v24  ;;  %v4581_v0 = vmul.f32 %v4565_v52, %v16186_v31  ;;  %v1863_v42 = vsel %vm1847_vm8, %v1831_v43, 0.0  ;;  %v10290_v52 = vpop.eup %5980  ;;  %v16198_v43 = vld [vmem:[#allocation102_spill] sm:$0xff] }
 0x227   : > { %v16183_v56 = vsel %vm10266_vm11, 4294967295, %v16182_v56  ;;  %v3739_v38 = vadd.f32 %v3723_v41, %v3643_v3  ;;  %v16187_v32 = vmax.f32 %v16146_v15, 1e-12  ;;  %vm16190_vm13 = vcmp.eq.s32.totalorder %v16101_v14, 1  ;;  %v16195_v14 = vld [vmem:[#allocation158_spill] sm:$0xff]  ;;  %v10313_v24 = vpop.eup %5982 }
 0x228   : > { %16184 = vst [vmem:[#allocation138_spill] sm:$0xff] %v16183_v56  ;;  %vm10283_vm7 = vmand %vm16190_vm13, %vm15780_vm1  ;;  %v1879_v8 = vsel %vm15778_vm4, %v1863_v42, 0.0  ;;  %v2817_v3 = vsel %vm2801_vm10, %v2785_v22, 0.0  ;;  %v4661_v15 = vmul.f32 2.0, %v4645_v17  ;;  %vm3755_vm0 = vcmp.lt.f32.partialorder %v9623_v27, %v16195_v14  ;;  %v16201_v17 = vld [vmem:[#allocation149_spill] sm:$0xff]  ;;  %v16209_v42 = vld [vmem:[#allocation63_spill] sm:$0xff] }
 0x229   : > { %v10277_v51 = vsel %vm10266_vm11, %v16187_v32, 1.0  ;;  %vm4094_vm8 = vmand %vm10173_vm6, %vm10283_vm7  ;;  %v4597_v54 = vadd.f32 %v4581_v0, %v4527_v55  ;;  %v4613_v18 = vsub.f32 %v16197_v44, %v16196_v25  ;;  %v1895_v45 = vmul.f32 0.5, %v1879_v8  ;;  %v16211_v14 = vld [vmem:[#allocation22_spill] sm:$0xff] }
 0x22a   : > { %16188 = vst [vmem:[#allocation136_spill] sm:$0xff] %v10277_v51  ;;  %v10302_v46 = vmul.f32 %v16199_v50, %v16198_v43  ;;  %5988 = vrsqrt.f32 %v16201_v17  ;;  %vm16202_vm4 = vcmp.lt.f32.partialorder %v16157_v49, 0.16  ;;  %v16203_v22 = vmov 0  ;;  %v16214_v25 = vld [vmem:[#allocation66_spill] sm:$0xff]  ;;  %v16221_v43 = vld [vmem:[#allocation111_spill] sm:$0xff] }
 0x22b   : > { %vm10307_vm9 = vmand %vm4094_vm8, %vm16202_vm4  ;;  %v2833_v41 = vsel %vm8869_vm3, %v2817_v3, 0.0  ;;  %v3771_v55 = vsel %vm3755_vm0, %v3739_v38, 0.0  ;;  %v16207_v31 = vmax.f32 %v16157_v49, 1e-12  ;;  %vm4629_vm10 = vcmp.lt.f32.partialorder %v9623_v27, %v4613_v18  ;;  %v16212_v3 = vld [vmem:[#allocation49_spill] sm:$0xff] }
 0x22c   : > { %16200 = vst [vmem:[#allocation6_spill] sm:$0xff] %v10302_v46  ;;  %v16204_v22 = vsel %vm10307_vm9, 4294967295, %v16203_v22  ;;  %v1911_v32 = vadd.f32 %v1895_v45, %v362_v39  ;;  %v2849_v34 = vmul.f32 0.5, %v2833_v41  ;;  %v1210_v8 = vsub.f32 %v16210_v7, %v8811_v4  ;;  %v16219_v18 = vld [vmem:[#allocation37_spill] sm:$0xff] }
 0x22d   : > { %16205 = vst [vmem:[#allocation90_spill] sm:$0xff] %v16204_v22  ;;  %v10319_v0 = vsel %vm10307_vm9, %v16207_v31, 1.0  ;;  %v10327_v38 = vmul.f32 %v16212_v3, %v16211_v14  ;;  %vm16215_vm3 = vcmp.eq.f32.partialorder %v16214_v25, %v15455_v9  ;;  %vm16216_vm13 = vcmp.ne.s32.totalorder %v16158_v1, %v7971_v10 }
 0x22e   : > { %16208 = vst [vmem:[#allocation151_spill] sm:$0xff] %v10319_v0  ;;  %vm10335_vm7 = vmand %vm16216_vm13, %vm16215_vm3  ;;  %vm16220_vm8 = vnez %v16219_v18  ;;  %v4677_v45 = vsel %vm4629_vm10, %v4661_v15, 0.0  ;;  %v10343_v41 = vmul.f32 %v16222_v30, %v16221_v43  ;;  %vm16224_vm0 = vcmp.eq.f32.partialorder %v16214_v25, %v15459_v61  ;;  %v16233_v43 = vld [vmem:[#allocation60_spill] sm:$0xff]  ;;  %v16238_v30 = vld [vmem:[#allocation165_spill] sm:$0xff] }
 0x22f   : > { %16213 = vst [vmem:[#allocation154_spill] sm:$0xff] %v10327_v38  ;;  %v3787_v39 = vsel %vm16220_vm8, %v3771_v55, 0.0  ;;  %vm16225_vm4 = vcmp.ne.s32.totalorder %v16158_v1, %v7985_v40  ;;  %v2865_v14 = vadd.f32 %v2849_v34, %v1911_v32  ;;  %v4693_v3 = vadd.f32 %v4677_v45, %v4597_v54  ;;  %v16228_v55 = vld [vmem:[#allocation156_spill] sm:$0xff]  ;;  %v16235_v34 = vld [vmem:[#allocation117_spill] sm:$0xff] }
 0x230   : > { %16223 = vst [vmem:[#allocation145_spill] sm:$0xff] %v10343_v41  ;;  %vm10351_vm6 = vmand %vm16225_vm4, %vm16224_vm0  ;;  %v3803_v20 = vmul.f32 0.5, %v3787_v39  ;;  %v2324_v15 = vsub.f32 %v10302_v46, %v8839_v60  ;;  %5990 = vrsqrt.f32 %v16228_v55  ;;  %vm16229_vm10 = vcmp.eq.f32.partialorder %v16214_v25, %v15460_v53  ;;  %v16234_v32 = vld [vmem:[#allocation164_spill] sm:$0xff]  ;;  %v16236_v39 = vld [vmem:[#allocation205_spill] sm:$0xff] }
 0x231   : > { %vm16230_vm3 = vcmp.ne.s32.totalorder %v16158_v1, %v7995_v19  ;;  %vm4709_vm0 = vcmp.lt.f32.partialorder %v9623_v27, %v16234_v32  ;;  %v1523_v54 = vmul.f32 %v10290_v52, %v16175_v59  ;;  %v10375_v45 = vmul.f32 %v16236_v39, %v16235_v34  ;;  %v16349_v0 = vld [vmem:[#allocation172_spill] sm:$0xff] }
 0x232   : > { %vm10364_vm13 = vmand %vm16230_vm3, %vm16229_vm10  ;;  %5992 = vrsqrt.f32 %v16238_v30  ;;  %vm16239_vm4 = vcmp.eq.s32.totalorder %v16169_v62, 1  ;;  %v3819_v22 = vadd.f32 %v3803_v20, %v2865_v14  ;;  %v4725_v56 = vsel %vm4709_vm0, %v4693_v3, 0.0  ;;  %v16247_v20 = vld [vmem:[#allocation110_spill] sm:$0xff]  ;;  %v10407_v14 = vpop.eup %5984 }
 0x233   : > { %16237 = vst [vmem:[#allocation51_spill] sm:$0xff] %v10375_v45  ;;  %vm10382_vm10 = vmand %vm16239_vm4, %vm15814_vm5  ;;  %v10387_v27 = vmul.f32 0.25, %v16210_v7  ;;  %v3278_v59 = vsub.f32 %v10327_v38, %v16170_v12  ;;  %vm16243_vm3 = vcmp.eq.f32.partialorder %v16214_v25, %v15461_v28  ;;  %vm16244_vm8 = vcmp.ne.s32.totalorder %v16158_v1, %v8005_v57 }
 0x234   : > { %vm10397_vm2 = vmand %vm16244_vm8, %vm16243_vm3  ;;  %vm16248_vm4 = vnez %v16247_v20  ;;  %5994 = vlog2.f32 %v1523_v54  ;;  %v10409_v34 = vand.u32 2147483647, %v1210_v8  ;;  %v10412_v25 = vmul.f32 0.25, %v10302_v46  ;;  %v16258_v54 = vld [vmem:[#allocation123_spill] sm:$0xff] }
 0x235   : > { %16242 = vst [vmem:[#allocation59_spill] sm:$0xff] %v10387_v27  ;;  %vm1031_vm0 = vmand %vm10335_vm7, %vm10382_vm10  ;;  %v4741_v3 = vsel %vm16248_vm4, %v4725_v56, 0.0  ;;  %v4232_v1 = vsub.f32 %v10343_v41, %v16197_v44  ;;  %v16251_v27 = vld [vmem:[#allocation64_spill] sm:$0xff]  ;;  %vm16252_vm3 = vcmp.lt.f32.partialorder %v16193_v48, 0.16  ;;  %v16253_v50 = vmov 0 }
 0x236   : > { %16249 = vst [vmem:[#allocation16_spill] sm:$0xff] %v10409_v34  ;;  %16250 = vst [vmem:[#allocation158_spill] sm:$0xff] %v10412_v25  ;;  %vm4117_vm8 = vcmp.lt.f32.partialorder %v16251_v27, 0.16  ;;  %v16256_v56 = vld [vmem:[#allocation160_spill] sm:$0xff]  ;;  %v4757_v49 = vmul.f32 0.5, %v4741_v3  ;;  %v10429_v20 = vmul.f32 %v10104_v35, %v16258_v54  ;;  %v10445_v3 = vpop.eup %5986  ;;  %v10524_v18 = vmul.f32 %v10290_v52, %v10290_v52 }
 0x237   : > { %vm10419_vm9 = vmand %vm1031_vm0, %vm16252_vm3  ;;  %v10425_v8 = vand.u32 2147483647, %v2324_v15  ;;  %v16260_v25 = vmax.f32 %v16193_v48, 1e-12  ;;  %vm16262_vm10 = vcmp.eq.s32.totalorder %v16169_v62, 1  ;;  %v2557_v15 = vmul.f32 %v10313_v24, %v10125_v36  ;;  %v16263_v54 = vld [vmem:[#allocation129_spill] sm:$0xff] }
 0x238   : > { %v16254_v50 = vsel %vm10419_vm9, 4294967295, %v16253_v50  ;;  %16259 = vst [vmem:[#allocation102_spill] sm:$0xff] %v10429_v20  ;;  %vm2161_vm0 = vmand %vm16262_vm10, %vm15753_vm12  ;;  %v1205_v48 = vsub.f32 %v10375_v45, %v8811_v4  ;;  %vm3067_vm10 = vcmp.ne.s32.totalorder %v16256_v56, %v7995_v19  ;;  %v10461_v36 = vand.u32 2147483647, %v3278_v59 }
 0x239   : > { %16255 = vst [vmem:[#allocation142_spill] sm:$0xff] %v16254_v50  ;;  %16257 = vst [vmem:[#allocation27_spill] sm:$0xff] %v10425_v8  ;;  %v10435_v46 = vsel %vm10419_vm9, %v16260_v25, 1.0  ;;  %v10451_v25 = vmul.f32 %v10127_v23, %v16263_v54  ;;  %v4773_v50 = vadd.f32 %v4757_v49, %v3819_v22  ;;  %v16265_v8 = vld [vmem:[#allocation187_spill] sm:$0xff]  ;;  %v10464_v34 = vmul.f32 0.25, %v10327_v38  ;;  %v16274_v54 = vld [vmem:[#allocation73_spill] sm:$0xff] }
 0x23a   : > { %16261 = vst [vmem:[#allocation149_spill] sm:$0xff] %v10435_v46  ;;  %vm2193_vm3 = vmand %vm10351_vm6, %vm2161_vm0  ;;  %v10459_v7 = vadd.f32 %v16170_v12, %v16265_v8  ;;  %v10467_v47 = vmul.f32 0.25, %v10343_v41  ;;  %vm16270_vm4 = vcmp.lt.f32.partialorder %v16209_v42, 0.16  ;;  %v16271_v31 = vmov 0  ;;  %v16276_v49 = vld [vmem:[#allocation132_spill] sm:$0xff] }
 0x23b   : > { %16264 = vst [vmem:[#allocation94_spill] sm:$0xff] %v10451_v25  ;;  %16267 = vst [vmem:[#allocation22_spill] sm:$0xff] %v10461_v36  ;;  %5996 = vlog2.f32 %v2557_v15  ;;  %v10476_v22 = vand.u32 2147483647, %v4232_v1  ;;  %v10480_v59 = vmul.f32 %v10141_v37, %v16276_v49  ;;  %vm16280_vm0 = vcmp.eq.s32.totalorder %v16169_v62, 1  ;;  %v16291_v38 = vld [vmem:[#allocation35_spill] sm:$0xff] }
 0x23c   : > { %16266 = vst [vmem:[#allocation63_spill] sm:$0xff] %v10459_v7  ;;  %16268 = vst [vmem:[#allocation66_spill] sm:$0xff] %v10464_v34  ;;  %v16278_v34 = vmax.f32 %v16209_v42, 1e-12  ;;  %v10496_v1 = vmul.f32 %v10407_v14, %v10407_v14  ;;  %v10499_v15 = vmul.f32 0.25, %v10375_v45  ;;  %v2319_v42 = vsub.f32 %v10429_v20, %v8839_v60  ;;  %v16292_v37 = vld [vmem:[#allocation40_spill] sm:$0xff] }
 0x23d   : > { %16269 = vst [vmem:[#allocation37_spill] sm:$0xff] %v10467_v47  ;;  %vm10471_vm7 = vmand %vm2193_vm3, %vm16270_vm4  ;;  %v10508_v49 = vmul.f32 %v10445_v3, %v10445_v3  ;;  %v16285_v41 = vmov 0  ;;  %v16288_v36 = vmax.f32 %v16233_v43, 1e-12  ;;  %v10540_v13 = vmul.f32 %v10313_v24, %v10313_v24 }
 0x23e   : > { %v16272_v31 = vsel %vm10471_vm7, 4294967295, %v16271_v31  ;;  %16275 = vst [vmem:[#allocation156_spill] sm:$0xff] %v10476_v22  ;;  %16277 = vst [vmem:[#allocation60_spill] sm:$0xff] %v10480_v59  ;;  %v10486_v47 = vsel %vm10471_vm7, %v16278_v34, 1.0  ;;  %v16282_v34 = vld [vmem:[#allocation179_spill] sm:$0xff]  ;;  %v3273_v22 = vsub.f32 %v10451_v25, %v16170_v12  ;;  %v10544_v23 = vmax.f32 %v10010_v33, %v16292_v37 }
 0x23f   : > { %16273 = vst [vmem:[#allocation111_spill] sm:$0xff] %v16272_v31  ;;  %16279 = vst [vmem:[#allocation164_spill] sm:$0xff] %v10486_v47  ;;  %5998 = vrsqrt.f32 %v16282_v34  ;;  %v10512_v31 = vand.u32 2147483647, %v1205_v48  ;;  %v1459_v37 = vsub.f32 %v10524_v18, %v10496_v1  ;;  %v10563_v47 = vand.u32 2147483647, %v2319_v42 }
 0x240   : > { %vm3115_vm4 = vmand %vm16280_vm0, %vm15765_vm15  ;;  %4789 = vst [vmem:[#allocation2 + $0x30] sm:$0xff] %v4773_v50  ;;  %v10510_v50 = vpop.eup %5988  ;;  %vm16284_vm0 = vcmp.lt.f32.partialorder %v16233_v43, 0.16  ;;  %6000 = vrcp.f32 %v10459_v7  ;;  %v16293_v43 = vld [vmem:[#allocation190_spill] sm:$0xff]  ;;  %v10566_v46 = vmul.f32 0.25, %v10451_v25  ;;  %v2541_v51 = vmul.f32 0.5, %v16349_v0 }
 0x241   : > { %16281 = vst [vmem:[#allocation117_spill] sm:$0xff] %v10499_v15  ;;  %vm3147_vm6 = vmand %vm10364_vm13, %vm3115_vm4  ;;  %vm16290_vm13 = vcmp.eq.s32.totalorder %v16169_v62, 1  ;;  %v4227_v62 = vsub.f32 %v10480_v59, %v16197_v44  ;;  %v10577_v32 = vpop.eup %5990  ;;  %v10581_v42 = vmul.f32 %v10510_v50, %v16201_v17  ;;  %v16308_v15 = vld [vmem:[#allocation41_spill] sm:$0xff]  ;;  %v10597_v25 = vand.u32 2147483647, %v3273_v22  ;;  %v16325_v7 = vld [vmem:[#allocation54_spill] sm:$0xff] }
 0x242   : > { %16283 = vst [vmem:[#allocation165_spill] sm:$0xff] %v10510_v50  ;;  %vm10518_vm3 = vmand %vm3147_vm6, %vm16284_vm0  ;;  %v10600_v17 = vmul.f32 0.25, %v10480_v59  ;;  %v16313_v50 = vld [vmem:[#allocation68_spill] sm:$0xff]  ;;  %vm16321_vm4 = vcmp.ne.s32.totalorder %v16256_v56, %v7985_v40  ;;  %v16324_v59 = vld [vmem:[#allocation189_spill] sm:$0xff]  ;;  %vm16357_vm7 = vcmp.lt.f32.partialorder %v16308_v15, 0.16 }
 0x243   : > { %v16286_v41 = vsel %vm10518_vm3, 4294967295, %v16285_v41  ;;  %v10531_v48 = vsel %vm10518_vm3, %v16288_v36, 1.0  ;;  %vm4069_vm6 = vmand %vm16290_vm13, %vm15780_vm1  ;;  %v10551_v36 = vmul.f32 0.25, %v10429_v20  ;;  %16298 = vst [vmem:[#allocation73_spill] sm:$0xff] %v10563_v47  ;;  %v10614_v22 = vand.u32 2147483647, %v4227_v62 }
 0x244   : > { %16287 = vst [vmem:[#allocation110_spill] sm:$0xff] %v16286_v41  ;;  %16289 = vst [vmem:[#allocation64_spill] sm:$0xff] %v10531_v48  ;;  %v10548_v41 = vadd.f32 %v16197_v44, %v16293_v43  ;;  %v16296_v48 = vld [vmem:[#allocation143_spill] sm:$0xff]  ;;  %v10593_v43 = vmax.f32 %v10010_v33, %v16309_v26  ;;  %v10635_v62 = vmul.f32 %v10577_v32, %v16228_v55  ;;  %v16371_v8 = vmov 0 }
 0x245   : > { %16295 = vst [vmem:[#allocation123_spill] sm:$0xff] %v10551_v36  ;;  %v10557_v35 = vmul.f32 %v10156_v5, %v16296_v48  ;;  %vm4101_vm0 = vmand %vm10397_vm2, %vm4069_vm6  ;;  %v16300_v36 = vmov 0  ;;  %v2493_v48 = vsub.f32 %v10540_v13, %v10508_v49  ;;  %v16305_v5 = vld [vmem:[#allocation188_spill] sm:$0xff]  ;;  %vm16315_vm6 = vcmp.ne.s32.totalorder %v16256_v56, %v7971_v10 }
 0x246   : > { %16294 = vst [vmem:[#allocation160_spill] sm:$0xff] %v10548_v41  ;;  %16299 = vst [vmem:[#allocation132_spill] sm:$0xff] %v10566_v46  ;;  %6002 = vrcp.f32 %v10548_v41  ;;  %v16306_v46 = vmax.f32 %v16251_v27, 1e-12  ;;  %v10595_v41 = vpop.eup %5992  ;;  %v16318_v27 = vld [vmem:[#allocation166_spill] sm:$0xff]  ;;  %vm16320_vm2 = vcmp.eq.f32.partialorder %v16313_v50, %v15459_v61  ;;  %v2326_v55 = vsub.f32 %v10581_v42, %v8839_v60 }
 0x247   : > { %16297 = vst [vmem:[#allocation129_spill] sm:$0xff] %v10557_v35  ;;  %vm10570_vm13 = vmand %vm4101_vm0, %vm4117_vm8  ;;  %6004 = vrsqrt.f32 %v16305_v5  ;;  %vm16314_vm8 = vcmp.eq.f32.partialorder %v16313_v50, %v15455_v9  ;;  %v1507_v26 = vmul.f32 0.5, %v16318_v27  ;;  %v10631_v47 = vmul.f32 %v16318_v27, %v16325_v7  ;;  %v16332_v27 = vld [vmem:[#allocation9_spill] sm:$0xff] }
 0x248   : > { %v16301_v36 = vsel %vm10570_vm13, 4294967295, %v16300_v36  ;;  %16303 = vst [vmem:[#allocation35_spill] sm:$0xff] %v10577_v32  ;;  %16304 = vst [vmem:[#allocation40_spill] sm:$0xff] %v10581_v42  ;;  %v10588_v39 = vsel %vm10570_vm13, %v16306_v46, 1.0  ;;  %6006 = vrcp.f32 %v10544_v23  ;;  %v2509_v7 = vmul.f32 %v2493_v48, %v16332_v27  ;;  %v16340_v48 = vld [vmem:[#allocation171_spill] sm:$0xff]  ;;  %v16347_v46 = vld [vmem:[#allocation25_spill] sm:$0xff] }
 0x249   : > { %16302 = vst [vmem:[#allocation179_spill] sm:$0xff] %v16301_v36  ;;  %16307 = vst [vmem:[#allocation143_spill] sm:$0xff] %v10588_v39  ;;  %v5995_v36 = vpop.eup %5994  ;;  %v1212_v39 = vsub.f32 %v10557_v35, %v8811_v4  ;;  %v10654_v32 = vmul.f32 %v10595_v41, %v16238_v30  ;;  %vm16334_vm13 = vcmp.eq.s32.totalorder %v16274_v54, 1  ;;  %v1427_v20 = vsub.f32 %v10407_v14, %v10290_v52 }
 0x24a   : > { %16310 = vst [vmem:[#allocation188_spill] sm:$0xff] %v10595_v41  ;;  %16311 = vst [vmem:[#allocation41_spill] sm:$0xff] %v10597_v25  ;;  %v1475_v25 = vmul.f32 %v1459_v37, %v16324_v59  ;;  %v16331_v59 = vld [vmem:[#allocation42_spill] sm:$0xff]  ;;  %v1542_v37 = vmul.f32 0.6931472, %v5995_v36  ;;  %v10664_v36 = vmul.f32 0.25, %v10557_v35  ;;  %v1673_v52 = vsub.f32 %v8811_v4, %v16340_v48 }
 0x24b   : > { %16312 = vst [vmem:[#allocation194_spill] sm:$0xff] %v10600_v17  ;;  %vm10608_vm0 = vmand %vm16315_vm6, %vm16314_vm8  ;;  %vm16328_vm6 = vcmp.eq.f32.partialorder %v16313_v50, %v15460_v53  ;;  %v2461_v27 = vsub.f32 %v10445_v3, %v10313_v24  ;;  %v10684_v41 = vadd.f32 %v8811_v4, %v10375_v45  ;;  %v16348_v48 = vld [vmem:[#allocation169_spill] sm:$0xff]  ;;  %v10698_v45 = vpop.permute.xlu0 %1715  ;;  %v16361_v17 = vld [vmem:[#allocation144_spill] sm:$0xff] }
 0x24c   : > { %16319 = vst [vmem:[#allocation68_spill] sm:$0xff] %v10614_v22  ;;  %vm10624_vm8 = vmand %vm16321_vm4, %vm16320_vm2  ;;  %v16327_v22 = vld [vmem:[#allocation193_spill] sm:$0xff]  ;;  %vm16337_vm2 = vcmp.ne.s32.totalorder %v16256_v56, %v8005_v57  ;;  %v16344_v56 = vmov 0  ;;  %v1491_v35 = vadd.f32 %v1475_v25, %v1427_v20  ;;  %v1571_v24 = vmul.f32 %v1542_v37, %v1507_v26 }
 0x24d   : > { %16326 = vst [vmem:[#allocation166_spill] sm:$0xff] %v10635_v62  ;;  %6008 = vrsqrt.f32 %v16327_v22  ;;  %vm10644_vm4 = vmand %vm3067_vm10, %vm16328_vm6  ;;  %vm16336_vm6 = vcmp.eq.f32.partialorder %v16313_v50, %v15461_v28  ;;  %v5997_v50 = vpop.eup %5996  ;;  %v2525_v20 = vadd.f32 %v2509_v7, %v2461_v27  ;;  %v10716_v37 = vand.u32 2147483647, %v2326_v55  ;;  %v16524_v11 = vld [vmem:[#allocation160_spill] sm:$0xff] }
 0x24e   : > { %16333 = vst [vmem:[#allocation189_spill] sm:$0xff] %v10654_v32  ;;  %vm994_vm10 = vmand %vm16334_vm13, %vm15814_vm5  ;;  %6010 = vrcp.f32 %v10593_v43  ;;  %v2576_v25 = vmul.f32 0.6931472, %v5997_v50  ;;  %v10714_v26 = vpop.eup %5998  ;;  %v1625_v7 = vsub.f32 %v10496_v1, %v10524_v18  ;;  %v16358_v50 = vmov 0  ;;  %v16362_v18 = vld [vmem:[#allocation48_spill] sm:$0xff] }
 0x24f   : > { %16335 = vst [vmem:[#allocation193_spill] sm:$0xff] %v10664_v36  ;;  %vm10672_vm3 = vmand %vm16337_vm2, %vm16336_vm6  ;;  %v10686_v36 = vand.u32 2147483647, %v1212_v39  ;;  %vm16343_vm2 = vcmp.lt.f32.partialorder %v16291_v38, 0.16  ;;  %v3280_v39 = vsub.f32 %v10635_v62, %v16170_v12  ;;  %v10734_v55 = vpop.eup %6000  ;;  %v1785_v1 = vsub.f32 %v10698_v45, %v10407_v14 }
 0x250   : > { %vm1026_vm13 = vmand %vm10608_vm0, %vm994_vm10  ;;  %16341 = vst [vmem:[#allocation42_spill] sm:$0xff] %v10684_v41  ;;  %vm10730_vm10 = vcmp.lt.f32.partialorder %v10010_v33, %v1673_v52  ;;  %6012 = vrcp.f32 %v10684_v41  ;;  %v16363_v52 = vmax.f32 %v16308_v15, 1e-12  ;;  %v10766_v15 = vmul.f32 0.25, %v10635_v62 }
 0x251   : > { %16342 = vst [vmem:[#allocation9_spill] sm:$0xff] %v10686_v36  ;;  %vm10690_vm6 = vmand %vm1026_vm13, %vm16343_vm2  ;;  %v16350_v36 = vmax.f32 %v16291_v38, 1e-12  ;;  %vm16351_vm13 = vcmp.eq.s32.totalorder %v16274_v54, 1  ;;  %v10719_v38 = vmul.f32 0.25, %v10581_v42  ;;  %6014 = vrsqrt.f32 %v16362_v18 }
 0x252   : > { %v16345_v56 = vsel %vm10690_vm6, 4294967295, %v16344_v56  ;;  %vm2156_vm2 = vmand %vm16351_vm13, %vm15753_vm12  ;;  %16352 = vst [vmem:[#allocation25_spill] sm:$0xff] %v10714_v26  ;;  %v10763_v14 = vand.u32 2147483647, %v3280_v39 }
 0x253   : > { %16346 = vst [vmem:[#allocation171_spill] sm:$0xff] %v16345_v56  ;;  %v10706_v6 = vsel %vm10690_vm6, %v16350_v36, 1.0  ;;  %16353 = vst [vmem:[#allocation169_spill] sm:$0xff] %v10716_v37  ;;  %v4234_v36 = vsub.f32 %v10654_v32, %v16197_v44  ;;  %v2659_v37 = vsub.f32 %v10508_v49, %v10540_v13  ;;  %v1587_v13 = vadd.f32 %v1571_v24, %v1491_v35 }
 0x254   : > { %16354 = vst [vmem:[#allocation172_spill] sm:$0xff] %v10719_v38  ;;  %vm2188_vm0 = vmand %vm10624_vm8, %vm2156_vm2  ;;  %v2605_v38 = vmul.f32 %v2576_v25, %v2541_v51  ;;  %v2739_v51 = vsub.f32 %v10698_v45, %v10445_v3  ;;  %v16367_v25 = vld [vmem:[#allocation199_spill] sm:$0xff]  ;;  %v10777_v35 = vmul.f32 0.25, %v10654_v32  ;;  %v10781_v3 = vmul.f32 %v10714_v26, %v16282_v34  ;;  %v16377_v34 = vld [vmem:[#allocation13_spill] sm:$0xff] }
 0x255   : > { %vm10738_vm9 = vmand %vm2188_vm0, %vm16357_vm7  ;;  %16365 = vst [vmem:[#allocation144_spill] sm:$0xff] %v10763_v14  ;;  %v1641_v24 = vmul.f32 %v1625_v7, %v10631_v47  ;;  %v16378_v47 = vld [vmem:[#allocation182_spill] sm:$0xff]  ;;  %v10809_v32 = vand.u32 2147483647, %v4234_v36  ;;  %vm16421_vm6 = vcmp.lt.f32.partialorder %v10010_v33, %v10055_v21  ;;  %v16427_v26 = vld [vmem:[#allocation191_spill] sm:$0xff] }
 0x256   : > { %v16359_v50 = vsel %vm10738_vm9, 4294967295, %v16358_v50  ;;  %v10753_v42 = vsel %vm10738_vm9, %v16363_v52, 1.0  ;;  %vm16364_vm7 = vmmov %vm16351_vm13  ;;  %16366 = vst [vmem:[#allocation48_spill] sm:$0xff] %v10766_v15  ;;  %v2621_v49 = vadd.f32 %v2605_v38, %v2525_v20  ;;  %v2643_v52 = vmul.f32 %v16349_v0, %v16367_v25  ;;  %v16428_v21 = vld [vmem:[#allocation84_spill] sm:$0xff]  ;;  %v16441_v14 = vld [vmem:[#allocation157_spill] sm:$0xff] }
 0x257   : > { %16360 = vst [vmem:[#allocation210_spill] sm:$0xff] %v16359_v50  ;;  %vm3110_vm0 = vmand %vm16364_vm7, %vm15765_vm15  ;;  %v10774_v50 = vpop.eup %6002  ;;  %vm16370_vm7 = vcmp.lt.f32.partialorder %v16331_v59, 0.16  ;;  %v3511_v0 = vmul.f32 %v10734_v55, %v10544_v23  ;;  %v16375_v20 = vmax.f32 %v16331_v59, 1e-12  ;;  %v2707_v7 = vsub.f32 %v8839_v60, %v16378_v47  ;;  %v16432_v25 = vld [vmem:[#allocation204_spill] sm:$0xff] }
 0x258   : > { %vm3142_vm8 = vmand %vm10644_vm4, %vm3110_vm0  ;;  %16368 = vst [vmem:[#allocation211_spill] sm:$0xff] %v10777_v35  ;;  %v10792_v39 = vpop.eup %6004  ;;  %v2675_v35 = vmul.f32 %v2659_v37, %v2643_v52  ;;  %v1801_v23 = vmul.f32 2.0, %v1785_v1  ;;  %v1657_v59 = vadd.f32 %v1641_v24, %v1587_v13  ;;  %v2755_v54 = vmul.f32 2.0, %v2739_v51  ;;  %v16384_v1 = vld [vmem:[#allocation177_spill] sm:$0xff] }
 0x259   : > { %16369 = vst [vmem:[#allocation212_spill] sm:$0xff] %v10781_v3  ;;  %vm10785_vm2 = vmand %vm3142_vm8, %vm16370_vm7  ;;  %v10807_v15 = vpop.eup %6006  ;;  %v16381_v37 = vmov 0  ;;  %6016 = vlog2.f32 %v3511_v0  ;;  %v4465_v30 = vmul.f32 %v10774_v50, %v10593_v43  ;;  %v1207_v13 = vsub.f32 %v10781_v3, %v8811_v4 }
 0x25a   : > { %v16372_v8 = vsel %vm10785_vm2, 4294967295, %v16371_v8  ;;  %16374 = vst [vmem:[#allocation214_spill] sm:$0xff] %v10792_v39  ;;  %v10798_v38 = vsel %vm10785_vm2, %v16375_v20, 1.0  ;;  %vm16376_vm4 = vmmov %vm16351_vm13  ;;  %v2691_v52 = vadd.f32 %v2675_v35, %v2621_v49  ;;  %v10822_v20 = vmul.f32 0.5, %v16384_v1  ;;  %v10826_v36 = vpop.eup %6008  ;;  %v16389_v35 = vld [vmem:[#allocation81_spill] sm:$0xff] }
 0x25b   : > { %16373 = vst [vmem:[#allocation213_spill] sm:$0xff] %v16372_v8  ;;  %vm4064_vm8 = vmand %vm16376_vm4, %vm15780_vm1  ;;  %vm16380_vm4 = vcmp.lt.f32.partialorder %v16347_v46, 0.16  ;;  %v10832_v51 = vmul.f32 %v10792_v39, %v16305_v5  ;;  %v16387_v24 = vmax.f32 %v16347_v46, 1e-12  ;;  %v10846_v0 = vpop.eup %6010  ;;  %v10849_v47 = vmul.f32 0.25, %v10781_v3 }
 0x25c   : > { %16379 = vst [vmem:[#allocation13_spill] sm:$0xff] %v10809_v32  ;;  %vm4096_vm7 = vmand %vm10672_vm3, %vm4064_vm8  ;;  %vm10842_vm8 = vcmp.lt.f32.partialorder %v10010_v33, %v2707_v7  ;;  %v16393_v5 = vld [vmem:[#allocation46_spill] sm:$0xff]  ;;  %v10863_v7 = vmul.f32 %v10807_v15, %v10807_v15  ;;  %v1817_v62 = vsel %vm10730_vm10, %v1801_v23, 0.0  ;;  %6018 = vlog2.f32 %v4465_v30  ;;  %v16405_v23 = vld [vmem:[#allocation201_spill] sm:$0xff] }
 0x25d   : > { %vm10817_vm0 = vmand %vm4096_vm7, %vm16380_vm4  ;;  %16385 = vst [vmem:[#allocation177_spill] sm:$0xff] %v10826_v36  ;;  %vm16394_vm7 = vcmp.eq.f32.partialorder %v16393_v5, %v15455_v9  ;;  %vm16395_vm4 = vcmp.ne.s32.totalorder %v16348_v48, %v7971_v10  ;;  %vm16399_vm3 = vcmp.eq.f32.partialorder %v16393_v5, %v15459_v61  ;;  %v2771_v8 = vsel %vm10842_vm8, %v2755_v54, 0.0  ;;  %v10940_v39 = vpop.eup %6012  ;;  %v16426_v46 = vld [vmem:[#allocation36_spill] sm:$0xff] }
 0x25e   : > { %v16382_v37 = vsel %vm10817_vm0, 4294967295, %v16381_v37  ;;  %16386 = vst [vmem:[#allocation215_spill] sm:$0xff] %v10832_v51  ;;  %v10838_v49 = vsel %vm10817_vm0, %v16387_v24, 1.0  ;;  %16392 = vst [vmem:[#allocation81_spill] sm:$0xff] %v10849_v47  ;;  %v16398_v24 = vld [vmem:[#allocation200_spill] sm:$0xff]  ;;  %v10887_v27 = vmul.f32 %v10826_v36, %v16327_v22  ;;  %6020 = vrsqrt.f32 %v16405_v23  ;;  %v16414_v36 = vld [vmem:[#allocation133_spill] sm:$0xff] }
 0x25f   : > { %16383 = vst [vmem:[#allocation182_spill] sm:$0xff] %v16382_v37  ;;  %16388 = vst [vmem:[#allocation216_spill] sm:$0xff] %v10838_v49  ;;  %v10867_v32 = vmul.f32 %v16384_v1, %v16398_v24  ;;  %v1833_v37 = vadd.f32 %v1817_v62, %v1657_v59  ;;  %v16403_v1 = vld [vmem:[#allocation58_spill] sm:$0xff]  ;;  %vm16406_vm10 = vcmp.eq.f32.partialorder %v16393_v5, %v15460_v53  ;;  %v16410_v59 = vld [vmem:[#allocation7_spill] sm:$0xff]  ;;  %v10905_v54 = vand.u32 2147483647, %v1207_v13 }
 0x260   : > { %vm10857_vm13 = vmand %vm16395_vm4, %vm16394_vm7  ;;  %vm16400_vm7 = vcmp.ne.s32.totalorder %v16348_v48, %v7985_v40  ;;  %v1317_v56 = vmax.f32 %v16403_v1, %v10512_v31  ;;  %16404 = vst [vmem:[#allocation46_spill] sm:$0xff] %v10887_v27  ;;  %v10903_v31 = vmul.f32 %v10734_v55, %v10734_v55  ;;  %v2787_v22 = vadd.f32 %v2771_v8, %v2691_v52  ;;  %v364_v52 = vld [vmem:[#allocation2 + $0x58] sm:$0xff]  ;;  %v16455_v62 = vld [vmem:[#allocation102_spill] sm:$0xff] }
 0x261   : > { %vm10877_vm4 = vmand %vm16400_vm7, %vm16399_vm3  ;;  %vm16407_vm3 = vcmp.ne.s32.totalorder %v16348_v48, %v7995_v19  ;;  %16411 = vst [vmem:[#allocation58_spill] sm:$0xff] %v10905_v54  ;;  %v2321_v30 = vsub.f32 %v10832_v51, %v8839_v60  ;;  %vm16412_vm0 = vcmp.eq.s32.totalorder %v16361_v17, 1  ;;  %v10915_v43 = vmul.f32 %v10846_v0, %v10846_v0  ;;  %v10957_v54 = vpop.eup %6014 }
 0x262   : > { %vm10896_vm7 = vmand %vm16407_vm3, %vm16406_vm10  ;;  %vm16413_vm3 = vcmp.lt.f32.partialorder %v10010_v33, %v10051_v58  ;;  %6022 = vrsqrt.f32 %v16414_v36  ;;  %vm16415_vm8 = vcmp.eq.f32.partialorder %v16393_v5, %v15461_v28  ;;  %vm16416_vm2 = vcmp.ne.s32.totalorder %v16348_v48, %v8005_v57  ;;  %16430 = vst [vmem:[#allocation7_spill] sm:$0xff] %v10957_v54 }
 0x263   : > { %vm996_vm10 = vmand %vm16412_vm0, %vm15814_vm5  ;;  %v1865_v47 = vsel %vm16413_vm3, %v1833_v37, 0.0  ;;  %v3447_v58 = vsub.f32 %v10903_v31, %v10863_v7  ;;  %v16419_v37 = vld [vmem:[#allocation8_spill] sm:$0xff]  ;;  %v2819_v5 = vsel %vm16421_vm6, %v2787_v22, 0.0  ;;  %v16423_v48 = vmov 0 }
 0x264   : > { %vm10927_vm9 = vmand %vm16416_vm2, %vm16415_vm8  ;;  %vm16420_vm3 = vnez %v16419_v37  ;;  %vm16422_vm2 = vcmp.lt.f32.partialorder %v16377_v34, 0.16  ;;  %vm16429_vm6 = vnez %v16428_v21  ;;  %6024 = vrcp.f32 %v1317_v56  ;;  %v16436_v21 = vld [vmem:[#allocation147_spill] sm:$0xff] }
 0x265   : > { %vm1028_vm0 = vmand %vm10857_vm13, %vm996_vm10  ;;  %v1881_v13 = vsel %vm16420_vm3, %v1865_v47, 0.0  ;;  %vm4114_vm13 = vcmp.lt.f32.partialorder %v16426_v46, 0.16  ;;  %v10953_v47 = vmul.f32 %v10774_v50, %v10774_v50  ;;  %v2835_v22 = vsel %vm16429_vm6, %v2819_v5, 0.0 }
 0x266   : > { %vm10944_vm8 = vmand %vm1028_vm0, %vm16422_vm2  ;;  %v1897_v37 = vmul.f32 0.5, %v1881_v13  ;;  %v10960_v3 = vmul.f32 0.25, %v10832_v51  ;;  %v3275_v24 = vsub.f32 %v10887_v27, %v16170_v12  ;;  %6026 = vrsqrt.f32 %v16432_v25 }
 0x267   : > { %v16424_v48 = vsel %vm10944_vm8, 4294967295, %v16423_v48  ;;  %v16433_v49 = vmax.f32 %v16377_v34, 1e-12  ;;  %vm16434_vm0 = vcmp.eq.s32.totalorder %v16361_v17, 1  ;;  %6028 = vrsqrt.f32 %v10199_v63 }
 0x268   : > { %16425 = vst [vmem:[#allocation201_spill] sm:$0xff] %v16424_v48  ;;  %16431 = vst [vmem:[#allocation133_spill] sm:$0xff] %v10960_v3  ;;  %v4401_v34 = vsub.f32 %v10953_v47, %v10915_v43  ;;  %v2851_v13 = vmul.f32 0.5, %v2835_v22  ;;  %v10984_v5 = vand.u32 2147483647, %v2321_v30  ;;  %6030 = vrsqrt.f32 %v16436_v21  ;;  %v16442_v48 = vld [vmem:[#allocation39_spill] sm:$0xff] }
 0x269   : > { %v10969_v41 = vsel %vm10944_vm8, %v16433_v49, 1.0  ;;  %vm2158_vm3 = vmand %vm16434_vm0, %vm15753_vm12  ;;  %v1913_v49 = vadd.f32 %v1897_v37, %v364_v52  ;;  %vm16437_vm0 = vcmp.lt.f32.partialorder %v16389_v35, 0.16  ;;  %v16438_v25 = vmov 0  ;;  %v16443_v30 = vld [vmem:[#allocation136_spill] sm:$0xff] }
 0x26a   : > { %vm2190_vm6 = vmand %vm10877_vm4, %vm2158_vm3  ;;  %16435 = vst [vmem:[#allocation8_spill] sm:$0xff] %v10984_v5  ;;  %v3463_v3 = vmul.f32 %v3447_v58, %v16442_v48  ;;  %v1525_v51 = vmul.f32 %v10940_v39, %v1317_v56  ;;  %v10998_v52 = vmul.f32 %v10957_v54, %v16362_v18  ;;  %6032 = vrsqrt.f32 %v16443_v30  ;;  %v16448_v58 = vld [vmem:[#allocation151_spill] sm:$0xff]  ;;  %v16468_v5 = vld [vmem:[#allocation21_spill] sm:$0xff] }
 0x26b   : > { %vm10989_vm2 = vmand %vm2190_vm6, %vm16437_vm0  ;;  %v16444_v37 = vmax.f32 %v16389_v35, 1e-12  ;;  %vm16446_vm3 = vcmp.eq.s32.totalorder %v16361_v17, 1  ;;  %v11013_v56 = vadd.f32 %v2851_v13, %v1913_v49  ;;  %v11016_v18 = vmul.f32 0.25, %v10887_v27  ;;  %v16454_v13 = vld [vmem:[#allocation195_spill] sm:$0xff] }
 0x26c   : > { %v16439_v25 = vsel %vm10989_vm2, 4294967295, %v16438_v25  ;;  %vm3112_vm6 = vmand %vm16446_vm3, %vm15765_vm15  ;;  %6034 = vrsqrt.f32 %v16448_v58  ;;  %v3415_v35 = vsub.f32 %v10807_v15, %v10734_v55  ;;  %v3693_v48 = vsub.f32 %v10698_v45, %v10807_v15 }
 0x26d   : > { %16440 = vst [vmem:[#allocation36_spill] sm:$0xff] %v16439_v25  ;;  %v11005_v22 = vsel %vm10989_vm2, %v16444_v37, 1.0  ;;  %16447 = vst [vmem:[#allocation84_spill] sm:$0xff] %v11016_v18  ;;  %v6017_v37 = vpop.eup %6016  ;;  %v11025_v25 = vand.u32 2147483647, %v3275_v24  ;;  %v16451_v49 = vmov 0  ;;  %v4417_v18 = vmul.f32 %v4401_v34, %v16454_v13 }
 0x26e   : > { %16445 = vst [vmem:[#allocation191_spill] sm:$0xff] %v11005_v22  ;;  %vm3144_vm4 = vmand %vm10896_vm7, %vm3112_vm6  ;;  %vm16450_vm3 = vcmp.lt.f32.partialorder %v16410_v59, 0.16  ;;  %6036 = vlog2.f32 %v1525_v51  ;;  %v11036_v54 = vadd.f32 %v8839_v60, %v16455_v62  ;;  %v16456_v55 = vmax.f32 %v16410_v59, 1e-12  ;;  %v16459_v24 = vld [vmem:[#allocation87_spill] sm:$0xff]  ;;  %v6019_v27 = vpop.eup %6018 }
 0x26f   : > { %16449 = vst [vmem:[#allocation147_spill] sm:$0xff] %v11025_v25  ;;  %vm11029_vm0 = vmand %vm3144_vm4, %vm16450_vm3  ;;  %vm16458_vm7 = vcmp.eq.s32.totalorder %v16361_v17, 1  ;;  %v3479_v25 = vadd.f32 %v3463_v3, %v3415_v35  ;;  %v3530_v34 = vmul.f32 0.6931472, %v6017_v37  ;;  %v3613_v51 = vsub.f32 %v10863_v7, %v10903_v31  ;;  %v16460_v59 = vld [vmem:[#allocation187_spill] sm:$0xff]  ;;  %v11071_v37 = vpop.eup %6020 }
 0x270   : > { %v16452_v49 = vsel %vm11029_vm0, 4294967295, %v16451_v49  ;;  %v11042_v15 = vsel %vm11029_vm0, %v16456_v55, 1.0  ;;  %vm4066_vm4 = vmand %vm16458_vm7, %vm15780_vm1  ;;  %v4229_v13 = vsub.f32 %v10998_v52, %v16197_v44  ;;  %v3661_v55 = vsub.f32 %v16170_v12, %v16460_v59  ;;  %16465 = vst [vmem:[#allocation151_spill] sm:$0xff] %v11071_v37 }
 0x271   : > { %16453 = vst [vmem:[#allocation157_spill] sm:$0xff] %v16452_v49  ;;  %16457 = vst [vmem:[#allocation39_spill] sm:$0xff] %v11042_v15  ;;  %v4369_v17 = vsub.f32 %v10846_v0, %v10774_v50  ;;  %v16461_v49 = vld [vmem:[#allocation180_spill] sm:$0xff]  ;;  %v16462_v3 = vmov 0  ;;  %v3559_v7 = vmul.f32 %v3530_v34, %v10822_v20  ;;  %v4567_v31 = vsub.f32 %v10915_v43, %v10953_v47  ;;  %v11097_v47 = vpop.eup %6022 }
 0x272   : > { %vm4098_vm3 = vmand %vm10927_vm9, %vm4066_vm4  ;;  %v4449_v15 = vmul.f32 0.5, %v16461_v49  ;;  %v3709_v8 = vmul.f32 2.0, %v3693_v48  ;;  %v4647_v35 = vsub.f32 %v10698_v45, %v10846_v0  ;;  %v16466_v50 = vmax.f32 %v16426_v46, 1e-12  ;;  %v16469_v20 = vld [vmem:[#allocation88_spill] sm:$0xff]  ;;  %v16474_v46 = vld [vmem:[#allocation73_spill] sm:$0xff]  ;;  %v11116_v34 = vpop.eup %6024 }
 0x273   : > { %vm11062_vm7 = vmand %vm4098_vm3, %vm4114_vm13  ;;  %v4433_v62 = vadd.f32 %v4417_v18, %v4369_v17  ;;  %v4484_v22 = vmul.f32 0.6931472, %v6019_v27  ;;  %6038 = vrcp.f32 %v11036_v54  ;;  %vm16470_vm13 = vcmp.eq.f32.partialorder %v16469_v20, %v15455_v9  ;;  %16475 = vst [vmem:[#allocation87_spill] sm:$0xff] %v11097_v47 }
 0x274   : > { %v16463_v3 = vsel %vm11062_vm7, 4294967295, %v16462_v3  ;;  %v11077_v59 = vsel %vm11062_vm7, %v16466_v50, 1.0  ;;  %6040 = vrsqrt.f32 %v10706_v6  ;;  %vm16471_vm4 = vcmp.ne.s32.totalorder %v16427_v26, %v7971_v10  ;;  %v16481_v10 = vld [vmem:[#allocation63_spill] sm:$0xff] }
 0x275   : > { %16464 = vst [vmem:[#allocation136_spill] sm:$0xff] %v16463_v3  ;;  %16467 = vst [vmem:[#allocation195_spill] sm:$0xff] %v11077_v59  ;;  %v3575_v0 = vadd.f32 %v3559_v7, %v3479_v25  ;;  %v3629_v43 = vmul.f32 %v3613_v51, %v10867_v32  ;;  %v11095_v27 = vmax.f32 %v16403_v1, %v16474_v46  ;;  %v11100_v18 = vmul.f32 0.25, %v10998_v52  ;;  %v16482_v25 = vld [vmem:[#allocation202_spill] sm:$0xff]  ;;  %v11135_v51 = vpop.eup %6026 }
 0x276   : > { %vm11088_vm3 = vmand %vm16471_vm4, %vm16470_vm13  ;;  %vm16477_vm9 = vcmp.eq.f32.partialorder %v16469_v20, %v15459_v61  ;;  %vm16478_vm13 = vcmp.ne.s32.totalorder %v16427_v26, %v7985_v40  ;;  %v4513_v32 = vmul.f32 %v4484_v22, %v4449_v15  ;;  %v4551_v48 = vmul.f32 %v16461_v49, %v16482_v25  ;;  %v16487_v40 = vld [vmem:[#allocation10_spill] sm:$0xff]  ;;  %16489 = vst [vmem:[#allocation180_spill] sm:$0xff] %v11135_v51  ;;  %v11141_v50 = vpop.eup %6028  ;;  %v16548_v51 = vld [vmem:[#allocation149_spill] sm:$0xff] }
 0x277   : > { %16476 = vst [vmem:[#allocation187_spill] sm:$0xff] %v11100_v18  ;;  %vm11108_vm4 = vmand %vm16478_vm13, %vm16477_vm9  ;;  %6042 = vrsqrt.f32 %v10753_v42  ;;  %vm16483_vm10 = vcmp.eq.f32.partialorder %v16469_v20, %v15460_v53  ;;  %vm16484_vm9 = vcmp.ne.s32.totalorder %v16427_v26, %v7995_v19  ;;  %v3645_v22 = vadd.f32 %v3629_v43, %v3575_v0  ;;  %v16488_v49 = vld [vmem:[#allocation94_spill] sm:$0xff]  ;;  %v16504_v0 = vld [vmem:[#allocation60_spill] sm:$0xff] }
 0x278   : > { %vm11125_vm13 = vmand %vm16484_vm9, %vm16483_vm10  ;;  %vm3677_vm7 = vcmp.lt.f32.partialorder %v10010_v33, %v3661_v55  ;;  %v11133_v15 = vadd.f32 %v16170_v12, %v16488_v49  ;;  %vm16490_vm0 = vcmp.eq.s32.totalorder %v16441_v14, 1  ;;  %v4529_v53 = vadd.f32 %v4513_v32, %v4433_v62  ;;  %16491 = vst [vmem:[#allocation21_spill] sm:$0xff] %v11141_v50  ;;  %v16506_v32 = vld [vmem:[#allocation207_spill] sm:$0xff] }
 0x279   : > { %vm998_vm2 = vmand %vm16490_vm0, %vm15814_vm5  ;;  %v4583_v19 = vmul.f32 %v4567_v31, %v4551_v48  ;;  %v3725_v17 = vsel %vm3677_vm7, %v3709_v8, 0.0  ;;  %v4663_v7 = vmul.f32 2.0, %v4647_v35  ;;  %vm16492_vm10 = vcmp.eq.f32.partialorder %v16469_v20, %v15461_v28  ;;  %v16497_v8 = vld [vmem:[#allocation41_spill] sm:$0xff]  ;;  %v11162_v28 = vpop.eup %6030 }
 0x27a   : > { %vm16493_vm9 = vcmp.ne.s32.totalorder %v16427_v26, %v8005_v57  ;;  %vm1030_vm8 = vmand %vm11088_vm3, %vm998_vm2  ;;  %v4615_v62 = vsub.f32 %v16197_v44, %v16496_v29  ;;  %v3741_v31 = vadd.f32 %v3725_v17, %v3645_v22  ;;  %6044 = vrcp.f32 %v11095_v27  ;;  %16498 = vst [vmem:[#allocation88_spill] sm:$0xff] %v11162_v28  ;;  %v16503_v26 = vld [vmem:[#allocation29_spill] sm:$0xff]  ;;  %v11180_v46 = vpop.eup %6032 }
 0x27b   : > { %vm11149_vm6 = vmand %vm16493_vm9, %vm16492_vm10  ;;  %v11160_v35 = vmax.f32 %v16403_v1, %v16497_v8  ;;  %vm16499_vm5 = vcmp.lt.f32.partialorder %v16459_v24, 0.16  ;;  %v16500_v57 = vmov 0  ;;  %vm4116_vm2 = vcmp.lt.f32.partialorder %v16503_v26, 0.16  ;;  %16505 = vst [vmem:[#allocation63_spill] sm:$0xff] %v11180_v46 }
 0x27c   : > { %vm11166_vm0 = vmand %vm1030_vm8, %vm16499_vm5  ;;  %v4599_v20 = vadd.f32 %v4583_v19, %v4529_v53  ;;  %v11173_v45 = vmul.f32 %v11116_v34, %v11116_v34  ;;  %6046 = vrcp.f32 %v11133_v15  ;;  %v11178_v43 = vadd.f32 %v16197_v44, %v16504_v0  ;;  %v11197_v19 = vpop.eup %6034 }
 0x27d   : > { %v16501_v57 = vsel %vm11166_vm0, 4294967295, %v16500_v57  ;;  %6048 = vrsqrt.f32 %v16506_v32  ;;  %v16507_v48 = vmax.f32 %v16459_v24, 1e-12  ;;  %vm16509_vm8 = vcmp.eq.s32.totalorder %v16441_v14, 1  ;;  %16511 = vst [vmem:[#allocation94_spill] sm:$0xff] %v11197_v19  ;;  %v16512_v24 = vld [vmem:[#allocation28_spill] sm:$0xff] }
 0x27e   : > { %16502 = vst [vmem:[#allocation73_spill] sm:$0xff] %v16501_v57  ;;  %vm2160_vm7 = vmand %vm16509_vm8, %vm15753_vm12  ;;  %vm4631_vm3 = vcmp.lt.f32.partialorder %v10010_v33, %v4615_v62  ;;  %vm16510_vm10 = vcmp.lt.f32.partialorder %v10010_v33, %v16481_v10  ;;  %v11199_v17 = vand.u32 2147483647, %v4229_v13  ;;  %vm16513_vm5 = vnez %v16512_v24  ;;  %v6037_v62 = vpop.eup %6036 }
 0x27f   : > { %v11187_v22 = vsel %vm11166_vm0, %v16507_v48, 1.0  ;;  %v3773_v53 = vsel %vm16510_vm10, %v3741_v31, 0.0  ;;  %vm2192_vm9 = vmand %vm11108_vm4, %vm2160_vm7  ;;  %v4679_v16 = vsel %vm4631_vm3, %v4663_v7, 0.0  ;;  %v11207_v8 = vmul.f32 %v10940_v39, %v10940_v39 }
 0x280   : > { %16508 = vst [vmem:[#allocation10_spill] sm:$0xff] %v11187_v22  ;;  %v3789_v29 = vsel %vm16513_vm5, %v3773_v53, 0.0  ;;  %v11211_v10 = vmul.f32 %v11141_v50, %v10199_v63  ;;  %vm16514_vm12 = vcmp.lt.f32.partialorder %v16468_v5, 0.16  ;;  %v16515_v13 = vmov 0  ;;  %v16521_v53 = vld [vmem:[#allocation68_spill] sm:$0xff] }
 0x281   : > { %vm11215_vm8 = vmand %vm2192_vm9, %vm16514_vm12  ;;  %v3805_v9 = vmul.f32 0.5, %v3789_v29  ;;  %v4695_v31 = vadd.f32 %v4679_v16, %v4599_v20  ;;  %6050 = vrcp.f32 %v11160_v35  ;;  %v16518_v7 = vmax.f32 %v16468_v5, 1e-12 }
 0x282   : > { %v16516_v13 = vsel %vm11215_vm8, 4294967295, %v16515_v13  ;;  %vm16520_vm4 = vcmp.eq.s32.totalorder %v16441_v14, 1  ;;  %v1461_v63 = vsub.f32 %v11207_v8, %v11173_v45  ;;  %v11234_v24 = vmax.f32 %v16403_v1, %v16521_v53 }
 0x283   : > { %16517 = vst [vmem:[#allocation190_spill] sm:$0xff] %v16516_v13  ;;  %v11224_v48 = vsel %vm11215_vm8, %v16518_v7, 1.0  ;;  %vm3114_vm7 = vmand %vm16520_vm4, %vm15765_vm15  ;;  %6052 = vrcp.f32 %v11178_v43  ;;  %v11239_v5 = vmul.f32 %v11162_v28, %v16436_v21  ;;  %v11243_v20 = vmul.f32 %v11180_v46, %v16443_v30  ;;  %v11261_v7 = vpop.eup %6038  ;;  %v16577_v46 = vld [vmem:[#allocation123_spill] sm:$0xff] }
 0x284   : > { %16519 = vst [vmem:[#allocation41_spill] sm:$0xff] %v11224_v48  ;;  %vm3146_vm15 = vmand %vm11125_vm13, %vm3114_vm7  ;;  %vm4711_vm3 = vcmp.lt.f32.partialorder %v10010_v33, %v16524_v11  ;;  %v3821_v29 = vadd.f32 %v3805_v9, %v11013_v56  ;;  %v11252_v16 = vmul.f32 %v11071_v37, %v16405_v23  ;;  %6054 = vrsqrt.f32 %v10798_v38  ;;  %v11281_v53 = vpop.eup %6040  ;;  %v16537_v11 = vld [vmem:[#allocation117_spill] sm:$0xff] }
 0x285   : > { %16522 = vst [vmem:[#allocation29_spill] sm:$0xff] %v11239_v5  ;;  %16523 = vst [vmem:[#allocation60_spill] sm:$0xff] %v11243_v20  ;;  %vm16526_vm10 = vcmp.lt.f32.partialorder %v16487_v40, 0.16  ;;  %v16527_v21 = vmov 0  ;;  %v4727_v30 = vsel %vm4711_vm3, %v4695_v31, 0.0  ;;  %v1209_v33 = vsub.f32 %v11211_v10, %v8811_v4 }
 0x286   : > { %16525 = vst [vmem:[#allocation28_spill] sm:$0xff] %v11252_v16  ;;  %vm11257_vm9 = vmand %vm3146_vm15, %vm16526_vm10  ;;  %v1546_v61 = vmul.f32 0.6931472, %v6037_v62  ;;  %v11267_v56 = vmul.f32 %v11197_v19, %v16448_v58  ;;  %v16531_v23 = vmax.f32 %v16487_v40, 1e-12  ;;  %v16534_v62 = vld [vmem:[#allocation31_spill] sm:$0xff]  ;;  %v1477_v40 = vmul.f32 %v1461_v63, %v16537_v11 }
 0x287   : > { %v16528_v21 = vsel %vm11257_vm9, 4294967295, %v16527_v21  ;;  %vm16533_vm13 = vmmov %vm16520_vm4  ;;  %vm16535_vm12 = vnez %v16534_v62  ;;  %16536 = vst [vmem:[#allocation31_spill] sm:$0xff] %v11281_v53  ;;  %v16538_v37 = vld [vmem:[#allocation205_spill] sm:$0xff]  ;;  %6056 = vrcp.f32 %v11234_v24  ;;  %v11290_v2 = vmul.f32 %v11097_v47, %v16414_v36 }
 0x288   : > { %16529 = vst [vmem:[#allocation68_spill] sm:$0xff] %v16528_v21  ;;  %16530 = vst [vmem:[#allocation160_spill] sm:$0xff] %v11267_v56  ;;  %v11273_v9 = vsel %vm11257_vm9, %v16531_v23, 1.0  ;;  %v4743_v31 = vsel %vm16535_vm12, %v4727_v30, 0.0  ;;  %v1509_v16 = vmul.f32 0.5, %v16538_v37  ;;  %v2323_v14 = vsub.f32 %v11239_v5, %v8839_v60  ;;  %v11304_v23 = vpop.eup %6042 }
 0x289   : > { %16532 = vst [vmem:[#allocation217_spill] sm:$0xff] %v11273_v9  ;;  %vm4068_vm5 = vmand %vm16533_vm13, %vm15780_vm1  ;;  %v4759_v58 = vmul.f32 0.5, %v4743_v31  ;;  %v3277_v30 = vsub.f32 %v11243_v20, %v16170_v12  ;;  %v16540_v55 = vmov 0  ;;  %v1429_v63 = vsub.f32 %v11116_v34, %v10940_v39 }
 0x28a   : > { %vm4100_vm4 = vmand %vm11149_vm6, %vm4068_vm5  ;;  %16539 = vst [vmem:[#allocation117_spill] sm:$0xff] %v11290_v2  ;;  %v16544_v36 = vmax.f32 %v16503_v26, 1e-12  ;;  %v1573_v11 = vmul.f32 %v1546_v61, %v1509_v16  ;;  %v2559_v47 = vmul.f32 %v11261_v7, %v11095_v27  ;;  %v11314_v2 = vand.u32 2147483647, %v1209_v33  ;;  %v11324_v26 = vpop.eup %6044  ;;  %v11330_v61 = vpop.permute.xlu0 %1725 }
 0x28b   : > { %vm11298_vm1 = vmand %vm4100_vm4, %vm4116_vm2  ;;  %16543 = vst [vmem:[#allocation218_spill] sm:$0xff] %v11304_v23  ;;  %v4775_v31 = vadd.f32 %v4759_v58, %v3821_v29  ;;  %v11317_v32 = vmul.f32 0.25, %v11211_v10  ;;  %6058 = vrsqrt.f32 %v16548_v51  ;;  %v11322_v39 = vmul.f32 %v11281_v53, %v10706_v6  ;;  %v11332_v33 = vpop.eup %6046  ;;  %v16553_v51 = vld [vmem:[#allocation51_spill] sm:$0xff] }
 0x28c   : > { %v16541_v55 = vsel %vm11298_vm1, 4294967295, %v16540_v55  ;;  %v11310_v62 = vsel %vm11298_vm1, %v16544_v36, 1.0  ;;  %16546 = vst [vmem:[#allocation220_spill] sm:$0xff] %v11314_v2  ;;  %v4231_v29 = vsub.f32 %v11267_v56, %v16197_v44  ;;  %v1493_v16 = vadd.f32 %v1477_v40, %v1429_v63  ;;  %v16552_v36 = vld [vmem:[#allocation164_spill] sm:$0xff] }
 0x28d   : > { %16542 = vst [vmem:[#allocation205_spill] sm:$0xff] %v16541_v55  ;;  %16545 = vst [vmem:[#allocation219_spill] sm:$0xff] %v11310_v62  ;;  %v1627_v27 = vsub.f32 %v11173_v45, %v11207_v8  ;;  %6060 = vlog2.f32 %v2559_v47  ;;  %v11334_v58 = vand.u32 2147483647, %v2323_v14  ;;  %v11337_v6 = vmul.f32 0.25, %v11239_v5  ;;  %v16557_v8 = vld [vmem:[#allocation54_spill] sm:$0xff] }
 0x28e   : > { %16547 = vst [vmem:[#allocation221_spill] sm:$0xff] %v11317_v32  ;;  %16549 = vst [vmem:[#allocation222_spill] sm:$0xff] %v11322_v39  ;;  %6062 = vrsqrt.f32 %v16552_v36  ;;  %v1675_v55 = vsub.f32 %v8811_v4, %v16553_v51  ;;  %v11344_v40 = vand.u32 2147483647, %v3277_v30  ;;  %v11347_v47 = vmul.f32 0.25, %v11243_v20  ;;  %v366_v5 = vld [vmem:[#allocation2 + $0x50] sm:$0xff] }
 0x28f   : > { %4791 = vst [vmem:[#allocation2 + $0x58] sm:$0xff] %v4775_v31  ;;  %16550 = vst [vmem:[#allocation223_spill] sm:$0xff] %v11334_v58  ;;  %v11342_v31 = vpop.eup %6048  ;;  %v1589_v45 = vadd.f32 %v1573_v11, %v1493_v16  ;;  %v1611_v14 = vmul.f32 %v16538_v37, %v16557_v8  ;;  %v11352_v63 = vmul.f32 0.25, %v11267_v56  ;;  %v1211_v36 = vsub.f32 %v11322_v39, %v8811_v4 }
 0x290   : > { %16551 = vst [vmem:[#allocation224_spill] sm:$0xff] %v11337_v6  ;;  %16554 = vst [vmem:[#allocation51_spill] sm:$0xff] %v11342_v31  ;;  %v3513_v51 = vmul.f32 %v11332_v33, %v11160_v35  ;;  %v1787_v30 = vsub.f32 %v11330_v61, %v11116_v34  ;;  %v11360_v31 = vpop.eup %6050  ;;  %v11362_v21 = vand.u32 2147483647, %v4231_v29  ;;  %v11366_v11 = vmul.f32 %v11304_v23, %v10753_v42  ;;  %v16563_v34 = vld [vmem:[#allocation42_spill] sm:$0xff]  ;;  %v16565_v42 = vld [vmem:[#allocation216_spill] sm:$0xff] }
 0x291   : > { %16555 = vst [vmem:[#allocation225_spill] sm:$0xff] %v11344_v40  ;;  %16556 = vst [vmem:[#allocation226_spill] sm:$0xff] %v11347_v47  ;;  %v1643_v37 = vmul.f32 %v1627_v27, %v1611_v14  ;;  %v2431_v16 = vmul.f32 %v11324_v26, %v11324_v26  ;;  %v11370_v13 = vpop.eup %6052  ;;  %vm11373_vm6 = vcmp.lt.f32.partialorder %v16403_v1, %v1675_v55  ;;  %v11380_v57 = vmul.f32 0.25, %v11322_v39  ;;  %v16572_v39 = vld [vmem:[#allocation12_spill] sm:$0xff]  ;;  %v16574_v6 = vld [vmem:[#allocation45_spill] sm:$0xff] }
 0x292   : > { %16558 = vst [vmem:[#allocation227_spill] sm:$0xff] %v11352_v63  ;;  %16559 = vst [vmem:[#allocation228_spill] sm:$0xff] %v11362_v21  ;;  %vm1851_vm2 = vcmp.lt.f32.partialorder %v16403_v1, %v16563_v34  ;;  %6064 = vlog2.f32 %v3513_v51  ;;  %v1803_v29 = vmul.f32 2.0, %v1787_v30  ;;  %v2447_v14 = vmul.f32 %v11261_v7, %v11261_v7  ;;  %v11385_v3 = vpop.eup %6054  ;;  %v16588_v40 = vld [vmem:[#allocation175_spill] sm:$0xff] }
 0x293   : > { %16560 = vst [vmem:[#allocation229_spill] sm:$0xff] %v11366_v11  ;;  %16564 = vst [vmem:[#allocation42_spill] sm:$0xff] %v11380_v57  ;;  %6066 = vrsqrt.f32 %v16565_v42  ;;  %v1659_v27 = vadd.f32 %v1643_v37, %v1589_v45  ;;  %v11387_v55 = vand.u32 2147483647, %v1211_v36  ;;  %v11392_v62 = vmul.f32 %v11360_v31, %v11360_v31  ;;  %v16568_v45 = vld [vmem:[#allocation191_spill] sm:$0xff]  ;;  %v16569_v57 = vld [vmem:[#allocation102_spill] sm:$0xff] }
 0x294   : > { %16566 = vst [vmem:[#allocation216_spill] sm:$0xff] %v11385_v3  ;;  %6068 = vrsqrt.f32 %v10969_v41  ;;  %v4467_v51 = vmul.f32 %v11370_v13, %v11234_v24  ;;  %v2495_v37 = vsub.f32 %v2447_v14, %v2431_v16  ;;  %v2709_v23 = vsub.f32 %v8839_v60, %v16569_v57  ;;  %v11401_v36 = vpop.eup %6056  ;;  %v16573_v57 = vld [vmem:[#allocation199_spill] sm:$0xff] }
 0x295   : > { %16567 = vst [vmem:[#allocation230_spill] sm:$0xff] %v11387_v55  ;;  %6070 = vrsqrt.f32 %v16568_v45  ;;  %v11404_v53 = vmul.f32 0.25, %v11366_v11  ;;  %v11408_v55 = vmul.f32 %v11332_v33, %v11332_v33  ;;  %v1819_v24 = vsel %vm11373_vm6, %v1803_v29, 0.0 }
 0x296   : > { %6072 = vlog2.f32 %v4467_v51  ;;  %v11414_v30 = vmul.f32 %v11385_v3, %v10798_v38  ;;  %v2543_v9 = vmul.f32 0.5, %v16572_v39  ;;  %v2645_v63 = vmul.f32 %v16572_v39, %v16573_v57  ;;  %v16575_v51 = vld [vmem:[#allocation200_spill] sm:$0xff] }
 0x297   : > { %16570 = vst [vmem:[#allocation191_spill] sm:$0xff] %v11404_v53  ;;  %v1835_v47 = vadd.f32 %v1819_v24, %v1659_v27  ;;  %v2661_v19 = vsub.f32 %v2431_v16, %v2447_v14  ;;  %v3449_v53 = vsub.f32 %v11408_v55, %v11392_v62  ;;  %v3497_v32 = vmul.f32 0.5, %v16574_v6  ;;  %v16580_v27 = vld [vmem:[#allocation212_spill] sm:$0xff] }
 0x298   : > { %16571 = vst [vmem:[#allocation102_spill] sm:$0xff] %v11414_v30  ;;  %v3599_v35 = vmul.f32 %v16574_v6, %v16575_v51  ;;  %v11424_v29 = vpop.eup %6058  ;;  %v2511_v38 = vmul.f32 %v2495_v37, %v16577_v46  ;;  %vm11428_vm7 = vcmp.lt.f32.partialorder %v16403_v1, %v2709_v23  ;;  %v4339_v39 = vmul.f32 %v11401_v36, %v11401_v36  ;;  %v16582_v37 = vld [vmem:[#allocation208_spill] sm:$0xff] }
 0x299   : > { %16576 = vst [vmem:[#allocation12_spill] sm:$0xff] %v11424_v29  ;;  %v1867_v16 = vsel %vm1851_vm2, %v1835_v47, 0.0  ;;  %v11439_v14 = vadd.f32 %v8811_v4, %v16580_v27  ;;  %v3663_v46 = vsub.f32 %v16170_v12, %v16488_v49  ;;  %v4451_v23 = vmul.f32 0.5, %v16582_v37  ;;  %v16583_v24 = vld [vmem:[#allocation116_spill] sm:$0xff] }
 0x29a   : > { %v6061_v6 = vpop.eup %6060  ;;  %vm16584_vm15 = vnez %v16583_v24  ;;  %v2741_v28 = vsub.f32 %v11330_v61, %v11324_v26  ;;  %v2463_v47 = vsub.f32 %v11324_v26, %v11261_v7  ;;  %v4355_v18 = vmul.f32 %v11370_v13, %v11370_v13 }
 0x29b   : > { %16581 = vst [vmem:[#allocation45_spill] sm:$0xff] %v11439_v14  ;;  %v1883_v29 = vsel %vm16584_vm15, %v1867_v16, 0.0  ;;  %v11448_v50 = vpop.eup %6062  ;;  %v2580_v34 = vmul.f32 0.6931472, %v6061_v6  ;;  %v4553_v49 = vmul.f32 %v16582_v37, %v16482_v25  ;;  %v2677_v21 = vmul.f32 %v2661_v19, %v2645_v63  ;;  %v16586_v16 = vld [vmem:[#allocation132_spill] sm:$0xff] }
 0x29c   : > { %16585 = vst [vmem:[#allocation123_spill] sm:$0xff] %v11448_v50  ;;  %vm2805_vm3 = vcmp.lt.f32.partialorder %v16403_v1, %v11036_v54  ;;  %v3465_v24 = vmul.f32 %v3449_v53, %v16586_v16  ;;  %v16587_v50 = vld [vmem:[#allocation58_spill] sm:$0xff]  ;;  %v2527_v7 = vadd.f32 %v2511_v38, %v2463_v47  ;;  %v4403_v6 = vsub.f32 %v4355_v18, %v4339_v39 }
 0x29d   : > { %v11463_v20 = vmax.f32 %v16588_v40, %v16587_v50  ;;  %v2607_v26 = vmul.f32 %v2580_v34, %v2543_v9  ;;  %6074 = vrcp.f32 %v11439_v14  ;;  %v3417_v19 = vsub.f32 %v11360_v31, %v11332_v33  ;;  %v16591_v33 = vld [vmem:[#allocation215_spill] sm:$0xff] }
 0x29e   : > { %v3615_v63 = vsub.f32 %v11392_v62, %v11408_v55  ;;  %vm11471_vm10 = vcmp.lt.f32.partialorder %v16403_v1, %v3663_v46  ;;  %v2757_v37 = vmul.f32 2.0, %v2741_v28  ;;  %v4371_v9 = vsub.f32 %v11401_v36, %v11370_v13  ;;  %v16593_v28 = vld [vmem:[#allocation8_spill] sm:$0xff]  ;;  %v16595_v13 = vld [vmem:[#allocation194_spill] sm:$0xff] }
 0x29f   : > { %6076 = vrcp.f32 %v11463_v20  ;;  %v6065_v50 = vpop.eup %6064  ;;  %v2623_v38 = vadd.f32 %v2607_v26, %v2527_v7  ;;  %v3695_v47 = vsub.f32 %v11330_v61, %v11360_v31  ;;  %v11482_v34 = vadd.f32 %v8839_v60, %v16591_v33 }
 0x2a0   : > { %v11484_v62 = vpop.eup %6066  ;;  %v3481_v55 = vadd.f32 %v3465_v24, %v3417_v19  ;;  %v3534_v46 = vmul.f32 0.6931472, %v6065_v50  ;;  %v4569_v16 = vsub.f32 %v4339_v39, %v4355_v18  ;;  %v11488_v56 = vmax.f32 %v16588_v40, %v16593_v28  ;;  %v16597_v39 = vld [vmem:[#allocation46_spill] sm:$0xff] }
 0x2a1   : > { %16592 = vst [vmem:[#allocation212_spill] sm:$0xff] %v11484_v62  ;;  %v11490_v7 = vpop.eup %6068  ;;  %v2693_v26 = vadd.f32 %v2677_v21, %v2623_v38  ;;  %v4419_v58 = vmul.f32 %v4403_v6, %v16595_v13  ;;  %v1899_v14 = vmul.f32 0.5, %v1883_v29  ;;  %6078 = vrcp.f32 %v11482_v34  ;;  %v16598_v29 = vld [vmem:[#allocation147_spill] sm:$0xff]  ;;  %v16599_v13 = vld [vmem:[#allocation120_spill] sm:$0xff] }
 0x2a2   : > { %16594 = vst [vmem:[#allocation208_spill] sm:$0xff] %v11490_v7  ;;  %v11494_v31 = vpop.eup %6070  ;;  %v3561_v2 = vmul.f32 %v3534_v46, %v3497_v32  ;;  %v2773_v24 = vsel %vm11428_vm7, %v2757_v37, 0.0  ;;  %v4649_v18 = vsub.f32 %v11330_v61, %v11401_v36  ;;  %v11502_v19 = vadd.f32 %v16170_v12, %v16597_v39 }
 0x2a3   : > { %16596 = vst [vmem:[#allocation116_spill] sm:$0xff] %v11494_v31  ;;  %v6073_v21 = vpop.eup %6072  ;;  %v2789_v50 = vadd.f32 %v2773_v24, %v2693_v26  ;;  %v3711_v6 = vmul.f32 2.0, %v3695_v47  ;;  %6080 = vrcp.f32 %v11488_v56  ;;  %v11507_v38 = vmax.f32 %v16588_v40, %v16598_v29 }
 0x2a4   : > { %v3577_v32 = vadd.f32 %v3561_v2, %v3481_v55  ;;  %v3631_v46 = vmul.f32 %v3615_v63, %v3599_v35  ;;  %v4488_v3 = vmul.f32 0.6931472, %v6073_v21  ;;  %6082 = vrcp.f32 %v11502_v19  ;;  %v16603_v55 = vld [vmem:[#allocation39_spill] sm:$0xff] }
 0x2a5   : > { %v4435_v37 = vadd.f32 %v4419_v58, %v4371_v9  ;;  %v4585_v61 = vmul.f32 %v4569_v16, %v4553_v49  ;;  %v1915_v36 = vadd.f32 %v1899_v14, %v366_v5  ;;  %v2821_v28 = vsel %vm2805_vm3, %v2789_v50, 0.0 }
 0x2a6   : > { %v3647_v26 = vadd.f32 %v3631_v46, %v3577_v32  ;;  %v4515_v47 = vmul.f32 %v4488_v3, %v4451_v23  ;;  %vm16600_vm13 = vnez %v16599_v13  ;;  %v11517_v29 = vadd.f32 %v16197_v44, %v10998_v52 }
 0x2a7   : > { %v2837_v24 = vsel %vm16600_vm13, %v2821_v28, 0.0  ;;  %v3727_v35 = vsel %vm11471_vm10, %v3711_v6, 0.0  ;;  %v4665_v58 = vmul.f32 2.0, %v4649_v18  ;;  %6084 = vrcp.f32 %v11507_v38  ;;  %v16606_v6 = vld [vmem:[#allocation127_spill] sm:$0xff] }
 0x2a8   : > { %v2853_v2 = vmul.f32 0.5, %v2837_v24  ;;  %v4531_v5 = vadd.f32 %v4515_v47, %v4435_v37  ;;  %v3743_v14 = vadd.f32 %v3727_v35, %v3647_v26  ;;  %v11524_v54 = vmax.f32 %v16588_v40, %v11199_v17  ;;  %v11570_v47 = vpop.permute.xlu0 %1735 }
 0x2a9   : > { %6086 = vrcp.f32 %v11517_v29  ;;  %v16601_v23 = vsub.f32 %v11366_v11, %v8839_v60  ;;  %v3279_v63 = vsub.f32 %v11414_v30, %v16170_v12  ;;  %vm3759_vm5 = vcmp.lt.f32.partialorder %v16403_v1, %v11133_v15 }
 0x2aa   : > { %v2869_v53 = vadd.f32 %v2853_v2, %v1915_v36  ;;  %v11536_v9 = vpop.eup %6074  ;;  %6088 = vrsqrt.f32 %v16603_v55  ;;  %v4601_v17 = vadd.f32 %v4585_v61, %v4531_v5  ;;  %v16604_v16 = vsub.f32 %v16197_v44, %v16504_v0 }
 0x2ab   : > { %v11530_v49 = vand.u32 2147483647, %v16601_v23  ;;  %v3775_v18 = vsel %vm3759_vm5, %v3743_v14, 0.0  ;;  %v11547_v50 = vmul.f32 %v11484_v62, %v16565_v42  ;;  %vm16607_vm4 = vnez %v16606_v6  ;;  %v16615_v6 = vld [vmem:[#allocation214_spill] sm:$0xff] }
 0x2ac   : > { %vm4633_vm12 = vcmp.lt.f32.partialorder %v16403_v1, %v16604_v16  ;;  %v11543_v21 = vpop.eup %6076  ;;  %v3791_v15 = vsel %vm16607_vm4, %v3775_v18, 0.0  ;;  %v1527_v46 = vmul.f32 %v11536_v9, %v11463_v20  ;;  %v11554_v3 = vmul.f32 0.25, %v11414_v30 }
 0x2ad   : > { %16602 = vst [vmem:[#allocation132_spill] sm:$0xff] %v11530_v49  ;;  %16605 = vst [vmem:[#allocation58_spill] sm:$0xff] %v11547_v50  ;;  %v4681_v32 = vsel %vm4633_vm12, %v4665_v58, 0.0  ;;  %v3807_v0 = vmul.f32 0.5, %v3791_v15  ;;  %6090 = vrcp.f32 %v11524_v54  ;;  %v11557_v61 = vand.u32 2147483647, %v3279_v63 }
 0x2ae   : > { %16608 = vst [vmem:[#allocation175_spill] sm:$0xff] %v11554_v3  ;;  %v4697_v37 = vadd.f32 %v4681_v32, %v4601_v17  ;;  %v11561_v42 = vmul.f32 %v11490_v7, %v10969_v41  ;;  %vm4713_vm6 = vcmp.lt.f32.partialorder %v16403_v1, %v11178_v43  ;;  %6092 = vlog2.f32 %v1527_v46  ;;  %v11565_v36 = vpop.eup %6078  ;;  %v16611_v41 = vld [vmem:[#allocation85_spill] sm:$0xff]  ;;  %v11675_v3 = vpop.permute.xlu1 %1250 }
 0x2af   : > { %16609 = vst [vmem:[#allocation215_spill] sm:$0xff] %v11557_v61  ;;  %6094 = vrsqrt.f32 %v11077_v59  ;;  %v3823_v20 = vadd.f32 %v3807_v0, %v2869_v53  ;;  %v1399_v26 = vmul.f32 %v11543_v21, %v11543_v21  ;;  %vm16612_vm2 = vnez %v16611_v41  ;;  %v16614_v17 = vld [vmem:[#allocation25_spill] sm:$0xff]  ;;  %16626 = vst [vmem:[#allocation147_spill] sm:$0xff] %v11675_v3  ;;  %v16639_v59 = vld [vmem:[#allocation84_spill] sm:$0xff] }
 0x2b0   : > { %16610 = vst [vmem:[#allocation8_spill] sm:$0xff] %v11561_v42  ;;  %v4729_v28 = vsel %vm4713_vm6, %v4697_v37, 0.0  ;;  %6096 = vrsqrt.f32 %v11187_v22  ;;  %v2561_v43 = vmul.f32 %v11565_v36, %v11488_v56  ;;  %v11579_v24 = vpop.eup %6080  ;;  %v1415_v35 = vmul.f32 %v11536_v9, %v11536_v9  ;;  %v16629_v0 = vld [vmem:[#allocation29_spill] sm:$0xff] }
 0x2b1   : > { %v4745_v1 = vsel %vm16612_vm2, %v4729_v28, 0.0  ;;  %6098 = vrsqrt.f32 %v11224_v48  ;;  %v1677_v58 = vsub.f32 %v8811_v4, %v16580_v27  ;;  %v11586_v5 = vpop.eup %6082  ;;  %v11592_v23 = vmul.f32 %v11494_v31, %v16568_v45 }
 0x2b2   : > { %v4761_v2 = vmul.f32 0.5, %v4745_v1  ;;  %6100 = vlog2.f32 %v2561_v43  ;;  %v1789_v56 = vsub.f32 %v11570_v47, %v11543_v21  ;;  %v1463_v53 = vsub.f32 %v1415_v35, %v1399_v26  ;;  %v11724_v22 = vpop.permute.xlu1 %1260 }
 0x2b3   : > { %16613 = vst [vmem:[#allocation194_spill] sm:$0xff] %v11592_v23  ;;  %v1511_v16 = vmul.f32 0.5, %v16614_v17  ;;  %v1613_v27 = vmul.f32 %v16614_v17, %v16557_v8  ;;  %v11601_v18 = vmul.f32 %v11579_v24, %v11579_v24  ;;  %v11604_v15 = vmul.f32 0.5, %v16615_v6  ;;  %16638 = vst [vmem:[#allocation85_spill] sm:$0xff] %v11724_v22 }
 0x2b4   : > { %v4777_v63 = vadd.f32 %v4761_v2, %v3823_v20  ;;  %v2711_v45 = vsub.f32 %v8839_v60, %v16591_v33  ;;  %v3515_v32 = vmul.f32 %v11586_v5, %v11507_v38  ;;  %v11610_v46 = vpop.eup %6084  ;;  %vm11613_vm7 = vcmp.lt.f32.partialorder %v16588_v40, %v1677_v58  ;;  %v16618_v20 = vld [vmem:[#allocation177_spill] sm:$0xff] }
 0x2b5   : > { %v2647_v37 = vmul.f32 %v16615_v6, %v16573_v57  ;;  %v11620_v28 = vmul.f32 0.5, %v16618_v20  ;;  %v11624_v33 = vmul.f32 %v16618_v20, %v16575_v51  ;;  %v1629_v38 = vsub.f32 %v1399_v26, %v1415_v35  ;;  %v16619_v2 = vld [vmem:[#allocation81_spill] sm:$0xff] }
 0x2b6   : > { %4793 = vst [vmem:[#allocation2 + $0x50] sm:$0xff] %v4777_v63  ;;  %v11626_v41 = vpop.eup %6086  ;;  %v2449_v1 = vmul.f32 %v11565_v36, %v11565_v36  ;;  %6102 = vlog2.f32 %v3515_v32  ;;  %v11630_v43 = vmul.f32 2.0, %v1789_v56  ;;  %v1479_v58 = vmul.f32 %v1463_v53, %v16619_v2  ;;  %v16623_v56 = vld [vmem:[#allocation7_spill] sm:$0xff]  ;;  %v16625_v32 = vld [vmem:[#allocation86_spill] sm:$0xff] }
 0x2b7   : > { %v3665_v63 = vsub.f32 %v16170_v12, %v16597_v39  ;;  %v4469_v17 = vmul.f32 %v11626_v41, %v11524_v54  ;;  %v11639_v6 = vadd.f32 %v8811_v4, %v11211_v10  ;;  %v11641_v20 = vpop.eup %6088  ;;  %vm11645_vm15 = vcmp.lt.f32.partialorder %v16588_v40, %v2711_v45  ;;  %v16624_v54 = vld [vmem:[#allocation220_spill] sm:$0xff] }
 0x2b8   : > { %16620 = vst [vmem:[#allocation46_spill] sm:$0xff] %v11641_v20  ;;  %v2497_v26 = vsub.f32 %v2449_v1, %v11601_v18  ;;  %v11650_v53 = vmul.f32 0.5, %v16623_v56  ;;  %v11654_v39 = vmul.f32 %v16623_v56, %v16482_v25  ;;  %v11658_v2 = vmax.f32 %v16625_v32, %v16624_v54 }
 0x2b9   : > { %v1431_v14 = vsub.f32 %v11543_v21, %v11536_v9  ;;  %v3387_v45 = vmul.f32 %v11610_v46, %v11610_v46  ;;  %6104 = vlog2.f32 %v4469_v17  ;;  %v2743_v13 = vsub.f32 %v11570_v47, %v11579_v24 }
 0x2ba   : > { %v11666_v31 = vpop.eup %6090  ;;  %v1645_v7 = vmul.f32 %v1629_v38, %v1613_v27  ;;  %v2465_v56 = vsub.f32 %v11579_v24, %v11565_v36  ;;  %v4619_v54 = vsub.f32 %v16197_v44, %v10998_v52  ;;  %v1821_v9 = vsel %vm11613_vm7, %v11630_v43, 0.0  ;;  %v16628_v24 = vld [vmem:[#allocation133_spill] sm:$0xff] }
 0x2bb   : > { %v6093_v21 = vpop.eup %6092  ;;  %v1495_v17 = vadd.f32 %v1479_v58, %v1431_v14  ;;  %v2663_v62 = vsub.f32 %v11601_v18, %v2449_v1  ;;  %v3403_v61 = vmul.f32 %v11586_v5, %v11586_v5  ;;  %6106 = vrcp.f32 %v11639_v6  ;;  %v16631_v14 = vld [vmem:[#allocation45_spill] sm:$0xff] }
 0x2bc   : > { %v11681_v27 = vpop.eup %6094  ;;  %v1550_v36 = vmul.f32 0.6931472, %v6093_v21  ;;  %v2513_v52 = vmul.f32 %v2497_v26, %v16628_v24  ;;  %6108 = vrcp.f32 %v11658_v2  ;;  %v11687_v38 = vadd.f32 %v8839_v60, %v16629_v0  ;;  %v16632_v21 = vld [vmem:[#allocation223_spill] sm:$0xff] }
 0x2bd   : > { %16627 = vst [vmem:[#allocation120_spill] sm:$0xff] %v11681_v27  ;;  %v11689_v43 = vpop.eup %6096  ;;  %vm1853_vm3 = vcmp.lt.f32.partialorder %v16588_v40, %v16631_v14  ;;  %v3451_v18 = vsub.f32 %v3403_v61, %v3387_v45  ;;  %v11695_v1 = vmul.f32 %v11666_v31, %v11666_v31  ;;  %v2759_v58 = vmul.f32 2.0, %v2743_v13 }
 0x2be   : > { %16630 = vst [vmem:[#allocation39_spill] sm:$0xff] %v11689_v43  ;;  %v11699_v26 = vmax.f32 %v16625_v32, %v16632_v21  ;;  %v11701_v24 = vpop.eup %6098  ;;  %v1575_v3 = vmul.f32 %v1550_v36, %v1511_v16  ;;  %v3617_v30 = vsub.f32 %v3387_v45, %v3403_v61  ;;  %v3697_v49 = vsub.f32 %v11570_v47, %v11610_v46  ;;  %v16636_v21 = vld [vmem:[#allocation60_spill] sm:$0xff]  ;;  %v16637_v61 = vld [vmem:[#allocation225_spill] sm:$0xff] }
 0x2bf   : > { %16633 = vst [vmem:[#allocation127_spill] sm:$0xff] %v11701_v24  ;;  %6110 = vrcp.f32 %v11687_v38  ;;  %v6101_v11 = vpop.eup %6100  ;;  %vm11707_vm10 = vcmp.lt.f32.partialorder %v16588_v40, %v3665_v63  ;;  %v4357_v13 = vmul.f32 %v11626_v41, %v11626_v41  ;;  %v11716_v16 = vadd.f32 %v16170_v12, %v16636_v21 }
 0x2c0   : > { %6112 = vrcp.f32 %v11699_v26  ;;  %v11720_v45 = vmax.f32 %v16625_v32, %v16637_v61  ;;  %v1591_v36 = vadd.f32 %v1575_v3, %v1495_v17  ;;  %v2584_v24 = vmul.f32 0.6931472, %v6101_v11 }
 0x2c1   : > { %v2679_v43 = vmul.f32 %v2663_v62, %v2647_v37  ;;  %v3419_v63 = vsub.f32 %v11610_v46, %v11586_v5  ;;  %v2529_v27 = vadd.f32 %v2513_v52, %v2465_v56  ;;  %vm2807_vm13 = vcmp.lt.f32.partialorder %v16588_v40, %v11482_v34  ;;  %v16640_v62 = vld [vmem:[#allocation160_spill] sm:$0xff]  ;;  %v16651_v34 = vld [vmem:[#allocation21_spill] sm:$0xff] }
 0x2c2   : > { %v3467_v42 = vmul.f32 %v3451_v18, %v16639_v59  ;;  %v4405_v23 = vsub.f32 %v4357_v13, %v11695_v1  ;;  %v2775_v61 = vsel %vm11645_vm15, %v2759_v58, 0.0  ;;  %v1661_v50 = vadd.f32 %v1645_v7, %v1591_v36  ;;  %v16641_v59 = vld [vmem:[#allocation228_spill] sm:$0xff]  ;;  %v11764_v58 = vpop.permute.xlu1 %1270 }
 0x2c3   : > { %v2609_v11 = vmul.f32 %v2584_v24, %v11604_v15  ;;  %6114 = vrcp.f32 %v11716_v16  ;;  %v11736_v3 = vadd.f32 %v16197_v44, %v16640_v62  ;;  %v6103_v5 = vpop.eup %6102  ;;  %v3633_v46 = vmul.f32 %v3617_v30, %v11624_v33  ;;  %v16644_v30 = vld [vmem:[#allocation187_spill] sm:$0xff]  ;;  %16646 = vst [vmem:[#allocation25_spill] sm:$0xff] %v11764_v58  ;;  %v16653_v15 = vld [vmem:[#allocation192_spill] sm:$0xff] }
 0x2c4   : > { %v3713_v37 = vmul.f32 2.0, %v3697_v49  ;;  %6116 = vrcp.f32 %v11720_v45  ;;  %v11742_v56 = vmax.f32 %v16625_v32, %v16641_v59  ;;  %v3538_v7 = vmul.f32 0.6931472, %v6103_v5 }
 0x2c5   : > { %v2625_v35 = vadd.f32 %v2609_v11, %v2529_v27  ;;  %vm11745_vm5 = vcmp.lt.f32.partialorder %v16588_v40, %v4619_v54  ;;  %v1837_v17 = vadd.f32 %v1821_v9, %v1661_v50  ;;  %6118 = vrcp.f32 %v11736_v3  ;;  %v16645_v9 = vld [vmem:[#allocation55_spill] sm:$0xff] }
 0x2c6   : > { %v3483_v52 = vadd.f32 %v3467_v42, %v3419_v63  ;;  %vm3761_vm12 = vcmp.lt.f32.partialorder %v16588_v40, %v11502_v19  ;;  %v4421_v49 = vmul.f32 %v4405_v23, %v16644_v30  ;;  %v4651_v33 = vsub.f32 %v11570_v47, %v11666_v31  ;;  %v6105_v27 = vpop.eup %6104  ;;  %v368_v23 = vld [vmem:[#allocation2 + $0x8] sm:$0xff]  ;;  %v16649_v30 = vld [vmem:[#allocation185_spill] sm:$0xff] }
 0x2c7   : > { %6120 = vrcp.f32 %v11742_v56  ;;  %v2695_v18 = vadd.f32 %v2679_v43, %v2625_v35  ;;  %v3563_v54 = vmul.f32 %v3538_v7, %v11620_v28  ;;  %v1869_v50 = vsel %vm1853_vm3, %v1837_v17, 0.0  ;;  %v16647_v43 = vld [vmem:[#allocation176_spill] sm:$0xff] }
 0x2c8   : > { %v11762_v42 = vadd.f32 %v8811_v4, %v16645_v9  ;;  %v4373_v47 = vsub.f32 %v11666_v31, %v11626_v41  ;;  %v4492_v24 = vmul.f32 0.6931472, %v6105_v27  ;;  %v4571_v36 = vsub.f32 %v11695_v1, %v4357_v13  ;;  %v11771_v63 = vpop.eup %6106 }
 0x2c9   : > { %vm16648_vm4 = vnez %v16647_v43  ;;  %v3579_v14 = vadd.f32 %v3563_v54, %v3483_v52  ;;  %vm4715_vm6 = vcmp.lt.f32.partialorder %v16588_v40, %v11517_v29  ;;  %v2791_v5 = vadd.f32 %v2775_v61, %v2695_v18  ;;  %v11777_v35 = vpop.eup %6108  ;;  %v11798_v18 = vpop.permute.xlu1 %1280 }
 0x2ca   : > { %v1885_v28 = vsel %vm16648_vm4, %v1869_v50, 0.0  ;;  %v3729_v59 = vsel %vm11707_vm10, %v3713_v37, 0.0  ;;  %v4437_v31 = vadd.f32 %v4421_v49, %v4373_v47  ;;  %v4517_v41 = vmul.f32 %v4492_v24, %v11650_v53  ;;  %16652 = vst [vmem:[#allocation214_spill] sm:$0xff] %v11798_v18 }
 0x2cb   : > { %v1901_v11 = vmul.f32 0.5, %v1885_v28  ;;  %v4667_v1 = vmul.f32 2.0, %v4651_v33  ;;  %v1529_v13 = vmul.f32 %v11771_v63, %v11658_v2  ;;  %v3649_v7 = vadd.f32 %v3633_v46, %v3579_v14 }
 0x2cc   : > { %v2823_v52 = vsel %vm2807_vm13, %v2791_v5, 0.0  ;;  %6122 = vrcp.f32 %v11762_v42  ;;  %v11786_v61 = vpop.eup %6110  ;;  %v4533_v48 = vadd.f32 %v4517_v41, %v4437_v31  ;;  %v4587_v37 = vmul.f32 %v4571_v36, %v11654_v39 }
 0x2cd   : > { %v1917_v17 = vadd.f32 %v1901_v11, %v368_v23  ;;  %vm16650_vm2 = vnez %v16649_v30  ;;  %6124 = vlog2.f32 %v1529_v13  ;;  %v11791_v49 = vpop.eup %6112  ;;  %v3745_v46 = vadd.f32 %v3729_v59, %v3649_v7  ;;  %v16655_v59 = vld [vmem:[#allocation88_spill] sm:$0xff]  ;;  %v11844_v29 = vpop.permute.xlu1 %1290 }
 0x2ce   : > { %v2839_v53 = vsel %vm16650_vm2, %v2823_v52, 0.0  ;;  %v1401_v33 = vmul.f32 %v11777_v35, %v11777_v35  ;;  %v11796_v27 = vmul.f32 0.5, %v16651_v34  ;;  %v4603_v54 = vadd.f32 %v4587_v37, %v4533_v48  ;;  %v16656_v52 = vld [vmem:[#allocation63_spill] sm:$0xff]  ;;  %16659 = vst [vmem:[#allocation177_spill] sm:$0xff] %v11844_v29 }
 0x2cf   : > { %v2855_v2 = vmul.f32 0.5, %v2839_v53  ;;  %v4683_v39 = vsel %vm11745_vm5, %v4667_v1, 0.0  ;;  %v1417_v50 = vmul.f32 %v11771_v63, %v11771_v63  ;;  %v1615_v23 = vmul.f32 %v16651_v34, %v16557_v8  ;;  %v16657_v53 = vld [vmem:[#allocation34_spill] sm:$0xff] }
 0x2d0   : > { %v3777_v24 = vsel %vm3761_vm12, %v3745_v46, 0.0  ;;  %v2435_v36 = vmul.f32 %v11791_v49, %v11791_v49  ;;  %v2563_v43 = vmul.f32 %v11786_v61, %v11699_v26  ;;  %v11813_v28 = vpop.eup %6114  ;;  %vm16654_vm7 = vnez %v16653_v15  ;;  %v16661_v15 = vld [vmem:[#allocation100_spill] sm:$0xff] }
 0x2d1   : > { %v2871_v47 = vadd.f32 %v2855_v2, %v1917_v17  ;;  %v3793_v14 = vsel %vm16654_vm7, %v3777_v24, 0.0  ;;  %v4699_v11 = vadd.f32 %v4683_v39, %v4603_v54  ;;  %v1679_v5 = vsub.f32 %v8811_v4, %v11211_v10  ;;  %v11822_v19 = vpop.eup %6116 }
 0x2d2   : > { %v11820_v31 = vmul.f32 0.5, %v16655_v59  ;;  %v3809_v41 = vmul.f32 0.5, %v3793_v14  ;;  %v1465_v1 = vsub.f32 %v1417_v50, %v1401_v33  ;;  %v2451_v13 = vmul.f32 %v11786_v61, %v11786_v61  ;;  %v11826_v26 = vpop.eup %6118  ;;  %v16662_v14 = vld [vmem:[#allocation150_spill] sm:$0xff] }
 0x2d3   : > { %6126 = vlog2.f32 %v2563_v43  ;;  %v4731_v7 = vsel %vm4715_vm6, %v4699_v11, 0.0  ;;  %v2649_v10 = vmul.f32 %v16655_v59, %v16573_v57  ;;  %v2713_v17 = vsub.f32 %v8839_v60, %v16629_v0 }
 0x2d4   : > { %v11836_v48 = vmul.f32 0.5, %v16656_v52  ;;  %v11838_v37 = vpop.eup %6120  ;;  %v3825_v30 = vadd.f32 %v3809_v41, %v2871_v47  ;;  %vm16658_vm15 = vnez %v16657_v53  ;;  %v2499_v46 = vsub.f32 %v2451_v13, %v2435_v36  ;;  %v16660_v47 = vld [vmem:[#allocation221_spill] sm:$0xff]  ;;  %v16663_v53 = vld [vmem:[#allocation224_spill] sm:$0xff] }
 0x2d5   : > { %v4747_v2 = vsel %vm16658_vm15, %v4731_v7, 0.0  ;;  %v3517_v40 = vmul.f32 %v11813_v28, %v11720_v45  ;;  %v11848_v54 = vmul.f32 %v11822_v19, %v11822_v19  ;;  %v3603_v0 = vmul.f32 %v16656_v52, %v16575_v51  ;;  %v1746_v52 = vpop.permute.xlu0 %1745 }
 0x2d6   : > { %v4763_v34 = vmul.f32 0.5, %v4747_v2  ;;  %v3667_v39 = vsub.f32 %v16170_v12, %v16636_v21  ;;  %v1481_v24 = vmul.f32 %v1465_v1, %v16660_v47  ;;  %v1631_v43 = vsub.f32 %v1401_v33, %v1417_v50  ;;  %v16664_v1 = vld [vmem:[#allocation94_spill] sm:$0xff] }
 0x2d7   : > { %6128 = vlog2.f32 %v3517_v40  ;;  %v1314_v45 = vmax.f32 %v16662_v14, %v16661_v15  ;;  %v3405_v59 = vmul.f32 %v11813_v28, %v11813_v28  ;;  %v4343_v41 = vmul.f32 %v11838_v37, %v11838_v37 }
 0x2d8   : > { %v4779_v11 = vadd.f32 %v4763_v34, %v3825_v30  ;;  %v4471_v7 = vmul.f32 %v11826_v26, %v11742_v56  ;;  %v2515_v21 = vmul.f32 %v2499_v46, %v16663_v53  ;;  %v2665_v2 = vsub.f32 %v2435_v36, %v2451_v13 }
 0x2d9   : > { %v11865_v33 = vmul.f32 0.5, %v16664_v1  ;;  %v4557_v50 = vmul.f32 %v16664_v1, %v16482_v25  ;;  %v11869_v30 = vpop.eup %6122  ;;  %v1433_v40 = vsub.f32 %v11777_v35, %v11771_v63  ;;  %vm11874_vm3 = vcmp.lt.f32.partialorder %v16625_v32, %v1679_v5  ;;  %v11886_v5 = vpop.permute.xlu1 %1300 }
 0x2da   : > { %4795 = vst [vmem:[#allocation2 + $0x8] sm:$0xff] %v4779_v11  ;;  %v3453_v56 = vsub.f32 %v3405_v59, %v11848_v54  ;;  %v4359_v36 = vmul.f32 %v11826_v26, %v11826_v26  ;;  %6130 = vlog2.f32 %v4471_v7  ;;  %v6125_v13 = vpop.eup %6124  ;;  %v1647_v46 = vmul.f32 %v1631_v43, %v1615_v23  ;;  %16667 = vst [vmem:[#allocation81_spill] sm:$0xff] %v11886_v5  ;;  %v16719_v5 = vld [vmem:[#allocation230_spill] sm:$0xff] }
 0x2db   : > { %v2467_v47 = vsub.f32 %v11791_v49, %v11786_v61  ;;  %v4621_v15 = vsub.f32 %v16197_v44, %v16640_v62  ;;  %v1791_v63 = vsub.f32 %v1746_v52, %v11777_v35  ;;  %v1497_v11 = vadd.f32 %v1481_v24, %v1433_v40  ;;  %v16670_v24 = vld [vmem:[#allocation226_spill] sm:$0xff] }
 0x2dc   : > { %v1554_v53 = vmul.f32 0.6931472, %v6125_v13  ;;  %v4407_v1 = vsub.f32 %v4359_v36, %v4343_v41  ;;  %6132 = vrcp.f32 %v1314_v45  ;;  %vm1855_vm10 = vcmp.lt.f32.partialorder %v16625_v32, %v11639_v6  ;;  %v370_v6 = vld [vmem:[#allocation2 + $0x40] sm:$0xff] }
 0x2dd   : > { %v2531_v7 = vadd.f32 %v2515_v21, %v2467_v47  ;;  %v2681_v29 = vmul.f32 %v2665_v2, %v2649_v10  ;;  %vm11891_vm13 = vcmp.lt.f32.partialorder %v16625_v32, %v2713_v17  ;;  %v3421_v62 = vsub.f32 %v11822_v19, %v11813_v28  ;;  %v16673_v28 = vld [vmem:[#allocation92_spill] sm:$0xff] }
 0x2de   : > { %v3619_v35 = vsub.f32 %v11848_v54, %v3405_v59  ;;  %v1577_v61 = vmul.f32 %v1554_v53, %v11796_v27  ;;  %v3469_v43 = vmul.f32 %v3453_v56, %v16670_v24  ;;  %v2745_v40 = vsub.f32 %v1746_v52, %v11791_v49  ;;  %v16674_v56 = vld [vmem:[#allocation227_spill] sm:$0xff] }
 0x2df   : > { %v1522_v13 = vmul.f32 %v11869_v30, %v1314_v45  ;;  %vm11903_vm5 = vcmp.lt.f32.partialorder %v16625_v32, %v3667_v39  ;;  %v4573_v17 = vsub.f32 %v4343_v41, %v4359_v36  ;;  %v1807_v21 = vmul.f32 2.0, %v1791_v63  ;;  %v11926_v63 = vpop.permute.xlu1 %1310 }
 0x2e0   : > { %v3699_v2 = vsub.f32 %v1746_v52, %v11822_v19  ;;  %v11910_v54 = vadd.f32 %v8839_v60, %v16673_v28  ;;  %v6127_v27 = vpop.eup %6126  ;;  %v1593_v59 = vadd.f32 %v1577_v61, %v1497_v11  ;;  %v4423_v47 = vmul.f32 %v4407_v1, %v16674_v56  ;;  %v16677_v19 = vld [vmem:[#allocation38_spill] sm:$0xff]  ;;  %16678 = vst [vmem:[#allocation7_spill] sm:$0xff] %v11926_v63 }
 0x2e1   : > { %v4653_v49 = vsub.f32 %v1746_v52, %v11838_v37  ;;  %6134 = vlog2.f32 %v1522_v13  ;;  %v2588_v45 = vmul.f32 0.6931472, %v6127_v27  ;;  %v4375_v39 = vsub.f32 %v11838_v37, %v11826_v26  ;;  %v16679_v61 = vld [vmem:[#allocation98_spill] sm:$0xff] }
 0x2e2   : > { %vm11917_vm12 = vcmp.lt.f32.partialorder %v16625_v32, %v4621_v15  ;;  %v11923_v36 = vmax.f32 %v16662_v14, %v16677_v19  ;;  %6136 = vrcp.f32 %v11910_v54  ;;  %v1663_v11 = vadd.f32 %v1647_v46, %v1593_v59 }
 0x2e3   : > { %vm2809_vm4 = vcmp.lt.f32.partialorder %v16625_v32, %v11687_v38  ;;  %v3485_v52 = vadd.f32 %v3469_v43, %v3421_v62  ;;  %v3635_v53 = vmul.f32 %v3619_v35, %v3603_v0  ;;  %v2761_v26 = vmul.f32 2.0, %v2745_v40  ;;  %v16680_v0 = vld [vmem:[#allocation44_spill] sm:$0xff]  ;;  %v16681_v62 = vld [vmem:[#allocation99_spill] sm:$0xff] }
 0x2e4   : > { %v2611_v37 = vmul.f32 %v2588_v45, %v11820_v31  ;;  %v4589_v15 = vmul.f32 %v4573_v17, %v4557_v50  ;;  %v1823_v1 = vsel %vm11874_vm3, %v1807_v21, 0.0  ;;  %v11935_v24 = vadd.f32 %v16170_v12, %v16679_v61  ;;  %v6129_v13 = vpop.eup %6128  ;;  %v11961_v45 = vpop.permute.xlu1 %1710  ;;  %v16687_v21 = vld [vmem:[#allocation101_spill] sm:$0xff] }
 0x2e5   : > { %v4439_v27 = vadd.f32 %v4423_v47, %v4375_v39  ;;  %v1839_v56 = vadd.f32 %v1823_v1, %v1663_v11  ;;  %v3715_v46 = vmul.f32 2.0, %v3699_v2  ;;  %v4669_v59 = vmul.f32 2.0, %v4653_v49  ;;  %v16683_v39 = vld [vmem:[#allocation33_spill] sm:$0xff] }
 0x2e6   : > { %v2627_v19 = vadd.f32 %v2611_v37, %v2531_v7  ;;  %v3542_v63 = vmul.f32 0.6931472, %v6129_v13  ;;  %6138 = vrcp.f32 %v11923_v36  ;;  %v11940_v31 = vmax.f32 %v16662_v14, %v16680_v0 }
 0x2e7   : > { %vm3763_vm6 = vcmp.lt.f32.partialorder %v16625_v32, %v11716_v16  ;;  %v1871_v50 = vsel %vm1855_vm10, %v1839_v56, 0.0  ;;  %v2777_v34 = vsel %vm11891_vm13, %v2761_v26, 0.0  ;;  %v1410_v7 = vmul.f32 %v11869_v30, %v11869_v30  ;;  %v6131_v43 = vpop.eup %6130 }
 0x2e8   : > { %v11953_v35 = vadd.f32 %v16197_v44, %v16681_v62  ;;  %v2697_v40 = vadd.f32 %v2681_v29, %v2627_v19  ;;  %v3565_v17 = vmul.f32 %v3542_v63, %v11836_v48  ;;  %v1887_v2 = vsel %vm10187_vm14, %v1871_v50, 0.0  ;;  %v16684_v48 = vld [vmem:[#allocation30_spill] sm:$0xff]  ;;  %v16685_v50 = vld [vmem:[#allocation11_spill] sm:$0xff] }
 0x2e9   : > { %6140 = vrcp.f32 %v11935_v24  ;;  %v4496_v47 = vmul.f32 0.6931472, %v6131_v43  ;;  %v1903_v23 = vmul.f32 0.5, %v1887_v2  ;;  %v3731_v49 = vsel %vm11903_vm5, %v3715_v46, 0.0  ;;  %v6133_v26 = vpop.eup %6132 }
 0x2ea   : > { %v1506_v11 = vmul.f32 0.5, %v16683_v39  ;;  %v3581_v37 = vadd.f32 %v3565_v17, %v3485_v52  ;;  %v2793_v29 = vadd.f32 %v2777_v34, %v2697_v40  ;;  %6142 = vrcp.f32 %v11940_v31 }
 0x2eb   : > { %v11967_v63 = vmax.f32 %v16662_v14, %v16684_v48  ;;  %v4519_v1 = vmul.f32 %v4496_v47, %v11865_v33  ;;  %v4685_v13 = vsel %vm11917_vm12, %v4669_v59, 0.0  ;;  %v1394_v10 = vmul.f32 %v6133_v26, %v6133_v26 }
 0x2ec   : > { %6144 = vrcp.f32 %v11953_v35  ;;  %v3651_v56 = vadd.f32 %v3635_v53, %v3581_v37  ;;  %v1919_v46 = vadd.f32 %v1903_v23, %v370_v6  ;;  %v2825_v52 = vsel %vm2809_vm4, %v2793_v29, 0.0 }
 0x2ed   : > { %v1784_v19 = vsub.f32 %v11961_v45, %v6133_v26  ;;  %v4535_v0 = vadd.f32 %v4519_v1, %v4439_v27  ;;  %vm16686_vm14 = vnez %v16685_v50  ;;  %v1458_v43 = vsub.f32 %v1410_v7, %v1394_v10 }
 0x2ee   : > { %v2841_v34 = vsel %vm16686_vm14, %v2825_v52, 0.0  ;;  %v1608_v33 = vmul.f32 %v16683_v39, %v16557_v8  ;;  %v6135_v41 = vpop.eup %6134  ;;  %v3747_v40 = vadd.f32 %v3731_v49, %v3651_v56  ;;  %v1426_v53 = vsub.f32 %v6133_v26, %v11869_v30 }
 0x2ef   : > { %v2857_v59 = vmul.f32 0.5, %v2841_v34  ;;  %6146 = vrcp.f32 %v11967_v63  ;;  %v11983_v17 = vpop.eup %6136  ;;  %v4605_v38 = vadd.f32 %v4589_v15, %v4535_v0  ;;  %v1474_v2 = vmul.f32 %v1458_v43, %v16687_v21  ;;  %v16699_v21 = vld [vmem:[#allocation195_spill] sm:$0xff] }
 0x2f0   : > { %v1540_v27 = vmul.f32 0.6931472, %v6135_v41  ;;  %v1624_v6 = vsub.f32 %v1394_v10, %v1410_v7  ;;  %v3779_v23 = vsel %vm3763_vm6, %v3747_v40, 0.0  ;;  %v1672_v39 = vsub.f32 %v8811_v4, %v16645_v9  ;;  %v16697_v41 = vld [vmem:[#allocation8_spill] sm:$0xff] }
 0x2f1   : > { %v2873_v47 = vadd.f32 %v2857_v59, %v1919_v46  ;;  %v1800_v49 = vmul.f32 2.0, %v1784_v19  ;;  %v3795_v30 = vsel %vm10266_vm11, %v3779_v23, 0.0  ;;  %v4701_v26 = vadd.f32 %v4685_v13, %v4605_v38  ;;  %v16695_v19 = vld [vmem:[#allocation194_spill] sm:$0xff]  ;;  %v16709_v13 = vld [vmem:[#allocation89_spill] sm:$0xff] }
 0x2f2   : > { %v1490_v29 = vadd.f32 %v1474_v2, %v1426_v53  ;;  %v1570_v48 = vmul.f32 %v1540_v27, %v1506_v11  ;;  %v11995_v15 = vmul.f32 %v11641_v20, %v16603_v55  ;;  %vm4717_vm2 = vcmp.lt.f32.partialorder %v16625_v32, %v11736_v3  ;;  %v16692_v55 = vld [vmem:[#allocation90_spill] sm:$0xff]  ;;  %v16700_v2 = vld [vmem:[#allocation120_spill] sm:$0xff] }
 0x2f3   : > { %v3811_v7 = vmul.f32 0.5, %v3795_v30  ;;  %v2556_v16 = vmul.f32 %v11983_v17, %v11923_v36  ;;  %v12001_v1 = vpop.eup %6138  ;;  %v4733_v9 = vsel %vm4717_vm2, %v4701_v26, 0.0  ;;  %v1640_v56 = vmul.f32 %v1624_v6, %v1608_v33  ;;  %v16694_v36 = vld [vmem:[#allocation58_spill] sm:$0xff] }
 0x2f4   : > { %16689 = vst [vmem:[#allocation220_spill] sm:$0xff] %v11995_v15  ;;  %v1586_v10 = vadd.f32 %v1570_v48, %v1490_v29  ;;  %vm12004_vm11 = vcmp.lt.f32.partialorder %v16662_v14, %v1672_v39  ;;  %vm16693_vm7 = vnez %v16692_v55  ;;  %v12015_v52 = vmul.f32 0.25, %v16694_v36  ;;  %v16701_v6 = vld [vmem:[#allocation10_spill] sm:$0xff] }
 0x2f5   : > { %v3827_v11 = vadd.f32 %v3811_v7, %v2873_v47  ;;  %v4749_v46 = vsel %vm16693_vm7, %v4733_v9, 0.0  ;;  %v1816_v32 = vsel %vm12004_vm11, %v1800_v49, 0.0  ;;  %6148 = vlog2.f32 %v2556_v16  ;;  %v16702_v47 = vld [vmem:[#allocation39_spill] sm:$0xff]  ;;  %v16707_v9 = vld [vmem:[#allocation217_spill] sm:$0xff] }
 0x2f6   : > { %v12012_v3 = vpop.eup %6140  ;;  %v2327_v0 = vsub.f32 %v16695_v19, %v8839_v60  ;;  %v4765_v50 = vmul.f32 0.5, %v4749_v46  ;;  %v1656_v34 = vadd.f32 %v1640_v56, %v1586_v10  ;;  %v16696_v43 = vsub.f32 %v16694_v36, %v16197_v44 }
 0x2f7   : > { %v12025_v59 = vmul.f32 0.25, %v16697_v41  ;;  %v3281_v40 = vsub.f32 %v11995_v15, %v16170_v12  ;;  %v12031_v53 = vmul.f32 %v12001_v1, %v12001_v1  ;;  %v12033_v38 = vpop.eup %6142  ;;  %v12037_v27 = vmul.f32 %v16700_v2, %v16699_v21  ;;  %v16724_v2 = vld [vmem:[#allocation132_spill] sm:$0xff] }
 0x2f8   : > { %v12022_v33 = vand.u32 2147483647, %v16696_v43  ;;  %v12041_v23 = vmul.f32 %v16702_v47, %v16701_v6  ;;  %v4781_v39 = vadd.f32 %v4765_v50, %v3827_v11  ;;  %v1832_v49 = vadd.f32 %v1816_v32, %v1656_v34  ;;  %v16713_v50 = vld [vmem:[#allocation127_spill] sm:$0xff]  ;;  %v16715_v43 = vld [vmem:[#allocation50_spill] sm:$0xff] }
 0x2f9   : > { %16698 = vst [vmem:[#allocation86_spill] sm:$0xff] %v12025_v59  ;;  %v12043_v37 = vpop.eup %6144  ;;  %v16704_v30 = vsub.f32 %v16697_v41, %v8811_v4  ;;  %vm1848_vm15 = vcmp.lt.f32.partialorder %v16662_v14, %v11762_v42  ;;  %v2444_v29 = vmul.f32 %v11983_v17, %v11983_v17  ;;  %v3510_v48 = vmul.f32 %v12012_v3, %v11940_v31  ;;  %v16718_v32 = vld [vmem:[#allocation103_spill] sm:$0xff] }
 0x2fa   : > { %16703 = vst [vmem:[#allocation133_spill] sm:$0xff] %v12041_v23  ;;  %v12056_v7 = vand.u32 2147483647, %v2327_v0  ;;  %v12059_v16 = vmul.f32 0.25, %v16695_v19  ;;  %6150 = vrsqrt.f32 %v16707_v9  ;;  %4797 = vst [vmem:[#allocation2 + $0x40] sm:$0xff] %v4781_v39  ;;  %v1864_v10 = vsel %vm1848_vm15, %v1832_v49, 0.0 }
 0x2fb   : > { %v12048_v26 = vand.u32 2147483647, %v16704_v30  ;;  %v12063_v56 = vmul.f32 0.25, %v11995_v15  ;;  %vm16710_vm3 = vnez %v16709_v13  ;;  %v2492_v11 = vsub.f32 %v2444_v29, %v12031_v53  ;;  %v16712_v0 = vld [vmem:[#allocation41_spill] sm:$0xff]  ;;  %v16717_v13 = vld [vmem:[#allocation222_spill] sm:$0xff]  ;;  %v16730_v59 = vld [vmem:[#allocation215_spill] sm:$0xff] }
 0x2fc   : > { %16705 = vst [vmem:[#allocation29_spill] sm:$0xff] %v12056_v7  ;;  %16706 = vst [vmem:[#allocation45_spill] sm:$0xff] %v12059_v16  ;;  %v1880_v42 = vsel %vm16710_vm3, %v1864_v10, 0.0  ;;  %6152 = vlog2.f32 %v3510_v48  ;;  %v12068_v55 = vpop.eup %6146  ;;  %v12070_v31 = vand.u32 2147483647, %v3281_v40  ;;  %v12078_v34 = vmul.f32 %v16713_v50, %v16712_v0  ;;  %v16716_v48 = vld [vmem:[#allocation20_spill] sm:$0xff] }
 0x2fd   : > { %16708 = vst [vmem:[#allocation223_spill] sm:$0xff] %v12063_v56  ;;  %v2540_v21 = vmul.f32 0.5, %v16715_v43  ;;  %v2642_v6 = vmul.f32 %v16715_v43, %v16573_v57  ;;  %v3382_v39 = vmul.f32 %v12033_v38, %v12033_v38  ;;  %v4464_v40 = vmul.f32 %v12043_v37, %v11967_v63  ;;  %v16720_v63 = vld [vmem:[#allocation17_spill] sm:$0xff]  ;;  %v16727_v16 = vld [vmem:[#allocation95_spill] sm:$0xff] }
 0x2fe   : > { %16711 = vst [vmem:[#allocation60_spill] sm:$0xff] %v12070_v31  ;;  %16714 = vst [vmem:[#allocation225_spill] sm:$0xff] %v12078_v34  ;;  %v2706_v49 = vsub.f32 %v8839_v60, %v16673_v28  ;;  %v2738_v30 = vsub.f32 %v11961_v45, %v12001_v1  ;;  %v3494_v10 = vmul.f32 0.5, %v16716_v48  ;;  %v12094_v0 = vadd.f32 %v8811_v4, %v16717_v13 }
 0x2ff   : > { %v2508_v43 = vmul.f32 %v2492_v11, %v16718_v32  ;;  %v3398_v46 = vmul.f32 %v12012_v3, %v12012_v3  ;;  %6154 = vlog2.f32 %v4464_v40  ;;  %v12101_v18 = vmax.f32 %v16720_v63, %v16719_v5 }
 0x300   : > { %vm12104_vm10 = vcmp.lt.f32.partialorder %v16662_v14, %v2706_v49  ;;  %v3596_v50 = vmul.f32 %v16716_v48, %v16575_v51  ;;  %v12112_v58 = vmul.f32 %v12068_v55, %v12068_v55  ;;  %6156 = vrcp.f32 %v12094_v0  ;;  %v16723_v48 = vld [vmem:[#allocation229_spill] sm:$0xff] }
 0x301   : > { %v2460_v11 = vsub.f32 %v12001_v1, %v11983_v17  ;;  %v2658_v5 = vsub.f32 %v12031_v53, %v2444_v29  ;;  %v3446_v32 = vsub.f32 %v3398_v46, %v3382_v39  ;;  %v3660_v40 = vsub.f32 %v16170_v12, %v16679_v61 }
 0x302   : > { %v6149_v49 = vpop.eup %6148  ;;  %v12122_v47 = vmul.f32 %v12043_v37, %v12043_v37  ;;  %6158 = vrcp.f32 %v12101_v18  ;;  %v12127_v56 = vadd.f32 %v8839_v60, %v16723_v48  ;;  %v12131_v17 = vmax.f32 %v16720_v63, %v16724_v2 }
 0x303   : > { %v2524_v1 = vadd.f32 %v2508_v43, %v2460_v11  ;;  %v2574_v53 = vmul.f32 0.6931472, %v6149_v49  ;;  %v2754_v29 = vmul.f32 2.0, %v2738_v30  ;;  %vm12134_vm13 = vcmp.lt.f32.partialorder %v16662_v14, %v3660_v40  ;;  %v16728_v43 = vld [vmem:[#allocation102_spill] sm:$0xff]  ;;  %v16729_v40 = vld [vmem:[#allocation104_spill] sm:$0xff] }
 0x304   : > { %v4448_v20 = vmul.f32 0.5, %v16727_v16  ;;  %vm2802_vm5 = vcmp.lt.f32.partialorder %v16662_v14, %v11910_v54  ;;  %v3692_v22 = vsub.f32 %v11961_v45, %v12033_v38  ;;  %v4400_v2 = vsub.f32 %v12122_v47, %v12112_v58 }
 0x305   : > { %6160 = vrcp.f32 %v12131_v17  ;;  %v12148_v30 = vadd.f32 %v16170_v12, %v16728_v43  ;;  %v2604_v11 = vmul.f32 %v2574_v53, %v2540_v21  ;;  %v3462_v49 = vmul.f32 %v3446_v32, %v16729_v40 }
 0x306   : > { %6162 = vrcp.f32 %v12127_v56  ;;  %v12154_v31 = vmax.f32 %v16720_v63, %v16730_v59  ;;  %v2674_v15 = vmul.f32 %v2658_v5, %v2642_v6  ;;  %v3414_v7 = vsub.f32 %v12033_v38, %v12012_v3  ;;  %v16732_v5 = vld [vmem:[#allocation109_spill] sm:$0xff]  ;;  %v363_v38 = vld [vmem:[#allocation2] sm:$0xff] }
 0x307   : > { %v3612_v19 = vsub.f32 %v3382_v39, %v3398_v46  ;;  %v4550_v9 = vmul.f32 %v16727_v16, %v16482_v25  ;;  %v12160_v23 = vpop.eup %6150  ;;  %v1896_v34 = vmul.f32 0.5, %v1880_v42  ;;  %v2620_v21 = vadd.f32 %v2604_v11, %v2524_v1  ;;  %v16733_v11 = vld [vmem:[#allocation114_spill] sm:$0xff] }
 0x308   : > { %16731 = vst [vmem:[#allocation84_spill] sm:$0xff] %v12160_v23  ;;  %v2770_v32 = vsel %vm12104_vm10, %v2754_v29, 0.0  ;;  %v12166_v53 = vadd.f32 %v16197_v44, %v16694_v36  ;;  %v3708_v6 = vmul.f32 2.0, %v3692_v22  ;;  %v4416_v40 = vmul.f32 %v4400_v2, %v16732_v5 }
 0x309   : > { %v6153_v59 = vpop.eup %6152  ;;  %v4646_v3 = vsub.f32 %v11961_v45, %v12068_v55  ;;  %6164 = vrcp.f32 %v12148_v30  ;;  %v2690_v16 = vadd.f32 %v2674_v15, %v2620_v21  ;;  %v3478_v42 = vadd.f32 %v3462_v49, %v3414_v7  ;;  %v16734_v49 = vld [vmem:[#allocation147_spill] sm:$0xff]  ;;  %v16737_v21 = vld [vmem:[#allocation106_spill] sm:$0xff] }
 0x30a   : > { %v3528_v46 = vmul.f32 0.6931472, %v6153_v59  ;;  %6166 = vrcp.f32 %v12154_v31  ;;  %v3628_v39 = vmul.f32 %v3612_v19, %v3596_v50  ;;  %vm3756_vm12 = vcmp.lt.f32.partialorder %v16662_v14, %v11935_v24 }
 0x30b   : > { %v4368_v22 = vsub.f32 %v12068_v55, %v12043_v37  ;;  %v4614_v28 = vsub.f32 %v16197_v44, %v16681_v62  ;;  %v12181_v45 = vmax.f32 %v16720_v63, %v12022_v33  ;;  %v2786_v1 = vadd.f32 %v2770_v32, %v2690_v16 }
 0x30c   : > { %v3558_v15 = vmul.f32 %v3528_v46, %v3494_v10  ;;  %v4566_v7 = vsub.f32 %v12112_v58, %v12122_v47  ;;  %6168 = vrcp.f32 %v12166_v53  ;;  %v6155_v19 = vpop.eup %6154  ;;  %v1912_v50 = vadd.f32 %v1896_v34, %v363_v38  ;;  %v16735_v47 = vld [vmem:[#allocation69_spill] sm:$0xff] }
 0x30d   : > { %v3724_v29 = vsel %vm12134_vm13, %v3708_v6, 0.0  ;;  %v4432_v37 = vadd.f32 %v4416_v40, %v4368_v22  ;;  %v4662_v55 = vmul.f32 2.0, %v4646_v3  ;;  %v12188_v2 = vpop.eup %6156  ;;  %v2818_v62 = vsel %vm2802_vm5, %v2786_v1, 0.0 }
 0x30e   : > { %v3574_v33 = vadd.f32 %v3558_v15, %v3478_v42  ;;  %v4482_v10 = vmul.f32 0.6931472, %v6155_v19  ;;  %v12195_v58 = vmax.f32 %v16734_v49, %v16733_v11  ;;  %vm16736_vm4 = vnez %v16735_v47  ;;  %v16741_v19 = vld [vmem:[#allocation218_spill] sm:$0xff] }
 0x30f   : > { %v2834_v34 = vsel %vm16736_vm4, %v2818_v62, 0.0  ;;  %v1531_v61 = vmul.f32 %v12188_v2, %v12101_v18  ;;  %6170 = vrcp.f32 %v12181_v45  ;;  %v12204_v32 = vadd.f32 %v8811_v4, %v16737_v21  ;;  %v12206_v54 = vpop.eup %6158  ;;  %v16740_v18 = vld [vmem:[#allocation31_spill] sm:$0xff] }
 0x310   : > { %v2850_v59 = vmul.f32 0.5, %v2834_v34  ;;  %v3644_v6 = vadd.f32 %v3628_v39, %v3574_v33  ;;  %v4512_v5 = vmul.f32 %v4482_v10, %v4448_v20  ;;  %vm12209_vm6 = vcmp.lt.f32.partialorder %v16662_v14, %v4614_v28 }
 0x311   : > { %v4582_v3 = vmul.f32 %v4566_v7, %v4550_v9  ;;  %vm4710_vm14 = vcmp.lt.f32.partialorder %v16662_v14, %v11953_v35  ;;  %v12216_v38 = vmul.f32 0.5, %v16740_v18  ;;  %6172 = vlog2.f32 %v1531_v61 }
 0x312   : > { %v12218_v16 = vpop.eup %6160  ;;  %v2866_v42 = vadd.f32 %v2850_v59, %v1912_v50  ;;  %v3740_v46 = vadd.f32 %v3724_v29, %v3644_v6  ;;  %v4528_v22 = vadd.f32 %v4512_v5, %v4432_v37  ;;  %6174 = vrcp.f32 %v12195_v58  ;;  %v16742_v29 = vld [vmem:[#allocation70_spill] sm:$0xff]  ;;  %v16744_v59 = vld [vmem:[#allocation216_spill] sm:$0xff]  ;;  %v12261_v5 = vpop.permute.xlu0 %1755 }
 0x313   : > { %v12221_v20 = vpop.eup %6162  ;;  %v4678_v39 = vsel %vm12209_vm6, %v4662_v55, 0.0  ;;  %v1403_v9 = vmul.f32 %v12206_v54, %v12206_v54  ;;  %v1617_v28 = vmul.f32 %v16740_v18, %v16557_v8  ;;  %6176 = vrcp.f32 %v12204_v32 }
 0x314   : > { %v3772_v1 = vsel %vm3756_vm12, %v3740_v46, 0.0  ;;  %v4598_v15 = vadd.f32 %v4582_v3, %v4528_v22  ;;  %v1681_v7 = vsub.f32 %v8811_v4, %v16717_v13  ;;  %v12236_v50 = vmul.f32 0.5, %v16741_v19  ;;  %v16745_v22 = vld [vmem:[#allocation71_spill] sm:$0xff] }
 0x315   : > { %vm16743_vm2 = vnez %v16742_v29  ;;  %v1419_v55 = vmul.f32 %v12188_v2, %v12188_v2  ;;  %v2565_v62 = vmul.f32 %v12221_v20, %v12131_v17  ;;  %v2651_v24 = vmul.f32 %v16741_v19, %v16573_v57 }
 0x316   : > { %v3788_v37 = vsel %vm16743_vm2, %v3772_v1, 0.0  ;;  %v12246_v33 = vpop.eup %6164  ;;  %v4694_v11 = vadd.f32 %v4678_v39, %v4598_v15  ;;  %v2437_v13 = vmul.f32 %v12218_v16, %v12218_v16  ;;  %v2715_v47 = vsub.f32 %v8839_v60, %v16723_v48  ;;  %v16747_v15 = vld [vmem:[#allocation212_spill] sm:$0xff] }
 0x317   : > { %v3804_v10 = vmul.f32 0.5, %v3788_v37  ;;  %v12252_v34 = vpop.eup %6166  ;;  %v1467_v61 = vsub.f32 %v1419_v55, %v1403_v9  ;;  %6178 = vlog2.f32 %v2565_v62  ;;  %v12255_v6 = vmul.f32 0.5, %v16744_v59  ;;  %v16748_v37 = vld [vmem:[#allocation42_spill] sm:$0xff] }
 0x318   : > { %v12259_v17 = vmul.f32 %v16744_v59, %v16575_v51  ;;  %v4726_v3 = vsel %vm4710_vm14, %v4694_v11, 0.0  ;;  %v2453_v48 = vmul.f32 %v12221_v20, %v12221_v20  ;;  %v3669_v18 = vsub.f32 %v16170_v12, %v16728_v43 }
 0x319   : > { %v3820_v40 = vadd.f32 %v3804_v10, %v2866_v42  ;;  %v12270_v46 = vpop.eup %6168  ;;  %vm16746_vm11 = vnez %v16745_v22  ;;  %v3519_v1 = vmul.f32 %v12246_v33, %v12154_v31  ;;  %v12277_v42 = vmul.f32 0.5, %v16747_v15 }
 0x31a   : > { %v4742_v39 = vsel %vm16746_vm11, %v4726_v3, 0.0  ;;  %v12281_v14 = vmul.f32 %v16747_v15, %v16482_v25  ;;  %v2501_v19 = vsub.f32 %v2453_v48, %v2437_v13  ;;  %v3391_v43 = vmul.f32 %v12252_v34, %v12252_v34  ;;  %v16752_v15 = vld [vmem:[#allocation107_spill] sm:$0xff] }
 0x31b   : > { %v4758_v35 = vmul.f32 0.5, %v4742_v39  ;;  %v1793_v29 = vsub.f32 %v12261_v5, %v12206_v54  ;;  %v1483_v62 = vmul.f32 %v1467_v61, %v16748_v37  ;;  %v1633_v10 = vsub.f32 %v1403_v9, %v1419_v55  ;;  %v16751_v55 = vld [vmem:[#allocation32_spill] sm:$0xff] }
 0x31c   : > { %6180 = vlog2.f32 %v3519_v1  ;;  %v12290_v11 = vpop.eup %6170  ;;  %vm12293_vm7 = vcmp.lt.f32.partialorder %v16720_v63, %v1681_v7  ;;  %v2667_v22 = vsub.f32 %v2437_v13, %v2453_v48  ;;  %v3407_v39 = vmul.f32 %v12246_v33, %v12246_v33  ;;  %v16753_v7 = vld [vmem:[#allocation83_spill] sm:$0xff] }
 0x31d   : > { %v4774_v59 = vadd.f32 %v4758_v35, %v3820_v40  ;;  %v4473_v61 = vmul.f32 %v12270_v46, %v12181_v45  ;;  %v1435_v9 = vsub.f32 %v12206_v54, %v12188_v2  ;;  %v12304_v1 = vmul.f32 0.5, %v16751_v55  ;;  %v16754_v48 = vld [vmem:[#allocation191_spill] sm:$0xff] }
 0x31e   : > { %v12308_v40 = vadd.f32 %v8839_v60, %v16752_v15  ;;  %v12312_v35 = vmax.f32 %v16734_v49, %v16753_v7  ;;  %v6173_v13 = vpop.eup %6172  ;;  %v2517_v37 = vmul.f32 %v2501_v19, %v16754_v48  ;;  %v3455_v31 = vsub.f32 %v3407_v39, %v3391_v43 }
 0x31f   : > { %4790 = vst [vmem:[#allocation2] sm:$0xff] %v4774_v59  ;;  %6182 = vlog2.f32 %v4473_v61  ;;  %v1809_v45 = vmul.f32 2.0, %v1793_v29  ;;  %v12315_v25 = vpop.eup %6174  ;;  %v1558_v2 = vmul.f32 0.6931472, %v6173_v13  ;;  %v1649_v54 = vmul.f32 %v1633_v10, %v1617_v28 }
 0x320   : > { %vm12318_vm15 = vcmp.lt.f32.partialorder %v16720_v63, %v2715_v47  ;;  %v4345_v7 = vmul.f32 %v12290_v11, %v12290_v11  ;;  %v2747_v59 = vsub.f32 %v12261_v5, %v12218_v16  ;;  %v12326_v57 = vpop.eup %6176  ;;  %v1499_v19 = vadd.f32 %v1483_v62, %v1435_v9  ;;  %v16757_v9 = vld [vmem:[#allocation175_spill] sm:$0xff] }
 0x321   : > { %vm1857_vm3 = vcmp.lt.f32.partialorder %v16720_v63, %v12094_v0  ;;  %v2469_v28 = vsub.f32 %v12218_v16, %v12221_v20  ;;  %v2683_v29 = vmul.f32 %v2667_v22, %v2651_v24  ;;  %v3423_v47 = vsub.f32 %v12252_v34, %v12246_v33 }
 0x322   : > { %v1579_v10 = vmul.f32 %v1558_v2, %v12216_v38  ;;  %v3621_v61 = vsub.f32 %v3391_v43, %v3407_v39  ;;  %v4361_v13 = vmul.f32 %v12270_v46, %v12270_v46  ;;  %v1524_v48 = vmul.f32 %v12326_v57, %v12195_v58 }
 0x323   : > { %v2533_v62 = vadd.f32 %v2517_v37, %v2469_v28  ;;  %v3471_v15 = vmul.f32 %v3455_v31, %v16757_v9  ;;  %v4377_v23 = vsub.f32 %v12290_v11, %v12270_v46  ;;  %v12344_v16 = vmul.f32 %v12315_v25, %v12315_v25  ;;  %v16767_v9 = vld [vmem:[#allocation115_spill] sm:$0xff] }
 0x324   : > { %v1595_v20 = vadd.f32 %v1579_v10, %v1499_v19  ;;  %v4409_v24 = vsub.f32 %v4361_v13, %v4345_v7  ;;  %v4575_v38 = vsub.f32 %v4345_v7, %v4361_v13  ;;  %6184 = vlog2.f32 %v1524_v48  ;;  %v6179_v33 = vpop.eup %6178  ;;  %v16765_v48 = vld [vmem:[#allocation171_spill] sm:$0xff] }
 0x325   : > { %vm12347_vm10 = vcmp.lt.f32.partialorder %v16720_v63, %v3669_v18  ;;  %v2763_v58 = vmul.f32 2.0, %v2747_v59  ;;  %v3701_v31 = vsub.f32 %v12261_v5, %v12252_v34  ;;  %v4655_v46 = vsub.f32 %v12261_v5, %v12290_v11  ;;  %v16760_v5 = vld [vmem:[#allocation113_spill] sm:$0xff] }
 0x326   : > { %v12357_v22 = vmul.f32 %v12326_v57, %v12326_v57  ;;  %v1665_v39 = vadd.f32 %v1649_v54, %v1595_v20  ;;  %v2592_v37 = vmul.f32 0.6931472, %v6179_v33  ;;  %v3637_v2 = vmul.f32 %v3621_v61, %v12259_v17 }
 0x327   : > { %v1825_v18 = vsel %vm12293_vm7, %v1809_v45, 0.0  ;;  %vm2811_vm13 = vcmp.lt.f32.partialorder %v16720_v63, %v12127_v56  ;;  %v3487_v7 = vadd.f32 %v3471_v15, %v3423_v47  ;;  %6186 = vrcp.f32 %v12308_v40 }
 0x328   : > { %v1460_v34 = vsub.f32 %v12357_v22, %v12344_v16  ;;  %v12369_v11 = vadd.f32 %v16170_v12, %v16760_v5  ;;  %v2613_v54 = vmul.f32 %v2592_v37, %v12236_v50  ;;  %v4425_v17 = vmul.f32 %v4409_v24, %v12015_v52  ;;  %v12380_v50 = vpop.permute.xlu1 %1720  ;;  %v16761_v52 = vld [vmem:[#allocation122_spill] sm:$0xff] }
 0x329   : > { %v4591_v3 = vmul.f32 %v4575_v38, %v12281_v14  ;;  %v1841_v45 = vadd.f32 %v1825_v18, %v1665_v39  ;;  %v6181_v59 = vpop.eup %6180  ;;  %v2779_v15 = vsel %vm12318_vm15, %v2763_v58, 0.0  ;;  %v3717_v19 = vmul.f32 2.0, %v3701_v31  ;;  %v16768_v58 = vld [vmem:[#allocation72_spill] sm:$0xff] }
 0x32a   : > { %v4671_v28 = vmul.f32 2.0, %v4655_v46  ;;  %6188 = vrcp.f32 %v12312_v35  ;;  %v2629_v47 = vadd.f32 %v2613_v54, %v2533_v62  ;;  %v3546_v10 = vmul.f32 0.6931472, %v6181_v59  ;;  %v372_v46 = vld [vmem:[#allocation2 + $0x10] sm:$0xff] }
 0x32b   : > { %v1873_v61 = vsel %vm1857_vm3, %v1841_v45, 0.0  ;;  %v12384_v14 = vmax.f32 %v16734_v49, %v16761_v52  ;;  %vm3765_vm5 = vcmp.lt.f32.partialorder %v16720_v63, %v12148_v30  ;;  %v16762_v51 = vsub.f32 %v16197_v44, %v16694_v36 }
 0x32c   : > { %vm16766_vm4 = vnez %v16765_v48  ;;  %v1428_v62 = vsub.f32 %v12315_v25, %v12326_v57  ;;  %v1476_v20 = vmul.f32 %v1460_v34, %v16767_v9  ;;  %6190 = vrcp.f32 %v12369_v11  ;;  %v6183_v24 = vpop.eup %6182  ;;  %v16769_v57 = vld [vmem:[#allocation126_spill] sm:$0xff] }
 0x32d   : > { %vm12392_vm12 = vcmp.lt.f32.partialorder %v16720_v63, %v16762_v51  ;;  %v1889_v0 = vsel %vm16766_vm4, %v1873_v61, 0.0  ;;  %v2699_v38 = vadd.f32 %v2683_v29, %v2629_v47  ;;  %v3567_v33 = vmul.f32 %v3546_v10, %v12255_v6  ;;  %v16770_v47 = vld [vmem:[#allocation210_spill] sm:$0xff] }
 0x32e   : > { %v1905_v36 = vmul.f32 0.5, %v1889_v0  ;;  %v12405_v31 = vadd.f32 %v16197_v44, %v16768_v58  ;;  %v4441_v39 = vadd.f32 %v4425_v17, %v4377_v23  ;;  %v4500_v37 = vmul.f32 0.6931472, %v6183_v24 }
 0x32f   : > { %v1786_v18 = vsub.f32 %v12380_v50, %v12315_v25  ;;  %v12411_v34 = vmax.f32 %v16734_v49, %v16769_v57  ;;  %v3583_v54 = vadd.f32 %v3567_v33, %v3487_v7  ;;  %vm4719_vm6 = vcmp.lt.f32.partialorder %v16720_v63, %v12166_v53  ;;  %v16779_v57 = vld [vmem:[#allocation182_spill] sm:$0xff]  ;;  %v16782_v63 = vld [vmem:[#allocation219_spill] sm:$0xff] }
 0x330   : > { %v2795_v6 = vadd.f32 %v2779_v15, %v2699_v38  ;;  %v3733_v29 = vsel %vm12347_vm10, %v3717_v19, 0.0  ;;  %6192 = vrcp.f32 %v12384_v14  ;;  %v4521_v23 = vmul.f32 %v4500_v37, %v12277_v42 }
 0x331   : > { %v1492_v17 = vadd.f32 %v1476_v20, %v1428_v62  ;;  %v1626_v25 = vsub.f32 %v12344_v16, %v12357_v22  ;;  %v12423_v45 = vadd.f32 %v8811_v4, %v16697_v41  ;;  %v3653_v7 = vadd.f32 %v3637_v2, %v3583_v54  ;;  %v6185_v43 = vpop.eup %6184  ;;  %v16772_v16 = vld [vmem:[#allocation197_spill] sm:$0xff] }
 0x332   : > { %v1921_v59 = vadd.f32 %v1905_v36, %v372_v46  ;;  %v2827_v15 = vsel %vm2811_vm13, %v2795_v6, 0.0  ;;  %6194 = vrcp.f32 %v12405_v31  ;;  %v4537_v19 = vadd.f32 %v4521_v23, %v4441_v39 }
 0x333   : > { %vm16771_vm14 = vnez %v16770_v47  ;;  %6196 = vrcp.f32 %v12411_v34  ;;  %v12434_v22 = vmax.f32 %v16772_v16, %v12048_v26  ;;  %v3749_v2 = vadd.f32 %v3733_v29, %v3653_v7 }
 0x334   : > { %v2843_v42 = vsel %vm16771_vm14, %v2827_v15, 0.0  ;;  %v1544_v61 = vmul.f32 0.6931472, %v6185_v43  ;;  %6198 = vrcp.f32 %v12423_v45  ;;  %v4607_v56 = vadd.f32 %v4591_v3, %v4537_v19  ;;  %v12441_v0 = vpop.eup %6186  ;;  %v16773_v3 = vld [vmem:[#allocation213_spill] sm:$0xff] }
 0x335   : > { %v2859_v10 = vmul.f32 0.5, %v2843_v42  ;;  %v1610_v52 = vmul.f32 %v16751_v55, %v16557_v8  ;;  %v1674_v51 = vsub.f32 %v8811_v4, %v16737_v21  ;;  %v1802_v48 = vmul.f32 2.0, %v1786_v18 }
 0x336   : > { %v3781_v26 = vsel %vm3765_vm5, %v3749_v2, 0.0  ;;  %v4687_v9 = vsel %vm12392_vm12, %v4671_v28, 0.0  ;;  %v1572_v20 = vmul.f32 %v1544_v61, %v12304_v1  ;;  %vm16774_vm2 = vnez %v16773_v3 }
 0x337   : > { %v2875_v62 = vadd.f32 %v2859_v10, %v1921_v59  ;;  %v3797_v24 = vsel %vm16774_vm2, %v3781_v26, 0.0  ;;  %v4703_v55 = vadd.f32 %v4687_v9, %v4607_v56  ;;  %vm12452_vm11 = vcmp.lt.f32.partialorder %v16734_v49, %v1674_v51  ;;  %v12458_v33 = vpop.eup %6188  ;;  %v16789_v56 = vld [vmem:[#allocation217_spill] sm:$0xff] }
 0x338   : > { %v2558_v38 = vmul.f32 %v12441_v0, %v12312_v35  ;;  %v3813_v30 = vmul.f32 0.5, %v3797_v24  ;;  %v1588_v36 = vadd.f32 %v1572_v20, %v1492_v17  ;;  %v1642_v13 = vmul.f32 %v1626_v25, %v1610_v52  ;;  %v16778_v35 = vld [vmem:[#allocation225_spill] sm:$0xff]  ;;  %v16790_v52 = vld [vmem:[#allocation84_spill] sm:$0xff]  ;;  %v16793_v20 = vld [vmem:[#allocation107_spill] sm:$0xff] }
 0x339   : > { %6200 = vrcp.f32 %v12434_v22  ;;  %v12462_v1 = vmul.f32 0.25, %v12037_v27  ;;  %v4735_v28 = vsel %vm4719_vm6, %v4703_v55, 0.0  ;;  %v1818_v46 = vsel %vm12452_vm11, %v1802_v48, 0.0  ;;  %v12469_v39 = vpop.eup %6190  ;;  %v16783_v25 = vld [vmem:[#allocation133_spill] sm:$0xff]  ;;  %v16794_v55 = vld [vmem:[#allocation78_spill] sm:$0xff] }
 0x33a   : > { %6202 = vlog2.f32 %v2558_v38  ;;  %v2329_v37 = vsub.f32 %v16778_v35, %v8839_v60  ;;  %v3829_v18 = vadd.f32 %v3813_v30, %v2875_v62  ;;  %vm16780_vm7 = vnez %v16779_v57  ;;  %v16791_v62 = vld [vmem:[#allocation91_spill] sm:$0xff] }
 0x33b   : > { %16777 = vst [vmem:[#allocation160_spill] sm:$0xff] %v12462_v1  ;;  %v4751_v54 = vsel %vm16780_vm7, %v4735_v28, 0.0  ;;  %v1658_v6 = vadd.f32 %v1642_v13, %v1588_v36  ;;  %v16781_v29 = vsub.f32 %v12037_v27, %v16197_v44  ;;  %6204 = vrsqrt.f32 %v16782_v63  ;;  %v16795_v38 = vld [vmem:[#allocation199_spill] sm:$0xff] }
 0x33c   : > { %v4767_v53 = vmul.f32 0.5, %v4751_v54  ;;  %v2430_v17 = vmul.f32 %v12458_v33, %v12458_v33  ;;  %v16784_v7 = vsub.f32 %v16783_v25, %v8811_v4  ;;  %v12489_v15 = vmul.f32 0.25, %v16783_v25  ;;  %v16799_v54 = vld [vmem:[#allocation200_spill] sm:$0xff] }
 0x33d   : > { %v12478_v23 = vand.u32 2147483647, %v16781_v29  ;;  %v1834_v43 = vadd.f32 %v1818_v46, %v1658_v6  ;;  %v3512_v19 = vmul.f32 %v12469_v39, %v12384_v14  ;;  %v12493_v47 = vpop.eup %6192  ;;  %v12496_v42 = vmul.f32 0.25, %v16778_v35 }
 0x33e   : > { %v12486_v59 = vand.u32 2147483647, %v16784_v7  ;;  %16786 = vst [vmem:[#allocation187_spill] sm:$0xff] %v12489_v15  ;;  %v4783_v10 = vadd.f32 %v4767_v53, %v3829_v18  ;;  %vm1850_vm15 = vcmp.lt.f32.partialorder %v16734_v49, %v12204_v32  ;;  %v2446_v2 = vmul.f32 %v12441_v0, %v12441_v0  ;;  %v16798_v18 = vld [vmem:[#allocation23_spill] sm:$0xff] }
 0x33f   : > { %16787 = vst [vmem:[#allocation55_spill] sm:$0xff] %v12496_v42  ;;  %v12502_v61 = vand.u32 2147483647, %v2329_v37  ;;  %v12506_v51 = vmul.f32 %v16790_v52, %v16789_v56  ;;  %v1866_v48 = vsel %vm1850_vm15, %v1834_v43, 0.0  ;;  %6206 = vlog2.f32 %v3512_v19  ;;  %v12508_v14 = vpop.eup %6194  ;;  %v16808_v52 = vld [vmem:[#allocation47_spill] sm:$0xff] }
 0x340   : > { %16785 = vst [vmem:[#allocation228_spill] sm:$0xff] %v12486_v59  ;;  %4799 = vst [vmem:[#allocation2 + $0x10] sm:$0xff] %v4783_v10  ;;  %vm16792_vm3 = vnez %v16791_v62  ;;  %v2494_v9 = vsub.f32 %v2446_v2, %v2430_v17  ;;  %v2708_v32 = vsub.f32 %v8839_v60, %v16793_v20  ;;  %v2740_v3 = vsub.f32 %v12380_v50, %v12458_v33  ;;  %v12516_v24 = vpop.eup %6196  ;;  %v16802_v10 = vld [vmem:[#allocation202_spill] sm:$0xff] }
 0x341   : > { %16788 = vst [vmem:[#allocation176_spill] sm:$0xff] %v12502_v61  ;;  %v1882_v26 = vsel %vm16792_vm3, %v1866_v48, 0.0  ;;  %v2542_v21 = vmul.f32 0.5, %v16794_v55  ;;  %v2644_v30 = vmul.f32 %v16794_v55, %v16795_v38  ;;  %v3384_v36 = vmul.f32 %v12493_v47, %v12493_v47  ;;  %v12525_v28 = vpop.eup %6198 }
 0x342   : > { %v4466_v13 = vmul.f32 %v12508_v14, %v12411_v34  ;;  %v2660_v46 = vsub.f32 %v2430_v17, %v2446_v2  ;;  %vm12528_vm10 = vcmp.lt.f32.partialorder %v16734_v49, %v2708_v32  ;;  %v3496_v57 = vmul.f32 0.5, %v16798_v18  ;;  %v16800_v34 = vld [vmem:[#allocation112_spill] sm:$0xff] }
 0x343   : > { %v3598_v6 = vmul.f32 %v16798_v18, %v16799_v54  ;;  %v3400_v29 = vmul.f32 %v12469_v39, %v12469_v39  ;;  %v3662_v53 = vsub.f32 %v16170_v12, %v16760_v5  ;;  %v12540_v7 = vmul.f32 0.5, %v16800_v34  ;;  %v16801_v17 = vld [vmem:[#allocation76_spill] sm:$0xff]  ;;  %v16806_v18 = vld [vmem:[#allocation194_spill] sm:$0xff] }
 0x344   : > { %6208 = vlog2.f32 %v4466_v13  ;;  %v2510_v43 = vmul.f32 %v2494_v9, %v16801_v17  ;;  %v2756_v19 = vmul.f32 2.0, %v2740_v3  ;;  %v12545_v2 = vmul.f32 %v16800_v34, %v16802_v10  ;;  %v16803_v5 = vld [vmem:[#allocation208_spill] sm:$0xff] }
 0x345   : > { %v4616_v56 = vsub.f32 %v16197_v44, %v16768_v58  ;;  %v3448_v48 = vsub.f32 %v3400_v29, %v3384_v36  ;;  %v12551_v62 = vmul.f32 %v12516_v24, %v12516_v24  ;;  %v12554_v20 = vmul.f32 0.5, %v16803_v5 }
 0x346   : > { %v1533_v32 = vmul.f32 %v12525_v28, %v12434_v22  ;;  %v12558_v9 = vpop.eup %6200  ;;  %v2462_v3 = vsub.f32 %v12458_v33, %v12441_v0  ;;  %v2676_v55 = vmul.f32 %v2660_v46, %v2644_v30  ;;  %vm12563_vm13 = vcmp.lt.f32.partialorder %v16734_v49, %v3662_v53  ;;  %v16807_v33 = vld [vmem:[#allocation29_spill] sm:$0xff] }
 0x347   : > { %v12569_v13 = vmul.f32 %v16803_v5, %v16557_v8  ;;  %v12573_v34 = vadd.f32 %v8839_v60, %v16806_v18  ;;  %v6203_v22 = vpop.eup %6202  ;;  %v3694_v17 = vsub.f32 %v12380_v50, %v12493_v47  ;;  %v4354_v0 = vmul.f32 %v12508_v14, %v12508_v14 }
 0x348   : > { %6210 = vlog2.f32 %v1533_v32  ;;  %v12581_v30 = vmax.f32 %v16772_v16, %v16807_v33  ;;  %v2526_v46 = vadd.f32 %v2510_v43, %v2462_v3  ;;  %v2578_v53 = vmul.f32 0.6931472, %v6203_v22  ;;  %v12586_v42 = vpop.eup %6204  ;;  %v16809_v43 = vld [vmem:[#allocation220_spill] sm:$0xff] }
 0x349   : > { %v2772_v5 = vsel %vm12528_vm10, %v2756_v19, 0.0  ;;  %6212 = vrcp.f32 %v12573_v34  ;;  %vm2804_vm5 = vcmp.lt.f32.partialorder %v16734_v49, %v12308_v40  ;;  %v3464_v15 = vmul.f32 %v3448_v48, %v16808_v52  ;;  %v16811_v22 = vld [vmem:[#allocation60_spill] sm:$0xff]  ;;  %v16820_v40 = vld [vmem:[#allocation85_spill] sm:$0xff] }
 0x34a   : > { %v4402_v32 = vsub.f32 %v4354_v0, %v12551_v62  ;;  %v12594_v33 = vmul.f32 %v12558_v9, %v12558_v9  ;;  %v12598_v3 = vadd.f32 %v16170_v12, %v16809_v43  ;;  %v2606_v37 = vmul.f32 %v2578_v53, %v2542_v21 }
 0x34b   : > { %v3614_v19 = vsub.f32 %v3384_v36, %v3400_v29  ;;  %6214 = vrcp.f32 %v12581_v30  ;;  %v12603_v61 = vmax.f32 %v16772_v16, %v16811_v22  ;;  %v1898_v35 = vmul.f32 0.5, %v1882_v26 }
 0x34c   : > { %16810 = vst [vmem:[#allocation185_spill] sm:$0xff] %v12598_v3  ;;  %v3416_v52 = vsub.f32 %v12493_v47, %v12469_v39  ;;  %v3710_v48 = vmul.f32 2.0, %v3694_v17  ;;  %vm12608_vm12 = vcmp.lt.f32.partialorder %v16734_v49, %v4616_v56  ;;  %v12614_v21 = vmul.f32 %v12525_v28, %v12525_v28  ;;  %v6207_v36 = vpop.eup %6206  ;;  %v365_v47 = vld [vmem:[#allocation2 + $0x18] sm:$0xff]  ;;  %v16814_v17 = vld [vmem:[#allocation124_spill] sm:$0xff] }
 0x34d   : > { %v2622_v29 = vadd.f32 %v2606_v37, %v2526_v46  ;;  %v4648_v53 = vsub.f32 %v12380_v50, %v12516_v24  ;;  %6216 = vrcp.f32 %v12598_v3  ;;  %v12621_v39 = vadd.f32 %v16197_v44, %v12037_v27 }
 0x34e   : > { %v3480_v26 = vadd.f32 %v3464_v15, %v3416_v52  ;;  %v3532_v56 = vmul.f32 0.6931472, %v6207_v36  ;;  %v4418_v22 = vmul.f32 %v4402_v32, %v16814_v17  ;;  %v1469_v59 = vsub.f32 %v12614_v21, %v12594_v33 }
 0x34f   : > { %v2692_v25 = vadd.f32 %v2676_v55, %v2622_v29  ;;  %v3630_v1 = vmul.f32 %v3614_v19, %v3598_v6  ;;  %vm3758_vm4 = vcmp.lt.f32.partialorder %v16734_v49, %v12369_v11  ;;  %6218 = vrcp.f32 %v12603_v61 }
 0x350   : > { %v12631_v50 = vmax.f32 %v16772_v16, %v12478_v23  ;;  %v3560_v46 = vmul.f32 %v3532_v56, %v3496_v57  ;;  %v3726_v15 = vsel %vm12563_vm13, %v3710_v48, 0.0  ;;  %v4370_v32 = vsub.f32 %v12516_v24, %v12508_v14  ;;  %v16815_v23 = vld [vmem:[#allocation86_spill] sm:$0xff]  ;;  %v16816_v24 = vld [vmem:[#allocation119_spill] sm:$0xff] }
 0x351   : > { %6220 = vrcp.f32 %v12621_v39  ;;  %v6209_v55 = vpop.eup %6208  ;;  %v1914_v6 = vadd.f32 %v1898_v35, %v365_v47  ;;  %v2788_v37 = vadd.f32 %v2772_v5, %v2692_v25  ;;  %v4568_v19 = vsub.f32 %v12551_v62, %v4354_v0  ;;  %v16817_v25 = vld [vmem:[#allocation14_spill] sm:$0xff]  ;;  %v16819_v5 = vld [vmem:[#allocation131_spill] sm:$0xff] }
 0x352   : > { %v4664_v52 = vmul.f32 2.0, %v4648_v53  ;;  %v3576_v36 = vadd.f32 %v3560_v46, %v3480_v26  ;;  %v4434_v29 = vadd.f32 %v4418_v22, %v4370_v32  ;;  %v4486_v17 = vmul.f32 0.6931472, %v6209_v55 }
 0x353   : > { %v1485_v3 = vmul.f32 %v1469_v59, %v16815_v23  ;;  %v2820_v57 = vsel %vm2804_vm5, %v2788_v37, 0.0  ;;  %v1437_v14 = vsub.f32 %v12558_v9, %v12525_v28  ;;  %6222 = vrcp.f32 %v12631_v50  ;;  %v12653_v59 = vpop.permute.xlu0 %1765 }
 0x354   : > { %v12648_v35 = vadd.f32 %v8811_v4, %v16816_v24  ;;  %vm16818_vm6 = vnez %v16817_v25  ;;  %v3646_v58 = vadd.f32 %v3630_v1, %v3576_v36  ;;  %v4514_v0 = vmul.f32 %v4486_v17, %v12540_v7 }
 0x355   : > { %v2836_v62 = vsel %vm16818_vm6, %v2820_v57, 0.0  ;;  %v12657_v48 = vmax.f32 %v16820_v40, %v16819_v5  ;;  %v6211_v53 = vpop.eup %6210  ;;  %v4584_v47 = vmul.f32 %v4568_v19, %v12545_v2  ;;  %v4680_v26 = vsel %vm12608_vm12, %v4664_v52, 0.0 }
 0x356   : > { %v2852_v28 = vmul.f32 0.5, %v2836_v62  ;;  %v1635_v56 = vsub.f32 %v12594_v33, %v12614_v21  ;;  %v12664_v22 = vpop.eup %6212  ;;  %v3742_v1 = vadd.f32 %v3726_v15, %v3646_v58  ;;  %v4530_v7 = vadd.f32 %v4514_v0, %v4434_v29  ;;  %v16823_v58 = vld [vmem:[#allocation75_spill] sm:$0xff] }
 0x357   : > { %v1501_v46 = vadd.f32 %v1485_v3, %v1437_v14  ;;  %v1562_v32 = vmul.f32 0.6931472, %v6211_v53  ;;  %v2567_v37 = vmul.f32 %v12664_v22, %v12581_v30  ;;  %v1795_v36 = vsub.f32 %v12653_v59, %v12558_v9  ;;  %v16821_v30 = vld [vmem:[#allocation15_spill] sm:$0xff]  ;;  %v16825_v53 = vld [vmem:[#allocation116_spill] sm:$0xff] }
 0x358   : > { %v2868_v55 = vadd.f32 %v2852_v28, %v1914_v6  ;;  %6224 = vrcp.f32 %v12648_v35  ;;  %v12671_v8 = vpop.eup %6214  ;;  %v3774_v2 = vsel %vm3758_vm4, %v3742_v1, 0.0  ;;  %v4600_v33 = vadd.f32 %v4584_v47, %v4530_v7 }
 0x359   : > { %v1581_v21 = vmul.f32 %v1562_v32, %v12554_v20  ;;  %6226 = vrcp.f32 %v12657_v48  ;;  %v12680_v3 = vmul.f32 %v12586_v42, %v16782_v63  ;;  %vm16822_vm14 = vnez %v16821_v30  ;;  %v16827_v30 = vld [vmem:[#allocation45_spill] sm:$0xff] }
 0x35a   : > { %v3790_v9 = vsel %vm16822_vm14, %v3774_v2, 0.0  ;;  %v1683_v15 = vsub.f32 %v8811_v4, %v16697_v41  ;;  %6228 = vlog2.f32 %v2567_v37  ;;  %v12686_v6 = vpop.eup %6216  ;;  %v4696_v19 = vadd.f32 %v4680_v26, %v4600_v33  ;;  %v16826_v37 = vld [vmem:[#allocation46_spill] sm:$0xff] }
 0x35b   : > { %v3806_v11 = vmul.f32 0.5, %v3790_v9  ;;  %v1597_v52 = vadd.f32 %v1581_v21, %v1501_v46  ;;  %v1651_v20 = vmul.f32 %v1635_v56, %v12569_v13  ;;  %v3283_v29 = vsub.f32 %v12506_v51, %v16170_v12 }
 0x35c   : > { %vm4712_vm2 = vcmp.lt.f32.partialorder %v16734_v49, %v12405_v31  ;;  %v2439_v63 = vmul.f32 %v12671_v8, %v12671_v8  ;;  %v1811_v17 = vmul.f32 2.0, %v1795_v36  ;;  %v12695_v23 = vpop.eup %6218  ;;  %v12698_v41 = vmul.f32 0.25, %v12506_v51 }
 0x35d   : > { %v3822_v57 = vadd.f32 %v3806_v11, %v2868_v55  ;;  %v4728_v14 = vsel %vm4712_vm2, %v4696_v19, 0.0  ;;  %v1667_v25 = vadd.f32 %v1651_v20, %v1597_v52  ;;  %v4237_v13 = vsub.f32 %v12680_v3, %v16197_v44  ;;  %v16829_v52 = vld [vmem:[#allocation201_spill] sm:$0xff] }
 0x35e   : > { %v12700_v62 = vpop.eup %6220  ;;  %vm16824_vm11 = vnez %v16823_v58  ;;  %v2455_v31 = vmul.f32 %v12664_v22, %v12664_v22  ;;  %v3521_v0 = vmul.f32 %v12686_v6, %v12603_v61  ;;  %vm1699_vm7 = vcmp.lt.f32.partialorder %v16772_v16, %v1683_v15  ;;  %v16828_v15 = vld [vmem:[#allocation120_spill] sm:$0xff] }
 0x35f   : > { %v4744_v49 = vsel %vm16824_vm11, %v4728_v14, 0.0  ;;  %vm1859_vm15 = vcmp.lt.f32.partialorder %v16772_v16, %v12423_v45  ;;  %v2551_v28 = vmul.f32 0.5, %v16825_v53  ;;  %v2717_v26 = vsub.f32 %v8839_v60, %v16806_v18  ;;  %v16833_v14 = vld [vmem:[#allocation82_spill] sm:$0xff] }
 0x360   : > { %v4760_v5 = vmul.f32 0.5, %v4744_v49  ;;  %v2503_v47 = vsub.f32 %v2455_v31, %v2439_v63  ;;  %6230 = vlog2.f32 %v3521_v0  ;;  %v1827_v56 = vsel %vm1699_vm7, %v1811_v17, 0.0  ;;  %v12716_v1 = vpop.eup %6222 }
 0x361   : > { %v3393_v61 = vmul.f32 %v12695_v23, %v12695_v23  ;;  %v4475_v46 = vmul.f32 %v12700_v62, %v12631_v50  ;;  %v1843_v32 = vadd.f32 %v1827_v56, %v1667_v25  ;;  %v2653_v55 = vmul.f32 %v16825_v53, %v16795_v38 }
 0x362   : > { %v4776_v7 = vadd.f32 %v4760_v5, %v3822_v57  ;;  %v12725_v36 = vmul.f32 0.5, %v16826_v37  ;;  %v3607_v18 = vmul.f32 %v16826_v37, %v16799_v54  ;;  %v3671_v2 = vsub.f32 %v16170_v12, %v16809_v43  ;;  %v16834_v5 = vld [vmem:[#allocation125_spill] sm:$0xff] }
 0x363   : > { %v2669_v33 = vsub.f32 %v2439_v63, %v2455_v31  ;;  %v3409_v21 = vmul.f32 %v12686_v6, %v12686_v6  ;;  %6232 = vlog2.f32 %v4475_v46  ;;  %v1875_v50 = vsel %vm1859_vm15, %v1843_v32, 0.0  ;;  %v16835_v46 = vld [vmem:[#allocation57_spill] sm:$0xff]  ;;  %v16844_v63 = vld [vmem:[#allocation130_spill] sm:$0xff] }
 0x364   : > { %4792 = vst [vmem:[#allocation2 + $0x18] sm:$0xff] %v4776_v7  ;;  %v2519_v9 = vmul.f32 %v2503_v47, %v16827_v30  ;;  %v12738_v11 = vmul.f32 0.5, %v16828_v15  ;;  %v4561_v19 = vmul.f32 %v16828_v15, %v16802_v10  ;;  %vm16830_vm3 = vnez %v16829_v52 }
 0x365   : > { %v1891_v43 = vsel %vm16830_vm3, %v1875_v50, 0.0  ;;  %v12744_v20 = vpop.eup %6224  ;;  %vm12747_vm10 = vcmp.lt.f32.partialorder %v16772_v16, %v2717_v26  ;;  %v3457_v45 = vsub.f32 %v3409_v21, %v3393_v61  ;;  %v4347_v17 = vmul.f32 %v12716_v1, %v12716_v1 }
 0x366   : > { %v4625_v57 = vsub.f32 %v16197_v44, %v12037_v27  ;;  %v12756_v25 = vmul.f32 0.5, %v16833_v14  ;;  %v12758_v58 = vpop.eup %6226  ;;  %v2471_v49 = vsub.f32 %v12671_v8, %v12664_v22  ;;  %v2749_v31 = vsub.f32 %v12653_v59, %v12671_v8  ;;  %v16852_v27 = vld [vmem:[#allocation157_spill] sm:$0xff] }
 0x367   : > { %v1526_v0 = vmul.f32 %v12744_v20, %v12657_v48  ;;  %v12768_v53 = vadd.f32 %v8839_v60, %v16834_v5  ;;  %v6229_v47 = vpop.eup %6228  ;;  %v2685_v26 = vmul.f32 %v2669_v33, %v2653_v55  ;;  %v3425_v56 = vsub.f32 %v12695_v23, %v12686_v6  ;;  %v16836_v48 = vld [vmem:[#allocation223_spill] sm:$0xff] }
 0x368   : > { %v4363_v7 = vmul.f32 %v12700_v62, %v12700_v62  ;;  %v12776_v22 = vmax.f32 %v16820_v40, %v16835_v46  ;;  %v2535_v8 = vadd.f32 %v2519_v9, %v2471_v49  ;;  %v2596_v32 = vmul.f32 0.6931472, %v6229_v47 }
 0x369   : > { %v3623_v37 = vsub.f32 %v3393_v61, %v3409_v21  ;;  %6234 = vlog2.f32 %v1526_v0  ;;  %vm2813_vm13 = vcmp.lt.f32.partialorder %v16772_v16, %v12573_v34  ;;  %v3473_v50 = vmul.f32 %v3457_v45, %v16836_v48 }
 0x36a   : > { %v4411_v55 = vsub.f32 %v4363_v7, %v4347_v17  ;;  %v4577_v33 = vsub.f32 %v4347_v17, %v4363_v7  ;;  %v12783_v6 = vmul.f32 %v12758_v58, %v12758_v58  ;;  %v2615_v30 = vmul.f32 %v2596_v32, %v2551_v28  ;;  %v16839_v28 = vld [vmem:[#allocation128_spill] sm:$0xff] }
 0x36b   : > { %v4379_v15 = vsub.f32 %v12716_v1, %v12700_v62  ;;  %v2765_v52 = vmul.f32 2.0, %v2749_v31  ;;  %v3703_v61 = vsub.f32 %v12653_v59, %v12695_v23  ;;  %vm12790_vm5 = vcmp.lt.f32.partialorder %v16772_v16, %v3671_v2  ;;  %v16840_v2 = vld [vmem:[#allocation62_spill] sm:$0xff] }
 0x36c   : > { %v4657_v9 = vsub.f32 %v12653_v59, %v12716_v1  ;;  %v12798_v45 = vmul.f32 %v12744_v20, %v12744_v20  ;;  %6236 = vrcp.f32 %v12768_v53  ;;  %v12803_v62 = vadd.f32 %v16170_v12, %v16839_v28  ;;  %v16841_v1 = vld [vmem:[#allocation160_spill] sm:$0xff] }
 0x36d   : > { %v2631_v17 = vadd.f32 %v2615_v30, %v2535_v8  ;;  %v3639_v23 = vmul.f32 %v3623_v37, %v3607_v18  ;;  %6238 = vrcp.f32 %v12776_v22  ;;  %v12808_v49 = vmax.f32 %v16820_v40, %v16840_v2  ;;  %v6231_v31 = vpop.eup %6230  ;;  %v374_v8 = vld [vmem:[#allocation2 + $0x60] sm:$0xff]  ;;  %v16842_v37 = vld [vmem:[#allocation185_spill] sm:$0xff] }
 0x36e   : > { %v3489_v59 = vadd.f32 %v3473_v50, %v3425_v56  ;;  %v4427_v0 = vmul.f32 %v4411_v55, %v16841_v1  ;;  %v4593_v47 = vmul.f32 %v4577_v33, %v4561_v19  ;;  %v1462_v7 = vsub.f32 %v12798_v45, %v12783_v6  ;;  %v16843_v56 = vld [vmem:[#allocation139_spill] sm:$0xff] }
 0x36f   : > { %v2701_v46 = vadd.f32 %v2685_v26, %v2631_v17  ;;  %v3550_v32 = vmul.f32 0.6931472, %v6231_v31  ;;  %v1907_v48 = vmul.f32 0.5, %v1891_v43  ;;  %v2781_v18 = vsel %vm12747_vm10, %v2765_v52, 0.0  ;;  %v12823_v43 = vpop.permute.xlu1 %1730  ;;  %v16846_v31 = vld [vmem:[#allocation133_spill] sm:$0xff] }
 0x370   : > { %vm3767_vm12 = vcmp.lt.f32.partialorder %v16772_v16, %v16842_v37  ;;  %v3719_v30 = vmul.f32 2.0, %v3703_v61  ;;  %v4673_v2 = vmul.f32 2.0, %v4657_v9  ;;  %6240 = vrcp.f32 %v12803_v62  ;;  %v6233_v50 = vpop.eup %6232  ;;  %v16845_v9 = vld [vmem:[#allocation24_spill] sm:$0xff] }
 0x371   : > { %v12820_v19 = vmax.f32 %v16820_v40, %v16843_v56  ;;  %v3569_v26 = vmul.f32 %v3550_v32, %v12725_v36  ;;  %v2797_v55 = vadd.f32 %v2781_v18, %v2701_v46  ;;  %6242 = vrcp.f32 %v12808_v49 }
 0x372   : > { %v12828_v33 = vadd.f32 %v16197_v44, %v16844_v63  ;;  %v4443_v52 = vadd.f32 %v4427_v0, %v4379_v15  ;;  %v4504_v61 = vmul.f32 0.6931472, %v6233_v50  ;;  %v1478_v17 = vmul.f32 %v1462_v7, %v16845_v9  ;;  %v16847_v0 = vld [vmem:[#allocation36_spill] sm:$0xff] }
 0x373   : > { %v12833_v1 = vadd.f32 %v8811_v4, %v16846_v31  ;;  %v3585_v56 = vadd.f32 %v3569_v26, %v3489_v59  ;;  %vm4721_vm4 = vcmp.lt.f32.partialorder %v16772_v16, %v12621_v39  ;;  %v1923_v36 = vadd.f32 %v1907_v48, %v374_v8  ;;  %v16850_v9 = vld [vmem:[#allocation140_spill] sm:$0xff] }
 0x374   : > { %v2829_v46 = vsel %vm2813_vm13, %v2797_v55, 0.0  ;;  %v1430_v32 = vsub.f32 %v12758_v58, %v12744_v20  ;;  %v4523_v15 = vmul.f32 %v4504_v61, %v12738_v11  ;;  %vm16848_vm6 = vnez %v16847_v0  ;;  %v16849_v61 = vld [vmem:[#allocation228_spill] sm:$0xff] }
 0x375   : > { %v2845_v7 = vsel %vm16848_vm6, %v2829_v46, 0.0  ;;  %v1788_v18 = vsub.f32 %v12823_v43, %v12758_v58  ;;  %6244 = vrcp.f32 %v12820_v19  ;;  %v3655_v59 = vadd.f32 %v3639_v23, %v3585_v56 }
 0x376   : > { %v2861_v50 = vmul.f32 0.5, %v2845_v7  ;;  %v3735_v48 = vsel %vm12790_vm5, %v3719_v30, 0.0  ;;  %6246 = vrcp.f32 %v12828_v33  ;;  %v6235_v34 = vpop.eup %6234  ;;  %v4539_v8 = vadd.f32 %v4523_v15, %v4443_v52 }
 0x377   : > { %v1494_v20 = vadd.f32 %v1478_v17, %v1430_v32  ;;  %v1628_v11 = vsub.f32 %v12783_v6, %v12798_v45  ;;  %6248 = vrcp.f32 %v12833_v1  ;;  %v3751_v55 = vadd.f32 %v3735_v48, %v3655_v59  ;;  %v16856_v59 = vld [vmem:[#allocation136_spill] sm:$0xff] }
 0x378   : > { %v2877_v26 = vadd.f32 %v2861_v50, %v1923_v36  ;;  %v1548_v58 = vmul.f32 0.6931472, %v6235_v34  ;;  %v12856_v23 = vmax.f32 %v16850_v9, %v16849_v61  ;;  %v4609_v56 = vadd.f32 %v4593_v47, %v4539_v8  ;;  %v16851_v36 = vld [vmem:[#allocation54_spill] sm:$0xff] }
 0x379   : > { %vm4641_vm14 = vcmp.lt.f32.partialorder %v16772_v16, %v4625_v57  ;;  %v1676_v21 = vsub.f32 %v8811_v4, %v16816_v24  ;;  %v1804_v30 = vmul.f32 2.0, %v1788_v18  ;;  %v12864_v6 = vpop.eup %6236  ;;  %v3783_v45 = vsel %vm3767_vm12, %v3751_v55, 0.0 }
 0x37a   : > { %v4689_v52 = vsel %vm4641_vm14, %v4673_v2, 0.0  ;;  %v1574_v17 = vmul.f32 %v1548_v58, %v12756_v25  ;;  %v1612_v47 = vmul.f32 %v16833_v14, %v16851_v36  ;;  %v12872_v46 = vpop.eup %6238  ;;  %vm16853_vm2 = vnez %v16852_v27  ;;  %v16864_v27 = vld [vmem:[#allocation121_spill] sm:$0xff] }
 0x37b   : > { %v3799_v57 = vsel %vm16853_vm2, %v3783_v45, 0.0  ;;  %v4705_v32 = vadd.f32 %v4689_v52, %v4609_v56  ;;  %vm12877_vm11 = vcmp.lt.f32.partialorder %v16820_v40, %v1676_v21  ;;  %v2560_v37 = vmul.f32 %v12864_v6, %v12776_v22 }
 0x37c   : > { %v3815_v2 = vmul.f32 0.5, %v3799_v57  ;;  %v1590_v15 = vadd.f32 %v1574_v17, %v1494_v20  ;;  %v1644_v25 = vmul.f32 %v1628_v11, %v1612_v47  ;;  %6250 = vrcp.f32 %v12856_v23  ;;  %v16860_v17 = vld [vmem:[#allocation77_spill] sm:$0xff] }
 0x37d   : > { %v12887_v14 = vand.u32 2147483647, %v3283_v29  ;;  %v4737_v0 = vsel %vm4721_vm4, %v4705_v32, 0.0  ;;  %v1820_v7 = vsel %vm12877_vm11, %v1804_v30, 0.0  ;;  %6252 = vlog2.f32 %v2560_v37  ;;  %v12894_v18 = vpop.eup %6240 }
 0x37e   : > { %v3831_v22 = vadd.f32 %v3815_v2, %v2877_v26  ;;  %vm16857_vm7 = vnez %v16856_v59  ;;  %v1660_v48 = vadd.f32 %v1644_v25, %v1590_v15  ;;  %v12900_v34 = vmul.f32 %v12872_v46, %v12872_v46  ;;  %v12902_v29 = vpop.eup %6242  ;;  %v16859_v26 = vld [vmem:[#allocation118_spill] sm:$0xff]  ;;  %v16865_v15 = vld [vmem:[#allocation52_spill] sm:$0xff] }
 0x37f   : > { %v4753_v50 = vsel %vm16857_vm7, %v4737_v0, 0.0  ;;  %v12907_v16 = vand.u32 2147483647, %v4237_v13  ;;  %v12910_v39 = vmul.f32 0.25, %v12680_v3  ;;  %vm1852_vm15 = vcmp.lt.f32.partialorder %v16820_v40, %v12648_v35 }
 0x380   : > { %v4769_v8 = vmul.f32 0.5, %v4753_v50  ;;  %v1836_v20 = vadd.f32 %v1820_v7, %v1660_v48  ;;  %v12916_v11 = vmul.f32 %v12864_v6, %v12864_v6  ;;  %v2544_v55 = vmul.f32 0.5, %v16859_v26  ;;  %v16866_v50 = vld [vmem:[#allocation39_spill] sm:$0xff] }
 0x381   : > { %16858 = vst [vmem:[#allocation21_spill] sm:$0xff] %v12910_v39  ;;  %v3514_v58 = vmul.f32 %v12894_v18, %v12808_v49  ;;  %v12923_v13 = vmul.f32 %v16859_v26, %v16795_v38  ;;  %v2710_v56 = vsub.f32 %v8839_v60, %v16834_v5  ;;  %v2742_v35 = vsub.f32 %v12823_v43, %v12872_v46 }
 0x382   : > { %v4785_v61 = vadd.f32 %v4769_v8, %v3831_v22  ;;  %v12929_v21 = vpop.eup %6244  ;;  %v1868_v30 = vsel %vm1852_vm15, %v1836_v20, 0.0  ;;  %v2496_v45 = vsub.f32 %v12916_v11, %v12900_v34  ;;  %v12935_v49 = vmul.f32 %v12902_v29, %v12902_v29  ;;  %v16867_v8 = vld [vmem:[#allocation134_spill] sm:$0xff] }
 0x383   : > { %6254 = vlog2.f32 %v3514_v58  ;;  %v12937_v52 = vpop.eup %6246  ;;  %vm16861_vm3 = vnez %v16860_v17  ;;  %vm12942_vm10 = vcmp.lt.f32.partialorder %v16820_v40, %v2710_v56  ;;  %v12947_v57 = vmul.f32 0.5, %v16864_v27  ;;  %v16870_v17 = vld [vmem:[#allocation176_spill] sm:$0xff] }
 0x384   : > { %4801 = vst [vmem:[#allocation2 + $0x60] sm:$0xff] %v4785_v61  ;;  %v1884_v5 = vsel %vm16861_vm3, %v1868_v30, 0.0  ;;  %v3600_v32 = vmul.f32 %v16864_v27, %v16799_v54  ;;  %v12951_v24 = vpop.eup %6248  ;;  %v3402_v37 = vmul.f32 %v12894_v18, %v12894_v18  ;;  %v3664_v2 = vsub.f32 %v16170_v12, %v16839_v28  ;;  %v16868_v61 = vld [vmem:[#allocation225_spill] sm:$0xff] }
 0x385   : > { %v12958_v25 = vmul.f32 0.5, %v16865_v15  ;;  %v4468_v0 = vmul.f32 %v12937_v52, %v12820_v19  ;;  %v12962_v7 = vmul.f32 2.0, %v2742_v35  ;;  %v4554_v22 = vmul.f32 %v16865_v15, %v16802_v10 }
 0x386   : > { %v4618_v59 = vsub.f32 %v16197_v44, %v16844_v63  ;;  %v12969_v48 = vmul.f32 0.5, %v16866_v50  ;;  %v2512_v20 = vmul.f32 %v2496_v45, %v16867_v8  ;;  %v3450_v28 = vsub.f32 %v3402_v37, %v12935_v49 }
 0x387   : > { %v3696_v26 = vsub.f32 %v12823_v43, %v12902_v29  ;;  %6256 = vlog2.f32 %v4468_v0  ;;  %v4340_v19 = vmul.f32 %v12929_v21, %v12929_v21  ;;  %v1535_v58 = vmul.f32 %v12951_v24, %v12856_v23 }
 0x388   : > { %v12981_v63 = vmul.f32 %v16866_v50, %v16851_v36  ;;  %v12985_v56 = vadd.f32 %v8839_v60, %v16868_v61  ;;  %v2464_v35 = vsub.f32 %v12872_v46, %v12864_v6  ;;  %v2662_v30 = vsub.f32 %v12900_v34, %v12916_v11  ;;  %v16873_v50 = vld [vmem:[#allocation135_spill] sm:$0xff] }
 0x389   : > { %v12995_v23 = vmax.f32 %v16850_v9, %v16870_v17  ;;  %v12997_v27 = vpop.eup %6250  ;;  %v2774_v15 = vsel %vm12942_vm10, %v12962_v7, 0.0  ;;  %v3418_v0 = vsub.f32 %v12902_v29, %v12894_v18  ;;  %vm13005_vm13 = vcmp.lt.f32.partialorder %v16820_v40, %v3664_v2  ;;  %v13088_v2 = vpop.permute.xlu0 %1775 }
 0x38a   : > { %16869 = vst [vmem:[#allocation192_spill] sm:$0xff] %v12985_v56  ;;  %v4356_v46 = vmul.f32 %v12937_v52, %v12937_v52  ;;  %6258 = vlog2.f32 %v1535_v58  ;;  %v6253_v34 = vpop.eup %6252  ;;  %v2528_v11 = vadd.f32 %v2512_v20, %v2464_v35  ;;  %v3466_v8 = vmul.f32 %v3450_v28, %v16873_v50 }
 0x38b   : > { %v3616_v17 = vsub.f32 %v12935_v49, %v3402_v37  ;;  %v13013_v47 = vmul.f32 2.0, %v3696_v26  ;;  %v2582_v7 = vmul.f32 0.6931472, %v6253_v34  ;;  %6260 = vrcp.f32 %v12985_v56 }
 0x38c   : > { %v4404_v45 = vsub.f32 %v4356_v46, %v4340_v19  ;;  %v13018_v18 = vadd.f32 %v16170_v12, %v12506_v51  ;;  %v1900_v29 = vmul.f32 0.5, %v1884_v5  ;;  %vm2806_vm5 = vcmp.lt.f32.partialorder %v16820_v40, %v12768_v53 }
 0x38d   : > { %vm13023_vm12 = vcmp.lt.f32.partialorder %v16820_v40, %v4618_v59  ;;  %v1407_v49 = vmul.f32 %v12997_v27, %v12997_v27  ;;  %6262 = vrcp.f32 %v12995_v23  ;;  %v13032_v37 = vmax.f32 %v16850_v9, %v12887_v14 }
 0x38e   : > { %16874 = vst [vmem:[#allocation88_spill] sm:$0xff] %v13018_v18  ;;  %v2608_v20 = vmul.f32 %v2582_v7, %v2544_v55  ;;  %v4570_v28 = vsub.f32 %v4340_v19, %v4356_v46  ;;  %v4650_v5 = vsub.f32 %v12823_v43, %v12929_v21  ;;  %6264 = vrcp.f32 %v13018_v18  ;;  %v367_v19 = vld [vmem:[#allocation2 + $0x68] sm:$0xff]  ;;  %v16877_v46 = vld [vmem:[#allocation137_spill] sm:$0xff] }
 0x38f   : > { %v1423_v59 = vmul.f32 %v12951_v24, %v12951_v24  ;;  %6266 = vrcp.f32 %v13032_v37  ;;  %v13042_v26 = vadd.f32 %v16197_v44, %v12680_v3  ;;  %v13046_v14 = vmax.f32 %v16850_v9, %v12907_v16 }
 0x390   : > { %v6255_v55 = vpop.eup %6254  ;;  %v2624_v58 = vadd.f32 %v2608_v20, %v2528_v11  ;;  %v2678_v43 = vmul.f32 %v2662_v30, %v12923_v13  ;;  %v3632_v35 = vmul.f32 %v3616_v17, %v3600_v32  ;;  %v4420_v34 = vmul.f32 %v4404_v45, %v16877_v46  ;;  %v16878_v20 = vld [vmem:[#allocation173_spill] sm:$0xff]  ;;  %v16885_v46 = vld [vmem:[#allocation162_spill] sm:$0xff] }
 0x391   : > { %v3482_v50 = vadd.f32 %v3466_v8, %v3418_v0  ;;  %v3536_v7 = vmul.f32 0.6931472, %v6255_v55  ;;  %v1471_v18 = vsub.f32 %v1423_v59, %v1407_v49  ;;  %6268 = vrcp.f32 %v13046_v14  ;;  %v16879_v55 = vld [vmem:[#allocation25_spill] sm:$0xff] }
 0x392   : > { %v2694_v56 = vadd.f32 %v2678_v43, %v2624_v58  ;;  %vm3760_vm4 = vcmp.lt.f32.partialorder %v16820_v40, %v12803_v62  ;;  %v4372_v16 = vsub.f32 %v12929_v21, %v12937_v52  ;;  %v4666_v39 = vmul.f32 2.0, %v4650_v5 }
 0x393   : > { %6270 = vrcp.f32 %v13042_v26  ;;  %v1916_v11 = vadd.f32 %v1900_v29, %v367_v19  ;;  %v3562_v13 = vmul.f32 %v3536_v7, %v12947_v57  ;;  %v3728_v32 = vsel %vm13005_vm13, %v13013_v47, 0.0  ;;  %v16880_v29 = vld [vmem:[#allocation187_spill] sm:$0xff] }
 0x394   : > { %v4586_v30 = vmul.f32 %v4570_v28, %v4554_v22  ;;  %v6257_v45 = vpop.eup %6256  ;;  %v2790_v0 = vadd.f32 %v2774_v15, %v2694_v56  ;;  %v4436_v8 = vadd.f32 %v4420_v34, %v4372_v16  ;;  %v1439_v17 = vsub.f32 %v12997_v27, %v12951_v24  ;;  %v16881_v24 = vld [vmem:[#allocation127_spill] sm:$0xff] }
 0x395   : > { %v13064_v21 = vmax.f32 %v16879_v55, %v16878_v20  ;;  %v3578_v52 = vadd.f32 %v3562_v13, %v3482_v50  ;;  %v4490_v5 = vmul.f32 0.6931472, %v6257_v45  ;;  %v1487_v19 = vmul.f32 %v1471_v18, %v16880_v29  ;;  %v16882_v15 = vld [vmem:[#allocation155_spill] sm:$0xff]  ;;  %v16883_v18 = vld [vmem:[#allocation56_spill] sm:$0xff] }
 0x396   : > { %v1637_v57 = vsub.f32 %v1407_v49, %v1423_v59  ;;  %v2822_v6 = vsel %vm2806_vm5, %v2790_v0, 0.0  ;;  %v4682_v22 = vsel %vm13023_vm12, %v4666_v39, 0.0  ;;  %vm4714_vm6 = vcmp.lt.f32.partialorder %v16820_v40, %v12828_v33  ;;  %v16895_v45 = vld [vmem:[#allocation55_spill] sm:$0xff] }
 0x397   : > { %v13075_v56 = vmul.f32 0.5, %v16881_v24  ;;  %v13079_v47 = vadd.f32 %v8811_v4, %v16882_v15  ;;  %v6259_v28 = vpop.eup %6258  ;;  %vm16884_vm14 = vnez %v16883_v18  ;;  %v3648_v59 = vadd.f32 %v3632_v35, %v3578_v52 }
 0x398   : > { %v2838_v49 = vsel %vm16884_vm14, %v2822_v6, 0.0  ;;  %v4516_v53 = vmul.f32 %v4490_v5, %v12958_v25  ;;  %v13086_v39 = vmul.f32 %v16881_v24, %v16795_v38  ;;  %v1566_v43 = vmul.f32 0.6931472, %v6259_v28  ;;  %v13095_v50 = vpop.eup %6260 }
 0x399   : > { %v2854_v58 = vmul.f32 0.5, %v2838_v49  ;;  %6272 = vrcp.f32 %v13064_v21  ;;  %v13093_v34 = vadd.f32 %v8839_v60, %v16885_v46  ;;  %v3744_v7 = vadd.f32 %v3728_v32, %v3648_v59 }
 0x39a   : > { %v4532_v35 = vadd.f32 %v4516_v53, %v4436_v8  ;;  %v1503_v16 = vadd.f32 %v1487_v19, %v1439_v17  ;;  %v1653_v25 = vmul.f32 %v1637_v57, %v12981_v63  ;;  %v16886_v13 = vsub.f32 %v8811_v4, %v16846_v31  ;;  %v13106_v0 = vpop.eup %6262  ;;  %v16891_v19 = vld [vmem:[#allocation84_spill] sm:$0xff] }
 0x39b   : > { %v2870_v20 = vadd.f32 %v2854_v58, %v1916_v11  ;;  %v1583_v52 = vmul.f32 %v1566_v43, %v12969_v48  ;;  %v1797_v32 = vsub.f32 %v13088_v2, %v12997_v27  ;;  %6274 = vrcp.f32 %v13079_v47  ;;  %v13112_v8 = vpop.eup %6264  ;;  %v16889_v48 = vld [vmem:[#allocation79_spill] sm:$0xff]  ;;  %v16892_v43 = vld [vmem:[#allocation80_spill] sm:$0xff] }
 0x39c   : > { %vm13102_vm2 = vcmp.lt.f32.partialorder %v16850_v9, %v16886_v13  ;;  %v3776_v31 = vsel %vm3760_vm4, %v3744_v7, 0.0  ;;  %v4602_v63 = vadd.f32 %v4586_v30, %v4532_v35  ;;  %v2569_v17 = vmul.f32 %v13095_v50, %v12995_v23  ;;  %v13121_v5 = vpop.eup %6266 }
 0x39d   : > { %v2719_v11 = vsub.f32 %v8839_v60, %v16868_v61  ;;  %vm16890_vm11 = vnez %v16889_v48  ;;  %v1599_v29 = vadd.f32 %v1583_v52, %v1503_v16  ;;  %vm1861_vm7 = vcmp.lt.f32.partialorder %v16850_v9, %v12833_v1 }
 0x39e   : > { %v3792_v27 = vsel %vm16890_vm11, %v3776_v31, 0.0  ;;  %v13128_v57 = vmul.f32 0.5, %v16891_v19  ;;  %6276 = vrcp.f32 %v13093_v34  ;;  %v4698_v30 = vadd.f32 %v4682_v22, %v4602_v63  ;;  %v13133_v61 = vpop.eup %6268 }
 0x39f   : > { %v3808_v62 = vmul.f32 0.5, %v3792_v27  ;;  %v2441_v23 = vmul.f32 %v13106_v0, %v13106_v0  ;;  %6278 = vlog2.f32 %v2569_v17  ;;  %v2457_v6 = vmul.f32 %v13095_v50, %v13095_v50  ;;  %v16894_v27 = vld [vmem:[#allocation148_spill] sm:$0xff] }
 0x3a0   : > { %v3395_v24 = vmul.f32 %v13121_v5, %v13121_v5  ;;  %v3609_v28 = vmul.f32 %v16891_v19, %v16799_v54  ;;  %v1813_v18 = vmul.f32 2.0, %v1797_v32  ;;  %v13141_v49 = vpop.eup %6270  ;;  %v4730_v22 = vsel %vm4714_vm6, %v4698_v30, 0.0 }
 0x3a1   : > { %v3824_v59 = vadd.f32 %v3808_v62, %v2870_v20  ;;  %v1669_v53 = vadd.f32 %v1653_v25, %v1599_v29  ;;  %v3523_v58 = vmul.f32 %v13112_v8, %v13032_v37  ;;  %vm16893_vm15 = vnez %v16892_v43 }
 0x3a2   : > { %v4746_v7 = vsel %vm16893_vm15, %v4730_v22, 0.0  ;;  %v3673_v35 = vsub.f32 %v16170_v12, %v12506_v51  ;;  %v13153_v16 = vmul.f32 0.5, %v12586_v42  ;;  %v4627_v13 = vsub.f32 %v16197_v44, %v12680_v3 }
 0x3a3   : > { %v4762_v20 = vmul.f32 0.5, %v4746_v7  ;;  %v2505_v52 = vsub.f32 %v2457_v6, %v2441_v23  ;;  %v3411_v40 = vmul.f32 %v13112_v8, %v13112_v8  ;;  %6280 = vlog2.f32 %v3523_v58  ;;  %v16910_v7 = vld [vmem:[#allocation168_spill] sm:$0xff] }
 0x3a4   : > { %v4349_v33 = vmul.f32 %v13133_v61, %v13133_v61  ;;  %v4477_v37 = vmul.f32 %v13141_v49, %v13046_v14  ;;  %v1829_v51 = vsel %vm13102_vm2, %v1813_v18, 0.0  ;;  %v2751_v25 = vsub.f32 %v13088_v2, %v13106_v0 }
 0x3a5   : > { %v4778_v32 = vadd.f32 %v4762_v20, %v3824_v59  ;;  %v2671_v3 = vsub.f32 %v2441_v23, %v2457_v6  ;;  %v3459_v31 = vsub.f32 %v3411_v40, %v3395_v24  ;;  %v1845_v63 = vadd.f32 %v1829_v51, %v1669_v53  ;;  %v16898_v6 = vld [vmem:[#allocation178_spill] sm:$0xff] }
 0x3a6   : > { %v4365_v17 = vmul.f32 %v13141_v49, %v13141_v49  ;;  %6282 = vlog2.f32 %v4477_v37  ;;  %v4563_v48 = vmul.f32 %v12586_v42, %v16802_v10  ;;  %v13172_v29 = vmul.f32 0.5, %v16894_v27  ;;  %v13174_v14 = vpop.eup %6272 }
 0x3a7   : > { %4794 = vst [vmem:[#allocation2 + $0x68] sm:$0xff] %v4778_v32  ;;  %v2521_v19 = vmul.f32 %v2505_v52, %v16895_v45  ;;  %vm13178_vm3 = vcmp.lt.f32.partialorder %v16850_v9, %v2719_v11  ;;  %v3625_v30 = vsub.f32 %v3395_v24, %v3411_v40  ;;  %v1877_v23 = vsel %vm1861_vm7, %v1845_v63, 0.0  ;;  %v16905_v45 = vld [vmem:[#allocation192_spill] sm:$0xff] }
 0x3a8   : > { %v2354_v42 = vmax.f32 %v16879_v55, %v16898_v6  ;;  %v4413_v18 = vsub.f32 %v4365_v17, %v4349_v33  ;;  %v1893_v22 = vsel %vm11166_vm0, %v1877_v23, 0.0  ;;  %v1614_v53 = vmul.f32 %v16894_v27, %v16851_v36  ;;  %v13193_v58 = vpop.eup %6274  ;;  %v16906_v6 = vld [vmem:[#allocation167_spill] sm:$0xff] }
 0x3a9   : > { %v1678_v11 = vsub.f32 %v8811_v4, %v16882_v15  ;;  %v2473_v24 = vsub.f32 %v13106_v0, %v13095_v50  ;;  %v2687_v1 = vmul.f32 %v2671_v3, %v13086_v39  ;;  %v3475_v43 = vmul.f32 %v3459_v31, %v12698_v41 }
 0x3aa   : > { %vm13200_vm10 = vcmp.lt.f32.partialorder %v16850_v9, %v3673_v35  ;;  %vm13205_vm0 = vcmp.lt.f32.partialorder %v16850_v9, %v4627_v13  ;;  %v2767_v52 = vmul.f32 2.0, %v2751_v25  ;;  %v3705_v40 = vsub.f32 %v13088_v2, %v13121_v5  ;;  %v16904_v25 = vld [vmem:[#allocation21_spill] sm:$0xff] }
 0x3ab   : > { %v4659_v50 = vsub.f32 %v13088_v2, %v13133_v61  ;;  %v1400_v41 = vmul.f32 %v13174_v14, %v13174_v14  ;;  %v1528_v39 = vmul.f32 %v13193_v58, %v13064_v21  ;;  %v13217_v0 = vpop.eup %6276  ;;  %v2537_v35 = vadd.f32 %v2521_v19, %v2473_v24  ;;  %v13231_v19 = vpop.permute.xlu1 %1740 }
 0x3ac   : > { %v3427_v13 = vsub.f32 %v13121_v5, %v13112_v8  ;;  %v3641_v37 = vmul.f32 %v3625_v30, %v3609_v28  ;;  %6284 = vrcp.f32 %v2354_v42  ;;  %v6279_v51 = vpop.eup %6278  ;;  %v4429_v32 = vmul.f32 %v4413_v18, %v16904_v25 }
 0x3ad   : > { %v4579_v3 = vsub.f32 %v4349_v33, %v4365_v17  ;;  %v1416_v2 = vmul.f32 %v13193_v58, %v13193_v58  ;;  %6286 = vlog2.f32 %v1528_v39  ;;  %v2600_v31 = vmul.f32 0.6931472, %v6279_v51  ;;  %v376_v17 = vld [vmem:[#allocation2 + $0x78] sm:$0xff] }
 0x3ae   : > { %v3491_v63 = vadd.f32 %v3475_v43, %v3427_v13  ;;  %v4381_v21 = vsub.f32 %v13133_v61, %v13141_v49  ;;  %v2562_v27 = vmul.f32 %v13217_v0, %v2354_v42  ;;  %vm2815_vm13 = vcmp.lt.f32.partialorder %v16850_v9, %v16905_v45 }
 0x3af   : > { %v1909_v8 = vmul.f32 0.5, %v1893_v22  ;;  %v3721_v5 = vmul.f32 2.0, %v3705_v40  ;;  %v13229_v28 = vmul.f32 2.0, %v4659_v50  ;;  %v1464_v33 = vsub.f32 %v1416_v2, %v1400_v41  ;;  %v16907_v22 = vld [vmem:[#allocation183_spill] sm:$0xff] }
 0x3b0   : > { %v2617_v30 = vmul.f32 %v2600_v31, %v13075_v56  ;;  %v1630_v23 = vsub.f32 %v1400_v41, %v1416_v2  ;;  %6288 = vlog2.f32 %v2562_v27  ;;  %v13236_v61 = vadd.f32 %v16170_v12, %v16906_v6  ;;  %v6281_v49 = vpop.eup %6280  ;;  %v16908_v41 = vld [vmem:[#allocation88_spill] sm:$0xff]  ;;  %v16913_v2 = vld [vmem:[#allocation186_spill] sm:$0xff] }
 0x3b1   : > { %v4445_v42 = vadd.f32 %v4429_v32, %v4381_v21  ;;  %v4595_v18 = vmul.f32 %v4579_v3, %v4563_v48  ;;  %v2783_v59 = vsel %vm13178_vm3, %v2767_v52, 0.0  ;;  %v13242_v24 = vmax.f32 %v16879_v55, %v16907_v22  ;;  %v16909_v52 = vld [vmem:[#allocation170_spill] sm:$0xff]  ;;  %v16914_v27 = vld [vmem:[#allocation152_spill] sm:$0xff] }
 0x3b2   : > { %v2633_v43 = vadd.f32 %v2617_v30, %v2537_v35  ;;  %v3554_v40 = vmul.f32 0.6931472, %v6281_v49  ;;  %v1432_v56 = vsub.f32 %v13174_v14, %v13193_v58  ;;  %v1790_v50 = vsub.f32 %v13231_v19, %v13174_v14  ;;  %v16918_v22 = vld [vmem:[#allocation196_spill] sm:$0xff] }
 0x3b3   : > { %vm3769_vm5 = vcmp.lt.f32.partialorder %v16850_v9, %v16908_v41  ;;  %v1925_v39 = vadd.f32 %v1909_v8, %v376_v17  ;;  %v3737_v48 = vsel %vm13200_vm10, %v3721_v5, 0.0  ;;  %v4691_v62 = vsel %vm13205_vm0, %v13229_v28, 0.0  ;;  %v6283_v13 = vpop.eup %6282  ;;  %v16915_v5 = vld [vmem:[#allocation16_spill] sm:$0xff]  ;;  %v16916_v28 = vld [vmem:[#allocation214_spill] sm:$0xff] }
 0x3b4   : > { %v1480_v35 = vmul.f32 %v1464_v33, %v16909_v52  ;;  %v2703_v51 = vadd.f32 %v2687_v1, %v2633_v43  ;;  %v3571_v58 = vmul.f32 %v3554_v40, %v13128_v57  ;;  %v1646_v25 = vmul.f32 %v1630_v23, %v1614_v53 }
 0x3b5   : > { %6290 = vrcp.f32 %v13236_v61  ;;  %v4508_v14 = vmul.f32 0.6931472, %v6283_v13  ;;  %v2450_v32 = vmul.f32 %v13217_v0, %v13217_v0  ;;  %v13263_v3 = vadd.f32 %v16197_v44, %v16910_v7 }
 0x3b6   : > { %6292 = vrcp.f32 %v13242_v24  ;;  %v3587_v20 = vadd.f32 %v3571_v58, %v3491_v63  ;;  %vm4723_vm12 = vcmp.lt.f32.partialorder %v16850_v9, %v13042_v26  ;;  %v2799_v1 = vadd.f32 %v2783_v59, %v2703_v51  ;;  %v16926_v9 = vld [vmem:[#allocation51_spill] sm:$0xff] }
 0x3b7   : > { %vm13271_vm4 = vcmp.lt.f32.partialorder %v16879_v55, %v1678_v11  ;;  %v1806_v53 = vmul.f32 2.0, %v1790_v50  ;;  %v13277_v31 = vmax.f32 %v16879_v55, %v16913_v2  ;;  %v4525_v21 = vmul.f32 %v4508_v14, %v13153_v16  ;;  %v16920_v2 = vld [vmem:[#allocation174_spill] sm:$0xff] }
 0x3b8   : > { %v1496_v63 = vadd.f32 %v1480_v35, %v1432_v56  ;;  %v2546_v8 = vmul.f32 0.5, %v16914_v27  ;;  %v13283_v33 = vmax.f32 %v16916_v28, %v16915_v5  ;;  %v3657_v15 = vadd.f32 %v3641_v37, %v3587_v20 }
 0x3b9   : > { %v2831_v11 = vsel %vm2815_vm13, %v2799_v1, 0.0  ;;  %v2648_v17 = vmul.f32 %v16914_v27, %v16795_v38  ;;  %v2712_v30 = vsub.f32 %v8839_v60, %v16885_v46  ;;  %v6285_v23 = vpop.eup %6284  ;;  %v4541_v16 = vadd.f32 %v4525_v21, %v4445_v42 }
 0x3ba   : > { %v2847_v59 = vsel %vm11215_vm8, %v2831_v11, 0.0  ;;  %6294 = vrcp.f32 %v13263_v3  ;;  %v13297_v37 = vadd.f32 %v8811_v4, %v16918_v22  ;;  %v6287_v43 = vpop.eup %6286  ;;  %v3753_v40 = vadd.f32 %v3737_v48, %v3657_v15 }
 0x3bb   : > { %v2863_v45 = vmul.f32 0.5, %v2847_v59  ;;  %v2434_v56 = vmul.f32 %v6285_v23, %v6285_v23  ;;  %6296 = vrcp.f32 %v13277_v31  ;;  %v4611_v50 = vadd.f32 %v4595_v18, %v4541_v16  ;;  %v16922_v59 = vld [vmem:[#allocation204_spill] sm:$0xff] }
 0x3bc   : > { %v1552_v52 = vmul.f32 0.6931472, %v6287_v43  ;;  %v2744_v46 = vsub.f32 %v13231_v19, %v6285_v23  ;;  %6298 = vrcp.f32 %v13283_v33  ;;  %v3785_v35 = vsel %vm3769_vm5, %v3753_v40, 0.0  ;;  %v16923_v43 = vld [vmem:[#allocation180_spill] sm:$0xff] }
 0x3bd   : > { %v2879_v42 = vadd.f32 %v2863_v45, %v1925_v39  ;;  %v2466_v13 = vsub.f32 %v6285_v23, %v13217_v0  ;;  %v2498_v51 = vsub.f32 %v2450_v32, %v2434_v56  ;;  %v6289_v58 = vpop.eup %6288  ;;  %v3801_v48 = vsel %vm11257_vm9, %v3785_v35, 0.0  ;;  %v16925_v45 = vld [vmem:[#allocation207_spill] sm:$0xff] }
 0x3be   : > { %v4707_v20 = vadd.f32 %v4691_v62, %v4611_v50  ;;  %v1576_v18 = vmul.f32 %v1552_v52, %v13172_v29  ;;  %6300 = vrcp.f32 %v13297_v37  ;;  %v3817_v1 = vmul.f32 0.5, %v3801_v48  ;;  %v16930_v52 = vld [vmem:[#allocation28_spill] sm:$0xff] }
 0x3bf   : > { %v2514_v21 = vmul.f32 %v2498_v51, %v16920_v2  ;;  %v2586_v39 = vmul.f32 0.6931472, %v6289_v58  ;;  %v2664_v27 = vsub.f32 %v2434_v56, %v2450_v32  ;;  %v1822_v5 = vsel %vm13271_vm4, %v1806_v53, 0.0  ;;  %v369_v2 = vld [vmem:[#allocation2 + $0x48] sm:$0xff] }
 0x3c0   : > { %v4739_v41 = vsel %vm4723_vm12, %v4707_v20, 0.0  ;;  %v1592_v0 = vadd.f32 %v1576_v18, %v1496_v63  ;;  %v2760_v15 = vmul.f32 2.0, %v2744_v46  ;;  %v3833_v11 = vadd.f32 %v3817_v1, %v2879_v42  ;;  %v16934_v18 = vld [vmem:[#allocation12_spill] sm:$0xff] }
 0x3c1   : > { %v4755_v29 = vsel %vm11298_vm1, %v4739_v41, 0.0  ;;  %v2530_v23 = vadd.f32 %v2514_v21, %v2466_v13  ;;  %v2610_v16 = vmul.f32 %v2586_v39, %v2546_v8  ;;  %v13322_v32 = vmul.f32 %v16923_v43, %v16922_v59  ;;  %v16931_v13 = vld [vmem:[#allocation117_spill] sm:$0xff]  ;;  %v16936_v21 = vld [vmem:[#allocation67_spill] sm:$0xff] }
 0x3c2   : > { %v13318_v49 = vpop.eup %6290  ;;  %v13326_v26 = vmul.f32 %v16926_v9, %v16925_v45  ;;  %v4771_v63 = vmul.f32 0.5, %v4755_v29  ;;  %v1662_v57 = vadd.f32 %v1646_v25, %v1592_v0  ;;  %v2680_v56 = vmul.f32 %v2664_v27, %v2648_v17  ;;  %v16939_v45 = vld [vmem:[#allocation19_spill] sm:$0xff] }
 0x3c3   : > { %16924 = vst [vmem:[#allocation63_spill] sm:$0xff] %v13322_v32  ;;  %v13328_v53 = vpop.eup %6292  ;;  %v2626_v40 = vadd.f32 %v2610_v16, %v2530_v23  ;;  %vm13331_vm8 = vcmp.lt.f32.partialorder %v16879_v55, %v2712_v30  ;;  %v3516_v8 = vmul.f32 %v13318_v49, %v13242_v24  ;;  %v1214_v46 = vsub.f32 %v16930_v52, %v8811_v4 }
 0x3c4   : > { %16927 = vst [vmem:[#allocation34_spill] sm:$0xff] %v13326_v26  ;;  %v4787_v42 = vadd.f32 %v4771_v63, %v3833_v11  ;;  %v1838_v35 = vadd.f32 %v1822_v5, %v1662_v57  ;;  %v2776_v25 = vsel %vm13331_vm8, %v2760_v15, 0.0  ;;  %v2328_v51 = vsub.f32 %v16931_v13, %v8839_v60 }
 0x3c5   : > { %vm1854_vm9 = vcmp.lt.f32.partialorder %v16879_v55, %v13079_v47  ;;  %v2696_v17 = vadd.f32 %v2680_v56, %v2626_v40  ;;  %6302 = vlog2.f32 %v3516_v8  ;;  %v13346_v30 = vmul.f32 0.25, %v16930_v52  ;;  %v16933_v47 = vld [vmem:[#allocation149_spill] sm:$0xff]  ;;  %v16942_v56 = vld [vmem:[#allocation64_spill] sm:$0xff] }
 0x3c6   : > { %v3282_v24 = vsub.f32 %v13322_v32, %v16170_v12  ;;  %4803 = vst [vmem:[#allocation2 + $0x78] sm:$0xff] %v4787_v42  ;;  %v1870_v58 = vsel %vm1854_vm9, %v1838_v35, 0.0  ;;  %v13352_v14 = vmul.f32 %v13328_v53, %v13328_v53  ;;  %v4236_v20 = vsub.f32 %v13326_v26, %v16197_v44  ;;  %v16968_v26 = vld [vmem:[#allocation177_spill] sm:$0xff] }
 0x3c7   : > { %16932 = vst [vmem:[#allocation221_spill] sm:$0xff] %v13346_v30  ;;  %v13354_v48 = vpop.eup %6294  ;;  %v13360_v1 = vmul.f32 %v16934_v18, %v16933_v47  ;;  %vm16937_vm1 = vnez %v16936_v21  ;;  %v2792_v27 = vadd.f32 %v2776_v25, %v2696_v17  ;;  %vm2808_vm6 = vcmp.lt.f32.partialorder %v16879_v55, %v13093_v34  ;;  %v16945_v25 = vld [vmem:[#allocation164_spill] sm:$0xff]  ;;  %v16948_v47 = vld [vmem:[#allocation181_spill] sm:$0xff] }
 0x3c8   : > { %v1886_v39 = vsel %vm16937_vm1, %v1870_v58, 0.0  ;;  %v13364_v41 = vpop.eup %6296  ;;  %v3404_v5 = vmul.f32 %v13318_v49, %v13318_v49  ;;  %v4470_v15 = vmul.f32 %v13354_v48, %v13277_v31  ;;  %v13374_v62 = vand.u32 2147483647, %v1214_v46  ;;  %v16944_v46 = vld [vmem:[#allocation143_spill] sm:$0xff] }
 0x3c9   : > { %16935 = vst [vmem:[#allocation100_spill] sm:$0xff] %v13360_v1  ;;  %v1902_v0 = vmul.f32 0.5, %v1886_v39  ;;  %v13372_v11 = vpop.eup %6298  ;;  %v13376_v29 = vand.u32 2147483647, %v2328_v51  ;;  %v13379_v23 = vmul.f32 0.25, %v16931_v13  ;;  %v2824_v16 = vsel %vm2808_vm6, %v2792_v27, 0.0 }
 0x3ca   : > { %vm16940_vm14 = vnez %v16939_v45  ;;  %v3452_v63 = vsub.f32 %v3404_v5, %v13352_v14  ;;  %6304 = vlog2.f32 %v4470_v15  ;;  %v13386_v31 = vand.u32 2147483647, %v3282_v24  ;;  %v16946_v51 = vld [vmem:[#allocation123_spill] sm:$0xff]  ;;  %v16949_v39 = vld [vmem:[#allocation6_spill] sm:$0xff] }
 0x3cb   : > { %16938 = vst [vmem:[#allocation150_spill] sm:$0xff] %v13379_v23  ;;  %v1918_v59 = vadd.f32 %v1902_v0, %v369_v2  ;;  %v2840_v34 = vsel %vm16940_vm14, %v2824_v16, 0.0  ;;  %v13384_v57 = vpop.eup %6300  ;;  %v1216_v40 = vsub.f32 %v13360_v1, %v8811_v4  ;;  %6306 = vrsqrt.f32 %v16942_v56  ;;  %v16951_v0 = vld [vmem:[#allocation159_spill] sm:$0xff] }
 0x3cc   : > { %16941 = vst [vmem:[#allocation224_spill] sm:$0xff] %v13386_v31  ;;  %v2856_v50 = vmul.f32 0.5, %v2840_v34  ;;  %v13391_v8 = vand.u32 2147483647, %v4236_v20  ;;  %6308 = vrsqrt.f32 %v16944_v46  ;;  %v4342_v42 = vmul.f32 %v13364_v41, %v13364_v41  ;;  %v16952_v16 = vld [vmem:[#allocation27_spill] sm:$0xff] }
 0x3cd   : > { %v1530_v35 = vmul.f32 %v13384_v57, %v13283_v33  ;;  %v13400_v17 = vmul.f32 %v16946_v51, %v16945_v25  ;;  %v3666_v58 = vsub.f32 %v16170_v12, %v16906_v6  ;;  %v3698_v20 = vsub.f32 %v13231_v19, %v13328_v53 }
 0x3ce   : > { %16943 = vst [vmem:[#allocation94_spill] sm:$0xff] %v13391_v8  ;;  %v13402_v24 = vadd.f32 %v2856_v50, %v1918_v59  ;;  %v3468_v2 = vmul.f32 %v3452_v63, %v16948_v47  ;;  %v4358_v21 = vmul.f32 %v13354_v48, %v13354_v48  ;;  %v13413_v33 = vadd.f32 %v8839_v60, %v16949_v39 }
 0x3cf   : > { %16947 = vst [vmem:[#allocation226_spill] sm:$0xff] %v13400_v17  ;;  %6310 = vlog2.f32 %v1530_v35  ;;  %v13415_v27 = vand.u32 2147483647, %v1216_v40  ;;  %v3500_v15 = vmul.f32 0.5, %v16951_v0  ;;  %v13420_v6 = vmul.f32 %v13372_v11, %v13372_v11  ;;  %v16955_v35 = vld [vmem:[#allocation161_spill] sm:$0xff] }
 0x3d0   : > { %v13424_v59 = vmax.f32 %v16916_v28, %v16952_v16  ;;  %v3420_v45 = vsub.f32 %v13328_v53, %v13318_v49  ;;  %v3602_v34 = vmul.f32 %v16951_v0, %v16799_v54  ;;  %vm13431_vm2 = vcmp.lt.f32.partialorder %v16879_v55, %v3666_v58  ;;  %v16956_v0 = vld [vmem:[#allocation154_spill] sm:$0xff] }
 0x3d1   : > { %16950 = vst [vmem:[#allocation92_spill] sm:$0xff] %v13415_v27  ;;  %v4406_v40 = vsub.f32 %v4358_v21, %v4342_v42  ;;  %v3618_v50 = vsub.f32 %v13352_v14, %v3404_v5  ;;  %v4454_v25 = vmul.f32 0.5, %v16955_v35  ;;  %v13439_v47 = vmul.f32 %v13384_v57, %v13384_v57  ;;  %v16957_v5 = vld [vmem:[#allocation22_spill] sm:$0xff] }
 0x3d2   : > { %6312 = vrcp.f32 %v13413_v33  ;;  %v6303_v49 = vpop.eup %6302  ;;  %v3484_v53 = vadd.f32 %v3468_v2, %v3420_v45  ;;  %v3714_v16 = vmul.f32 2.0, %v3698_v20  ;;  %v4620_v58 = vsub.f32 %v16197_v44, %v16910_v7  ;;  %v16958_v20 = vld [vmem:[#allocation184_spill] sm:$0xff] }
 0x3d3   : > { %v13446_v51 = vadd.f32 %v16170_v12, %v16956_v0  ;;  %v3540_v18 = vmul.f32 0.6931472, %v6303_v49  ;;  %v1466_v14 = vsub.f32 %v13439_v47, %v13420_v6  ;;  %6314 = vrcp.f32 %v13424_v59 }
 0x3d4   : > { %v13453_v9 = vmax.f32 %v16916_v28, %v16957_v5  ;;  %vm3762_vm11 = vcmp.lt.f32.partialorder %v16879_v55, %v13236_v61  ;;  %v4422_v2 = vmul.f32 %v4406_v40, %v16958_v20  ;;  %v4556_v7 = vmul.f32 %v16955_v35, %v16802_v10  ;;  %v16961_v5 = vld [vmem:[#allocation93_spill] sm:$0xff]  ;;  %v13474_v20 = vpop.permute.xlu1 %1750 }
 0x3d5   : > { %vm13461_vm7 = vcmp.lt.f32.partialorder %v16879_v55, %v4620_v58  ;;  %v4652_v49 = vsub.f32 %v13231_v19, %v13364_v41  ;;  %v3564_v43 = vmul.f32 %v3540_v18, %v3500_v15  ;;  %v3634_v23 = vmul.f32 %v3618_v50, %v3602_v34  ;;  %v16962_v18 = vld [vmem:[#allocation59_spill] sm:$0xff]  ;;  %v16963_v34 = vld [vmem:[#allocation145_spill] sm:$0xff] }
 0x3d6   : > { %v1514_v27 = vmul.f32 0.5, %v16961_v5  ;;  %v1616_v30 = vmul.f32 %v16961_v5, %v16851_v36  ;;  %v3730_v40 = vsel %vm13431_vm2, %v3714_v16, 0.0  ;;  %v4374_v35 = vsub.f32 %v13364_v41, %v13354_v48  ;;  %v16964_v41 = vld [vmem:[#allocation156_spill] sm:$0xff] }
 0x3d7   : > { %v4572_v58 = vsub.f32 %v4342_v42, %v4358_v21  ;;  %6316 = vrcp.f32 %v13446_v51  ;;  %v6305_v1 = vpop.eup %6304  ;;  %v3580_v19 = vadd.f32 %v3564_v43, %v3484_v53  ;;  %v1482_v15 = vmul.f32 %v1466_v14, %v16962_v18  ;;  %v16966_v18 = vld [vmem:[#allocation129_spill] sm:$0xff] }
 0x3d8   : > { %6318 = vrcp.f32 %v13453_v9  ;;  %v13481_v50 = vadd.f32 %v16197_v44, %v16963_v34  ;;  %v13483_v63 = vpop.eup %6306  ;;  %v4438_v16 = vadd.f32 %v4422_v2, %v4374_v35  ;;  %v4494_v5 = vmul.f32 0.6931472, %v6305_v1 }
 0x3d9   : > { %v4668_v48 = vmul.f32 2.0, %v4652_v49  ;;  %v13487_v42 = vmax.f32 %v16916_v28, %v16964_v41  ;;  %v13489_v21 = vpop.eup %6308  ;;  %v3650_v43 = vadd.f32 %v3634_v23, %v3580_v19  ;;  %v1434_v53 = vsub.f32 %v13372_v11, %v13384_v57  ;;  %v16967_v57 = vld [vmem:[#allocation9_spill] sm:$0xff] }
 0x3da   : > { %16965 = vst [vmem:[#allocation227_spill] sm:$0xff] %v13489_v21  ;;  %v1792_v14 = vsub.f32 %v13474_v20, %v13372_v11  ;;  %v13497_v8 = vadd.f32 %v8811_v4, %v16966_v18  ;;  %v4518_v2 = vmul.f32 %v4494_v5, %v4454_v25  ;;  %v4588_v1 = vmul.f32 %v4572_v58, %v4556_v7  ;;  %v16969_v25 = vld [vmem:[#allocation40_spill] sm:$0xff]  ;;  %v16970_v58 = vld [vmem:[#allocation18_spill] sm:$0xff] }
 0x3db   : > { %v1632_v49 = vsub.f32 %v13420_v6, %v13439_v47  ;;  %v1680_v35 = vsub.f32 %v8811_v4, %v16918_v22  ;;  %v3746_v23 = vadd.f32 %v3730_v40, %v3650_v43  ;;  %v1498_v19 = vadd.f32 %v1482_v15, %v1434_v53  ;;  %v16972_v43 = vld [vmem:[#allocation169_spill] sm:$0xff] }
 0x3dc   : > { %v6311_v41 = vpop.eup %6310  ;;  %6320 = vrcp.f32 %v13481_v50  ;;  %v13506_v11 = vmax.f32 %v16968_v26, %v16967_v57  ;;  %v4534_v31 = vadd.f32 %v4518_v2, %v4438_v16  ;;  %v13511_v7 = vadd.f32 %v8839_v60, %v16969_v25 }
 0x3dd   : > { %v1556_v32 = vmul.f32 0.6931472, %v6311_v41  ;;  %6322 = vrcp.f32 %v13487_v42  ;;  %v3778_v22 = vsel %vm3762_vm11, %v3746_v23, 0.0  ;;  %v4684_v6 = vsel %vm13461_vm7, %v4668_v48, 0.0 }
 0x3de   : > { %v1808_v47 = vmul.f32 2.0, %v1792_v14  ;;  %6324 = vrcp.f32 %v13497_v8  ;;  %vm16971_vm15 = vnez %v16970_v58  ;;  %v4604_v16 = vadd.f32 %v4588_v1, %v4534_v31 }
 0x3df   : > { %v13519_v40 = vpop.eup %6312  ;;  %v3794_v15 = vsel %vm16971_vm15, %v3778_v22, 0.0  ;;  %v1578_v5 = vmul.f32 %v1556_v32, %v1514_v27  ;;  %v13525_v53 = vmax.f32 %v16968_v26, %v16972_v43  ;;  %vm13528_vm3 = vcmp.lt.f32.partialorder %v16916_v28, %v1680_v35  ;;  %v16977_v22 = vld [vmem:[#allocation203_spill] sm:$0xff] }
 0x3e0   : > { %v3810_v2 = vmul.f32 0.5, %v3794_v15  ;;  %v2564_v45 = vmul.f32 %v13519_v40, %v13424_v59  ;;  %6326 = vrcp.f32 %v13506_v11  ;;  %v13535_v48 = vpop.eup %6314  ;;  %v4700_v14 = vadd.f32 %v4684_v6, %v4604_v16  ;;  %v16980_v15 = vld [vmem:[#allocation49_spill] sm:$0xff] }
 0x3e1   : > { %v1594_v31 = vadd.f32 %v1578_v5, %v1498_v19  ;;  %v1648_v32 = vmul.f32 %v1632_v49, %v1616_v30  ;;  %6328 = vrcp.f32 %v13511_v7  ;;  %vm4716_vm10 = vcmp.lt.f32.partialorder %v16879_v55, %v13263_v3  ;;  %v16975_v30 = vld [vmem:[#allocation74_spill] sm:$0xff]  ;;  %v16986_v59 = vld [vmem:[#allocation165_spill] sm:$0xff] }
 0x3e2   : > { %v3826_v27 = vadd.f32 %v3810_v2, %v13402_v24  ;;  %v1824_v1 = vsel %vm13528_vm3, %v1808_v47, 0.0  ;;  %6330 = vlog2.f32 %v2564_v45  ;;  %v4732_v35 = vsel %vm4716_vm10, %v4700_v14, 0.0  ;;  %v16981_v14 = vld [vmem:[#allocation97_spill] sm:$0xff] }
 0x3e3   : > { %v1664_v41 = vadd.f32 %v1648_v32, %v1594_v31  ;;  %6332 = vrcp.f32 %v13525_v53  ;;  %vm16976_vm0 = vnez %v16975_v30  ;;  %vm1856_vm13 = vcmp.lt.f32.partialorder %v16916_v28, %v13297_v37  ;;  %v16984_v30 = vld [vmem:[#allocation65_spill] sm:$0xff] }
 0x3e4   : > { %v13546_v23 = vpop.eup %6316  ;;  %v4748_v49 = vsel %vm16976_vm0, %v4732_v35, 0.0  ;;  %v2436_v55 = vmul.f32 %v13535_v48, %v13535_v48  ;;  %v2714_v3 = vsub.f32 %v8839_v60, %v16949_v39  ;;  %v2548_v6 = vmul.f32 0.5, %v16977_v22  ;;  %v16983_v35 = vld [vmem:[#allocation53_spill] sm:$0xff] }
 0x3e5   : > { %v13556_v24 = vpop.eup %6318  ;;  %v4764_v19 = vmul.f32 0.5, %v4748_v49  ;;  %v1840_v57 = vadd.f32 %v1824_v1, %v1664_v41  ;;  %v2650_v47 = vmul.f32 %v16977_v22, %v16795_v38  ;;  %v2452_v58 = vmul.f32 %v13519_v40, %v13519_v40 }
 0x3e6   : > { %vm13564_vm5 = vcmp.lt.f32.partialorder %v16916_v28, %v2714_v3  ;;  %v13569_v16 = vmul.f32 0.5, %v16980_v15  ;;  %v3518_v39 = vmul.f32 %v13546_v23, %v13453_v9  ;;  %v3604_v5 = vmul.f32 %v16980_v15, %v16799_v54  ;;  %v16985_v15 = vld [vmem:[#allocation144_spill] sm:$0xff] }
 0x3e7   : > { %v4780_v43 = vadd.f32 %v4764_v19, %v3826_v27  ;;  %v1872_v2 = vsel %vm1856_vm13, %v1840_v57, 0.0  ;;  %v2746_v61 = vsub.f32 %v13474_v20, %v13535_v48  ;;  %v3668_v45 = vsub.f32 %v16170_v12, %v16956_v0 }
 0x3e8   : > { %vm16982_vm12 = vnez %v16981_v14  ;;  %v2500_v32 = vsub.f32 %v2452_v58, %v2436_v55  ;;  %v3390_v1 = vmul.f32 %v13556_v24, %v13556_v24  ;;  %6334 = vlog2.f32 %v3518_v39 }
 0x3e9   : > { %v1888_v31 = vsel %vm16982_vm12, %v1872_v2, 0.0  ;;  %v13583_v9 = vpop.eup %6320  ;;  %4796 = vst [vmem:[#allocation2 + $0x48] sm:$0xff] %v4780_v43  ;;  %v13586_v27 = vmul.f32 0.5, %v16983_v35  ;;  %v13590_v41 = vmul.f32 %v16983_v35, %v16802_v10  ;;  %v13595_v49 = vmul.f32 0.5, %v16984_v30 }
 0x3ea   : > { %v13597_v3 = vpop.eup %6322  ;;  %v3406_v19 = vmul.f32 %v13546_v23, %v13546_v23  ;;  %v4472_v57 = vmul.f32 %v13583_v9, %v13487_v42  ;;  %v13605_v22 = vmul.f32 %v16984_v30, %v16851_v36  ;;  %v13609_v39 = vmax.f32 %v16968_v26, %v16985_v15  ;;  %v16987_v42 = vld [vmem:[#allocation158_spill] sm:$0xff] }
 0x3eb   : > { %v13611_v43 = vpop.eup %6324  ;;  %v2666_v2 = vsub.f32 %v2436_v55, %v2452_v58  ;;  %v13613_v14 = vmul.f32 2.0, %v2746_v61  ;;  %v13618_v0 = vmul.f32 0.5, %v16986_v59  ;;  %v2516_v17 = vmul.f32 %v2500_v32, %v16987_v42 }
 0x3ec   : > { %v3454_v10 = vsub.f32 %v3406_v19, %v3390_v1  ;;  %6336 = vlog2.f32 %v4472_v57  ;;  %v13623_v30 = vmul.f32 %v16986_v59, %v16795_v38  ;;  %vm13628_vm4 = vcmp.lt.f32.partialorder %v16916_v28, %v3668_v45  ;;  %v16990_v57 = vld [vmem:[#allocation166_spill] sm:$0xff] }
 0x3ed   : > { %v13625_v15 = vpop.eup %6326  ;;  %v4344_v58 = vmul.f32 %v13597_v3, %v13597_v3  ;;  %v1532_v61 = vmul.f32 %v13611_v43, %v13506_v11  ;;  %v13640_v59 = vadd.f32 %v16170_v12, %v16990_v57  ;;  %v2468_v45 = vsub.f32 %v13535_v48, %v13519_v40 }
 0x3ee   : > { %v13642_v42 = vpop.eup %6328  ;;  %v3620_v35 = vsub.f32 %v3390_v1, %v3406_v19  ;;  %v3700_v38 = vsub.f32 %v13474_v20, %v13556_v24  ;;  %6338 = vrcp.f32 %v13609_v39  ;;  %v2682_v11 = vmul.f32 %v2666_v2, %v2650_v47  ;;  %v16992_v1 = vld [vmem:[#allocation66_spill] sm:$0xff] }
 0x3ef   : > { %16991 = vst [vmem:[#allocation38_spill] sm:$0xff] %v13640_v59  ;;  %v6331_v36 = vpop.eup %6330  ;;  %v2778_v32 = vsel %vm13564_vm5, %v13613_v14, 0.0  ;;  %v4360_v54 = vmul.f32 %v13583_v9, %v13583_v9  ;;  %6340 = vlog2.f32 %v1532_v61  ;;  %v2532_v57 = vadd.f32 %v2516_v17, %v2468_v45  ;;  %v371_v14 = vld [vmem:[#allocation2 + $0x20] sm:$0xff] }
 0x3f0   : > { %v13654_v12 = vpop.eup %6332  ;;  %v2590_v40 = vmul.f32 0.6931472, %v6331_v36  ;;  %v3422_v48 = vsub.f32 %v13556_v24, %v13546_v23  ;;  %v3470_v19 = vmul.f32 %v3454_v10, %v16992_v1  ;;  %v1904_v21 = vmul.f32 0.5, %v1888_v31 }
 0x3f1   : > { %vm2810_vm8 = vcmp.lt.f32.partialorder %v16916_v28, %v13413_v33  ;;  %v4408_v47 = vsub.f32 %v4360_v54, %v4344_v58  ;;  %v13663_v37 = vmul.f32 %v13625_v15, %v13625_v15  ;;  %v2566_v2 = vmul.f32 %v13642_v42, %v13525_v53  ;;  %v17006_v33 = vld [vmem:[#allocation81_spill] sm:$0xff] }
 0x3f2   : > { %v2612_v17 = vmul.f32 %v2590_v40, %v2548_v6  ;;  %v3636_v36 = vmul.f32 %v3620_v35, %v3604_v5  ;;  %v3716_v61 = vmul.f32 2.0, %v3700_v38  ;;  %6342 = vrcp.f32 %v13640_v59  ;;  %v16993_v35 = vld [vmem:[#allocation37_spill] sm:$0xff] }
 0x3f3   : > { %v4654_v10 = vsub.f32 %v13474_v20, %v13597_v3  ;;  %v1420_v23 = vmul.f32 %v13611_v43, %v13611_v43  ;;  %v13674_v24 = vmul.f32 %v13654_v12, %v13654_v12  ;;  %6344 = vlog2.f32 %v2566_v2 }
 0x3f4   : > { %v2628_v31 = vadd.f32 %v2612_v17, %v2532_v57  ;;  %v3486_v45 = vadd.f32 %v3470_v19, %v3422_v48  ;;  %v4376_v53 = vsub.f32 %v13597_v3, %v13583_v9  ;;  %v4574_v6 = vsub.f32 %v4344_v58, %v4360_v54  ;;  %v16997_v9 = vld [vmem:[#allocation189_spill] sm:$0xff] }
 0x3f5   : > { %v6335_v38 = vpop.eup %6334  ;;  %v1920_v5 = vadd.f32 %v1904_v21, %v371_v14  ;;  %v4424_v40 = vmul.f32 %v4408_v47, %v16993_v35  ;;  %v1468_v20 = vsub.f32 %v1420_v23, %v13663_v37  ;;  %v13682_v1 = vmul.f32 %v13642_v42, %v13642_v42  ;;  %v13694_v21 = vpop.permute.xlu1 %1760  ;;  %v17005_v35 = vld [vmem:[#allocation172_spill] sm:$0xff] }
 0x3f6   : > { %v2698_v59 = vadd.f32 %v2682_v11, %v2628_v31  ;;  %v3544_v46 = vmul.f32 0.6931472, %v6335_v38  ;;  %v3732_v57 = vsel %vm13628_vm4, %v3716_v61, 0.0  ;;  %v16994_v48 = vsub.f32 %v16197_v44, %v16963_v34  ;;  %v16998_v11 = vld [vmem:[#allocation13_spill] sm:$0xff]  ;;  %v17027_v38 = vld [vmem:[#allocation188_spill] sm:$0xff] }
 0x3f7   : > { %v13698_v3 = vadd.f32 %v16197_v44, %v16997_v9  ;;  %vm3764_vm1 = vcmp.lt.f32.partialorder %v16916_v28, %v13446_v51  ;;  %v4670_v58 = vmul.f32 2.0, %v4654_v10  ;;  %v1436_v55 = vsub.f32 %v13625_v15, %v13611_v43  ;;  %v16999_v10 = vld [vmem:[#allocation193_spill] sm:$0xff] }
 0x3f8   : > { %vm13690_vm9 = vcmp.lt.f32.partialorder %v16916_v28, %v16994_v48  ;;  %v2502_v34 = vsub.f32 %v13682_v1, %v13674_v24  ;;  %v13708_v19 = vmax.f32 %v16968_v26, %v16998_v11  ;;  %v2794_v47 = vadd.f32 %v2778_v32, %v2698_v59 }
 0x3f9   : > { %v3566_v2 = vmul.f32 %v3544_v46, %v13569_v16  ;;  %v4590_v14 = vmul.f32 %v4574_v6, %v13590_v41  ;;  %6346 = vrcp.f32 %v13698_v3  ;;  %v6337_v17 = vpop.eup %6336  ;;  %v4440_v61 = vadd.f32 %v4424_v40, %v4376_v53  ;;  %v17003_v53 = vld [vmem:[#allocation43_spill] sm:$0xff] }
 0x3fa   : > { %v1484_v31 = vmul.f32 %v1468_v20, %v16999_v10  ;;  %v17000_v43 = vsub.f32 %v8811_v4, %v16966_v18  ;;  %v1794_v32 = vsub.f32 %v13694_v21, %v13625_v15  ;;  %6348 = vrcp.f32 %v13708_v19 }
 0x3fb   : > { %v2826_v46 = vsel %vm2810_vm8, %v2794_v47, 0.0  ;;  %v3582_v16 = vadd.f32 %v3566_v2, %v3486_v45  ;;  %v4498_v41 = vmul.f32 0.6931472, %v6337_v17  ;;  %v13730_v59 = vadd.f32 %v8811_v4, %v16930_v52  ;;  %v13732_v18 = vpop.eup %6338 }
 0x3fc   : > { %vm13718_vm6 = vcmp.lt.f32.partialorder %v16968_v26, %v17000_v43  ;;  %vm17004_vm14 = vnez %v17003_v53  ;;  %vm4718_vm2 = vcmp.lt.f32.partialorder %v16916_v28, %v13481_v50  ;;  %v1634_v15 = vsub.f32 %v13663_v37, %v1420_v23  ;;  %v6341_v20 = vpop.eup %6340 }
 0x3fd   : > { %v2842_v6 = vsel %vm17004_vm14, %v2826_v46, 0.0  ;;  %v2518_v40 = vmul.f32 %v2502_v34, %v17005_v35  ;;  %v13742_v45 = vmax.f32 %v17006_v33, %v13374_v62  ;;  %v3652_v11 = vadd.f32 %v3636_v36, %v3582_v16  ;;  %v17012_v35 = vld [vmem:[#allocation108_spill] sm:$0xff] }
 0x3fe   : > { %v2858_v48 = vmul.f32 0.5, %v2842_v6  ;;  %v4520_v47 = vmul.f32 %v4498_v41, %v13586_v27  ;;  %6350 = vrcp.f32 %v13730_v59  ;;  %v1500_v2 = vadd.f32 %v1484_v31, %v1436_v55 }
 0x3ff   : > { %v1560_v17 = vmul.f32 0.6931472, %v6341_v20  ;;  %v1810_v10 = vmul.f32 2.0, %v1794_v32  ;;  %v2470_v43 = vsub.f32 %v13654_v12, %v13642_v42  ;;  %v3748_v23 = vadd.f32 %v3732_v57, %v3652_v11  ;;  %v13750_v46 = vpop.eup %6342 }
 0x400   : > { %v2874_v37 = vadd.f32 %v2858_v48, %v1920_v5  ;;  %v4536_v34 = vadd.f32 %v4520_v47, %v4440_v61  ;;  %v2748_v62 = vsub.f32 %v13694_v21, %v13654_v12  ;;  %v4686_v36 = vsel %vm13690_vm9, %v4670_v58, 0.0  ;;  %v6345_v31 = vpop.eup %6344  ;;  %v17007_v61 = vld [vmem:[#allocation105_spill] sm:$0xff] }
 0x401   : > { %v1580_v27 = vmul.f32 %v1560_v17, %v13595_v49  ;;  %v1650_v55 = vmul.f32 %v1634_v15, %v13605_v22  ;;  %6352 = vrcp.f32 %v13742_v45  ;;  %v3780_v42 = vsel %vm3764_vm1, %v3748_v23, 0.0  ;;  %v17014_v23 = vld [vmem:[#allocation141_spill] sm:$0xff] }
 0x402   : > { %v4606_v5 = vadd.f32 %v4590_v14, %v4536_v34  ;;  %v2534_v57 = vadd.f32 %v2518_v40, %v2470_v43  ;;  %v2668_v12 = vsub.f32 %v13674_v24, %v13682_v1  ;;  %vm17008_vm11 = vnez %v17007_v61  ;;  %v17018_v61 = vld [vmem:[#allocation146_spill] sm:$0xff] }
 0x403   : > { %v3796_v54 = vsel %vm17008_vm11, %v3780_v42, 0.0  ;;  %v1596_v58 = vadd.f32 %v1580_v27, %v1500_v2  ;;  %v2594_v32 = vmul.f32 0.6931472, %v6345_v31  ;;  %v3520_v49 = vmul.f32 %v13750_v46, %v13609_v39  ;;  %v17016_v31 = vld [vmem:[#allocation143_spill] sm:$0xff] }
 0x404   : > { %v3812_v22 = vmul.f32 0.5, %v3796_v54  ;;  %v4702_v16 = vadd.f32 %v4686_v36, %v4606_v5  ;;  %v1826_v41 = vsel %vm13718_vm6, %v1810_v10, 0.0  ;;  %v2764_v51 = vmul.f32 2.0, %v2748_v62  ;;  %v17017_v42 = vld [vmem:[#allocation227_spill] sm:$0xff] }
 0x405   : > { %v1666_v53 = vadd.f32 %v1650_v55, %v1596_v58  ;;  %vm1858_vm7 = vcmp.lt.f32.partialorder %v16968_v26, %v13497_v8  ;;  %v2614_v24 = vmul.f32 %v2594_v32, %v13618_v0  ;;  %6354 = vlog2.f32 %v3520_v49  ;;  %v17020_v58 = vld [vmem:[#allocation35_spill] sm:$0xff]  ;;  %v17021_v49 = vld [vmem:[#allocation166_spill] sm:$0xff] }
 0x406   : > { %v3828_v1 = vadd.f32 %v3812_v22, %v2874_v37  ;;  %v4734_v14 = vsel %vm4718_vm2, %v4702_v16, 0.0  ;;  %v2684_v39 = vmul.f32 %v2668_v12, %v13623_v30  ;;  %v17009_v6 = vsub.f32 %v8839_v60, %v16969_v25  ;;  %v13783_v15 = vpop.eup %6346  ;;  %v373_v37 = vld [vmem:[#allocation2 + $0x38] sm:$0xff]  ;;  %v17022_v22 = vld [vmem:[#allocation96_spill] sm:$0xff] }
 0x407   : > { %vm17013_vm3 = vnez %v17012_v35  ;;  %v1842_v40 = vadd.f32 %v1826_v41, %v1666_v53  ;;  %v2630_v20 = vadd.f32 %v2614_v24, %v2534_v57  ;;  %v13789_v28 = vmul.f32 %v13732_v18, %v13732_v18  ;;  %v13791_v50 = vpop.eup %6348  ;;  %v17024_v24 = vld [vmem:[#allocation200_spill] sm:$0xff] }
 0x408   : > { %vm13779_vm15 = vcmp.lt.f32.partialorder %v16968_v26, %v17009_v6  ;;  %v4750_v0 = vsel %vm17013_vm3, %v4734_v14, 0.0  ;;  %v4474_v48 = vmul.f32 %v13783_v15, %v13708_v19  ;;  %v13799_v11 = vadd.f32 %v8839_v60, %v16931_v13 }
 0x409   : > { %v4766_v30 = vmul.f32 0.5, %v4750_v0  ;;  %v2780_v25 = vsel %vm13779_vm15, %v2764_v51, 0.0  ;;  %v1874_v47 = vsel %vm1858_vm7, %v1842_v40, 0.0  ;;  %v2700_v2 = vadd.f32 %v2684_v39, %v2630_v20  ;;  %v17023_v51 = vld [vmem:[#allocation48_spill] sm:$0xff] }
 0x40a   : > { %v13806_v17 = vmul.f32 %v13750_v46, %v13750_v46  ;;  %v13810_v10 = vmax.f32 %v17006_v33, %v13376_v29  ;;  %v13814_v19 = vmul.f32 %v13483_v63, %v16942_v56  ;;  %vm17015_vm10 = vnez %v17014_v23  ;;  %v17030_v23 = vld [vmem:[#allocation224_spill] sm:$0xff] }
 0x40b   : > { %v4782_v43 = vadd.f32 %v4766_v30, %v3828_v1  ;;  %v1890_v34 = vsel %vm17015_vm10, %v1874_v47, 0.0  ;;  %6356 = vlog2.f32 %v4474_v48  ;;  %v13818_v8 = vpop.eup %6350  ;;  %v2796_v36 = vadd.f32 %v2780_v25, %v2700_v2  ;;  %v17028_v30 = vld [vmem:[#allocation63_spill] sm:$0xff]  ;;  %v17029_v2 = vld [vmem:[#allocation202_spill] sm:$0xff] }
 0x40c   : > { %v1906_v62 = vmul.f32 0.5, %v1890_v34  ;;  %vm2812_vm0 = vcmp.lt.f32.partialorder %v16968_v26, %v13511_v7  ;;  %v3456_v29 = vsub.f32 %v13806_v17, %v13789_v28  ;;  %v3702_v56 = vsub.f32 %v13694_v21, %v13732_v18 }
 0x40d   : > { %4798 = vst [vmem:[#allocation2 + $0x20] sm:$0xff] %v4782_v43  ;;  %v4346_v27 = vmul.f32 %v13791_v50, %v13791_v50  ;;  %v1534_v55 = vmul.f32 %v13818_v8, %v13742_v45  ;;  %6358 = vrcp.f32 %v13799_v11  ;;  %v13833_v5 = vmul.f32 %v17017_v42, %v17016_v31 }
 0x40e   : > { %v1922_v7 = vadd.f32 %v1906_v62, %v373_v37  ;;  %v2828_v57 = vsel %vm2812_vm0, %v2796_v36, 0.0  ;;  %6360 = vrcp.f32 %v13810_v10  ;;  %v13836_v12 = vpop.eup %6352  ;;  %vm17019_vm13 = vnez %v17018_v61  ;;  %v17032_v36 = vld [vmem:[#allocation211_spill] sm:$0xff] }
 0x40f   : > { %v2844_v54 = vsel %vm17019_vm13, %v2828_v57, 0.0  ;;  %v3504_v32 = vmul.f32 0.5, %v17020_v58  ;;  %v3670_v45 = vsub.f32 %v17022_v22, %v17021_v49  ;;  %v4362_v16 = vmul.f32 %v13783_v15, %v13783_v15  ;;  %v17035_v61 = vld [vmem:[#allocation151_spill] sm:$0xff] }
 0x410   : > { %v2860_v41 = vmul.f32 0.5, %v2844_v54  ;;  %v3472_v53 = vmul.f32 %v3456_v29, %v17023_v51  ;;  %v3606_v1 = vmul.f32 %v17020_v58, %v17024_v24  ;;  %6362 = vlog2.f32 %v1534_v55  ;;  %v17036_v58 = vld [vmem:[#allocation34_spill] sm:$0xff] }
 0x411   : > { %vm13849_vm5 = vcmp.lt.f32.partialorder %v16968_v26, %v3670_v45  ;;  %v3718_v39 = vmul.f32 2.0, %v3702_v56  ;;  %v4410_v6 = vsub.f32 %v4362_v16, %v4346_v27  ;;  %v4458_v35 = vmul.f32 0.5, %v17027_v38  ;;  %v17037_v45 = vld [vmem:[#allocation94_spill] sm:$0xff] }
 0x412   : > { %v13854_v0 = vadd.f32 %v2860_v41, %v1922_v7  ;;  %v3424_v40 = vsub.f32 %v13732_v18, %v13750_v46  ;;  %v13860_v20 = vmul.f32 %v13836_v12, %v13836_v12  ;;  %v13864_v25 = vadd.f32 %v17022_v22, %v17028_v30  ;;  %v6355_v48 = vpop.eup %6354  ;;  %v17038_v51 = vld [vmem:[#allocation54_spill] sm:$0xff] }
 0x413   : > { %v3622_v47 = vsub.f32 %v13789_v28, %v13806_v17  ;;  %v4560_v43 = vmul.f32 %v17027_v38, %v17029_v2  ;;  %v4624_v37 = vsub.f32 %v16197_v44, %v16997_v9  ;;  %v13874_v18 = vmax.f32 %v17006_v33, %v17030_v23  ;;  %v17031_v17 = vld [vmem:[#allocation38_spill] sm:$0xff] }
 0x414   : > { %v3488_v46 = vadd.f32 %v3472_v53, %v3424_v40  ;;  %v3548_v34 = vmul.f32 0.6931472, %v6355_v48  ;;  %v1422_v62 = vmul.f32 %v13818_v8, %v13818_v8  ;;  %6364 = vrcp.f32 %v13864_v25 }
 0x415   : > { %v3734_v28 = vsel %vm13849_vm5, %v3718_v39, 0.0  ;;  %vm3766_vm12 = vcmp.lt.f32.partialorder %v16968_v26, %v17031_v17  ;;  %v4426_v29 = vmul.f32 %v4410_v6, %v17032_v36  ;;  %vm13885_vm4 = vcmp.lt.f32.partialorder %v16968_v26, %v4624_v37  ;;  %v17039_v6 = vld [vmem:[#allocation100_spill] sm:$0xff] }
 0x416   : > { %v4656_v56 = vsub.f32 %v13694_v21, %v13791_v50  ;;  %v3568_v55 = vmul.f32 %v3548_v34, %v3504_v32  ;;  %v4576_v31 = vsub.f32 %v4346_v27, %v4362_v16  ;;  %v1470_v7 = vsub.f32 %v1422_v62, %v13860_v20  ;;  %v13904_v16 = vpop.permute.xlu1 %1770 }
 0x417   : > { %6366 = vrcp.f32 %v13874_v18  ;;  %v4378_v57 = vsub.f32 %v13791_v50, %v13783_v15  ;;  %v1518_v54 = vmul.f32 0.5, %v17035_v61  ;;  %v13898_v49 = vadd.f32 %v16197_v44, %v17036_v58 }
 0x418   : > { %v13902_v41 = vmax.f32 %v17006_v33, %v17037_v45  ;;  %v6357_v21 = vpop.eup %6356  ;;  %v3584_v32 = vadd.f32 %v3568_v55, %v3488_v46  ;;  %v3638_v27 = vmul.f32 %v3622_v47, %v3606_v1  ;;  %v1620_v53 = vmul.f32 %v17035_v61, %v17038_v51  ;;  %v17040_v1 = vld [vmem:[#allocation221_spill] sm:$0xff] }
 0x419   : > { %v1684_v15 = vsub.f32 %v8811_v4, %v16930_v52  ;;  %v4442_v50 = vadd.f32 %v4426_v29, %v4378_v57  ;;  %v4502_v14 = vmul.f32 0.6931472, %v6357_v21  ;;  %v4672_v39 = vmul.f32 2.0, %v4656_v56  ;;  %v17042_v56 = vld [vmem:[#allocation7_spill] sm:$0xff]  ;;  %v17043_v61 = vld [vmem:[#allocation153_spill] sm:$0xff] }
 0x41a   : > { %v13912_v38 = vadd.f32 %v8811_v4, %v17039_v6  ;;  %v13914_v40 = vpop.eup %6358  ;;  %v3654_v48 = vadd.f32 %v3638_v27, %v3584_v32  ;;  %v4592_v37 = vmul.f32 %v4576_v31, %v4560_v43  ;;  %v1486_v47 = vmul.f32 %v1470_v7, %v17040_v1  ;;  %v17041_v43 = vld [vmem:[#allocation92_spill] sm:$0xff] }
 0x41b   : > { %6368 = vrcp.f32 %v13902_v41  ;;  %v13918_v23 = vpop.eup %6360  ;;  %v4522_v46 = vmul.f32 %v4502_v14, %v4458_v35  ;;  %v1796_v52 = vsub.f32 %v13904_v16, %v13836_v12  ;;  %v2568_v34 = vmul.f32 %v13914_v40, %v13810_v10 }
 0x41c   : > { %6370 = vrcp.f32 %v13898_v49  ;;  %v3750_v36 = vadd.f32 %v3734_v28, %v3654_v48  ;;  %v1438_v29 = vsub.f32 %v13836_v12, %v13818_v8  ;;  %v13929_v55 = vmax.f32 %v17042_v56, %v17041_v43 }
 0x41d   : > { %6372 = vrcp.f32 %v13912_v38  ;;  %v6363_v31 = vpop.eup %6362  ;;  %v4538_v35 = vadd.f32 %v4522_v46, %v4442_v50  ;;  %v4688_v7 = vsel %vm13885_vm4, %v4672_v39, 0.0  ;;  %v1636_v57 = vsub.f32 %v13860_v20, %v1422_v62 }
 0x41e   : > { %6374 = vlog2.f32 %v2568_v34  ;;  %v3782_v10 = vsel %vm3766_vm12, %v3750_v36, 0.0  ;;  %v1502_v28 = vadd.f32 %v1486_v47, %v1438_v29  ;;  %v1564_v8 = vmul.f32 0.6931472, %v6363_v31  ;;  %v17049_v36 = vld [vmem:[#allocation226_spill] sm:$0xff] }
 0x41f   : > { %v13940_v12 = vmul.f32 %v13918_v23, %v13918_v23  ;;  %vm17044_vm8 = vnez %v17043_v61  ;;  %v4608_v21 = vadd.f32 %v4592_v37, %v4538_v35  ;;  %v1812_v32 = vmul.f32 2.0, %v1796_v52 }
 0x420   : > { %v3798_v45 = vsel %vm17044_vm8, %v3782_v10, 0.0  ;;  %6376 = vrcp.f32 %v13929_v55  ;;  %v3284_v20 = vsub.f32 %v13814_v19, %v17022_v22  ;;  %v1582_v9 = vmul.f32 %v1564_v8, %v1518_v54  ;;  %v17051_v10 = vld [vmem:[#allocation150_spill] sm:$0xff] }
 0x421   : > { %v3814_v62 = vmul.f32 0.5, %v3798_v45  ;;  %v13949_v17 = vmul.f32 %v13914_v40, %v13914_v40  ;;  %v13951_v27 = vpop.eup %6364  ;;  %v4704_v50 = vadd.f32 %v4688_v7, %v4608_v21  ;;  %vm4720_vm9 = vcmp.lt.f32.partialorder %v16968_v26, %v13698_v3 }
 0x422   : > { %v1652_v14 = vmul.f32 %v1636_v57, %v1620_v53  ;;  %vm13956_vm1 = vcmp.lt.f32.partialorder %v17006_v33, %v1684_v15  ;;  %v1598_v37 = vadd.f32 %v1582_v9, %v1502_v28  ;;  %v3522_v1 = vmul.f32 %v13951_v27, %v13874_v18  ;;  %v17047_v15 = vld [vmem:[#allocation163_spill] sm:$0xff] }
 0x423   : > { %v3830_v48 = vadd.f32 %v3814_v62, %v13854_v0  ;;  %v2504_v54 = vsub.f32 %v13949_v17, %v13940_v12  ;;  %v3442_v46 = vmul.f32 0.25, %v17028_v30  ;;  %v4238_v26 = vsub.f32 %v13833_v5, %v16197_v44 }
 0x424   : > { %v13965_v47 = vpop.eup %6366  ;;  %v4736_v3 = vsel %vm4720_vm9, %v4704_v50, 0.0  ;;  %v1828_v53 = vsel %vm13956_vm1, %v1812_v32, 0.0  ;;  %v13973_v0 = vmul.f32 0.25, %v17036_v58  ;;  %vm17048_vm6 = vnez %v17047_v15  ;;  %v17052_v32 = vld [vmem:[#allocation87_spill] sm:$0xff] }
 0x425   : > { %v4752_v52 = vsel %vm17048_vm6, %v4736_v3, 0.0  ;;  %v1668_v34 = vadd.f32 %v1652_v14, %v1598_v37  ;;  %6378 = vlog2.f32 %v3522_v1  ;;  %v13978_v18 = vmul.f32 0.25, %v17039_v6 }
 0x426   : > { %v17050_v29 = vsub.f32 %v17049_v36, %v8839_v60  ;;  %v4768_v31 = vmul.f32 0.5, %v4752_v52  ;;  %v2750_v35 = vsub.f32 %v13904_v16, %v13918_v23  ;;  %v3300_v7 = vand.u32 2147483647, %v3284_v20 }
 0x427   : > { %v1844_v57 = vadd.f32 %v1828_v53, %v1668_v34  ;;  %v2520_v28 = vmul.f32 %v2504_v54, %v17051_v10  ;;  %v13988_v8 = vmul.f32 %v13965_v47, %v13965_v47  ;;  %v13992_v45 = vand.u32 2147483647, %v4238_v26  ;;  %v17055_v54 = vld [vmem:[#allocation199_spill] sm:$0xff] }
 0x428   : > { %v2346_v43 = vand.u32 2147483647, %v17050_v29  ;;  %v13990_v61 = vpop.eup %6368  ;;  %v4784_v21 = vadd.f32 %v4768_v31, %v3830_v48  ;;  %vm1860_vm14 = vcmp.lt.f32.partialorder %v17006_v33, %v13730_v59  ;;  %v2552_v62 = vmul.f32 0.5, %v17052_v32  ;;  %v17053_v48 = vld [vmem:[#allocation198_spill] sm:$0xff] }
 0x429   : > { %v13997_v9 = vpop.eup %6370  ;;  %v1876_v20 = vsel %vm1860_vm14, %v1844_v57, 0.0  ;;  %v2472_v50 = vsub.f32 %v13918_v23, %v13914_v40  ;;  %v2718_v14 = vsub.f32 %v8839_v60, %v16931_v13  ;;  %v3410_v39 = vmul.f32 %v13951_v27, %v13951_v27 }
 0x42a   : > { %v14005_v37 = vpop.eup %6372  ;;  %4800 = vst [vmem:[#allocation2 + $0x38] sm:$0xff] %v4784_v21  ;;  %vm17054_vm2 = vnez %v17053_v48  ;;  %v2654_v1 = vmul.f32 %v17052_v32, %v17055_v54  ;;  %v2766_v26 = vmul.f32 2.0, %v2750_v35  ;;  %v4476_v3 = vmul.f32 %v13997_v9, %v13902_v41 }
 0x42b   : > { %v1892_v59 = vsel %vm17054_vm2, %v1876_v20, 0.0  ;;  %v6375_v40 = vpop.eup %6374  ;;  %v2536_v23 = vadd.f32 %v2520_v28, %v2472_v50  ;;  %v2670_v13 = vsub.f32 %v13940_v12, %v13949_v17  ;;  %vm14016_vm11 = vcmp.lt.f32.partialorder %v17006_v33, %v2718_v14  ;;  %v17058_v12 = vld [vmem:[#allocation180_spill] sm:$0xff] }
 0x42c   : > { %v3458_v15 = vsub.f32 %v3410_v39, %v13988_v8  ;;  %v2598_v52 = vmul.f32 0.6931472, %v6375_v40  ;;  %6380 = vlog2.f32 %v4476_v3  ;;  %v1536_v34 = vmul.f32 %v14005_v37, %v13929_v55 }
 0x42d   : > { %v14024_v29 = vmax.f32 %v17042_v56, %v2346_v43  ;;  %v14026_v41 = vpop.eup %6376  ;;  %vm2814_vm7 = vcmp.lt.f32.partialorder %v17006_v33, %v13799_v11  ;;  %v3506_v17 = vmul.f32 0.5, %v17058_v12  ;;  %v3608_v31 = vmul.f32 %v17058_v12, %v17024_v24 }
 0x42e   : > { %v3672_v35 = vsub.f32 %v17022_v22, %v17028_v30  ;;  %v14037_v57 = vadd.f32 %v8839_v60, %v17049_v36  ;;  %v2616_v55 = vmul.f32 %v2598_v52, %v2552_v62  ;;  %v2782_v43 = vsel %vm14016_vm11, %v2766_v26, 0.0 }
 0x42f   : > { %v14043_v10 = vmul.f32 %v13990_v61, %v13990_v61  ;;  %6382 = vlog2.f32 %v1536_v34  ;;  %v2686_v28 = vmul.f32 %v2670_v13, %v2654_v1  ;;  %v3426_v21 = vsub.f32 %v13965_v47, %v13951_v27 }
 0x430   : > { %v3474_v32 = vmul.f32 %v3458_v15, %v3442_v46  ;;  %vm14048_vm15 = vcmp.lt.f32.partialorder %v17006_v33, %v3672_v35  ;;  %v3704_v62 = vsub.f32 %v13904_v16, %v13965_v47  ;;  %v2632_v20 = vadd.f32 %v2616_v55, %v2536_v23  ;;  %v17061_v23 = vld [vmem:[#allocation51_spill] sm:$0xff]  ;;  %v17062_v35 = vld [vmem:[#allocation12_spill] sm:$0xff] }
 0x431   : > { %v14056_v50 = vmul.f32 %v13997_v9, %v13997_v9  ;;  %v14060_v14 = vmul.f32 %v14026_v41, %v14026_v41  ;;  %6384 = vrcp.f32 %v14024_v29  ;;  %v1908_v27 = vmul.f32 0.5, %v1892_v59  ;;  %v375_v59 = vld [vmem:[#allocation2 + $0x70] sm:$0xff] }
 0x432   : > { %v3624_v46 = vsub.f32 %v13988_v8, %v3410_v39  ;;  %6386 = vrcp.f32 %v14037_v57  ;;  %v14067_v48 = vadd.f32 %v17022_v22, %v13814_v19  ;;  %v6379_v47 = vpop.eup %6378  ;;  %v2702_v1 = vadd.f32 %v2686_v28, %v2632_v20 }
 0x433   : > { %v4412_v26 = vsub.f32 %v14056_v50, %v14043_v10  ;;  %v14073_v3 = vmul.f32 %v14005_v37, %v14005_v37  ;;  %v14076_v40 = vmax.f32 %v17042_v56, %v3300_v7  ;;  %v3490_v8 = vadd.f32 %v3474_v32, %v3426_v21 }
 0x434   : > { %v3552_v39 = vmul.f32 0.6931472, %v6379_v47  ;;  %v4460_v13 = vmul.f32 0.5, %v17061_v23  ;;  %6388 = vrcp.f32 %v14067_v48  ;;  %v2798_v53 = vadd.f32 %v2782_v43, %v2702_v1 }
 0x435   : > { %v3720_v15 = vmul.f32 2.0, %v3704_v62  ;;  %vm3768_vm3 = vcmp.lt.f32.partialorder %v17006_v33, %v13864_v25  ;;  %v4626_v52 = vsub.f32 %v16197_v44, %v17036_v58  ;;  %v1472_v34 = vsub.f32 %v14073_v3, %v14060_v14  ;;  %v17065_v62 = vld [vmem:[#allocation26_spill] sm:$0xff] }
 0x436   : > { %v3570_v7 = vmul.f32 %v3552_v39, %v3506_v17  ;;  %v4562_v12 = vmul.f32 %v17061_v23, %v17029_v2  ;;  %v1520_v55 = vmul.f32 0.5, %v17062_v35  ;;  %6390 = vrcp.f32 %v14076_v40  ;;  %v14099_v17 = vpop.permute.xlu1 %1780 }
 0x437   : > { %v1924_v28 = vadd.f32 %v1908_v27, %v375_v59  ;;  %v2830_v43 = vsel %vm2814_vm7, %v2798_v53, 0.0  ;;  %v3640_v21 = vmul.f32 %v3624_v46, %v3608_v31  ;;  %v4428_v32 = vmul.f32 %v4412_v26, %v13973_v0 }
 0x438   : > { %vm14095_vm10 = vcmp.lt.f32.partialorder %v17006_v33, %v4626_v52  ;;  %vm17066_vm0 = vnez %v17065_v62  ;;  %v3586_v47 = vadd.f32 %v3570_v7, %v3490_v8  ;;  %v4658_v27 = vsub.f32 %v13904_v16, %v13990_v61 }
 0x439   : > { %v2846_v20 = vsel %vm17066_vm0, %v2830_v43, 0.0  ;;  %v14107_v11 = vadd.f32 %v16197_v44, %v13833_v5  ;;  %v3736_v0 = vsel %vm14048_vm15, %v3720_v15, 0.0  ;;  %v4380_v46 = vsub.f32 %v13990_v61, %v13997_v9  ;;  %v6381_v26 = vpop.eup %6380 }
 0x43a   : > { %v2862_v31 = vmul.f32 0.5, %v2846_v20  ;;  %v1488_v1 = vmul.f32 %v1472_v34, %v13978_v18  ;;  %v3656_v59 = vadd.f32 %v3640_v21, %v3586_v47  ;;  %v4578_v8 = vsub.f32 %v14043_v10, %v14056_v50 }
 0x43b   : > { %v1798_v16 = vsub.f32 %v14099_v17, %v14026_v41  ;;  %v4270_v39 = vmax.f32 %v17042_v56, %v13992_v45  ;;  %v4444_v53 = vadd.f32 %v4428_v32, %v4380_v46  ;;  %v4506_v30 = vmul.f32 0.6931472, %v6381_v26 }
 0x43c   : > { %v2878_v23 = vadd.f32 %v2862_v31, %v1924_v28  ;;  %v1440_v15 = vsub.f32 %v14026_v41, %v14005_v37  ;;  %v6383_v61 = vpop.eup %6382  ;;  %v3752_v9 = vadd.f32 %v3736_v0, %v3656_v59  ;;  %v4674_v18 = vmul.f32 2.0, %v4658_v27 }
 0x43d   : > { %v1622_v52 = vmul.f32 %v17062_v35, %v17038_v51  ;;  %6392 = vrcp.f32 %v14107_v11  ;;  %v4524_v10 = vmul.f32 %v4506_v30, %v4460_v13  ;;  %v1568_v34 = vmul.f32 0.6931472, %v6383_v61  ;;  %v17067_v35 = vld [vmem:[#allocation61_spill] sm:$0xff] }
 0x43e   : > { %v1504_v50 = vadd.f32 %v1488_v1, %v1440_v15  ;;  %v1638_v45 = vsub.f32 %v14060_v14, %v14073_v3  ;;  %v14127_v7 = vpop.eup %6384  ;;  %v3784_v37 = vsel %vm3768_vm3, %v3752_v9, 0.0  ;;  %v1686_v41 = vsub.f32 %v8811_v4, %v17039_v6  ;;  %v17069_v1 = vld [vmem:[#allocation206_spill] sm:$0xff] }
 0x43f   : > { %v1814_v28 = vmul.f32 2.0, %v1798_v16  ;;  %6394 = vrcp.f32 %v4270_v39  ;;  %v6387_v51 = vpop.eup %6386  ;;  %vm17068_vm13 = vnez %v17067_v35  ;;  %v4540_v43 = vadd.f32 %v4524_v10, %v4444_v53 }
 0x440   : > { %v3800_v13 = vsel %vm17068_vm13, %v3784_v37, 0.0  ;;  %v4594_v21 = vmul.f32 %v4578_v8, %v4562_v12  ;;  %v1584_v32 = vmul.f32 %v1568_v34, %v1520_v55  ;;  %v4690_v14 = vsel %vm14095_vm10, %v4674_v18, 0.0 }
 0x441   : > { %v3816_v62 = vmul.f32 0.5, %v3800_v13  ;;  %v2570_v3 = vmul.f32 %v6387_v51, %v14024_v29  ;;  %v6389_v25 = vpop.eup %6388  ;;  %v1654_v27 = vmul.f32 %v1638_v45, %v1622_v52  ;;  %vm1702_vm5 = vcmp.lt.f32.partialorder %v17042_v56, %v1686_v41 }
 0x442   : > { %v4610_v20 = vadd.f32 %v4594_v21, %v4540_v43  ;;  %v1600_v47 = vadd.f32 %v1584_v32, %v1504_v50  ;;  %v1830_v6 = vsel %vm1702_vm5, %v1814_v28, 0.0  ;;  %v3524_v31 = vmul.f32 %v6389_v25, %v14076_v40  ;;  %v17073_v28 = vld [vmem:[#allocation123_spill] sm:$0xff] }
 0x443   : > { %v3832_v4 = vadd.f32 %v3816_v62, %v2878_v23  ;;  %6396 = vlog2.f32 %v2570_v3  ;;  %v6391_v0 = vpop.eup %6390  ;;  %vm4722_vm12 = vcmp.lt.f32.partialorder %v17006_v33, %v13898_v49  ;;  %v2442_v29 = vmul.f32 %v14127_v7, %v14127_v7  ;;  %v17071_v23 = vld [vmem:[#allocation142_spill] sm:$0xff] }
 0x444   : > { %v4706_v12 = vadd.f32 %v4690_v14, %v4610_v20  ;;  %v1670_v55 = vadd.f32 %v1654_v27, %v1600_v47  ;;  %6398 = vlog2.f32 %v3524_v31  ;;  %vm17070_vm4 = vnez %v17069_v1 }
 0x445   : > { %vm1862_vm8 = vcmp.lt.f32.partialorder %v17042_v56, %v13912_v38  ;;  %v2458_v59 = vmul.f32 %v6387_v51, %v6387_v51  ;;  %v3396_v40 = vmul.f32 %v6391_v0, %v6391_v0  ;;  %vm17072_vm9 = vnez %v17071_v23 }
 0x446   : > { %v4738_v58 = vsel %vm4722_vm12, %v4706_v12, 0.0  ;;  %v1846_v46 = vadd.f32 %v1830_v6, %v1670_v55  ;;  %v3412_v49 = vmul.f32 %v6389_v25, %v6389_v25  ;;  %v2490_v61 = vmul.f32 0.25, %v17049_v36 }
 0x447   : > { %v4754_v26 = vsel %vm17070_vm4, %v4738_v58, 0.0  ;;  %v2506_v33 = vsub.f32 %v2458_v59, %v2442_v29  ;;  %v3444_v10 = vmul.f32 0.25, %v13814_v19  ;;  %v2752_v50 = vsub.f32 %v14099_v17, %v14127_v7 }
 0x448   : > { %v4770_v8 = vmul.f32 0.5, %v4754_v26  ;;  %v1878_v16 = vsel %vm1862_vm8, %v1846_v46, 0.0  ;;  %v3460_v9 = vsub.f32 %v3412_v49, %v3396_v40  ;;  %v2474_v34 = vsub.f32 %v14127_v7, %v6387_v51  ;;  %v377_v26 = vld [vmem:[#allocation2 + $0x28] sm:$0xff] }
 0x449   : > { %v1894_v53 = vsel %vm17072_vm9, %v1878_v16, 0.0  ;;  %v2522_v38 = vmul.f32 %v2506_v33, %v2490_v61  ;;  %v2554_v35 = vmul.f32 0.5, %v17073_v28  ;;  %v2672_v13 = vsub.f32 %v2442_v29, %v2458_v59 }
 0x44a   : > { %v6393_v30 = vpop.eup %6392  ;;  %v4786_v15 = vadd.f32 %v4770_v8, %v3832_v4  ;;  %v3476_v45 = vmul.f32 %v3460_v9, %v3444_v10  ;;  %v3706_v43 = vsub.f32 %v14099_v17, %v6391_v0  ;;  %v3428_v62 = vsub.f32 %v6391_v0, %v6389_v25 }
 0x44b   : > { %v4478_v18 = vmul.f32 %v6393_v30, %v4270_v39  ;;  %v2656_v39 = vmul.f32 %v17073_v28, %v17055_v54  ;;  %v2538_v21 = vadd.f32 %v2522_v38, %v2474_v34  ;;  %v4366_v14 = vmul.f32 %v6393_v30, %v6393_v30  ;;  %v17078_v38 = vld [vmem:[#allocation111_spill] sm:$0xff] }
 0x44c   : > { %v6395_v52 = vpop.eup %6394  ;;  %4802 = vst [vmem:[#allocation2 + $0x70] sm:$0xff] %v4786_v15  ;;  %v2720_v7 = vsub.f32 %v8839_v60, %v17049_v36  ;;  %v2768_v51 = vmul.f32 2.0, %v2752_v50  ;;  %v3508_v20 = vmul.f32 0.5, %v13483_v63  ;;  %v3626_v47 = vsub.f32 %v3396_v40, %v3412_v49 }
 0x44d   : > { %6400 = vlog2.f32 %v4478_v18  ;;  %v14156_v37 = vmul.f32 %v6395_v52, %v6395_v52  ;;  %v3492_v4 = vadd.f32 %v3476_v45, %v3428_v62  ;;  %v4398_v31 = vmul.f32 0.25, %v13833_v5 }
 0x44e   : > { %vm14168_vm1 = vcmp.lt.f32.partialorder %v17042_v56, %v2720_v7  ;;  %v3674_v25 = vsub.f32 %v17022_v22, %v13814_v19  ;;  %v3722_v60 = vmul.f32 2.0, %v3706_v43  ;;  %v2688_v0 = vmul.f32 %v2672_v13, %v2656_v39 }
 0x44f   : > { %v4414_v54 = vsub.f32 %v4366_v14, %v14156_v37  ;;  %v3610_v29 = vmul.f32 %v13483_v63, %v17024_v24  ;;  %v1910_v58 = vmul.f32 0.5, %v1894_v53  ;;  %v2784_v46 = vsel %vm14168_vm1, %v2768_v51, 0.0 }
 0x450   : > { %v6397_v41 = vpop.eup %6396  ;;  %vm14179_vm6 = vcmp.lt.f32.partialorder %v17042_v56, %v3674_v25  ;;  %v4660_v16 = vsub.f32 %v14099_v17, %v6395_v52  ;;  %v4382_v23 = vsub.f32 %v6395_v52, %v6393_v30  ;;  %vm2816_vm14 = vcmp.lt.f32.partialorder %v17042_v56, %v14037_v57 }
 0x451   : > { %v2602_v32 = vmul.f32 0.6931472, %v6397_v41  ;;  %v6399_v3 = vpop.eup %6398  ;;  %v3642_v19 = vmul.f32 %v3626_v47, %v3610_v29  ;;  %v4430_v22 = vmul.f32 %v4414_v54, %v4398_v31  ;;  %v3738_v8 = vsel %vm14179_vm6, %v3722_v60, 0.0 }
 0x452   : > { %v3556_v6 = vmul.f32 0.6931472, %v6399_v3  ;;  %v1926_v33 = vadd.f32 %v1910_v58, %v377_v26  ;;  %v4462_v49 = vmul.f32 0.5, %v17017_v42  ;;  %v4580_v15 = vsub.f32 %v14156_v37, %v4366_v14  ;;  %v17080_v37 = vld [vmem:[#allocation110_spill] sm:$0xff] }
 0x453   : > { %v2618_v27 = vmul.f32 %v2602_v32, %v2554_v35  ;;  %v4446_v18 = vadd.f32 %v4430_v22, %v4382_v23  ;;  %vm17079_vm2 = vnez %v17078_v38  ;;  %vm3770_vm11 = vcmp.lt.f32.partialorder %v17042_v56, %v14067_v48  ;;  %v17082_v32 = vld [vmem:[#allocation179_spill] sm:$0xff] }
 0x454   : > { %v3572_v55 = vmul.f32 %v3556_v6, %v3508_v20  ;;  %v4628_v17 = vsub.f32 %v16197_v44, %v13833_v5  ;;  %v4676_v30 = vmul.f32 2.0, %v4660_v16  ;;  %v4564_v45 = vmul.f32 %v17017_v42, %v17029_v2 }
 0x455   : > { %v2634_v36 = vadd.f32 %v2618_v27, %v2538_v21  ;;  %vm17081_vm7 = vnez %v17080_v37  ;;  %vm4724_vm3 = vcmp.lt.f32.partialorder %v17042_v56, %v14107_v11  ;;  %vm17083_vm10 = vnez %v17082_v32 }
 0x456   : > { %v3588_v40 = vadd.f32 %v3572_v55, %v3492_v4  ;;  %vm4644_vm15 = vcmp.lt.f32.partialorder %v17042_v56, %v4628_v17  ;;  %v4596_v13 = vmul.f32 %v4580_v15, %v4564_v45 }
 0x457   : > { %v2704_v59 = vadd.f32 %v2688_v0, %v2634_v36  ;;  %v4692_v48 = vsel %vm4644_vm15, %v4676_v30, 0.0 }
 0x458   : > { %v3658_v24 = vadd.f32 %v3642_v19, %v3588_v40 }
 0x459   : > { %v2800_v63 = vadd.f32 %v2784_v46, %v2704_v59 }
 0x45a   : > { %v6401_v53 = vpop.eup %6400  ;;  %v3754_v9 = vadd.f32 %v3738_v8, %v3658_v24 }
 0x45b   : > { %v2832_v61 = vsel %vm2816_vm14, %v2800_v63, 0.0  ;;  %v4510_v10 = vmul.f32 0.6931472, %v6401_v53 }
 0x45c   : > { %v2848_v50 = vsel %vm17079_vm2, %v2832_v61, 0.0  ;;  %v3786_v57 = vsel %vm3770_vm11, %v3754_v9, 0.0 }
 0x45d   : > { %v2864_v52 = vmul.f32 0.5, %v2848_v50  ;;  %v4526_v34 = vmul.f32 %v4510_v10, %v4462_v49  ;;  %v3802_v41 = vsel %vm17081_vm7, %v3786_v57, 0.0 }
 0x45e   : > { %v3818_v35 = vmul.f32 0.5, %v3802_v41 }
 0x45f   : > { %v2880_v28 = vadd.f32 %v2864_v52, %v1926_v33  ;;  %v4542_v39 = vadd.f32 %v4526_v34, %v4446_v18 }
 0x461   : > { %v3834_v43 = vadd.f32 %v3818_v35, %v2880_v28  ;;  %v4612_v21 = vadd.f32 %v4596_v13, %v4542_v39 }
 0x463   : > { %v4708_v44 = vadd.f32 %v4692_v48, %v4612_v21 }
 0x465   : > { %v4740_v5 = vsel %vm4724_vm3, %v4708_v44, 0.0 }
 0x466   : > { %v4756_v42 = vsel %vm17083_vm10, %v4740_v5, 0.0 }
 0x467   : > { %v4772_v2 = vmul.f32 0.5, %v4756_v42 }
 0x469   : > { %v4788_v62 = vadd.f32 %v4772_v2, %v3834_v43 }
 0x46b   : > { %4804 = vst [vmem:[#allocation2 + $0x28] sm:$0xff] %v4788_v62 }
 0x46c PF: > { %v4808_v14 = vld [vmem:[#allocation2 + $0x30] sm:$0xff]  ;;  %v4810_v3 = vld [vmem:[#allocation2 + $0x58] sm:$0xff]  ;;  %v4809_v7 = vld [vmem:[#allocation2] sm:$0xff]  ;;  %s6577_s12 = smov 3   ;;  %s6578_s13 = smov 4   ;;  %vm5640_vm0 = vcmask 7168  }
 0x46d   : > { %4824 = vadd.xlane.f32.xlu0 %v4808_v14  ;;  %4828 = vadd.xlane.f32.xlu1 %v4810_v3  ;;  %v4811_v51 = vld [vmem:[#allocation2 + $0x18] sm:$0xff]  ;;  %v4812_v20 = vld [vmem:[#allocation2 + $0x50] sm:$0xff]  ;;  %v4813_v47 = vld [vmem:[#allocation2 + $0x68] sm:$0xff]  ;;  %s6580_s14 = smov 127   ;;  %s6581_s15 = smov 126  }
 0x46e   : > { %v4814_v56 = vld [vmem:[#allocation2 + $0x8] sm:$0xff]  ;;  %v4816_v27 = vld [vmem:[#allocation2 + $0x40] sm:$0xff]  ;;  %v4818_v6 = vld [vmem:[#allocation2 + $0x10] sm:$0xff] }
 0x46f   : > { %v4815_v11 = vld [vmem:[#allocation2 + $0x48] sm:$0xff]  ;;  %v4817_v4 = vld [vmem:[#allocation2 + $0x20] sm:$0xff]  ;;  %v4819_v54 = vld [vmem:[#allocation2 + $0x38] sm:$0xff] }
 0x470   : > { %v4820_v31 = vld [vmem:[#allocation2 + $0x60] sm:$0xff]  ;;  %v4821_v12 = vld [vmem:[#allocation2 + $0x70] sm:$0xff]  ;;  %v4822_v25 = vld [vmem:[#allocation2 + $0x78] sm:$0xff] }
 0x471   : > { %4826 = vadd.xlane.f32.xlu0 %v4809_v7  ;;  %4830 = vadd.xlane.f32.xlu1 %v4811_v51  ;;  %v14206_v36 = vld [vmem:[%s6651_s10] sm:$0xff]  ;;  %v14212_v55 = vld [vmem:[%s6651_s10 + $0x8] sm:$0xff]  ;;  %v14215_v58 = vld [vmem:[%s6651_s10 + $0x10] sm:$0xff] }
 0x472   : > { %v4823_v60 = vld [vmem:[#allocation2 + $0x28] sm:$0xff]  ;;  %v14209_v0 = vadd.f32 -0.0195141, %v14206_v36  ;;  %v14221_v26 = vadd.f32 -0.0195141, %v14212_v55  ;;  %v14224_v59 = vld [vmem:[%s6651_s10 + $0x20] sm:$0xff] }
 0x473   : > { %v14229_v40 = vadd.f32 -0.0195141, %v14215_v58  ;;  %v14232_v22 = vld [vmem:[%s6651_s10 + $0x18] sm:$0xff]  ;;  %v14238_v63 = vadd.f32 -0.0195141, %v14224_v59  ;;  %v14241_v24 = vld [vmem:[%s6651_s10 + $0x30] sm:$0xff] }
 0x474   : > { %17084 = vst [vmem:[#allocation231_spill] sm:$0xff] %v14209_v0  ;;  %17085 = vst [vmem:[#allocation232_spill] sm:$0xff] %v14221_v26  ;;  %v14249_v53 = vadd.f32 -0.0195141, %v14232_v22  ;;  %v14252_v49 = vld [vmem:[%s6651_s10 + $0x28] sm:$0xff]  ;;  %v14261_v18 = vld [vmem:[%s6651_s10 + $0x40] sm:$0xff] }
 0x475   : > { %4832 = vadd.xlane.f32.xlu0 %v4812_v20  ;;  %4834 = vadd.xlane.f32.xlu1 %v4813_v47  ;;  %17086 = vst [vmem:[#allocation233_spill] sm:$0xff] %v14229_v40  ;;  %17087 = vst [vmem:[#allocation234_spill] sm:$0xff] %v14238_v63  ;;  %v14258_v9 = vadd.f32 -0.0195141, %v14241_v24  ;;  %v14271_v38 = vadd.f32 -0.0195141, %v14252_v49 }
 0x476   : > { %17088 = vst [vmem:[#allocation235_spill] sm:$0xff] %v14249_v53  ;;  %v14274_v17 = vld [vmem:[%s6651_s10 + $0x38] sm:$0xff]  ;;  %v14280_v57 = vadd.f32 -0.0195141, %v14261_v18  ;;  %v14283_v34 = vld [vmem:[%s6651_s10 + $0x50] sm:$0xff]  ;;  %v14296_v28 = vld [vmem:[%s6651_s10 + $0x48] sm:$0xff] }
 0x477   : > { %17089 = vst [vmem:[#allocation236_spill] sm:$0xff] %v14258_v9  ;;  %17090 = vst [vmem:[#allocation237_spill] sm:$0xff] %v14271_v38  ;;  %v14293_v37 = vadd.f32 -0.0195141, %v14274_v17  ;;  %v14300_v13 = vadd.f32 -0.0195141, %v14283_v34 }
 0x478   : > { %17091 = vst [vmem:[#allocation238_spill] sm:$0xff] %v14280_v57  ;;  %v14303_v48 = vld [vmem:[%s6651_s10 + $0x60] sm:$0xff]  ;;  %v14310_v21 = vadd.f32 -0.0195141, %v14296_v28  ;;  %v14313_v5 = vld [vmem:[%s6651_s10 + $0x58] sm:$0xff]  ;;  %v14320_v62 = vld [vmem:[%s6651_s10 + $0x70] sm:$0xff] }
 0x479   : > { %4836 = vadd.xlane.f32.xlu0 %v4814_v56  ;;  %4838 = vadd.xlane.f32.xlu1 %v4815_v11  ;;  %17092 = vst [vmem:[#allocation239_spill] sm:$0xff] %v14293_v37  ;;  %17093 = vst [vmem:[#allocation240_spill] sm:$0xff] %v14300_v13  ;;  %v14317_v2 = vadd.f32 -0.0195141, %v14303_v48  ;;  %v14326_v3 = vadd.f32 -0.0195141, %v14313_v5 }
 0x47a   : > { %17094 = vst [vmem:[#allocation241_spill] sm:$0xff] %v14310_v21  ;;  %v14329_v51 = vld [vmem:[%s6651_s10 + $0x68] sm:$0xff]  ;;  %v14333_v47 = vadd.f32 -0.0195141, %v14320_v62 }
 0x47b   : > { %17095 = vst [vmem:[#allocation242_spill] sm:$0xff] %v14317_v2  ;;  %17096 = vst [vmem:[#allocation243_spill] sm:$0xff] %v14326_v3 }
 0x47c   : > { %17097 = vst [vmem:[#allocation244_spill] sm:$0xff] %v14329_v51  ;;  %17098 = vst [vmem:[#allocation245_spill] sm:$0xff] %v14333_v47 }
 0x47d   : > { %4840 = vadd.xlane.f32.xlu0 %v4816_v27  ;;  %4842 = vadd.xlane.f32.xlu1 %v4817_v4  ;;  %v14339_v27 = vadd.f32 -0.0195141, %v14329_v51 }
 0x47f   : > { %17099 = vst [vmem:[#allocation246_spill] sm:$0xff] %v14339_v27 }
 0x481   : > { %4844 = vadd.xlane.f32.xlu0 %v4818_v6  ;;  %4846 = vadd.xlane.f32.xlu1 %v4819_v54  ;;  %v14342_v6 = vld [vmem:[%s6651_s10 + $0x78] sm:$0xff]  ;;  %s6579_s10 = smov 2  }
 0x482   : > { %17100 = vst [vmem:[#allocation247_spill] sm:$0xff] %v14342_v6 }
 0x485   : > { %4848 = vadd.xlane.f32.xlu0 %v4820_v31  ;;  %4850 = vadd.xlane.f32.xlu1 %v4821_v12  ;;  %v14349_v12 = vadd.f32 -0.0195141, %v14342_v6 }
 0x487   : > { %17101 = vst [vmem:[#allocation248_spill] sm:$0xff] %v14349_v12 }
 0x489   : > { %4852 = vadd.xlane.f32.xlu0 %v4822_v25  ;;  %4854 = vadd.xlane.f32.xlu1 %v4823_v60 }
 0x4f6   : > { %v4825_v29 = vpop.xlane.xlu0 %4824  ;;  %v4829_v46 = vpop.xlane.xlu1 %4828 }
 0x4f7   : > { %v14218_v1 = vmul.f32 %v14209_v0, %v4825_v29  ;;  %v14246_v23 = vmul.f32 %v14229_v40, %v4829_v46 }
 0x4f9   : > { %4984 = vrot.lane.b32.xlu0 %v14218_v1, %s6577_s12 }
 0x4fa   : > { %v4827_v19 = vpop.xlane.xlu0 %4826  ;;  %v4831_v8 = vpop.xlane.xlu1 %4830 }
 0x4fb   : > { %v14235_v16 = vmul.f32 %v14221_v26, %v4827_v19  ;;  %v14268_v10 = vmul.f32 %v14249_v53, %v4831_v8 }
 0x4fd   : > { %4986 = vrot.lane.b32.xlu1 %v14235_v16, %s6577_s12 }
 0x4fe   : > { %v4833_v33 = vpop.xlane.xlu0 %4832  ;;  %v4835_v15 = vpop.xlane.xlu1 %4834 }
 0x4ff   : > { %v14255_v61 = vmul.f32 %v14238_v63, %v4833_v33  ;;  %v14290_v45 = vmul.f32 %v14271_v38, %v4835_v15 }
 0x501   : > { %4988 = vrot.lane.b32.xlu1 %v14246_v23, %s6577_s12  ;;  %4992 = vrot.lane.b32.xlu0 %v14255_v61, %s6577_s12 }
 0x502   : > { %v4837_v50 = vpop.xlane.xlu0 %4836  ;;  %v4839_v30 = vpop.xlane.xlu1 %4838 }
 0x503   : > { %v14277_v52 = vmul.f32 %v14258_v9, %v4837_v50  ;;  %v4895_v43 = vmul.f32 %v14293_v37, %v4839_v30 }
 0x505   : > { %4990 = vrot.lane.b32.xlu1 %v14268_v10, %s6577_s12  ;;  %4996 = vrot.lane.b32.xlu0 %v14277_v52, %s6577_s12 }
 0x506   : > { %v4841_v41 = vpop.xlane.xlu0 %4840  ;;  %v4843_v35 = vpop.xlane.xlu1 %4842 }
 0x507   : > { %v4896_v39 = vmul.f32 %v14280_v57, %v4841_v41  ;;  %v4897_v14 = vmul.f32 %v14310_v21, %v4843_v35 }
 0x509   : > { %4994 = vrot.lane.b32.xlu1 %v14290_v45, %s6577_s12  ;;  %5000 = vrot.lane.b32.xlu0 %v4896_v39, %s6577_s12 }
 0x50a   : > { %v4845_v44 = vpop.xlane.xlu0 %4844  ;;  %v4847_v32 = vpop.xlane.xlu1 %4846 }
 0x50b   : > { %v4898_v42 = vmul.f32 %v14300_v13, %v4845_v44  ;;  %v4899_v11 = vmul.f32 %v14326_v3, %v4847_v32 }
 0x50d   : > { %4998 = vrot.lane.b32.xlu1 %v4895_v43, %s6577_s12  ;;  %5004 = vrot.lane.b32.xlu0 %v4898_v42, %s6577_s12 }
 0x50e   : > { %v4849_v7 = vpop.xlane.xlu0 %4848  ;;  %v4851_v56 = vpop.xlane.xlu1 %4850 }
 0x50f   : > { %v4900_v20 = vmul.f32 %v14317_v2, %v4849_v7  ;;  %v4901_v31 = vmul.f32 %v14339_v27, %v4851_v56 }
 0x511   : > { %5002 = vrot.lane.b32.xlu1 %v4897_v14, %s6577_s12  ;;  %5008 = vrot.lane.b32.xlu0 %v4900_v20, %s6577_s12 }
 0x512   : > { %v4853_v4 = vpop.xlane.xlu0 %4852  ;;  %v4855_v25 = vpop.xlane.xlu1 %4854 }
 0x513   : > { %v4902_v54 = vmul.f32 %v14333_v47, %v4853_v4  ;;  %v4903_v60 = vmul.f32 %v14349_v12, %v4855_v25 }
 0x515   : > { %5006 = vrot.lane.b32.xlu1 %v4899_v11, %s6577_s12  ;;  %5012 = vrot.lane.b32.xlu0 %v4902_v54, %s6577_s12 }
 0x519   : > { %5010 = vrot.lane.b32.xlu1 %v4901_v31, %s6577_s12  ;;  %5144 = vrot.lane.b32.xlu0 %v14218_v1, %s6578_s13 }
 0x51d   : > { %5014 = vrot.lane.b32.xlu1 %v4903_v60, %s6577_s12  ;;  %5148 = vrot.lane.b32.xlu0 %v14246_v23, %s6578_s13 }
 0x521   : > { %5146 = vrot.lane.b32.xlu1 %v14235_v16, %s6578_s13  ;;  %5152 = vrot.lane.b32.xlu0 %v14255_v61, %s6578_s13 }
 0x525   : > { %5150 = vrot.lane.b32.xlu1 %v14268_v10, %s6578_s13  ;;  %5156 = vrot.lane.b32.xlu0 %v14277_v52, %s6578_s13 }
 0x529   : > { %5154 = vrot.lane.b32.xlu1 %v14290_v45, %s6578_s13  ;;  %5160 = vrot.lane.b32.xlu0 %v4896_v39, %s6578_s13 }
 0x52d   : > { %5158 = vrot.lane.b32.xlu1 %v4895_v43, %s6578_s13  ;;  %5164 = vrot.lane.b32.xlu0 %v4898_v42, %s6578_s13 }
 0x531   : > { %5162 = vrot.lane.b32.xlu1 %v4897_v14, %s6578_s13  ;;  %5168 = vrot.lane.b32.xlu0 %v4900_v20, %s6578_s13 }
 0x535   : > { %5166 = vrot.lane.b32.xlu1 %v4899_v11, %s6578_s13  ;;  %5172 = vrot.lane.b32.xlu0 %v4902_v54, %s6578_s13 }
 0x539   : > { %5170 = vrot.lane.b32.xlu1 %v4901_v31, %s6578_s13  ;;  %4920 = vrot.lane.b32.xlu0 %v14218_v1, %s6579_s10 }
 0x53d   : > { %5174 = vrot.lane.b32.xlu1 %v4903_v60, %s6578_s13  ;;  %4924 = vrot.lane.b32.xlu0 %v14246_v23, %s6579_s10 }
 0x541   : > { %4922 = vrot.lane.b32.xlu1 %v14235_v16, %s6579_s10  ;;  %4928 = vrot.lane.b32.xlu0 %v14255_v61, %s6579_s10 }
 0x545   : > { %4926 = vrot.lane.b32.xlu1 %v14268_v10, %s6579_s10  ;;  %4932 = vrot.lane.b32.xlu0 %v14277_v52, %s6579_s10 }
 0x549   : > { %4930 = vrot.lane.b32.xlu1 %v14290_v45, %s6579_s10  ;;  %4936 = vrot.lane.b32.xlu0 %v4896_v39, %s6579_s10 }
 0x54d   : > { %4934 = vrot.lane.b32.xlu1 %v4895_v43, %s6579_s10  ;;  %4940 = vrot.lane.b32.xlu0 %v4898_v42, %s6579_s10 }
 0x551   : > { %4938 = vrot.lane.b32.xlu1 %v4897_v14, %s6579_s10  ;;  %4944 = vrot.lane.b32.xlu0 %v4900_v20, %s6579_s10 }
 0x555   : > { %4942 = vrot.lane.b32.xlu1 %v4899_v11, %s6579_s10  ;;  %4948 = vrot.lane.b32.xlu0 %v4902_v54, %s6579_s10 }
 0x559   : > { %4946 = vrot.lane.b32.xlu1 %v4901_v31, %s6579_s10  ;;  %5384 = vrot.lane.b32.xlu0 %v14206_v36, %s6579_s10 }
 0x55d   : > { %4950 = vrot.lane.b32.xlu1 %v4903_v60, %s6579_s10  ;;  %5388 = vrot.lane.b32.xlu0 %v14215_v58, %s6579_s10 }
 0x561   : > { %5386 = vrot.lane.b32.xlu1 %v14212_v55, %s6579_s10  ;;  %5392 = vrot.lane.b32.xlu0 %v14224_v59, %s6579_s10 }
 0x565   : > { %5390 = vrot.lane.b32.xlu1 %v14232_v22, %s6579_s10  ;;  %5396 = vrot.lane.b32.xlu0 %v14241_v24, %s6579_s10 }
 0x569   : > { %5394 = vrot.lane.b32.xlu1 %v14252_v49, %s6579_s10  ;;  %5400 = vrot.lane.b32.xlu0 %v14261_v18, %s6579_s10 }
 0x56b   : > { %v4985_v29 = vpop.permute.xlu0 %4984 }
 0x56c   : > { %v5032_v46 = vmul.f32 %v4985_v29, %v14206_v36 }
 0x56d   : > { %5398 = vrot.lane.b32.xlu1 %v14274_v17, %s6579_s10  ;;  %5404 = vrot.lane.b32.xlu0 %v14283_v34, %s6579_s10 }
 0x56e   : > { %v5048_v19 = vmul.f32 %v5032_v46, %v4985_v29 }
 0x56f   : > { %v4987_v1 = vpop.permute.xlu1 %4986 }
 0x570   : > { %v5033_v61 = vmul.f32 %v4987_v1, %v14212_v55 }
 0x571   : > { %5402 = vrot.lane.b32.xlu1 %v14296_v28, %s6579_s10  ;;  %5408 = vrot.lane.b32.xlu0 %v14303_v48, %s6579_s10 }
 0x572   : > { %v5049_v45 = vmul.f32 %v5033_v61, %v4987_v1 }
 0x573   : > { %v4989_v8 = vpop.permute.xlu1 %4988  ;;  %v4993_v16 = vpop.permute.xlu0 %4992 }
 0x574   : > { %v5034_v23 = vmul.f32 %v4989_v8, %v14215_v58  ;;  %v5036_v33 = vmul.f32 %v4993_v16, %v14224_v59 }
 0x575   : > { %5406 = vrot.lane.b32.xlu1 %v14313_v5, %s6579_s10  ;;  %5080 = vrot.lane.b32.xlu0 %v5048_v19, %s6580_s14 }
 0x576   : > { %v5050_v15 = vmul.f32 %v5034_v23, %v4989_v8  ;;  %v5052_v30 = vmul.f32 %v5036_v33, %v4993_v16 }
 0x577   : > { %v4991_v10 = vpop.permute.xlu1 %4990  ;;  %v4997_v50 = vpop.permute.xlu0 %4996 }
 0x578   : > { %v5038_v52 = vmul.f32 %v4997_v50, %v14241_v24  ;;  %v5035_v41 = vmul.f32 %v4991_v10, %v14232_v22 }
 0x579   : > { %5410 = vrot.lane.b32.xlu1 %v14329_v51, %s6579_s10  ;;  %5084 = vrot.lane.b32.xlu0 %v5050_v15, %s6580_s14 }
 0x57a   : > { %v5054_v43 = vmul.f32 %v5038_v52, %v4997_v50  ;;  %v5051_v32 = vmul.f32 %v5035_v41, %v4991_v10 }
 0x57b   : > { %v4995_v35 = vpop.permute.xlu1 %4994  ;;  %v5001_v39 = vpop.permute.xlu0 %5000 }
 0x57c   : > { %v5040_v44 = vmul.f32 %v5001_v39, %v14261_v18  ;;  %v5037_v42 = vmul.f32 %v4995_v35, %v14252_v49 }
 0x57d   : > { %5082 = vrot.lane.b32.xlu1 %v5049_v45, %s6580_s14  ;;  %5088 = vrot.lane.b32.xlu0 %v5052_v30, %s6580_s14 }
 0x57e   : > { %v5056_v20 = vmul.f32 %v5040_v44, %v5001_v39  ;;  %v5053_v11 = vmul.f32 %v5037_v42, %v4995_v35 }
 0x57f   : > { %v4999_v14 = vpop.permute.xlu1 %4998  ;;  %v5005_v7 = vpop.permute.xlu0 %5004 }
 0x580   : > { %v5042_v56 = vmul.f32 %v5005_v7, %v14283_v34  ;;  %v5039_v4 = vmul.f32 %v4999_v14, %v14274_v17 }
 0x581   : > { %5086 = vrot.lane.b32.xlu1 %v5051_v32, %s6580_s14  ;;  %5092 = vrot.lane.b32.xlu0 %v5054_v43, %s6580_s14 }
 0x582   : > { %v5058_v25 = vmul.f32 %v5042_v56, %v5005_v7  ;;  %v5055_v29 = vmul.f32 %v5039_v4, %v4999_v14 }
 0x583   : > { %v5003_v54 = vpop.permute.xlu1 %5002  ;;  %v5009_v31 = vpop.permute.xlu0 %5008 }
 0x584   : > { %v5044_v60 = vmul.f32 %v5009_v31, %v14303_v48  ;;  %v5041_v46 = vmul.f32 %v5003_v54, %v14296_v28 }
 0x585   : > { %5090 = vrot.lane.b32.xlu1 %v5053_v11, %s6580_s14  ;;  %5096 = vrot.lane.b32.xlu0 %v5056_v20, %s6580_s14 }
 0x586   : > { %v5060_v8 = vmul.f32 %v5044_v60, %v5009_v31  ;;  %v5057_v23 = vmul.f32 %v5041_v46, %v5003_v54 }
 0x587   : > { %v5007_v1 = vpop.permute.xlu1 %5006  ;;  %v5013_v19 = vpop.permute.xlu0 %5012 }
 0x588   : > { %v5046_v16 = vmul.f32 %v5013_v19, %v14320_v62  ;;  %v5043_v33 = vmul.f32 %v5007_v1, %v14313_v5 }
 0x589   : > { %5094 = vrot.lane.b32.xlu1 %v5055_v29, %s6580_s14  ;;  %5100 = vrot.lane.b32.xlu0 %v5058_v25, %s6580_s14 }
 0x58a   : > { %v5062_v50 = vmul.f32 %v5046_v16, %v5013_v19  ;;  %v5059_v30 = vmul.f32 %v5043_v33, %v5007_v1 }
 0x58b   : > { %v5011_v15 = vpop.permute.xlu1 %5010  ;;  %v5145_v61 = vpop.permute.xlu0 %5144 }
 0x58c   : > { %v5192_v10 = vmul.f32 %v5145_v61, %v14206_v36  ;;  %v5045_v52 = vmul.f32 %v5011_v15, %v14329_v51 }
 0x58d   : > { %5098 = vrot.lane.b32.xlu1 %v5057_v23, %s6580_s14  ;;  %5104 = vrot.lane.b32.xlu0 %v5060_v8, %s6580_s14 }
 0x58e   : > { %v5208_v45 = vmul.f32 %v5192_v10, %v5145_v61  ;;  %v5061_v43 = vmul.f32 %v5045_v52, %v5011_v15 }
 0x58f   : > { %v5015_v41 = vpop.permute.xlu1 %5014  ;;  %v5149_v35 = vpop.permute.xlu0 %5148 }
 0x590   : > { %v5194_v39 = vmul.f32 %v5149_v35, %v14215_v58  ;;  %v5047_v44 = vmul.f32 %v5015_v41, %v14342_v6  ;;  %v5224_v7 = vmul.f32 %v5208_v45, %v5145_v61 }
 0x591   : > { %5102 = vrot.lane.b32.xlu1 %v5059_v30, %s6580_s14  ;;  %5108 = vrot.lane.b32.xlu0 %v5062_v50, %s6580_s14 }
 0x592   : > { %v5210_v32 = vmul.f32 %v5194_v39, %v5149_v35  ;;  %v5063_v11 = vmul.f32 %v5047_v44, %v5015_v41 }
 0x593   : > { %v5147_v42 = vpop.permute.xlu1 %5146  ;;  %v5153_v14 = vpop.permute.xlu0 %5152 }
 0x594   : > { %v5193_v20 = vmul.f32 %v5147_v42, %v14212_v55  ;;  %v5196_v56 = vmul.f32 %v5153_v14, %v14224_v59  ;;  %v5226_v60 = vmul.f32 %v5210_v32, %v5149_v35 }
 0x595   : > { %5106 = vrot.lane.b32.xlu1 %v5061_v43, %s6580_s14  ;;  %5256 = vrot.lane.b32.xlu0 %v5224_v7, %s6581_s15 }
 0x596   : > { %v5209_v4 = vmul.f32 %v5193_v20, %v5147_v42  ;;  %v5212_v54 = vmul.f32 %v5196_v56, %v5153_v14 }
 0x597   : > { %v5151_v31 = vpop.permute.xlu1 %5150  ;;  %v5157_v25 = vpop.permute.xlu0 %5156 }
 0x598   : > { %v5195_v29 = vmul.f32 %v5151_v31, %v14232_v22  ;;  %v5198_v46 = vmul.f32 %v5157_v25, %v14241_v24  ;;  %v5225_v23 = vmul.f32 %v5209_v4, %v5147_v42  ;;  %v5228_v33 = vmul.f32 %v5212_v54, %v5153_v14 }
 0x599   : > { %5110 = vrot.lane.b32.xlu1 %v5063_v11, %s6580_s14  ;;  %5260 = vrot.lane.b32.xlu0 %v5226_v60, %s6581_s15 }
 0x59a   : > { %v5211_v1 = vmul.f32 %v5195_v29, %v5151_v31  ;;  %v5214_v19 = vmul.f32 %v5198_v46, %v5157_v25 }
 0x59b   : > { %v5155_v8 = vpop.permute.xlu1 %5154  ;;  %v5161_v16 = vpop.permute.xlu0 %5160 }
 0x59c   : > { %v5197_v15 = vmul.f32 %v5155_v8, %v14252_v49  ;;  %v5200_v61 = vmul.f32 %v5161_v16, %v14261_v18  ;;  %v5227_v10 = vmul.f32 %v5211_v1, %v5151_v31  ;;  %v5230_v50 = vmul.f32 %v5214_v19, %v5157_v25 }
 0x59d   : > { %5258 = vrot.lane.b32.xlu1 %v5225_v23, %s6581_s15  ;;  %5264 = vrot.lane.b32.xlu0 %v5228_v33, %s6581_s15 }
 0x59e   : > { %v5213_v30 = vmul.f32 %v5197_v15, %v5155_v8  ;;  %v5216_v52 = vmul.f32 %v5200_v61, %v5161_v16 }
 0x59f   : > { %v5159_v45 = vpop.permute.xlu1 %5158  ;;  %v5165_v41 = vpop.permute.xlu0 %5164 }
 0x5a0   : > { %v5199_v35 = vmul.f32 %v5159_v45, %v14274_v17  ;;  %v5202_v39 = vmul.f32 %v5165_v41, %v14283_v34  ;;  %v5229_v43 = vmul.f32 %v5213_v30, %v5155_v8  ;;  %v5232_v44 = vmul.f32 %v5216_v52, %v5161_v16 }
 0x5a1   : > { %5262 = vrot.lane.b32.xlu1 %v5227_v10, %s6581_s15  ;;  %5268 = vrot.lane.b32.xlu0 %v5230_v50, %s6581_s15 }
 0x5a2   : > { %v5215_v32 = vmul.f32 %v5199_v35, %v5159_v45  ;;  %v5218_v42 = vmul.f32 %v5202_v39, %v5165_v41 }
 0x5a3   : > { %v5163_v14 = vpop.permute.xlu1 %5162  ;;  %v5169_v7 = vpop.permute.xlu0 %5168 }
 0x5a4   : > { %v5201_v20 = vmul.f32 %v5163_v14, %v14296_v28  ;;  %v5204_v56 = vmul.f32 %v5169_v7, %v14303_v48  ;;  %v5231_v11 = vmul.f32 %v5215_v32, %v5159_v45  ;;  %v5234_v4 = vmul.f32 %v5218_v42, %v5165_v41 }
 0x5a5   : > { %5266 = vrot.lane.b32.xlu1 %v5229_v43, %s6581_s15  ;;  %5272 = vrot.lane.b32.xlu0 %v5232_v44, %s6581_s15 }
 0x5a6   : > { %v5217_v54 = vmul.f32 %v5201_v20, %v5163_v14  ;;  %v5220_v31 = vmul.f32 %v5204_v56, %v5169_v7 }
 0x5a7   : > { %v5167_v25 = vpop.permute.xlu1 %5166  ;;  %v5173_v60 = vpop.permute.xlu0 %5172 }
 0x5a8   : > { %v5203_v29 = vmul.f32 %v5167_v25, %v14313_v5  ;;  %v5206_v46 = vmul.f32 %v5173_v60, %v14320_v62  ;;  %v5233_v1 = vmul.f32 %v5217_v54, %v5163_v14  ;;  %v5236_v19 = vmul.f32 %v5220_v31, %v5169_v7 }
 0x5a9   : > { %5270 = vrot.lane.b32.xlu1 %v5231_v11, %s6581_s15  ;;  %5276 = vrot.lane.b32.xlu0 %v5234_v4, %s6581_s15 }
 0x5aa   : > { %v5219_v8 = vmul.f32 %v5203_v29, %v5167_v25  ;;  %v5222_v16 = vmul.f32 %v5206_v46, %v5173_v60 }
 0x5ab   : > { %v5171_v23 = vpop.permute.xlu1 %5170  ;;  %v4921_v33 = vpop.permute.xlu0 %4920 }
 0x5ac   : > { %v5205_v15 = vmul.f32 %v5171_v23, %v14329_v51  ;;  %v5235_v61 = vmul.f32 %v5219_v8, %v5167_v25  ;;  %v5238_v10 = vmul.f32 %v5222_v16, %v5173_v60  ;;  %v4968_v63 = vmul.f32 %v4921_v33, %v14206_v36 }
 0x5ad   : > { %5274 = vrot.lane.b32.xlu1 %v5233_v1, %s6581_s15  ;;  %5280 = vrot.lane.b32.xlu0 %v5236_v19, %s6581_s15 }
 0x5ae   : > { %v5221_v50 = vmul.f32 %v5205_v15, %v5171_v23 }
 0x5af   : > { %v5175_v30 = vpop.permute.xlu1 %5174  ;;  %v4925_v52 = vpop.permute.xlu0 %4924 }
 0x5b0   : > { %v5207_v45 = vmul.f32 %v5175_v30, %v14342_v6  ;;  %v5237_v41 = vmul.f32 %v5221_v50, %v5171_v23 }
 0x5b1   : > { %5278 = vrot.lane.b32.xlu1 %v5235_v61, %s6581_s15  ;;  %5284 = vrot.lane.b32.xlu0 %v5238_v10, %s6581_s15 }
 0x5b2   : > { %v5223_v35 = vmul.f32 %v5207_v45, %v5175_v30 }
 0x5b3   : > { %v4923_v39 = vpop.permute.xlu1 %4922  ;;  %v4929_v43 = vpop.permute.xlu0 %4928 }
 0x5b4   : > { %v5239_v44 = vmul.f32 %v5223_v35, %v5175_v30  ;;  %v4969_v51 = vmul.f32 %v4923_v39, %v14212_v55 }
 0x5b5   : > { %5282 = vrot.lane.b32.xlu1 %v5237_v41, %s6581_s15  ;;  %5412 = vrot.lane.b32.xlu0 %v14320_v62, %s6579_s10 }
 0x5b7   : > { %v4927_v32 = vpop.permute.xlu1 %4926  ;;  %v4933_v42 = vpop.permute.xlu0 %4932 }
 0x5b8   : > { %v4971_v33 = vmul.f32 %v4927_v32, %v14232_v22 }
 0x5b9   : > { %5286 = vrot.lane.b32.xlu1 %v5239_v44, %s6581_s15 }
 0x5bb   : > { %v14478_v14 = vpop.permute.xlu1 %4930  ;;  %v14480_v7 = vpop.permute.xlu0 %4936 }
 0x5bc   : > { %v4973_v55 = vmul.f32 %v14478_v14, %v14252_v49  ;;  %v4976_v22 = vmul.f32 %v14480_v7, %v14261_v18 }
 0x5bd   : > { %5414 = vrot.lane.b32.xlu1 %v14342_v6, %s6579_s10 }
 0x5bf   : > { %v14484_v20 = vpop.permute.xlu1 %4934  ;;  %v14486_v56 = vpop.permute.xlu0 %4940 }
 0x5c0   : > { %v4978_v49 = vmul.f32 %v14486_v56, %v14283_v34 }
 0x5c3   : > { %v14488_v11 = vpop.permute.xlu1 %4938  ;;  %v14490_v4 = vpop.permute.xlu0 %4944 }
 0x5c4   : > { %v4977_v34 = vmul.f32 %v14488_v11, %v14296_v28  ;;  %v4980_v14 = vmul.f32 %v14490_v4, %v14303_v48 }
 0x5c7   : > { %v14492_v54 = vpop.permute.xlu1 %4942  ;;  %v14494_v31 = vpop.permute.xlu0 %4948 }
 0x5c8   : > { %v4979_v48 = vmul.f32 %v14492_v54, %v14313_v5  ;;  %v4982_v11 = vmul.f32 %v14494_v31, %v14320_v62 }
 0x5cb   : > { %v14496_v25 = vpop.permute.xlu1 %4946  ;;  %v5385_v60 = vpop.permute.xlu0 %5384 }
 0x5cc   : > { %17102 = vst [vmem:[#allocation249_spill] sm:$0xff] %v14496_v25  ;;  %6406 = vrcp.f32 %v5385_v60 }
 0x5cf   : > { %v14498_v29 = vpop.permute.xlu1 %4950  ;;  %v5389_v46 = vpop.permute.xlu0 %5388 }
 0x5d0   : > { %17103 = vst [vmem:[#allocation250_spill] sm:$0xff] %v14498_v29 }
 0x5d3   : > { %v5387_v1 = vpop.permute.xlu1 %5386  ;;  %v5393_v19 = vpop.permute.xlu0 %5392 }
 0x5d7   : > { %v5391_v8 = vpop.permute.xlu1 %5390  ;;  %v5397_v16 = vpop.permute.xlu0 %5396 }
 0x5db   : > { %v14500_v23 = vpop.permute.xlu1 %5394  ;;  %v14502_v15 = vpop.permute.xlu0 %5400 }
 0x5df   : > { %v14504_v61 = vpop.permute.xlu1 %5398  ;;  %v14506_v10 = vpop.permute.xlu0 %5404 }
 0x5e3   : > { %v14508_v50 = vpop.permute.xlu1 %5402  ;;  %v14510_v30 = vpop.permute.xlu0 %5408 }
 0x5e7   : > { %v14512_v45 = vpop.permute.xlu1 %5406  ;;  %v5081_v41 = vpop.permute.xlu0 %5080 }
 0x5e8   : > { %17104 = vst [vmem:[#allocation251_spill] sm:$0xff] %v14512_v45  ;;  %v5128_v26 = vsub.f32 %v4968_v63, %v5081_v41 }
 0x5eb   : > { %v14514_v35 = vpop.permute.xlu1 %5410  ;;  %v5085_v44 = vpop.permute.xlu0 %5084 }
 0x5ec   : > { %17105 = vst [vmem:[#allocation252_spill] sm:$0xff] %v14514_v35  ;;  %v4970_v35 = vmul.f32 %v4925_v52, %v14215_v58 }
 0x5ee   : > { %v5130_v6 = vsub.f32 %v4970_v35, %v5085_v44 }
 0x5ef   : > { %v5083_v12 = vpop.permute.xlu1 %5082  ;;  %v5089_v27 = vpop.permute.xlu0 %5088 }
 0x5f0   : > { %v5129_v36 = vsub.f32 %v4969_v51, %v5083_v12 }
 0x5f3   : > { %v5087_v47 = vpop.permute.xlu1 %5086  ;;  %v5093_v3 = vpop.permute.xlu0 %5092 }
 0x5f4   : > { %v5131_v60 = vsub.f32 %v4971_v33, %v5087_v47  ;;  %v17111_v33 = vld [vmem:[#allocation249_spill] sm:$0xff] }
 0x5f7   : > { %v5091_v2 = vpop.permute.xlu1 %5090  ;;  %v5097_v21 = vpop.permute.xlu0 %5096 }
 0x5fb   : > { %v14516_v13 = vpop.permute.xlu1 %5094  ;;  %v14518_v37 = vpop.permute.xlu0 %5100 }
 0x5ff   : > { %v14520_v57 = vpop.permute.xlu1 %5098  ;;  %v14522_v38 = vpop.permute.xlu0 %5104 }
 0x603   : > { %v14524_v9 = vpop.permute.xlu1 %5102  ;;  %v14526_v53 = vpop.permute.xlu0 %5108 }
 0x604   : > { %17106 = vst [vmem:[#allocation253_spill] sm:$0xff] %v14524_v9  ;;  %17107 = vst [vmem:[#allocation254_spill] sm:$0xff] %v14526_v53  ;;  %v4972_v9 = vmul.f32 %v4929_v43, %v14224_v59 }
 0x606   : > { %v5132_v63 = vsub.f32 %v4972_v9, %v5089_v27  ;;  %v5133_v27 = vsub.f32 %v4973_v55, %v5091_v2 }
 0x607   : > { %v14529_v40 = vpop.permute.xlu1 %5106  ;;  %v5257_v0 = vpop.permute.xlu0 %5256 }
 0x608   : > { %v5304_v29 = vadd.f32 %v5257_v0, %v5128_v26  ;;  %v4974_v0 = vmul.f32 %v4933_v42, %v14241_v24  ;;  %v6407_v24 = vpop.eup %6406  ;;  %v5138_v42 = vsub.f32 %v4978_v49, %v14518_v37  ;;  %v17115_v49 = vld [vmem:[#allocation252_spill] sm:$0xff] }
 0x60a   : > { %6408 = vtanh.f32 %v5304_v29  ;;  %v5134_v29 = vsub.f32 %v4974_v0, %v5093_v3  ;;  %v4975_v3 = vmul.f32 %v14484_v20, %v14274_v17 }
 0x60b   : > { %v14532_v45 = vpop.permute.xlu1 %5110  ;;  %v5261_v25 = vpop.permute.xlu0 %5260  ;;  %6410 = vrcp.f32 %v5389_v46  ;;  %v17108_v35 = vld [vmem:[#allocation253_spill] sm:$0xff]  ;;  %v17109_v5 = vld [vmem:[#allocation254_spill] sm:$0xff] }
 0x60c   : > { %v5306_v53 = vadd.f32 %v5261_v25, %v5130_v6  ;;  %v5136_v6 = vsub.f32 %v4976_v22, %v5097_v21  ;;  %v5135_v21 = vsub.f32 %v4975_v3, %v14516_v13  ;;  %v5139_v44 = vsub.f32 %v4979_v48, %v17108_v35  ;;  %v17121_v35 = vld [vmem:[#allocation236_spill] sm:$0xff] }
 0x60d   : > { %v5142_v54 = vsub.f32 %v4982_v11, %v17109_v5  ;;  %v17122_v5 = vld [vmem:[#allocation237_spill] sm:$0xff] }
 0x60e   : > { %6412 = vtanh.f32 %v5306_v53 }
 0x60f   : > { %v5259_v41 = vpop.permute.xlu1 %5258  ;;  %v5265_v58 = vpop.permute.xlu0 %5264  ;;  %6414 = vrcp.f32 %v5387_v1  ;;  %v5137_v1 = vsub.f32 %v4977_v34, %v14520_v57 }
 0x610   : > { %v5305_v26 = vadd.f32 %v5259_v41, %v5129_v36  ;;  %v5308_v52 = vadd.f32 %v5265_v58, %v5132_v63  ;;  %6416 = vrcp.f32 %v5393_v19  ;;  %v5140_v19 = vsub.f32 %v4980_v14, %v14522_v38  ;;  %v17110_v63 = vld [vmem:[#allocation244_spill] sm:$0xff] }
 0x611   : > { %v4981_v41 = vmul.f32 %v17111_v33, %v17110_v63 }
 0x612   : > { %6418 = vtanh.f32 %v5305_v26 }
 0x613   : > { %6420 = vtanh.f32 %v5308_v52  ;;  %v5263_v59 = vpop.permute.xlu1 %5262  ;;  %v5269_v9 = vpop.permute.xlu0 %5268  ;;  %v17112_v52 = vld [vmem:[#allocation251_spill] sm:$0xff]  ;;  %v5141_v55 = vsub.f32 %v4981_v41, %v14529_v40  ;;  %v17125_v41 = vld [vmem:[#allocation240_spill] sm:$0xff] }
 0x614   : > { %6422 = vrcp.f32 %v5391_v8  ;;  %v5307_v53 = vadd.f32 %v5263_v59, %v5131_v60  ;;  %v5310_v51 = vadd.f32 %v5269_v9, %v5134_v29 }
 0x615   : > { %6424 = vrcp.f32 %v5397_v16 }
 0x616   : > { %6426 = vtanh.f32 %v5307_v53 }
 0x617   : > { %v6409_v47 = vpop.eup %6408  ;;  %6428 = vtanh.f32 %v5310_v51  ;;  %v5267_v12 = vpop.permute.xlu1 %5266  ;;  %v17113_v51 = vld [vmem:[#allocation247_spill] sm:$0xff] }
 0x618   : > { %v5273_v39 = vpop.permute.xlu0 %5272  ;;  %6430 = vrcp.f32 %v14500_v23  ;;  %v5309_v18 = vadd.f32 %v5267_v12, %v5133_v27  ;;  %v5433_v32 = vmul.f32 %v6409_v47, %v6407_v24  ;;  %v6411_v2 = vpop.eup %6410  ;;  %v17114_v24 = vld [vmem:[#allocation250_spill] sm:$0xff] }
 0x619   : > { %v5312_v43 = vadd.f32 %v5273_v39, %v5136_v6  ;;  %6432 = vrcp.f32 %v14502_v15  ;;  %v4983_v27 = vmul.f32 %v17114_v24, %v17113_v51 }
 0x61a   : > { %6434 = vtanh.f32 %v5309_v18  ;;  %5480 = vrot.lane.b32.xlu0 %v5433_v32, %s6581_s15 }
 0x61b   : > { %v6413_v17 = vpop.eup %6412  ;;  %6436 = vtanh.f32 %v5312_v43  ;;  %v5271_v7 = vpop.permute.xlu1 %5270  ;;  %v5143_v39 = vsub.f32 %v4983_v27, %v14532_v45  ;;  %v17129_v27 = vld [vmem:[#allocation245_spill] sm:$0xff] }
 0x61c   : > { %v5277_v20 = vpop.permute.xlu0 %5276  ;;  %6438 = vrcp.f32 %v14504_v61  ;;  %v5311_v56 = vadd.f32 %v5271_v7, %v5135_v21  ;;  %v5437_v13 = vmul.f32 %v6413_v17, %v6411_v2  ;;  %v6415_v46 = vpop.eup %6414 }
 0x61d   : > { %v5314_v25 = vadd.f32 %v5277_v20, %v5138_v42  ;;  %6440 = vrcp.f32 %v14506_v10  ;;  %v6417_v37 = vpop.eup %6416 }
 0x61e   : > { %6442 = vtanh.f32 %v5311_v56  ;;  %5484 = vrot.lane.b32.xlu0 %v5437_v13, %s6581_s15 }
 0x61f   : > { %v6419_v28 = vpop.eup %6418  ;;  %6444 = vtanh.f32 %v5314_v25  ;;  %v5275_v4 = vpop.permute.xlu1 %5274 }
 0x620   : > { %v5281_v8 = vpop.permute.xlu0 %5280  ;;  %v6421_v16 = vpop.eup %6420  ;;  %6446 = vrcp.f32 %v14508_v50  ;;  %v5313_v23 = vadd.f32 %v5275_v4, %v5137_v1  ;;  %v5435_v15 = vmul.f32 %v6419_v28, %v6415_v46 }
 0x621   : > { %v5316_v57 = vadd.f32 %v5281_v8, %v5140_v19  ;;  %v6423_v38 = vpop.eup %6422  ;;  %6448 = vrcp.f32 %v14510_v30  ;;  %v5441_v61 = vmul.f32 %v6421_v16, %v6417_v37 }
 0x622   : > { %v6425_v10 = vpop.eup %6424  ;;  %6450 = vtanh.f32 %v5313_v23  ;;  %5482 = vrot.lane.b32.xlu1 %v5435_v15, %s6581_s15  ;;  %v17116_v23 = vld [vmem:[#allocation231_spill] sm:$0xff]  ;;  %v17118_v15 = vld [vmem:[#allocation232_spill] sm:$0xff] }
 0x623   : > { %v6427_v62 = vpop.eup %6426  ;;  %6452 = vtanh.f32 %v5316_v57  ;;  %5488 = vrot.lane.b32.xlu0 %v5441_v61, %s6581_s15  ;;  %v5279_v31 = vpop.permute.xlu1 %5278  ;;  %v17117_v57 = vld [vmem:[#allocation233_spill] sm:$0xff]  ;;  %v17120_v61 = vld [vmem:[#allocation235_spill] sm:$0xff] }
 0x624   : > { %v5285_v50 = vpop.permute.xlu0 %5284  ;;  %v6429_v36 = vpop.eup %6428  ;;  %v5315_v30 = vadd.f32 %v5279_v31, %v5139_v44  ;;  %v5439_v0 = vmul.f32 %v6427_v62, %v6423_v38  ;;  %6454 = vrcp.f32 %v17112_v52  ;;  %v17119_v38 = vld [vmem:[#allocation234_spill] sm:$0xff] }
 0x625   : > { %v5318_v58 = vadd.f32 %v5285_v50, %v5142_v54  ;;  %v6431_v26 = vpop.eup %6430  ;;  %v5445_v60 = vmul.f32 %v6429_v36, %v6425_v10  ;;  %v17123_v31 = vld [vmem:[#allocation238_spill] sm:$0xff]  ;;  %v17124_v36 = vld [vmem:[#allocation239_spill] sm:$0xff] }
 0x626   : > { %v6433_v29 = vpop.eup %6432  ;;  %6456 = vtanh.f32 %v5315_v30  ;;  %5486 = vrot.lane.b32.xlu1 %v5439_v0, %s6581_s15  ;;  %v17126_v0 = vld [vmem:[#allocation241_spill] sm:$0xff] }
 0x627   : > { %v6435_v59 = vpop.eup %6434  ;;  %6458 = vtanh.f32 %v5318_v58  ;;  %5492 = vrot.lane.b32.xlu0 %v5445_v60, %s6581_s15  ;;  %v5283_v9 = vpop.permute.xlu1 %5282 }
 0x628   : > { %v5413_v22 = vpop.permute.xlu0 %5412  ;;  %v6437_v53 = vpop.eup %6436  ;;  %v5317_v6 = vadd.f32 %v5283_v9, %v5141_v55  ;;  %v5443_v47 = vmul.f32 %v6435_v59, %v6431_v26 }
 0x629   : > { %6460 = vrcp.f32 %v5413_v22  ;;  %v6439_v3 = vpop.eup %6438  ;;  %v5449_v40 = vmul.f32 %v6437_v53, %v6433_v29  ;;  %v17127_v29 = vld [vmem:[#allocation242_spill] sm:$0xff]  ;;  %v17128_v22 = vld [vmem:[#allocation243_spill] sm:$0xff] }
 0x62a   : > { %6462 = vrcp.f32 %v17115_v49  ;;  %v6441_v12 = vpop.eup %6440  ;;  %5490 = vrot.lane.b32.xlu1 %v5443_v47, %s6581_s15 }
 0x62b   : > { %6464 = vtanh.f32 %v5317_v6  ;;  %v6443_v18 = vpop.eup %6442  ;;  %5496 = vrot.lane.b32.xlu0 %v5449_v40, %s6581_s15  ;;  %v5287_v43 = vpop.permute.xlu1 %5286  ;;  %v17130_v40 = vld [vmem:[#allocation246_spill] sm:$0xff] }
 0x62c   : > { %v6445_v32 = vpop.eup %6444  ;;  %v5319_v2 = vadd.f32 %v5287_v43, %v5143_v39  ;;  %v5447_v21 = vmul.f32 %v6443_v18, %v6439_v3 }
 0x62d   : > { %v6447_v42 = vpop.eup %6446  ;;  %v5453_v17 = vmul.f32 %v6445_v32, %v6441_v12 }
 0x62e   : > { %v6449_v34 = vpop.eup %6448  ;;  %5494 = vrot.lane.b32.xlu1 %v5447_v21, %s6581_s15  ;;  %6466 = vtanh.f32 %v5319_v2 }
 0x62f   : > { %v6451_v14 = vpop.eup %6450  ;;  %5500 = vrot.lane.b32.xlu0 %v5453_v17, %s6581_s15  ;;  %v5415_v45 = vpop.permute.xlu1 %5414 }
 0x630   : > { %v6453_v7 = vpop.eup %6452  ;;  %6468 = vrcp.f32 %v5415_v45  ;;  %v5451_v20 = vmul.f32 %v6451_v14, %v6447_v42  ;;  %v17131_v14 = vld [vmem:[#allocation248_spill] sm:$0xff] }
 0x631   : > { %v5457_v56 = vmul.f32 %v6453_v7, %v6449_v34  ;;  %v6455_v25 = vpop.eup %6454  ;;  %6470 = vrcp.f32 %v17116_v23 }
 0x632   : > { %5498 = vrot.lane.b32.xlu1 %v5451_v20, %s6581_s15  ;;  %6472 = vrcp.f32 %v17117_v57 }
 0x633   : > { %v6457_v13 = vpop.eup %6456  ;;  %5504 = vrot.lane.b32.xlu0 %v5457_v56, %s6581_s15  ;;  %6474 = vrcp.f32 %v17118_v15 }
 0x634   : > { %v6459_v46 = vpop.eup %6458  ;;  %v5455_v37 = vmul.f32 %v6457_v13, %v6455_v25  ;;  %6476 = vrcp.f32 %v17119_v38 }
 0x635   : > { %6478 = vrcp.f32 %v17120_v61 }
 0x636   : > { %v6461_v1 = vpop.eup %6460  ;;  %5502 = vrot.lane.b32.xlu1 %v5455_v37, %s6581_s15  ;;  %6480 = vrcp.f32 %v17121_v35 }
 0x637   : > { %v6463_v19 = vpop.eup %6462  ;;  %v5461_v28 = vmul.f32 %v6461_v1, %v6459_v46  ;;  %6482 = vrcp.f32 %v17122_v5 }
 0x638   : > { %v6465_v48 = vpop.eup %6464  ;;  %6484 = vrcp.f32 %v17123_v31 }
 0x639   : > { %5508 = vrot.lane.b32.xlu0 %v5461_v28, %s6581_s15  ;;  %v5459_v11 = vmul.f32 %v6465_v48, %v6463_v19 }
 0x63b   : > { %5506 = vrot.lane.b32.xlu1 %v5459_v11, %s6581_s15  ;;  %v6467_v4 = vpop.eup %6466 }
 0x63d   : > { %v6469_v8 = vpop.eup %6468 }
 0x63e   : > { %v5463_v16 = vmul.f32 %v6469_v8, %v6467_v4  ;;  %v6471_v10 = vpop.eup %6470 }
 0x63f   : > { %v6473_v62 = vpop.eup %6472 }
 0x640   : > { %5510 = vrot.lane.b32.xlu1 %v5463_v16, %s6581_s15  ;;  %v6475_v33 = vpop.eup %6474 }
 0x641   : > { %v6477_v30 = vpop.eup %6476 }
 0x642   : > { %v6479_v60 = vpop.eup %6478 }
 0x643   : > { %v6481_v59 = vpop.eup %6480 }
 0x644   : > { %v6483_v24 = vpop.eup %6482 }
 0x645   : > { %v6485_v47 = vpop.eup %6484 }
 0x68c   : > { %v5481_v44 = vpop.permute.xlu0 %5480 }
 0x68d   : > { %v5528_v54 = vsub.f32 %v6471_v10, %v5481_v44 }
 0x68f   : > { %6486 = vrcp.f32 %v5528_v54 }
 0x690   : > { %v5485_v50 = vpop.permute.xlu0 %5484  ;;  %6488 = vrcp.f32 %v17124_v36 }
 0x691   : > { %v5530_v63 = vsub.f32 %v6473_v62, %v5485_v50  ;;  %6490 = vrcp.f32 %v17125_v41 }
 0x693   : > { %6492 = vrcp.f32 %v5530_v63 }
 0x694   : > { %v5483_v58 = vpop.permute.xlu1 %5482  ;;  %6494 = vrcp.f32 %v17126_v0 }
 0x695   : > { %v5529_v26 = vsub.f32 %v6475_v33, %v5483_v58  ;;  %v5489_v52 = vpop.permute.xlu0 %5488  ;;  %6496 = vrcp.f32 %v17127_v29 }
 0x696   : > { %v5532_v55 = vsub.f32 %v6477_v30, %v5489_v52 }
 0x697   : > { %6498 = vrcp.f32 %v5529_v26 }
 0x698   : > { %6500 = vrcp.f32 %v5532_v55  ;;  %v5487_v9 = vpop.permute.xlu1 %5486 }
 0x699   : > { %6502 = vrcp.f32 %v17128_v22  ;;  %v5531_v53 = vsub.f32 %v6479_v60, %v5487_v9  ;;  %v5493_v51 = vpop.permute.xlu0 %5492 }
 0x69a   : > { %6504 = vrcp.f32 %v17129_v27  ;;  %v5534_v6 = vsub.f32 %v6481_v59, %v5493_v51 }
 0x69b   : > { %6506 = vrcp.f32 %v5531_v53 }
 0x69c   : > { %v6487_v3 = vpop.eup %6486  ;;  %6508 = vrcp.f32 %v5534_v6  ;;  %v5491_v49 = vpop.permute.xlu1 %5490 }
 0x69d   : > { %6510 = vrcp.f32 %v17130_v40  ;;  %v5533_v12 = vsub.f32 %v6483_v24, %v5491_v49  ;;  %v5497_v39 = vpop.permute.xlu0 %5496  ;;  %5592 = vrot.lane.b32.xlu0 %v6487_v3, %s6580_s14  ;;  %v6489_v18 = vpop.eup %6488 }
 0x69e   : > { %v5536_v43 = vsub.f32 %v6485_v47, %v5497_v39  ;;  %v6491_v32 = vpop.eup %6490 }
 0x69f   : > { %6512 = vrcp.f32 %v5533_v12 }
 0x6a0   : > { %v6493_v2 = vpop.eup %6492  ;;  %6514 = vrcp.f32 %v5536_v43  ;;  %v5495_v21 = vpop.permute.xlu1 %5494 }
 0x6a1   : > { %v5535_v42 = vsub.f32 %v6489_v18, %v5495_v21  ;;  %v5501_v17 = vpop.permute.xlu0 %5500  ;;  %5596 = vrot.lane.b32.xlu0 %v6493_v2, %s6580_s14  ;;  %v6495_v34 = vpop.eup %6494  ;;  %6516 = vrcp.f32 %v17131_v14 }
 0x6a2   : > { %v5538_v45 = vsub.f32 %v6491_v32, %v5501_v17  ;;  %v6497_v7 = vpop.eup %6496 }
 0x6a3   : > { %6518 = vrcp.f32 %v5535_v42 }
 0x6a4   : > { %v6499_v20 = vpop.eup %6498  ;;  %6520 = vrcp.f32 %v5538_v45  ;;  %v5499_v56 = vpop.permute.xlu1 %5498 }
 0x6a5   : > { %v6501_v25 = vpop.eup %6500  ;;  %v5537_v13 = vsub.f32 %v6495_v34, %v5499_v56  ;;  %v5505_v46 = vpop.permute.xlu0 %5504  ;;  %5594 = vrot.lane.b32.xlu1 %v6499_v20, %s6580_s14 }
 0x6a6   : > { %v6503_v37 = vpop.eup %6502  ;;  %v5540_v1 = vsub.f32 %v6497_v7, %v5505_v46  ;;  %5600 = vrot.lane.b32.xlu0 %v6501_v25, %s6580_s14 }
 0x6a7   : > { %v6505_v19 = vpop.eup %6504  ;;  %6522 = vrcp.f32 %v5537_v13 }
 0x6a8   : > { %v6507_v28 = vpop.eup %6506  ;;  %6524 = vrcp.f32 %v5540_v1  ;;  %v5503_v48 = vpop.permute.xlu1 %5502 }
 0x6a9   : > { %v6509_v11 = vpop.eup %6508  ;;  %v5539_v4 = vsub.f32 %v6503_v37, %v5503_v48  ;;  %5598 = vrot.lane.b32.xlu1 %v6507_v28, %s6580_s14 }
 0x6aa   : > { %v6511_v8 = vpop.eup %6510  ;;  %5604 = vrot.lane.b32.xlu0 %v6509_v11, %s6580_s14 }
 0x6ab   : > { %v5509_v16 = vpop.permute.xlu0 %5508  ;;  %6526 = vrcp.f32 %v5539_v4 }
 0x6ac   : > { %v5542_v23 = vsub.f32 %v6505_v19, %v5509_v16  ;;  %v6513_v57 = vpop.eup %6512 }
 0x6ad   : > { %v5507_v15 = vpop.permute.xlu1 %5506  ;;  %v6515_v38 = vpop.eup %6514  ;;  %5602 = vrot.lane.b32.xlu1 %v6513_v57, %s6580_s14 }
 0x6ae   : > { %6528 = vrcp.f32 %v5542_v23  ;;  %v5541_v61 = vsub.f32 %v6511_v8, %v5507_v15  ;;  %5608 = vrot.lane.b32.xlu0 %v6515_v38, %s6580_s14  ;;  %v6517_v10 = vpop.eup %6516 }
 0x6b0   : > { %6530 = vrcp.f32 %v5541_v61  ;;  %v6519_v35 = vpop.eup %6518 }
 0x6b1   : > { %v6521_v44 = vpop.eup %6520  ;;  %5606 = vrot.lane.b32.xlu1 %v6519_v35, %s6580_s14 }
 0x6b2   : > { %5612 = vrot.lane.b32.xlu0 %v6521_v44, %s6580_s14  ;;  %v5511_v5 = vpop.permute.xlu1 %5510 }
 0x6b3   : > { %v5543_v54 = vsub.f32 %v6517_v10, %v5511_v5 }
 0x6b4   : > { %v6523_v62 = vpop.eup %6522 }
 0x6b5   : > { %v6525_v31 = vpop.eup %6524  ;;  %6532 = vrcp.f32 %v5543_v54  ;;  %5610 = vrot.lane.b32.xlu1 %v6523_v62, %s6580_s14 }
 0x6b6   : > { %5616 = vrot.lane.b32.xlu0 %v6525_v31, %s6580_s14 }
 0x6b8   : > { %v6527_v50 = vpop.eup %6526 }
 0x6b9   : > { %5614 = vrot.lane.b32.xlu1 %v6527_v50, %s6580_s14 }
 0x6bb   : > { %v6529_v36 = vpop.eup %6528 }
 0x6bc   : > { %5620 = vrot.lane.b32.xlu0 %v6529_v36, %s6580_s14 }
 0x6bd   : > { %v6531_v63 = vpop.eup %6530 }
 0x6be   : > { %5618 = vrot.lane.b32.xlu1 %v6531_v63, %s6580_s14 }
 0x6c2   : > { %v6533_v33 = vpop.eup %6532 }
 0x6c3   : > { %5622 = vrot.lane.b32.xlu1 %v6533_v33, %s6580_s14 }
 0x70f   : > { %v5593_v41 = vpop.permute.xlu0 %5592 }
 0x710   : > { %5641 = vst.msk [vmem:[%s6661_s16] sm:$0xff] %vm5640_vm0, %v5593_v41 }
 0x713   : > { %v5597_v30 = vpop.permute.xlu0 %5596 }
 0x714   : > { %5643 = vst.msk [vmem:[%s6661_s16 + $0x10] sm:$0xff] %vm5640_vm0, %v5597_v30 }
 0x717   : > { %v5595_v58 = vpop.permute.xlu1 %5594 }
 0x718   : > { %5642 = vst.msk [vmem:[%s6661_s16 + $0x8] sm:$0xff] %vm5640_vm0, %v5595_v58  ;;  %v5601_v0 = vpop.permute.xlu0 %5600 }
 0x719   : > { %5645 = vst.msk [vmem:[%s6661_s16 + $0x20] sm:$0xff] %vm5640_vm0, %v5601_v0 }
 0x71b   : > { %v5599_v26 = vpop.permute.xlu1 %5598 }
 0x71c   : > { %5644 = vst.msk [vmem:[%s6661_s16 + $0x18] sm:$0xff] %vm5640_vm0, %v5599_v26  ;;  %v5605_v52 = vpop.permute.xlu0 %5604 }
 0x71d   : > { %5647 = vst.msk [vmem:[%s6661_s16 + $0x30] sm:$0xff] %vm5640_vm0, %v5605_v52 }
 0x71f   : > { %v5603_v60 = vpop.permute.xlu1 %5602 }
 0x720   : > { %5646 = vst.msk [vmem:[%s6661_s16 + $0x28] sm:$0xff] %vm5640_vm0, %v5603_v60  ;;  %v5609_v29 = vpop.permute.xlu0 %5608 }
 0x721   : > { %5649 = vst.msk [vmem:[%s6661_s16 + $0x40] sm:$0xff] %vm5640_vm0, %v5609_v29 }
 0x723   : > { %v5607_v55 = vpop.permute.xlu1 %5606 }
 0x724   : > { %5648 = vst.msk [vmem:[%s6661_s16 + $0x38] sm:$0xff] %vm5640_vm0, %v5607_v55  ;;  %v5613_v59 = vpop.permute.xlu0 %5612 }
 0x725   : > { %5651 = vst.msk [vmem:[%s6661_s16 + $0x50] sm:$0xff] %vm5640_vm0, %v5613_v59 }
 0x727   : > { %v5611_v9 = vpop.permute.xlu1 %5610 }
 0x728   : > { %5650 = vst.msk [vmem:[%s6661_s16 + $0x48] sm:$0xff] %vm5640_vm0, %v5611_v9  ;;  %v5617_v22 = vpop.permute.xlu0 %5616 }
 0x729   : > { %5653 = vst.msk [vmem:[%s6661_s16 + $0x60] sm:$0xff] %vm5640_vm0, %v5617_v22 }
 0x72b   : > { %v5615_v53 = vpop.permute.xlu1 %5614 }
 0x72c   : > { %5652 = vst.msk [vmem:[%s6661_s16 + $0x58] sm:$0xff] %vm5640_vm0, %v5615_v53 }
 0x72e   : > { %v5621_v51 = vpop.permute.xlu0 %5620 }
 0x72f   : > { %5655 = vst.msk [vmem:[%s6661_s16 + $0x70] sm:$0xff] %vm5640_vm0, %v5621_v51 }
 0x730   : > { %v5619_v24 = vpop.permute.xlu1 %5618 }
 0x731   : > { %5654 = vst.msk [vmem:[%s6661_s16 + $0x68] sm:$0xff] %vm5640_vm0, %v5619_v24 }
 0x735   : > { %v5623_v27 = vpop.permute.xlu1 %5622 }
 0x736   : > { %5656 = vst.msk [vmem:[%s6661_s16 + $0x78] sm:$0xff] %vm5640_vm0, %v5623_v27 }
 0x737 PF: > { %s21_s25 = sadd.s32 1, %s6570_s25   ;;  %s17132_s23 = smov %s6566_s24 }
 0x738   : > { %p18_p11 = scmp.ge.s32.totalorder %s21_s25, 6   ;;  %s17133_s24 = smov %s17135_s0 }
 0x73a   :  { %20 = sbr.rel (!%p18_p11) target bundleno = 17 (0x11), region = 87 }

</bundles_post_ra>
